<compile_context>
chip_gen: v5e
topology: v5e:2x2
jax: 0.10.0
libtpu: 0.0.40
codegen_flags: <defaults>
</compile_context>

<pallas_src>
import jax
import jax.numpy as jnp
from jax.experimental import pallas as pl
from jax.experimental.pallas import tpu as pltpu


_LEAKY_SLOPE = 0.01   # PyTorch nn.LeakyReLU default negative slope
_WPAD = 8             # minimum column tile -> keeps sublane groups 8-aligned


def _leaky_relu(x):
    return jnp.where(x >= 0.0, x, _LEAKY_SLOPE * x)


def _conv3x3(in_ref, w_ref, b_ref, *, stride, ho, wo_pad):
    """3x3 conv over a zero-padded VMEM activation as 9 accumulating matmuls.

    in_ref : (bb, Hp, Wp, Cin) zero-padded activation (VMEM scratch)
    w_ref  : (9, Cin, Cout) bf16 taps, tap index k = dy*3 + dx
    b_ref  : (1, Cout) f32 bias
    Returns LeakyReLU(conv + bias) as a (bb, ho, wo_pad, Cout) f32 value.
    Output columns >= the true output width are scrap rows computed from the
    zero padding; callers slice them away before storing.
    """
    bb = in_ref.shape[0]
    cin = in_ref.shape[-1]
    cout = w_ref.shape[-1]
    m = bb * ho * wo_pad
    acc = jnp.zeros((m, cout), jnp.float32)
    for dy in range(3):
        for dx in range(3):
            if stride == 1:
                win = in_ref[:, dy:dy + ho, dx:dx + wo_pad, :]
            else:
                win = in_ref[:, pl.ds(dy, ho, stride=stride),
                             pl.ds(dx, wo_pad, stride=stride), :]
            # (bb, ho, wo_pad, cin) -> (m, cin): wo_pad is a multiple of 8, so
            # this reshape is layout-preserving (no sublane data movement).
            lhs = win.reshape(m, cin).astype(jnp.bfloat16)
            acc = acc + jnp.dot(lhs, w_ref[dy * 3 + dx],
                                preferred_element_type=jnp.float32)
    y = _leaky_relu(acc + b_ref[...])
    return y.reshape(bb, ho, wo_pad, cout)


def _fused_forward_kernel(x_ref,
                          w1_ref, b1_ref, w2_ref, b2_ref,
                          w3_ref, b3_ref, w4_ref, b4_ref,
                          fw1_ref, fb1_ref, fw2_ref, fb2_ref,
                          o_ref,
                          pad0, pad1, pad2, pad3, zbuf):
    bb, h, w, _ = x_ref.shape

    # stage 0: zero-padded input (conv1 input) ------------------------------
    pad0[...] = jnp.zeros_like(pad0)
    pad0[:, 1:1 + h, 1:1 + w, :] = x_ref[...]

    # conv1, stride 1: (h, w, Cin) -> (h, w, 64) -----------------------------
    y = _conv3x3(pad0, w1_ref, b1_ref, stride=1, ho=h, wo_pad=w)
    pad1[...] = jnp.zeros_like(pad1)
    pad1[:, 1:1 + h, 1:1 + w, :] = y

    # conv2, stride 2: -> (h/2, w/2, 128) ------------------------------------
    h2, w2 = h // 2, w // 2
    y = _conv3x3(pad1, w2_ref, b2_ref, stride=2, ho=h2, wo_pad=max(w2, _WPAD))
    pad2[...] = jnp.zeros_like(pad2)
    pad2[:, 1:1 + h2, 1:1 + w2, :] = y[:, :, :w2, :]

    # conv3, stride 2: -> (h/4, w/4, 128) ------------------------------------
    h3, w3 = h // 4, w // 4
    y = _conv3x3(pad2, w3_ref, b3_ref, stride=2, ho=h3, wo_pad=max(w3, _WPAD))
    pad3[...] = jnp.zeros_like(pad3)
    pad3[:, 1:1 + h3, 1:1 + w3, :] = y[:, :, :w3, :]

    # conv4, stride 2: -> (h/8, w/8, 128) ------------------------------------
    h4, w4 = h // 8, w // 8
    y = _conv3x3(pad3, w4_ref, b4_ref, stride=2, ho=h4, wo_pad=max(w4, _WPAD))
    zbuf[...] = y                                        # (bb, h4, >=w4, 128)

    # Flatten (NCHW order pre-folded into fc1_w) + Linear + ReLU + Linear ----
    inter = fw1_ref.shape[-1]
    acc = jnp.zeros((bb, inter), jnp.float32)
    for i in range(h4):
        for j in range(w4):
            p = i * w4 + j
            lhs = zbuf[:, i, j, :].astype(jnp.bfloat16)          # (bb, 128)
            acc = acc + jnp.dot(lhs, fw1_ref[p],
                                preferred_element_type=jnp.float32)
    hid = jnp.maximum(acc + fb1_ref[...], 0.0)                   # ReLU
    out = jnp.dot(hid.astype(jnp.bfloat16), fw2_ref[...],
                  preferred_element_type=jnp.float32) + fb2_ref[...]
    o_ref[...] = out.astype(o_ref.dtype)


# ------------------------------- wrapper ------------------------------------

_PARAM_ORDER = ("w1", "b1", "w2", "b2", "w3", "b3", "w4", "b4",
                "fc1_w", "fc1_b", "fc2_w", "fc2_b")


def _full_spec(arr):
    zero_index = (0,) * arr.ndim
    return pl.BlockSpec(arr.shape, lambda i: zero_index)


def middle_action_network_forward(x_nchw, params):
    """Forward pass.  x_nchw: (B, n_channels, 16, 16), any real dtype."""
    x = jnp.transpose(x_nchw.astype(jnp.float32), (0, 2, 3, 1))   # NCHW -> NHWC
    b, h, w, c = x.shape
    assert h == w == 16, "torch module hard-codes Linear(512,...) => in_dim=16"

    c1 = params["w1"].shape[-1]
    c2 = params["w2"].shape[-1]
    c3 = params["w3"].shape[-1]
    c4 = params["w4"].shape[-1]
    act = params["fc2_b"].shape[-1]
    h2, h3, h4 = h // 2, h // 4, h // 8
    w2, w3, w4 = w // 2, w // 4, w // 8
    assert params["fc1_w"].shape[0] == h4 * w4
    assert params["fc1_w"].shape[1] == c4

    # One grid step handles `bb` samples; batch axis is "parallel" (megacore).
    bb = b if (b <= 8 or b % 8 != 0) else 8
    grid = (b // bb,)

    # Scratch widths are sized for the strided (wo_pad-wide) window reads.
    pad2_w = max(w2 + 2, 2 * max(w3, _WPAD) + 2)
    pad3_w = max(w3 + 2, 2 * max(w4, _WPAD) + 2)
    zbuf_w = max(w4, _WPAD)

    weights = [params[k] for k in _PARAM_ORDER]
    in_specs = [pl.BlockSpec((bb, h, w, c), lambda i: (i, 0, 0, 0))]
    in_specs += [_full_spec(a) for a in weights]

    grid_spec = pltpu.PrefetchScalarGridSpec(
        num_scalar_prefetch=0,
        grid=grid,
        in_specs=in_specs,
        out_specs=pl.BlockSpec((bb, act), lambda i: (i, 0)),
        scratch_shapes=[
            pltpu.VMEM((bb, h + 2, w + 2, c), jnp.float32),    # padded input
            pltpu.VMEM((bb, h + 2, w + 2, c1), jnp.float32),   # padded conv1 out
            pltpu.VMEM((bb, h2 + 2, pad2_w, c2), jnp.float32),  # padded conv2 out
            pltpu.VMEM((bb, h3 + 2, pad3_w, c3), jnp.float32),  # padded conv3 out
            pltpu.VMEM((bb, h4, zbuf_w, c4), jnp.float32),      # conv4 out
        ],
    )

    return pl.pallas_call(
        _fused_forward_kernel,
        out_shape=jax.ShapeDtypeStruct((b, act), jnp.float32),
        grid_spec=grid_spec,
        compiler_params=pltpu.CompilerParams(
            dimension_semantics=("parallel",),
            vmem_limit_bytes=32 * 1024 * 1024,
        ),
    )(x, *weights)


# ------------------------------ parameters ----------------------------------

def init_params(key, n_channels, in_dim=16, intermediate_size=256, action_num=4):
    """Random parameters in kernel-ready layout.

    Mapping from a PyTorch checkpoint (for reference):
      w{l}  (9, Cin, Cout) bf16 : w[dy*3+dx, ci, co] == conv.weight[co, ci, dy, dx]
      b{l}  (1, Cout)      f32  : conv.bias
      fc1_w (P, 128, inter) bf16, P=(in_dim//8)**2 :
            fc1_w[p, c, j] == fc1.weight[j, c*P + p]   (nn.Flatten NCHW order)
      fc1_b (1, inter) f32, fc2_w (inter, action_num) bf16 == fc2.weight.T,
      fc2_b (1, action_num) f32.
    """
    assert in_dim % 8 == 0
    p = (in_dim // 8) ** 2
    assert p * 128 == 512, "torch module hard-codes Linear(512, ...)"
    ks = jax.random.split(key, 12)

    def conv_w(k, cin, cout):
        scale = 1.0 / jnp.sqrt(9.0 * cin)
        return (jax.random.normal(k, (9, cin, cout), jnp.float32)
                * scale).astype(jnp.bfloat16)

    def bias(k, n):
        return jax.random.normal(k, (1, n), jnp.float32) * 0.01

    fc1 = (jax.random.normal(ks[8], (p, 128, intermediate_size), jnp.float32)
           * (1.0 / jnp.sqrt(512.0))).astype(jnp.bfloat16)
    fc2 = (jax.random.normal(ks[10], (intermediate_size, action_num), jnp.float32)
           * (1.0 / jnp.sqrt(float(intermediate_size)))).astype(jnp.bfloat16)

    return {
        "w1": conv_w(ks[0], n_channels, 64), "b1": bias(ks[1], 64),
        "w2": conv_w(ks[2], 64, 128),        "b2": bias(ks[3], 128),
        "w3": conv_w(ks[4], 128, 128),       "b3": bias(ks[5], 128),
        "w4": conv_w(ks[6], 128, 128),       "b4": bias(ks[7], 128),
        "fc1_w": fc1, "fc1_b": bias(ks[9], intermediate_size),
        "fc2_w": fc2, "fc2_b": bias(ks[11], action_num),
    }


# ------------------------- pure-JAX reference (check) -----------------------

def _reference_forward(x_nchw, params):
    x = jnp.transpose(x_nchw.astype(jnp.float32), (0, 2, 3, 1))

    def conv(xx, w9, bias, stride):
        cin, cout = w9.shape[1], w9.shape[2]
        w = w9.astype(jnp.float32).reshape(3, 3, cin, cout)
        y = jax.lax.conv_general_dilated(
            xx, w, window_strides=(stride, stride), padding=((1, 1), (1, 1)),
            dimension_numbers=("NHWC", "HWIO", "NHWC"))
        y = y + bias.reshape(1, 1, 1, cout)
        return jnp.where(y >= 0.0, y, _LEAKY_SLOPE * y)

    hh = conv(x, params["w1"], params["b1"], 1)
    hh = conv(hh, params["w2"], params["b2"], 2)
    hh = conv(hh, params["w3"], params["b3"], 2)
    hh = conv(hh, params["w4"], params["b4"], 2)
    bsz = hh.shape[0]
    z = hh.reshape(bsz, hh.shape[1] * hh.shape[2], hh.shape[3])
    h1 = jnp.einsum("bpc,pcj->bj", z, params["fc1_w"].astype(jnp.float32))
    h1 = jnp.maximum(h1 + params["fc1_b"], 0.0)
    return h1 @ params["fc2_w"].astype(jnp.float32) + params["fc2_b"]


if __name__ == "__main__":
    key = jax.random.PRNGKey(0)
    k_x, k_p = jax.random.split(key)

    batch, n_channels, in_dim = 2, 4, 16   # 128 * (16/8)^2 = 512 -> Linear(512, .)
    x = jax.random.normal(k_x, (batch, n_channels, in_dim, in_dim), jnp.float32)
    params = init_params(k_p, n_channels, in_dim=in_dim,
                         intermediate_size=256, action_num=4)

    fwd = jax.jit(middle_action_network_forward)
    out = fwd(x, params)
    jax.block_until_ready(out)
    assert out.shape == (batch, 4)

    # numerical sanity check vs. pure-JAX reference (bf16-matmul tolerance)
    ref = _reference_forward(x, params)
    max_err = float(jnp.max(jnp.abs(out - ref)))
    assert max_err < 3e-2, f"kernel/reference mismatch: max |diff| = {max_err}"

    print("KERNEL_OK")
</pallas_src>

<mosaic_0001>
module attributes {stable_mosaic.version = 11 : i64} {
  func.func @_fused_forward_kernel(%arg0: i32, %arg1: memref<2x16x16x4xf32, #tpu.memory_space<vmem>>, %arg2: memref<9x4x64xbf16, #tpu.memory_space<vmem>>, %arg3: memref<1x64xf32, #tpu.memory_space<vmem>>, %arg4: memref<9x64x128xbf16, #tpu.memory_space<vmem>>, %arg5: memref<1x128xf32, #tpu.memory_space<vmem>>, %arg6: memref<9x128x128xbf16, #tpu.memory_space<vmem>>, %arg7: memref<1x128xf32, #tpu.memory_space<vmem>>, %arg8: memref<9x128x128xbf16, #tpu.memory_space<vmem>>, %arg9: memref<1x128xf32, #tpu.memory_space<vmem>>, %arg10: memref<4x128x256xbf16, #tpu.memory_space<vmem>>, %arg11: memref<1x256xf32, #tpu.memory_space<vmem>>, %arg12: memref<256x4xbf16, #tpu.memory_space<vmem>>, %arg13: memref<1x4xf32, #tpu.memory_space<vmem>>, %arg14: memref<2x4xf32, #tpu.memory_space<vmem>>, %arg15: memref<2x18x18x4xf32, #tpu.memory_space<vmem>>, %arg16: memref<2x18x18x64xf32, #tpu.memory_space<vmem>>, %arg17: memref<2x10x18x128xf32, #tpu.memory_space<vmem>>, %arg18: memref<2x6x18x128xf32, #tpu.memory_space<vmem>>, %arg19: memref<2x2x8x128xf32, #tpu.memory_space<vmem>>) attributes {dimension_semantics = [#tpu.dimension_semantics<parallel>], iteration_bounds = array<i64: 1>, scalar_prefetch = 0 : i64, scratch_operands = 5 : i64, tpu.core_type = #tpu.core_type<tc>, window_params = [{transform_indices = @transform_0, window_bounds = array<i64: 2, 16, 16, 4>}, {pipeline_mode = #tpu.pipeline_mode<synchronous>, transform_indices = @transform_1, window_bounds = array<i64: 9, 4, 64>}, {pipeline_mode = #tpu.pipeline_mode<synchronous>, transform_indices = @transform_2, window_bounds = array<i64: 1, 64>}, {pipeline_mode = #tpu.pipeline_mode<synchronous>, transform_indices = @transform_3, window_bounds = array<i64: 9, 64, 128>}, {pipeline_mode = #tpu.pipeline_mode<synchronous>, transform_indices = @transform_4, window_bounds = array<i64: 1, 128>}, {pipeline_mode = #tpu.pipeline_mode<synchronous>, transform_indices = @transform_5, window_bounds = array<i64: 9, 128, 128>}, {pipeline_mode = #tpu.pipeline_mode<synchronous>, transform_indices = @transform_6, window_bounds = array<i64: 1, 128>}, {pipeline_mode = #tpu.pipeline_mode<synchronous>, transform_indices = @transform_7, window_bounds = array<i64: 9, 128, 128>}, {pipeline_mode = #tpu.pipeline_mode<synchronous>, transform_indices = @transform_8, window_bounds = array<i64: 1, 128>}, {pipeline_mode = #tpu.pipeline_mode<synchronous>, transform_indices = @transform_9, window_bounds = array<i64: 4, 128, 256>}, {pipeline_mode = #tpu.pipeline_mode<synchronous>, transform_indices = @transform_10, window_bounds = array<i64: 1, 256>}, {pipeline_mode = #tpu.pipeline_mode<synchronous>, transform_indices = @transform_11, window_bounds = array<i64: 256, 4>}, {pipeline_mode = #tpu.pipeline_mode<synchronous>, transform_indices = @transform_12, window_bounds = array<i64: 1, 4>}, {transform_indices = @transform_13, window_bounds = array<i64: 2, 4>}]} {
    %cst = arith.constant 0.000000e+00 : f32
    %0 = vector.broadcast %cst : f32 to vector<2x18x18x4xf32>
    %c0 = arith.constant 0 : index
    %c0_0 = arith.constant 0 : index
    %c0_1 = arith.constant 0 : index
    %c0_2 = arith.constant 0 : index
    %1 = vector.load %arg15[%c0, %c0_0, %c0_1, %c0_2] : memref<2x18x18x4xf32, #tpu.memory_space<vmem>>, vector<2x18x18x4xf32>
    tpu.vector_store %arg15[%c0, %c0_0, %c0_1, %c0_2], %0 {strides = array<i32>} : memref<2x18x18x4xf32, #tpu.memory_space<vmem>>, vector<2x18x18x4xf32>,
    %c0_3 = arith.constant 0 : index
    %c0_4 = arith.constant 0 : index
    %c0_5 = arith.constant 0 : index
    %c0_6 = arith.constant 0 : index
    %2 = vector.load %arg1[%c0_3, %c0_4, %c0_5, %c0_6] : memref<2x16x16x4xf32, #tpu.memory_space<vmem>>, vector<2x16x16x4xf32>
    %c0_7 = arith.constant 0 : index
    %c1 = arith.constant 1 : index
    %c1_8 = arith.constant 1 : index
    %c0_9 = arith.constant 0 : index
    %3 = vector.load %arg15[%c0_7, %c1, %c1_8, %c0_9] : memref<2x18x18x4xf32, #tpu.memory_space<vmem>>, vector<2x16x16x4xf32>
    tpu.vector_store %arg15[%c0_7, %c1, %c1_8, %c0_9], %2 {strides = array<i32>} : memref<2x18x18x4xf32, #tpu.memory_space<vmem>>, vector<2x16x16x4xf32>,
    %cst_10 = arith.constant 0.000000e+00 : f32
    %4 = vector.broadcast %cst_10 : f32 to vector<512x64xf32>
    %c0_11 = arith.constant 0 : index
    %c0_12 = arith.constant 0 : index
    %c0_13 = arith.constant 0 : index
    %c0_14 = arith.constant 0 : index
    %5 = vector.load %arg15[%c0_11, %c0_12, %c0_13, %c0_14] : memref<2x18x18x4xf32, #tpu.memory_space<vmem>>, vector<2x16x16x4xf32>
    %6 = vector.shape_cast %5 : vector<2x16x16x4xf32> to vector<512x4xf32>
    %7 = arith.truncf %6 : vector<512x4xf32> to vector<512x4xbf16>
    %c0_15 = arith.constant 0 : index
    %c0_16 = arith.constant 0 : index
    %c0_17 = arith.constant 0 : index
    %8 = vector.load %arg2[%c0_15, %c0_16, %c0_17] : memref<9x4x64xbf16, #tpu.memory_space<vmem>>, vector<1x4x64xbf16>
    %9 = vector.shape_cast %8 : vector<1x4x64xbf16> to vector<4x64xbf16>
    %cst_18 = arith.constant dense<0.000000e+00> : vector<512x64xf32>
    %10 = tpu.matmul %7, %9, %cst_18 {dimension_numbers = #tpu.dot_dimension_numbers<[1], [0], [0], [1], [0, 0, 1, 1], [], []>} : vector<512x4xbf16>, vector<4x64xbf16>, vector<512x64xf32> -> vector<512x64xf32>
    %11 = arith.addf %4, %10 : vector<512x64xf32>
    %c0_19 = arith.constant 0 : index
    %c0_20 = arith.constant 0 : index
    %c1_21 = arith.constant 1 : index
    %c0_22 = arith.constant 0 : index
    %12 = vector.load %arg15[%c0_19, %c0_20, %c1_21, %c0_22] : memref<2x18x18x4xf32, #tpu.memory_space<vmem>>, vector<2x16x16x4xf32>
    %13 = vector.shape_cast %12 : vector<2x16x16x4xf32> to vector<512x4xf32>
    %14 = arith.truncf %13 : vector<512x4xf32> to vector<512x4xbf16>
    %c1_23 = arith.constant 1 : index
    %c0_24 = arith.constant 0 : index
    %c0_25 = arith.constant 0 : index
    %15 = vector.load %arg2[%c1_23, %c0_24, %c0_25] : memref<9x4x64xbf16, #tpu.memory_space<vmem>>, vector<1x4x64xbf16>
    %16 = vector.shape_cast %15 : vector<1x4x64xbf16> to vector<4x64xbf16>
    %cst_26 = arith.constant dense<0.000000e+00> : vector<512x64xf32>
    %17 = tpu.matmul %14, %16, %cst_26 {dimension_numbers = #tpu.dot_dimension_numbers<[1], [0], [0], [1], [0, 0, 1, 1], [], []>} : vector<512x4xbf16>, vector<4x64xbf16>, vector<512x64xf32> -> vector<512x64xf32>
    %18 = arith.addf %11, %17 : vector<512x64xf32>
    %c0_27 = arith.constant 0 : index
    %c0_28 = arith.constant 0 : index
    %c2 = arith.constant 2 : index
    %c0_29 = arith.constant 0 : index
    %19 = vector.load %arg15[%c0_27, %c0_28, %c2, %c0_29] : memref<2x18x18x4xf32, #tpu.memory_space<vmem>>, vector<2x16x16x4xf32>
    %20 = vector.shape_cast %19 : vector<2x16x16x4xf32> to vector<512x4xf32>
    %21 = arith.truncf %20 : vector<512x4xf32> to vector<512x4xbf16>
    %c2_30 = arith.constant 2 : index
    %c0_31 = arith.constant 0 : index
    %c0_32 = arith.constant 0 : index
    %22 = vector.load %arg2[%c2_30, %c0_31, %c0_32] : memref<9x4x64xbf16, #tpu.memory_space<vmem>>, vector<1x4x64xbf16>
    %23 = vector.shape_cast %22 : vector<1x4x64xbf16> to vector<4x64xbf16>
    %cst_33 = arith.constant dense<0.000000e+00> : vector<512x64xf32>
    %24 = tpu.matmul %21, %23, %cst_33 {dimension_numbers = #tpu.dot_dimension_numbers<[1], [0], [0], [1], [0, 0, 1, 1], [], []>} : vector<512x4xbf16>, vector<4x64xbf16>, vector<512x64xf32> -> vector<512x64xf32>
    %25 = arith.addf %18, %24 : vector<512x64xf32>
    %c0_34 = arith.constant 0 : index
    %c1_35 = arith.constant 1 : index
    %c0_36 = arith.constant 0 : index
    %c0_37 = arith.constant 0 : index
    %26 = vector.load %arg15[%c0_34, %c1_35, %c0_36, %c0_37] : memref<2x18x18x4xf32, #tpu.memory_space<vmem>>, vector<2x16x16x4xf32>
    %27 = vector.shape_cast %26 : vector<2x16x16x4xf32> to vector<512x4xf32>
    %28 = arith.truncf %27 : vector<512x4xf32> to vector<512x4xbf16>
    %c3 = arith.constant 3 : index
    %c0_38 = arith.constant 0 : index
    %c0_39 = arith.constant 0 : index
    %29 = vector.load %arg2[%c3, %c0_38, %c0_39] : memref<9x4x64xbf16, #tpu.memory_space<vmem>>, vector<1x4x64xbf16>
    %30 = vector.shape_cast %29 : vector<1x4x64xbf16> to vector<4x64xbf16>
    %cst_40 = arith.constant dense<0.000000e+00> : vector<512x64xf32>
    %31 = tpu.matmul %28, %30, %cst_40 {dimension_numbers = #tpu.dot_dimension_numbers<[1], [0], [0], [1], [0, 0, 1, 1], [], []>} : vector<512x4xbf16>, vector<4x64xbf16>, vector<512x64xf32> -> vector<512x64xf32>
    %32 = arith.addf %25, %31 : vector<512x64xf32>
    %c0_41 = arith.constant 0 : index
    %c1_42 = arith.constant 1 : index
    %c1_43 = arith.constant 1 : index
    %c0_44 = arith.constant 0 : index
    %33 = vector.load %arg15[%c0_41, %c1_42, %c1_43, %c0_44] : memref<2x18x18x4xf32, #tpu.memory_space<vmem>>, vector<2x16x16x4xf32>
    %34 = vector.shape_cast %33 : vector<2x16x16x4xf32> to vector<512x4xf32>
    %35 = arith.truncf %34 : vector<512x4xf32> to vector<512x4xbf16>
    %c4 = arith.constant 4 : index
    %c0_45 = arith.constant 0 : index
    %c0_46 = arith.constant 0 : index
    %36 = vector.load %arg2[%c4, %c0_45, %c0_46] : memref<9x4x64xbf16, #tpu.memory_space<vmem>>, vector<1x4x64xbf16>
    %37 = vector.shape_cast %36 : vector<1x4x64xbf16> to vector<4x64xbf16>
    %cst_47 = arith.constant dense<0.000000e+00> : vector<512x64xf32>
    %38 = tpu.matmul %35, %37, %cst_47 {dimension_numbers = #tpu.dot_dimension_numbers<[1], [0], [0], [1], [0, 0, 1, 1], [], []>} : vector<512x4xbf16>, vector<4x64xbf16>, vector<512x64xf32> -> vector<512x64xf32>
    %39 = arith.addf %32, %38 : vector<512x64xf32>
    %c0_48 = arith.constant 0 : index
    %c1_49 = arith.constant 1 : index
    %c2_50 = arith.constant 2 : index
    %c0_51 = arith.constant 0 : index
    %40 = vector.load %arg15[%c0_48, %c1_49, %c2_50, %c0_51] : memref<2x18x18x4xf32, #tpu.memory_space<vmem>>, vector<2x16x16x4xf32>
    %41 = vector.shape_cast %40 : vector<2x16x16x4xf32> to vector<512x4xf32>
    %42 = arith.truncf %41 : vector<512x4xf32> to vector<512x4xbf16>
    %c5 = arith.constant 5 : index
    %c0_52 = arith.constant 0 : index
    %c0_53 = arith.constant 0 : index
    %43 = vector.load %arg2[%c5, %c0_52, %c0_53] : memref<9x4x64xbf16, #tpu.memory_space<vmem>>, vector<1x4x64xbf16>
    %44 = vector.shape_cast %43 : vector<1x4x64xbf16> to vector<4x64xbf16>
    %cst_54 = arith.constant dense<0.000000e+00> : vector<512x64xf32>
    %45 = tpu.matmul %42, %44, %cst_54 {dimension_numbers = #tpu.dot_dimension_numbers<[1], [0], [0], [1], [0, 0, 1, 1], [], []>} : vector<512x4xbf16>, vector<4x64xbf16>, vector<512x64xf32> -> vector<512x64xf32>
    %46 = arith.addf %39, %45 : vector<512x64xf32>
    %c0_55 = arith.constant 0 : index
    %c2_56 = arith.constant 2 : index
    %c0_57 = arith.constant 0 : index
    %c0_58 = arith.constant 0 : index
    %47 = vector.load %arg15[%c0_55, %c2_56, %c0_57, %c0_58] : memref<2x18x18x4xf32, #tpu.memory_space<vmem>>, vector<2x16x16x4xf32>
    %48 = vector.shape_cast %47 : vector<2x16x16x4xf32> to vector<512x4xf32>
    %49 = arith.truncf %48 : vector<512x4xf32> to vector<512x4xbf16>
    %c6 = arith.constant 6 : index
    %c0_59 = arith.constant 0 : index
    %c0_60 = arith.constant 0 : index
    %50 = vector.load %arg2[%c6, %c0_59, %c0_60] : memref<9x4x64xbf16, #tpu.memory_space<vmem>>, vector<1x4x64xbf16>
    %51 = vector.shape_cast %50 : vector<1x4x64xbf16> to vector<4x64xbf16>
    %cst_61 = arith.constant dense<0.000000e+00> : vector<512x64xf32>
    %52 = tpu.matmul %49, %51, %cst_61 {dimension_numbers = #tpu.dot_dimension_numbers<[1], [0], [0], [1], [0, 0, 1, 1], [], []>} : vector<512x4xbf16>, vector<4x64xbf16>, vector<512x64xf32> -> vector<512x64xf32>
    %53 = arith.addf %46, %52 : vector<512x64xf32>
    %c0_62 = arith.constant 0 : index
    %c2_63 = arith.constant 2 : index
    %c1_64 = arith.constant 1 : index
    %c0_65 = arith.constant 0 : index
    %54 = vector.load %arg15[%c0_62, %c2_63, %c1_64, %c0_65] : memref<2x18x18x4xf32, #tpu.memory_space<vmem>>, vector<2x16x16x4xf32>
    %55 = vector.shape_cast %54 : vector<2x16x16x4xf32> to vector<512x4xf32>
    %56 = arith.truncf %55 : vector<512x4xf32> to vector<512x4xbf16>
    %c7 = arith.constant 7 : index
    %c0_66 = arith.constant 0 : index
    %c0_67 = arith.constant 0 : index
    %57 = vector.load %arg2[%c7, %c0_66, %c0_67] : memref<9x4x64xbf16, #tpu.memory_space<vmem>>, vector<1x4x64xbf16>
    %58 = vector.shape_cast %57 : vector<1x4x64xbf16> to vector<4x64xbf16>
    %cst_68 = arith.constant dense<0.000000e+00> : vector<512x64xf32>
    %59 = tpu.matmul %56, %58, %cst_68 {dimension_numbers = #tpu.dot_dimension_numbers<[1], [0], [0], [1], [0, 0, 1, 1], [], []>} : vector<512x4xbf16>, vector<4x64xbf16>, vector<512x64xf32> -> vector<512x64xf32>
    %60 = arith.addf %53, %59 : vector<512x64xf32>
    %c0_69 = arith.constant 0 : index
    %c2_70 = arith.constant 2 : index
    %c2_71 = arith.constant 2 : index
    %c0_72 = arith.constant 0 : index
    %61 = vector.load %arg15[%c0_69, %c2_70, %c2_71, %c0_72] : memref<2x18x18x4xf32, #tpu.memory_space<vmem>>, vector<2x16x16x4xf32>
    %62 = vector.shape_cast %61 : vector<2x16x16x4xf32> to vector<512x4xf32>
    %63 = arith.truncf %62 : vector<512x4xf32> to vector<512x4xbf16>
    %c8 = arith.constant 8 : index
    %c0_73 = arith.constant 0 : index
    %c0_74 = arith.constant 0 : index
    %64 = vector.load %arg2[%c8, %c0_73, %c0_74] : memref<9x4x64xbf16, #tpu.memory_space<vmem>>, vector<1x4x64xbf16>
    %65 = vector.shape_cast %64 : vector<1x4x64xbf16> to vector<4x64xbf16>
    %cst_75 = arith.constant dense<0.000000e+00> : vector<512x64xf32>
    %66 = tpu.matmul %63, %65, %cst_75 {dimension_numbers = #tpu.dot_dimension_numbers<[1], [0], [0], [1], [0, 0, 1, 1], [], []>} : vector<512x4xbf16>, vector<4x64xbf16>, vector<512x64xf32> -> vector<512x64xf32>
    %67 = arith.addf %60, %66 : vector<512x64xf32>
    %c0_76 = arith.constant 0 : index
    %c0_77 = arith.constant 0 : index
    %68 = vector.load %arg3[%c0_76, %c0_77] : memref<1x64xf32, #tpu.memory_space<vmem>>, vector<1x64xf32>
    %69 = vector.broadcast %68 : vector<1x64xf32> to vector<512x64xf32>
    %70 = arith.addf %67, %69 : vector<512x64xf32>
    %cst_78 = arith.constant 0.000000e+00 : f32
    %71 = vector.broadcast %cst_78 : f32 to vector<512x64xf32>
    %72 = arith.cmpf oge, %70, %71 : vector<512x64xf32>
    %cst_79 = arith.constant 0.00999999977 : f32
    %73 = vector.broadcast %cst_79 : f32 to vector<512x64xf32>
    %74 = arith.mulf %73, %70 : vector<512x64xf32>
    %75 = arith.select %72, %70, %74 : vector<512x64xi1>, vector<512x64xf32>
    %76 = vector.shape_cast %75 : vector<512x64xf32> to vector<2x16x16x64xf32>
    %cst_80 = arith.constant 0.000000e+00 : f32
    %77 = vector.broadcast %cst_80 : f32 to vector<2x18x18x64xf32>
    %c0_81 = arith.constant 0 : index
    %c0_82 = arith.constant 0 : index
    %c0_83 = arith.constant 0 : index
    %c0_84 = arith.constant 0 : index
    %78 = vector.load %arg16[%c0_81, %c0_82, %c0_83, %c0_84] : memref<2x18x18x64xf32, #tpu.memory_space<vmem>>, vector<2x18x18x64xf32>
    tpu.vector_store %arg16[%c0_81, %c0_82, %c0_83, %c0_84], %77 {strides = array<i32>} : memref<2x18x18x64xf32, #tpu.memory_space<vmem>>, vector<2x18x18x64xf32>,
    %c0_85 = arith.constant 0 : index
    %c1_86 = arith.constant 1 : index
    %c1_87 = arith.constant 1 : index
    %c0_88 = arith.constant 0 : index
    %79 = vector.load %arg16[%c0_85, %c1_86, %c1_87, %c0_88] : memref<2x18x18x64xf32, #tpu.memory_space<vmem>>, vector<2x16x16x64xf32>
    tpu.vector_store %arg16[%c0_85, %c1_86, %c1_87, %c0_88], %76 {strides = array<i32>} : memref<2x18x18x64xf32, #tpu.memory_space<vmem>>, vector<2x16x16x64xf32>,
    %cst_89 = arith.constant 0.000000e+00 : f32
    %80 = vector.broadcast %cst_89 : f32 to vector<128x128xf32>
    %c0_90 = arith.constant 0 : index
    %c0_91 = arith.constant 0 : index
    %c0_92 = arith.constant 0 : index
    %c0_93 = arith.constant 0 : index
    %81 = tpu.strided_load %arg16[%c0_90, %c0_91, %c0_92, %c0_93] {strides = array<i32: 1, 2, 2, 1>} : memref<2x18x18x64xf32, #tpu.memory_space<vmem>>, vector<2x8x8x64xf32>
    %82 = vector.shape_cast %81 : vector<2x8x8x64xf32> to vector<128x64xf32>
    %83 = arith.truncf %82 : vector<128x64xf32> to vector<128x64xbf16>
    %c0_94 = arith.constant 0 : index
    %c0_95 = arith.constant 0 : index
    %c0_96 = arith.constant 0 : index
    %84 = vector.load %arg4[%c0_94, %c0_95, %c0_96] : memref<9x64x128xbf16, #tpu.memory_space<vmem>>, vector<1x64x128xbf16>
    %85 = vector.shape_cast %84 : vector<1x64x128xbf16> to vector<64x128xbf16>
    %cst_97 = arith.constant dense<0.000000e+00> : vector<128x128xf32>
    %86 = tpu.matmul %83, %85, %cst_97 {dimension_numbers = #tpu.dot_dimension_numbers<[1], [0], [0], [1], [0, 0, 1, 1], [], []>} : vector<128x64xbf16>, vector<64x128xbf16>, vector<128x128xf32> -> vector<128x128xf32>
    %87 = arith.addf %80, %86 : vector<128x128xf32>
    %c0_98 = arith.constant 0 : index
    %c0_99 = arith.constant 0 : index
    %c1_100 = arith.constant 1 : index
    %c0_101 = arith.constant 0 : index
    %88 = tpu.strided_load %arg16[%c0_98, %c0_99, %c1_100, %c0_101] {strides = array<i32: 1, 2, 2, 1>} : memref<2x18x18x64xf32, #tpu.memory_space<vmem>>, vector<2x8x8x64xf32>
    %89 = vector.shape_cast %88 : vector<2x8x8x64xf32> to vector<128x64xf32>
    %90 = arith.truncf %89 : vector<128x64xf32> to vector<128x64xbf16>
    %c1_102 = arith.constant 1 : index
    %c0_103 = arith.constant 0 : index
    %c0_104 = arith.constant 0 : index
    %91 = vector.load %arg4[%c1_102, %c0_103, %c0_104] : memref<9x64x128xbf16, #tpu.memory_space<vmem>>, vector<1x64x128xbf16>
    %92 = vector.shape_cast %91 : vector<1x64x128xbf16> to vector<64x128xbf16>
    %cst_105 = arith.constant dense<0.000000e+00> : vector<128x128xf32>
    %93 = tpu.matmul %90, %92, %cst_105 {dimension_numbers = #tpu.dot_dimension_numbers<[1], [0], [0], [1], [0, 0, 1, 1], [], []>} : vector<128x64xbf16>, vector<64x128xbf16>, vector<128x128xf32> -> vector<128x128xf32>
    %94 = arith.addf %87, %93 : vector<128x128xf32>
    %c0_106 = arith.constant 0 : index
    %c0_107 = arith.constant 0 : index
    %c2_108 = arith.constant 2 : index
    %c0_109 = arith.constant 0 : index
    %95 = tpu.strided_load %arg16[%c0_106, %c0_107, %c2_108, %c0_109] {strides = array<i32: 1, 2, 2, 1>} : memref<2x18x18x64xf32, #tpu.memory_space<vmem>>, vector<2x8x8x64xf32>
    %96 = vector.shape_cast %95 : vector<2x8x8x64xf32> to vector<128x64xf32>
    %97 = arith.truncf %96 : vector<128x64xf32> to vector<128x64xbf16>
    %c2_110 = arith.constant 2 : index
    %c0_111 = arith.constant 0 : index
    %c0_112 = arith.constant 0 : index
    %98 = vector.load %arg4[%c2_110, %c0_111, %c0_112] : memref<9x64x128xbf16, #tpu.memory_space<vmem>>, vector<1x64x128xbf16>
    %99 = vector.shape_cast %98 : vector<1x64x128xbf16> to vector<64x128xbf16>
    %cst_113 = arith.constant dense<0.000000e+00> : vector<128x128xf32>
    %100 = tpu.matmul %97, %99, %cst_113 {dimension_numbers = #tpu.dot_dimension_numbers<[1], [0], [0], [1], [0, 0, 1, 1], [], []>} : vector<128x64xbf16>, vector<64x128xbf16>, vector<128x128xf32> -> vector<128x128xf32>
    %101 = arith.addf %94, %100 : vector<128x128xf32>
    %c0_114 = arith.constant 0 : index
    %c1_115 = arith.constant 1 : index
    %c0_116 = arith.constant 0 : index
    %c0_117 = arith.constant 0 : index
    %102 = tpu.strided_load %arg16[%c0_114, %c1_115, %c0_116, %c0_117] {strides = array<i32: 1, 2, 2, 1>} : memref<2x18x18x64xf32, #tpu.memory_space<vmem>>, vector<2x8x8x64xf32>
    %103 = vector.shape_cast %102 : vector<2x8x8x64xf32> to vector<128x64xf32>
    %104 = arith.truncf %103 : vector<128x64xf32> to vector<128x64xbf16>
    %c3_118 = arith.constant 3 : index
    %c0_119 = arith.constant 0 : index
    %c0_120 = arith.constant 0 : index
    %105 = vector.load %arg4[%c3_118, %c0_119, %c0_120] : memref<9x64x128xbf16, #tpu.memory_space<vmem>>, vector<1x64x128xbf16>
    %106 = vector.shape_cast %105 : vector<1x64x128xbf16> to vector<64x128xbf16>
    %cst_121 = arith.constant dense<0.000000e+00> : vector<128x128xf32>
    %107 = tpu.matmul %104, %106, %cst_121 {dimension_numbers = #tpu.dot_dimension_numbers<[1], [0], [0], [1], [0, 0, 1, 1], [], []>} : vector<128x64xbf16>, vector<64x128xbf16>, vector<128x128xf32> -> vector<128x128xf32>
    %108 = arith.addf %101, %107 : vector<128x128xf32>
    %c0_122 = arith.constant 0 : index
    %c1_123 = arith.constant 1 : index
    %c1_124 = arith.constant 1 : index
    %c0_125 = arith.constant 0 : index
    %109 = tpu.strided_load %arg16[%c0_122, %c1_123, %c1_124, %c0_125] {strides = array<i32: 1, 2, 2, 1>} : memref<2x18x18x64xf32, #tpu.memory_space<vmem>>, vector<2x8x8x64xf32>
    %110 = vector.shape_cast %109 : vector<2x8x8x64xf32> to vector<128x64xf32>
    %111 = arith.truncf %110 : vector<128x64xf32> to vector<128x64xbf16>
    %c4_126 = arith.constant 4 : index
    %c0_127 = arith.constant 0 : index
    %c0_128 = arith.constant 0 : index
    %112 = vector.load %arg4[%c4_126, %c0_127, %c0_128] : memref<9x64x128xbf16, #tpu.memory_space<vmem>>, vector<1x64x128xbf16>
    %113 = vector.shape_cast %112 : vector<1x64x128xbf16> to vector<64x128xbf16>
    %cst_129 = arith.constant dense<0.000000e+00> : vector<128x128xf32>
    %114 = tpu.matmul %111, %113, %cst_129 {dimension_numbers = #tpu.dot_dimension_numbers<[1], [0], [0], [1], [0, 0, 1, 1], [], []>} : vector<128x64xbf16>, vector<64x128xbf16>, vector<128x128xf32> -> vector<128x128xf32>
    %115 = arith.addf %108, %114 : vector<128x128xf32>
    %c0_130 = arith.constant 0 : index
    %c1_131 = arith.constant 1 : index
    %c2_132 = arith.constant 2 : index
    %c0_133 = arith.constant 0 : index
    %116 = tpu.strided_load %arg16[%c0_130, %c1_131, %c2_132, %c0_133] {strides = array<i32: 1, 2, 2, 1>} : memref<2x18x18x64xf32, #tpu.memory_space<vmem>>, vector<2x8x8x64xf32>
    %117 = vector.shape_cast %116 : vector<2x8x8x64xf32> to vector<128x64xf32>
    %118 = arith.truncf %117 : vector<128x64xf32> to vector<128x64xbf16>
    %c5_134 = arith.constant 5 : index
    %c0_135 = arith.constant 0 : index
    %c0_136 = arith.constant 0 : index
    %119 = vector.load %arg4[%c5_134, %c0_135, %c0_136] : memref<9x64x128xbf16, #tpu.memory_space<vmem>>, vector<1x64x128xbf16>
    %120 = vector.shape_cast %119 : vector<1x64x128xbf16> to vector<64x128xbf16>
    %cst_137 = arith.constant dense<0.000000e+00> : vector<128x128xf32>
    %121 = tpu.matmul %118, %120, %cst_137 {dimension_numbers = #tpu.dot_dimension_numbers<[1], [0], [0], [1], [0, 0, 1, 1], [], []>} : vector<128x64xbf16>, vector<64x128xbf16>, vector<128x128xf32> -> vector<128x128xf32>
    %122 = arith.addf %115, %121 : vector<128x128xf32>
    %c0_138 = arith.constant 0 : index
    %c2_139 = arith.constant 2 : index
    %c0_140 = arith.constant 0 : index
    %c0_141 = arith.constant 0 : index
    %123 = tpu.strided_load %arg16[%c0_138, %c2_139, %c0_140, %c0_141] {strides = array<i32: 1, 2, 2, 1>} : memref<2x18x18x64xf32, #tpu.memory_space<vmem>>, vector<2x8x8x64xf32>
    %124 = vector.shape_cast %123 : vector<2x8x8x64xf32> to vector<128x64xf32>
    %125 = arith.truncf %124 : vector<128x64xf32> to vector<128x64xbf16>
    %c6_142 = arith.constant 6 : index
    %c0_143 = arith.constant 0 : index
    %c0_144 = arith.constant 0 : index
    %126 = vector.load %arg4[%c6_142, %c0_143, %c0_144] : memref<9x64x128xbf16, #tpu.memory_space<vmem>>, vector<1x64x128xbf16>
    %127 = vector.shape_cast %126 : vector<1x64x128xbf16> to vector<64x128xbf16>
    %cst_145 = arith.constant dense<0.000000e+00> : vector<128x128xf32>
    %128 = tpu.matmul %125, %127, %cst_145 {dimension_numbers = #tpu.dot_dimension_numbers<[1], [0], [0], [1], [0, 0, 1, 1], [], []>} : vector<128x64xbf16>, vector<64x128xbf16>, vector<128x128xf32> -> vector<128x128xf32>
    %129 = arith.addf %122, %128 : vector<128x128xf32>
    %c0_146 = arith.constant 0 : index
    %c2_147 = arith.constant 2 : index
    %c1_148 = arith.constant 1 : index
    %c0_149 = arith.constant 0 : index
    %130 = tpu.strided_load %arg16[%c0_146, %c2_147, %c1_148, %c0_149] {strides = array<i32: 1, 2, 2, 1>} : memref<2x18x18x64xf32, #tpu.memory_space<vmem>>, vector<2x8x8x64xf32>
    %131 = vector.shape_cast %130 : vector<2x8x8x64xf32> to vector<128x64xf32>
    %132 = arith.truncf %131 : vector<128x64xf32> to vector<128x64xbf16>
    %c7_150 = arith.constant 7 : index
    %c0_151 = arith.constant 0 : index
    %c0_152 = arith.constant 0 : index
    %133 = vector.load %arg4[%c7_150, %c0_151, %c0_152] : memref<9x64x128xbf16, #tpu.memory_space<vmem>>, vector<1x64x128xbf16>
    %134 = vector.shape_cast %133 : vector<1x64x128xbf16> to vector<64x128xbf16>
    %cst_153 = arith.constant dense<0.000000e+00> : vector<128x128xf32>
    %135 = tpu.matmul %132, %134, %cst_153 {dimension_numbers = #tpu.dot_dimension_numbers<[1], [0], [0], [1], [0, 0, 1, 1], [], []>} : vector<128x64xbf16>, vector<64x128xbf16>, vector<128x128xf32> -> vector<128x128xf32>
    %136 = arith.addf %129, %135 : vector<128x128xf32>
    %c0_154 = arith.constant 0 : index
    %c2_155 = arith.constant 2 : index
    %c2_156 = arith.constant 2 : index
    %c0_157 = arith.constant 0 : index
    %137 = tpu.strided_load %arg16[%c0_154, %c2_155, %c2_156, %c0_157] {strides = array<i32: 1, 2, 2, 1>} : memref<2x18x18x64xf32, #tpu.memory_space<vmem>>, vector<2x8x8x64xf32>
    %138 = vector.shape_cast %137 : vector<2x8x8x64xf32> to vector<128x64xf32>
    %139 = arith.truncf %138 : vector<128x64xf32> to vector<128x64xbf16>
    %c8_158 = arith.constant 8 : index
    %c0_159 = arith.constant 0 : index
    %c0_160 = arith.constant 0 : index
    %140 = vector.load %arg4[%c8_158, %c0_159, %c0_160] : memref<9x64x128xbf16, #tpu.memory_space<vmem>>, vector<1x64x128xbf16>
    %141 = vector.shape_cast %140 : vector<1x64x128xbf16> to vector<64x128xbf16>
    %cst_161 = arith.constant dense<0.000000e+00> : vector<128x128xf32>
    %142 = tpu.matmul %139, %141, %cst_161 {dimension_numbers = #tpu.dot_dimension_numbers<[1], [0], [0], [1], [0, 0, 1, 1], [], []>} : vector<128x64xbf16>, vector<64x128xbf16>, vector<128x128xf32> -> vector<128x128xf32>
    %143 = arith.addf %136, %142 : vector<128x128xf32>
    %c0_162 = arith.constant 0 : index
    %c0_163 = arith.constant 0 : index
    %144 = vector.load %arg5[%c0_162, %c0_163] : memref<1x128xf32, #tpu.memory_space<vmem>>, vector<1x128xf32>
    %145 = vector.broadcast %144 : vector<1x128xf32> to vector<128x128xf32>
    %146 = arith.addf %143, %145 : vector<128x128xf32>
    %cst_164 = arith.constant 0.000000e+00 : f32
    %147 = vector.broadcast %cst_164 : f32 to vector<128x128xf32>
    %148 = arith.cmpf oge, %146, %147 : vector<128x128xf32>
    %cst_165 = arith.constant 0.00999999977 : f32
    %149 = vector.broadcast %cst_165 : f32 to vector<128x128xf32>
    %150 = arith.mulf %149, %146 : vector<128x128xf32>
    %151 = arith.select %148, %146, %150 : vector<128x128xi1>, vector<128x128xf32>
    %152 = vector.shape_cast %151 : vector<128x128xf32> to vector<2x8x8x128xf32>
    %cst_166 = arith.constant 0.000000e+00 : f32
    %153 = vector.broadcast %cst_166 : f32 to vector<2x10x18x128xf32>
    %c0_167 = arith.constant 0 : index
    %c0_168 = arith.constant 0 : index
    %c0_169 = arith.constant 0 : index
    %c0_170 = arith.constant 0 : index
    %154 = vector.load %arg17[%c0_167, %c0_168, %c0_169, %c0_170] : memref<2x10x18x128xf32, #tpu.memory_space<vmem>>, vector<2x10x18x128xf32>
    tpu.vector_store %arg17[%c0_167, %c0_168, %c0_169, %c0_170], %153 {strides = array<i32>} : memref<2x10x18x128xf32, #tpu.memory_space<vmem>>, vector<2x10x18x128xf32>,
    %c0_171 = arith.constant 0 : index
    %c1_172 = arith.constant 1 : index
    %c1_173 = arith.constant 1 : index
    %c0_174 = arith.constant 0 : index
    %155 = vector.load %arg17[%c0_171, %c1_172, %c1_173, %c0_174] : memref<2x10x18x128xf32, #tpu.memory_space<vmem>>, vector<2x8x8x128xf32>
    tpu.vector_store %arg17[%c0_171, %c1_172, %c1_173, %c0_174], %152 {strides = array<i32>} : memref<2x10x18x128xf32, #tpu.memory_space<vmem>>, vector<2x8x8x128xf32>,
    %cst_175 = arith.constant 0.000000e+00 : f32
    %156 = vector.broadcast %cst_175 : f32 to vector<64x128xf32>
    %c0_176 = arith.constant 0 : index
    %c0_177 = arith.constant 0 : index
    %c0_178 = arith.constant 0 : index
    %c0_179 = arith.constant 0 : index
    %157 = tpu.strided_load %arg17[%c0_176, %c0_177, %c0_178, %c0_179] {strides = array<i32: 1, 2, 2, 1>} : memref<2x10x18x128xf32, #tpu.memory_space<vmem>>, vector<2x4x8x128xf32>
    %158 = vector.shape_cast %157 : vector<2x4x8x128xf32> to vector<64x128xf32>
    %159 = arith.truncf %158 : vector<64x128xf32> to vector<64x128xbf16>
    %c0_180 = arith.constant 0 : index
    %c0_181 = arith.constant 0 : index
    %c0_182 = arith.constant 0 : index
    %160 = vector.load %arg6[%c0_180, %c0_181, %c0_182] : memref<9x128x128xbf16, #tpu.memory_space<vmem>>, vector<1x128x128xbf16>
    %161 = vector.shape_cast %160 : vector<1x128x128xbf16> to vector<128x128xbf16>
    %cst_183 = arith.constant dense<0.000000e+00> : vector<64x128xf32>
    %162 = tpu.matmul %159, %161, %cst_183 {dimension_numbers = #tpu.dot_dimension_numbers<[1], [0], [0], [1], [0, 0, 1, 1], [], []>} : vector<64x128xbf16>, vector<128x128xbf16>, vector<64x128xf32> -> vector<64x128xf32>
    %163 = arith.addf %156, %162 : vector<64x128xf32>
    %c0_184 = arith.constant 0 : index
    %c0_185 = arith.constant 0 : index
    %c1_186 = arith.constant 1 : index
    %c0_187 = arith.constant 0 : index
    %164 = tpu.strided_load %arg17[%c0_184, %c0_185, %c1_186, %c0_187] {strides = array<i32: 1, 2, 2, 1>} : memref<2x10x18x128xf32, #tpu.memory_space<vmem>>, vector<2x4x8x128xf32>
    %165 = vector.shape_cast %164 : vector<2x4x8x128xf32> to vector<64x128xf32>
    %166 = arith.truncf %165 : vector<64x128xf32> to vector<64x128xbf16>
    %c1_188 = arith.constant 1 : index
    %c0_189 = arith.constant 0 : index
    %c0_190 = arith.constant 0 : index
    %167 = vector.load %arg6[%c1_188, %c0_189, %c0_190] : memref<9x128x128xbf16, #tpu.memory_space<vmem>>, vector<1x128x128xbf16>
    %168 = vector.shape_cast %167 : vector<1x128x128xbf16> to vector<128x128xbf16>
    %cst_191 = arith.constant dense<0.000000e+00> : vector<64x128xf32>
    %169 = tpu.matmul %166, %168, %cst_191 {dimension_numbers = #tpu.dot_dimension_numbers<[1], [0], [0], [1], [0, 0, 1, 1], [], []>} : vector<64x128xbf16>, vector<128x128xbf16>, vector<64x128xf32> -> vector<64x128xf32>
    %170 = arith.addf %163, %169 : vector<64x128xf32>
    %c0_192 = arith.constant 0 : index
    %c0_193 = arith.constant 0 : index
    %c2_194 = arith.constant 2 : index
    %c0_195 = arith.constant 0 : index
    %171 = tpu.strided_load %arg17[%c0_192, %c0_193, %c2_194, %c0_195] {strides = array<i32: 1, 2, 2, 1>} : memref<2x10x18x128xf32, #tpu.memory_space<vmem>>, vector<2x4x8x128xf32>
    %172 = vector.shape_cast %171 : vector<2x4x8x128xf32> to vector<64x128xf32>
    %173 = arith.truncf %172 : vector<64x128xf32> to vector<64x128xbf16>
    %c2_196 = arith.constant 2 : index
    %c0_197 = arith.constant 0 : index
    %c0_198 = arith.constant 0 : index
    %174 = vector.load %arg6[%c2_196, %c0_197, %c0_198] : memref<9x128x128xbf16, #tpu.memory_space<vmem>>, vector<1x128x128xbf16>
    %175 = vector.shape_cast %174 : vector<1x128x128xbf16> to vector<128x128xbf16>
    %cst_199 = arith.constant dense<0.000000e+00> : vector<64x128xf32>
    %176 = tpu.matmul %173, %175, %cst_199 {dimension_numbers = #tpu.dot_dimension_numbers<[1], [0], [0], [1], [0, 0, 1, 1], [], []>} : vector<64x128xbf16>, vector<128x128xbf16>, vector<64x128xf32> -> vector<64x128xf32>
    %177 = arith.addf %170, %176 : vector<64x128xf32>
    %c0_200 = arith.constant 0 : index
    %c1_201 = arith.constant 1 : index
    %c0_202 = arith.constant 0 : index
    %c0_203 = arith.constant 0 : index
    %178 = tpu.strided_load %arg17[%c0_200, %c1_201, %c0_202, %c0_203] {strides = array<i32: 1, 2, 2, 1>} : memref<2x10x18x128xf32, #tpu.memory_space<vmem>>, vector<2x4x8x128xf32>
    %179 = vector.shape_cast %178 : vector<2x4x8x128xf32> to vector<64x128xf32>
    %180 = arith.truncf %179 : vector<64x128xf32> to vector<64x128xbf16>
    %c3_204 = arith.constant 3 : index
    %c0_205 = arith.constant 0 : index
    %c0_206 = arith.constant 0 : index
    %181 = vector.load %arg6[%c3_204, %c0_205, %c0_206] : memref<9x128x128xbf16, #tpu.memory_space<vmem>>, vector<1x128x128xbf16>
    %182 = vector.shape_cast %181 : vector<1x128x128xbf16> to vector<128x128xbf16>
    %cst_207 = arith.constant dense<0.000000e+00> : vector<64x128xf32>
    %183 = tpu.matmul %180, %182, %cst_207 {dimension_numbers = #tpu.dot_dimension_numbers<[1], [0], [0], [1], [0, 0, 1, 1], [], []>} : vector<64x128xbf16>, vector<128x128xbf16>, vector<64x128xf32> -> vector<64x128xf32>
    %184 = arith.addf %177, %183 : vector<64x128xf32>
    %c0_208 = arith.constant 0 : index
    %c1_209 = arith.constant 1 : index
    %c1_210 = arith.constant 1 : index
    %c0_211 = arith.constant 0 : index
    %185 = tpu.strided_load %arg17[%c0_208, %c1_209, %c1_210, %c0_211] {strides = array<i32: 1, 2, 2, 1>} : memref<2x10x18x128xf32, #tpu.memory_space<vmem>>, vector<2x4x8x128xf32>
    %186 = vector.shape_cast %185 : vector<2x4x8x128xf32> to vector<64x128xf32>
    %187 = arith.truncf %186 : vector<64x128xf32> to vector<64x128xbf16>
    %c4_212 = arith.constant 4 : index
    %c0_213 = arith.constant 0 : index
    %c0_214 = arith.constant 0 : index
    %188 = vector.load %arg6[%c4_212, %c0_213, %c0_214] : memref<9x128x128xbf16, #tpu.memory_space<vmem>>, vector<1x128x128xbf16>
    %189 = vector.shape_cast %188 : vector<1x128x128xbf16> to vector<128x128xbf16>
    %cst_215 = arith.constant dense<0.000000e+00> : vector<64x128xf32>
    %190 = tpu.matmul %187, %189, %cst_215 {dimension_numbers = #tpu.dot_dimension_numbers<[1], [0], [0], [1], [0, 0, 1, 1], [], []>} : vector<64x128xbf16>, vector<128x128xbf16>, vector<64x128xf32> -> vector<64x128xf32>
    %191 = arith.addf %184, %190 : vector<64x128xf32>
    %c0_216 = arith.constant 0 : index
    %c1_217 = arith.constant 1 : index
    %c2_218 = arith.constant 2 : index
    %c0_219 = arith.constant 0 : index
    %192 = tpu.strided_load %arg17[%c0_216, %c1_217, %c2_218, %c0_219] {strides = array<i32: 1, 2, 2, 1>} : memref<2x10x18x128xf32, #tpu.memory_space<vmem>>, vector<2x4x8x128xf32>
    %193 = vector.shape_cast %192 : vector<2x4x8x128xf32> to vector<64x128xf32>
    %194 = arith.truncf %193 : vector<64x128xf32> to vector<64x128xbf16>
    %c5_220 = arith.constant 5 : index
    %c0_221 = arith.constant 0 : index
    %c0_222 = arith.constant 0 : index
    %195 = vector.load %arg6[%c5_220, %c0_221, %c0_222] : memref<9x128x128xbf16, #tpu.memory_space<vmem>>, vector<1x128x128xbf16>
    %196 = vector.shape_cast %195 : vector<1x128x128xbf16> to vector<128x128xbf16>
    %cst_223 = arith.constant dense<0.000000e+00> : vector<64x128xf32>
    %197 = tpu.matmul %194, %196, %cst_223 {dimension_numbers = #tpu.dot_dimension_numbers<[1], [0], [0], [1], [0, 0, 1, 1], [], []>} : vector<64x128xbf16>, vector<128x128xbf16>, vector<64x128xf32> -> vector<64x128xf32>
    %198 = arith.addf %191, %197 : vector<64x128xf32>
    %c0_224 = arith.constant 0 : index
    %c2_225 = arith.constant 2 : index
    %c0_226 = arith.constant 0 : index
    %c0_227 = arith.constant 0 : index
    %199 = tpu.strided_load %arg17[%c0_224, %c2_225, %c0_226, %c0_227] {strides = array<i32: 1, 2, 2, 1>} : memref<2x10x18x128xf32, #tpu.memory_space<vmem>>, vector<2x4x8x128xf32>
    %200 = vector.shape_cast %199 : vector<2x4x8x128xf32> to vector<64x128xf32>
    %201 = arith.truncf %200 : vector<64x128xf32> to vector<64x128xbf16>
    %c6_228 = arith.constant 6 : index
    %c0_229 = arith.constant 0 : index
    %c0_230 = arith.constant 0 : index
    %202 = vector.load %arg6[%c6_228, %c0_229, %c0_230] : memref<9x128x128xbf16, #tpu.memory_space<vmem>>, vector<1x128x128xbf16>
    %203 = vector.shape_cast %202 : vector<1x128x128xbf16> to vector<128x128xbf16>
    %cst_231 = arith.constant dense<0.000000e+00> : vector<64x128xf32>
    %204 = tpu.matmul %201, %203, %cst_231 {dimension_numbers = #tpu.dot_dimension_numbers<[1], [0], [0], [1], [0, 0, 1, 1], [], []>} : vector<64x128xbf16>, vector<128x128xbf16>, vector<64x128xf32> -> vector<64x128xf32>
    %205 = arith.addf %198, %204 : vector<64x128xf32>
    %c0_232 = arith.constant 0 : index
    %c2_233 = arith.constant 2 : index
    %c1_234 = arith.constant 1 : index
    %c0_235 = arith.constant 0 : index
    %206 = tpu.strided_load %arg17[%c0_232, %c2_233, %c1_234, %c0_235] {strides = array<i32: 1, 2, 2, 1>} : memref<2x10x18x128xf32, #tpu.memory_space<vmem>>, vector<2x4x8x128xf32>
    %207 = vector.shape_cast %206 : vector<2x4x8x128xf32> to vector<64x128xf32>
    %208 = arith.truncf %207 : vector<64x128xf32> to vector<64x128xbf16>
    %c7_236 = arith.constant 7 : index
    %c0_237 = arith.constant 0 : index
    %c0_238 = arith.constant 0 : index
    %209 = vector.load %arg6[%c7_236, %c0_237, %c0_238] : memref<9x128x128xbf16, #tpu.memory_space<vmem>>, vector<1x128x128xbf16>
    %210 = vector.shape_cast %209 : vector<1x128x128xbf16> to vector<128x128xbf16>
    %cst_239 = arith.constant dense<0.000000e+00> : vector<64x128xf32>
    %211 = tpu.matmul %208, %210, %cst_239 {dimension_numbers = #tpu.dot_dimension_numbers<[1], [0], [0], [1], [0, 0, 1, 1], [], []>} : vector<64x128xbf16>, vector<128x128xbf16>, vector<64x128xf32> -> vector<64x128xf32>
    %212 = arith.addf %205, %211 : vector<64x128xf32>
    %c0_240 = arith.constant 0 : index
    %c2_241 = arith.constant 2 : index
    %c2_242 = arith.constant 2 : index
    %c0_243 = arith.constant 0 : index
    %213 = tpu.strided_load %arg17[%c0_240, %c2_241, %c2_242, %c0_243] {strides = array<i32: 1, 2, 2, 1>} : memref<2x10x18x128xf32, #tpu.memory_space<vmem>>, vector<2x4x8x128xf32>
    %214 = vector.shape_cast %213 : vector<2x4x8x128xf32> to vector<64x128xf32>
    %215 = arith.truncf %214 : vector<64x128xf32> to vector<64x128xbf16>
    %c8_244 = arith.constant 8 : index
    %c0_245 = arith.constant 0 : index
    %c0_246 = arith.constant 0 : index
    %216 = vector.load %arg6[%c8_244, %c0_245, %c0_246] : memref<9x128x128xbf16, #tpu.memory_space<vmem>>, vector<1x128x128xbf16>
    %217 = vector.shape_cast %216 : vector<1x128x128xbf16> to vector<128x128xbf16>
    %cst_247 = arith.constant dense<0.000000e+00> : vector<64x128xf32>
    %218 = tpu.matmul %215, %217, %cst_247 {dimension_numbers = #tpu.dot_dimension_numbers<[1], [0], [0], [1], [0, 0, 1, 1], [], []>} : vector<64x128xbf16>, vector<128x128xbf16>, vector<64x128xf32> -> vector<64x128xf32>
    %219 = arith.addf %212, %218 : vector<64x128xf32>
    %c0_248 = arith.constant 0 : index
    %c0_249 = arith.constant 0 : index
    %220 = vector.load %arg7[%c0_248, %c0_249] : memref<1x128xf32, #tpu.memory_space<vmem>>, vector<1x128xf32>
    %221 = vector.broadcast %220 : vector<1x128xf32> to vector<64x128xf32>
    %222 = arith.addf %219, %221 : vector<64x128xf32>
    %cst_250 = arith.constant 0.000000e+00 : f32
    %223 = vector.broadcast %cst_250 : f32 to vector<64x128xf32>
    %224 = arith.cmpf oge, %222, %223 : vector<64x128xf32>
    %cst_251 = arith.constant 0.00999999977 : f32
    %225 = vector.broadcast %cst_251 : f32 to vector<64x128xf32>
    %226 = arith.mulf %225, %222 : vector<64x128xf32>
    %227 = arith.select %224, %222, %226 : vector<64x128xi1>, vector<64x128xf32>
    %228 = vector.shape_cast %227 : vector<64x128xf32> to vector<2x4x8x128xf32>
    %cst_252 = arith.constant 0.000000e+00 : f32
    %229 = vector.broadcast %cst_252 : f32 to vector<2x6x18x128xf32>
    %c0_253 = arith.constant 0 : index
    %c0_254 = arith.constant 0 : index
    %c0_255 = arith.constant 0 : index
    %c0_256 = arith.constant 0 : index
    %230 = vector.load %arg18[%c0_253, %c0_254, %c0_255, %c0_256] : memref<2x6x18x128xf32, #tpu.memory_space<vmem>>, vector<2x6x18x128xf32>
    tpu.vector_store %arg18[%c0_253, %c0_254, %c0_255, %c0_256], %229 {strides = array<i32>} : memref<2x6x18x128xf32, #tpu.memory_space<vmem>>, vector<2x6x18x128xf32>,
    %231 = vector.extract_strided_slice %228 {offsets = [0, 0, 0, 0], sizes = [2, 4, 4, 128], strides = [1, 1, 1, 1]} : vector<2x4x8x128xf32> to vector<2x4x4x128xf32>
    %c0_257 = arith.constant 0 : index
    %c1_258 = arith.constant 1 : index
    %c1_259 = arith.constant 1 : index
    %c0_260 = arith.constant 0 : index
    %232 = vector.load %arg18[%c0_257, %c1_258, %c1_259, %c0_260] : memref<2x6x18x128xf32, #tpu.memory_space<vmem>>, vector<2x4x4x128xf32>
    tpu.vector_store %arg18[%c0_257, %c1_258, %c1_259, %c0_260], %231 {strides = array<i32>} : memref<2x6x18x128xf32, #tpu.memory_space<vmem>>, vector<2x4x4x128xf32>,
    %cst_261 = arith.constant 0.000000e+00 : f32
    %233 = vector.broadcast %cst_261 : f32 to vector<32x128xf32>
    %c0_262 = arith.constant 0 : index
    %c0_263 = arith.constant 0 : index
    %c0_264 = arith.constant 0 : index
    %c0_265 = arith.constant 0 : index
    %234 = tpu.strided_load %arg18[%c0_262, %c0_263, %c0_264, %c0_265] {strides = array<i32: 1, 2, 2, 1>} : memref<2x6x18x128xf32, #tpu.memory_space<vmem>>, vector<2x2x8x128xf32>
    %235 = vector.shape_cast %234 : vector<2x2x8x128xf32> to vector<32x128xf32>
    %236 = arith.truncf %235 : vector<32x128xf32> to vector<32x128xbf16>
    %c0_266 = arith.constant 0 : index
    %c0_267 = arith.constant 0 : index
    %c0_268 = arith.constant 0 : index
    %237 = vector.load %arg8[%c0_266, %c0_267, %c0_268] : memref<9x128x128xbf16, #tpu.memory_space<vmem>>, vector<1x128x128xbf16>
    %238 = vector.shape_cast %237 : vector<1x128x128xbf16> to vector<128x128xbf16>
    %cst_269 = arith.constant dense<0.000000e+00> : vector<32x128xf32>
    %239 = tpu.matmul %236, %238, %cst_269 {dimension_numbers = #tpu.dot_dimension_numbers<[1], [0], [0], [1], [0, 0, 1, 1], [], []>} : vector<32x128xbf16>, vector<128x128xbf16>, vector<32x128xf32> -> vector<32x128xf32>
    %240 = arith.addf %233, %239 : vector<32x128xf32>
    %c0_270 = arith.constant 0 : index
    %c0_271 = arith.constant 0 : index
    %c1_272 = arith.constant 1 : index
    %c0_273 = arith.constant 0 : index
    %241 = tpu.strided_load %arg18[%c0_270, %c0_271, %c1_272, %c0_273] {strides = array<i32: 1, 2, 2, 1>} : memref<2x6x18x128xf32, #tpu.memory_space<vmem>>, vector<2x2x8x128xf32>
    %242 = vector.shape_cast %241 : vector<2x2x8x128xf32> to vector<32x128xf32>
    %243 = arith.truncf %242 : vector<32x128xf32> to vector<32x128xbf16>
    %c1_274 = arith.constant 1 : index
    %c0_275 = arith.constant 0 : index
    %c0_276 = arith.constant 0 : index
    %244 = vector.load %arg8[%c1_274, %c0_275, %c0_276] : memref<9x128x128xbf16, #tpu.memory_space<vmem>>, vector<1x128x128xbf16>
    %245 = vector.shape_cast %244 : vector<1x128x128xbf16> to vector<128x128xbf16>
    %cst_277 = arith.constant dense<0.000000e+00> : vector<32x128xf32>
    %246 = tpu.matmul %243, %245, %cst_277 {dimension_numbers = #tpu.dot_dimension_numbers<[1], [0], [0], [1], [0, 0, 1, 1], [], []>} : vector<32x128xbf16>, vector<128x128xbf16>, vector<32x128xf32> -> vector<32x128xf32>
    %247 = arith.addf %240, %246 : vector<32x128xf32>
    %c0_278 = arith.constant 0 : index
    %c0_279 = arith.constant 0 : index
    %c2_280 = arith.constant 2 : index
    %c0_281 = arith.constant 0 : index
    %248 = tpu.strided_load %arg18[%c0_278, %c0_279, %c2_280, %c0_281] {strides = array<i32: 1, 2, 2, 1>} : memref<2x6x18x128xf32, #tpu.memory_space<vmem>>, vector<2x2x8x128xf32>
    %249 = vector.shape_cast %248 : vector<2x2x8x128xf32> to vector<32x128xf32>
    %250 = arith.truncf %249 : vector<32x128xf32> to vector<32x128xbf16>
    %c2_282 = arith.constant 2 : index
    %c0_283 = arith.constant 0 : index
    %c0_284 = arith.constant 0 : index
    %251 = vector.load %arg8[%c2_282, %c0_283, %c0_284] : memref<9x128x128xbf16, #tpu.memory_space<vmem>>, vector<1x128x128xbf16>
    %252 = vector.shape_cast %251 : vector<1x128x128xbf16> to vector<128x128xbf16>
    %cst_285 = arith.constant dense<0.000000e+00> : vector<32x128xf32>
    %253 = tpu.matmul %250, %252, %cst_285 {dimension_numbers = #tpu.dot_dimension_numbers<[1], [0], [0], [1], [0, 0, 1, 1], [], []>} : vector<32x128xbf16>, vector<128x128xbf16>, vector<32x128xf32> -> vector<32x128xf32>
    %254 = arith.addf %247, %253 : vector<32x128xf32>
    %c0_286 = arith.constant 0 : index
    %c1_287 = arith.constant 1 : index
    %c0_288 = arith.constant 0 : index
    %c0_289 = arith.constant 0 : index
    %255 = tpu.strided_load %arg18[%c0_286, %c1_287, %c0_288, %c0_289] {strides = array<i32: 1, 2, 2, 1>} : memref<2x6x18x128xf32, #tpu.memory_space<vmem>>, vector<2x2x8x128xf32>
    %256 = vector.shape_cast %255 : vector<2x2x8x128xf32> to vector<32x128xf32>
    %257 = arith.truncf %256 : vector<32x128xf32> to vector<32x128xbf16>
    %c3_290 = arith.constant 3 : index
    %c0_291 = arith.constant 0 : index
    %c0_292 = arith.constant 0 : index
    %258 = vector.load %arg8[%c3_290, %c0_291, %c0_292] : memref<9x128x128xbf16, #tpu.memory_space<vmem>>, vector<1x128x128xbf16>
    %259 = vector.shape_cast %258 : vector<1x128x128xbf16> to vector<128x128xbf16>
    %cst_293 = arith.constant dense<0.000000e+00> : vector<32x128xf32>
    %260 = tpu.matmul %257, %259, %cst_293 {dimension_numbers = #tpu.dot_dimension_numbers<[1], [0], [0], [1], [0, 0, 1, 1], [], []>} : vector<32x128xbf16>, vector<128x128xbf16>, vector<32x128xf32> -> vector<32x128xf32>
    %261 = arith.addf %254, %260 : vector<32x128xf32>
    %c0_294 = arith.constant 0 : index
    %c1_295 = arith.constant 1 : index
    %c1_296 = arith.constant 1 : index
    %c0_297 = arith.constant 0 : index
    %262 = tpu.strided_load %arg18[%c0_294, %c1_295, %c1_296, %c0_297] {strides = array<i32: 1, 2, 2, 1>} : memref<2x6x18x128xf32, #tpu.memory_space<vmem>>, vector<2x2x8x128xf32>
    %263 = vector.shape_cast %262 : vector<2x2x8x128xf32> to vector<32x128xf32>
    %264 = arith.truncf %263 : vector<32x128xf32> to vector<32x128xbf16>
    %c4_298 = arith.constant 4 : index
    %c0_299 = arith.constant 0 : index
    %c0_300 = arith.constant 0 : index
    %265 = vector.load %arg8[%c4_298, %c0_299, %c0_300] : memref<9x128x128xbf16, #tpu.memory_space<vmem>>, vector<1x128x128xbf16>
    %266 = vector.shape_cast %265 : vector<1x128x128xbf16> to vector<128x128xbf16>
    %cst_301 = arith.constant dense<0.000000e+00> : vector<32x128xf32>
    %267 = tpu.matmul %264, %266, %cst_301 {dimension_numbers = #tpu.dot_dimension_numbers<[1], [0], [0], [1], [0, 0, 1, 1], [], []>} : vector<32x128xbf16>, vector<128x128xbf16>, vector<32x128xf32> -> vector<32x128xf32>
    %268 = arith.addf %261, %267 : vector<32x128xf32>
    %c0_302 = arith.constant 0 : index
    %c1_303 = arith.constant 1 : index
    %c2_304 = arith.constant 2 : index
    %c0_305 = arith.constant 0 : index
    %269 = tpu.strided_load %arg18[%c0_302, %c1_303, %c2_304, %c0_305] {strides = array<i32: 1, 2, 2, 1>} : memref<2x6x18x128xf32, #tpu.memory_space<vmem>>, vector<2x2x8x128xf32>
    %270 = vector.shape_cast %269 : vector<2x2x8x128xf32> to vector<32x128xf32>
    %271 = arith.truncf %270 : vector<32x128xf32> to vector<32x128xbf16>
    %c5_306 = arith.constant 5 : index
    %c0_307 = arith.constant 0 : index
    %c0_308 = arith.constant 0 : index
    %272 = vector.load %arg8[%c5_306, %c0_307, %c0_308] : memref<9x128x128xbf16, #tpu.memory_space<vmem>>, vector<1x128x128xbf16>
    %273 = vector.shape_cast %272 : vector<1x128x128xbf16> to vector<128x128xbf16>
    %cst_309 = arith.constant dense<0.000000e+00> : vector<32x128xf32>
    %274 = tpu.matmul %271, %273, %cst_309 {dimension_numbers = #tpu.dot_dimension_numbers<[1], [0], [0], [1], [0, 0, 1, 1], [], []>} : vector<32x128xbf16>, vector<128x128xbf16>, vector<32x128xf32> -> vector<32x128xf32>
    %275 = arith.addf %268, %274 : vector<32x128xf32>
    %c0_310 = arith.constant 0 : index
    %c2_311 = arith.constant 2 : index
    %c0_312 = arith.constant 0 : index
    %c0_313 = arith.constant 0 : index
    %276 = tpu.strided_load %arg18[%c0_310, %c2_311, %c0_312, %c0_313] {strides = array<i32: 1, 2, 2, 1>} : memref<2x6x18x128xf32, #tpu.memory_space<vmem>>, vector<2x2x8x128xf32>
    %277 = vector.shape_cast %276 : vector<2x2x8x128xf32> to vector<32x128xf32>
    %278 = arith.truncf %277 : vector<32x128xf32> to vector<32x128xbf16>
    %c6_314 = arith.constant 6 : index
    %c0_315 = arith.constant 0 : index
    %c0_316 = arith.constant 0 : index
    %279 = vector.load %arg8[%c6_314, %c0_315, %c0_316] : memref<9x128x128xbf16, #tpu.memory_space<vmem>>, vector<1x128x128xbf16>
    %280 = vector.shape_cast %279 : vector<1x128x128xbf16> to vector<128x128xbf16>
    %cst_317 = arith.constant dense<0.000000e+00> : vector<32x128xf32>
    %281 = tpu.matmul %278, %280, %cst_317 {dimension_numbers = #tpu.dot_dimension_numbers<[1], [0], [0], [1], [0, 0, 1, 1], [], []>} : vector<32x128xbf16>, vector<128x128xbf16>, vector<32x128xf32> -> vector<32x128xf32>
    %282 = arith.addf %275, %281 : vector<32x128xf32>
    %c0_318 = arith.constant 0 : index
    %c2_319 = arith.constant 2 : index
    %c1_320 = arith.constant 1 : index
    %c0_321 = arith.constant 0 : index
    %283 = tpu.strided_load %arg18[%c0_318, %c2_319, %c1_320, %c0_321] {strides = array<i32: 1, 2, 2, 1>} : memref<2x6x18x128xf32, #tpu.memory_space<vmem>>, vector<2x2x8x128xf32>
    %284 = vector.shape_cast %283 : vector<2x2x8x128xf32> to vector<32x128xf32>
    %285 = arith.truncf %284 : vector<32x128xf32> to vector<32x128xbf16>
    %c7_322 = arith.constant 7 : index
    %c0_323 = arith.constant 0 : index
    %c0_324 = arith.constant 0 : index
    %286 = vector.load %arg8[%c7_322, %c0_323, %c0_324] : memref<9x128x128xbf16, #tpu.memory_space<vmem>>, vector<1x128x128xbf16>
    %287 = vector.shape_cast %286 : vector<1x128x128xbf16> to vector<128x128xbf16>
    %cst_325 = arith.constant dense<0.000000e+00> : vector<32x128xf32>
    %288 = tpu.matmul %285, %287, %cst_325 {dimension_numbers = #tpu.dot_dimension_numbers<[1], [0], [0], [1], [0, 0, 1, 1], [], []>} : vector<32x128xbf16>, vector<128x128xbf16>, vector<32x128xf32> -> vector<32x128xf32>
    %289 = arith.addf %282, %288 : vector<32x128xf32>
    %c0_326 = arith.constant 0 : index
    %c2_327 = arith.constant 2 : index
    %c2_328 = arith.constant 2 : index
    %c0_329 = arith.constant 0 : index
    %290 = tpu.strided_load %arg18[%c0_326, %c2_327, %c2_328, %c0_329] {strides = array<i32: 1, 2, 2, 1>} : memref<2x6x18x128xf32, #tpu.memory_space<vmem>>, vector<2x2x8x128xf32>
    %291 = vector.shape_cast %290 : vector<2x2x8x128xf32> to vector<32x128xf32>
    %292 = arith.truncf %291 : vector<32x128xf32> to vector<32x128xbf16>
    %c8_330 = arith.constant 8 : index
    %c0_331 = arith.constant 0 : index
    %c0_332 = arith.constant 0 : index
    %293 = vector.load %arg8[%c8_330, %c0_331, %c0_332] : memref<9x128x128xbf16, #tpu.memory_space<vmem>>, vector<1x128x128xbf16>
    %294 = vector.shape_cast %293 : vector<1x128x128xbf16> to vector<128x128xbf16>
    %cst_333 = arith.constant dense<0.000000e+00> : vector<32x128xf32>
    %295 = tpu.matmul %292, %294, %cst_333 {dimension_numbers = #tpu.dot_dimension_numbers<[1], [0], [0], [1], [0, 0, 1, 1], [], []>} : vector<32x128xbf16>, vector<128x128xbf16>, vector<32x128xf32> -> vector<32x128xf32>
    %296 = arith.addf %289, %295 : vector<32x128xf32>
    %c0_334 = arith.constant 0 : index
    %c0_335 = arith.constant 0 : index
    %297 = vector.load %arg9[%c0_334, %c0_335] : memref<1x128xf32, #tpu.memory_space<vmem>>, vector<1x128xf32>
    %298 = vector.broadcast %297 : vector<1x128xf32> to vector<32x128xf32>
    %299 = arith.addf %296, %298 : vector<32x128xf32>
    %cst_336 = arith.constant 0.000000e+00 : f32
    %300 = vector.broadcast %cst_336 : f32 to vector<32x128xf32>
    %301 = arith.cmpf oge, %299, %300 : vector<32x128xf32>
    %cst_337 = arith.constant 0.00999999977 : f32
    %302 = vector.broadcast %cst_337 : f32 to vector<32x128xf32>
    %303 = arith.mulf %302, %299 : vector<32x128xf32>
    %304 = arith.select %301, %299, %303 : vector<32x128xi1>, vector<32x128xf32>
    %305 = vector.shape_cast %304 : vector<32x128xf32> to vector<2x2x8x128xf32>
    %c0_338 = arith.constant 0 : index
    %c0_339 = arith.constant 0 : index
    %c0_340 = arith.constant 0 : index
    %c0_341 = arith.constant 0 : index
    %306 = vector.load %arg19[%c0_338, %c0_339, %c0_340, %c0_341] : memref<2x2x8x128xf32, #tpu.memory_space<vmem>>, vector<2x2x8x128xf32>
    tpu.vector_store %arg19[%c0_338, %c0_339, %c0_340, %c0_341], %305 {strides = array<i32>} : memref<2x2x8x128xf32, #tpu.memory_space<vmem>>, vector<2x2x8x128xf32>,
    %cst_342 = arith.constant 0.000000e+00 : f32
    %307 = vector.broadcast %cst_342 : f32 to vector<2x256xf32>
    %c0_343 = arith.constant 0 : index
    %c0_344 = arith.constant 0 : index
    %c0_345 = arith.constant 0 : index
    %c0_346 = arith.constant 0 : index
    %308 = vector.load %arg19[%c0_343, %c0_344, %c0_345, %c0_346] : memref<2x2x8x128xf32, #tpu.memory_space<vmem>>, vector<2x1x1x128xf32>
    %309 = vector.shape_cast %308 : vector<2x1x1x128xf32> to vector<2x128xf32>
    %310 = arith.truncf %309 : vector<2x128xf32> to vector<2x128xbf16>
    %c0_347 = arith.constant 0 : index
    %c0_348 = arith.constant 0 : index
    %c0_349 = arith.constant 0 : index
    %311 = vector.load %arg10[%c0_347, %c0_348, %c0_349] : memref<4x128x256xbf16, #tpu.memory_space<vmem>>, vector<1x128x256xbf16>
    %312 = vector.shape_cast %311 : vector<1x128x256xbf16> to vector<128x256xbf16>
    %cst_350 = arith.constant dense<0.000000e+00> : vector<2x256xf32>
    %313 = tpu.matmul %310, %312, %cst_350 {dimension_numbers = #tpu.dot_dimension_numbers<[1], [0], [0], [1], [0, 0, 1, 1], [], []>} : vector<2x128xbf16>, vector<128x256xbf16>, vector<2x256xf32> -> vector<2x256xf32>
    %314 = arith.addf %307, %313 : vector<2x256xf32>
    %c0_351 = arith.constant 0 : index
    %c0_352 = arith.constant 0 : index
    %c1_353 = arith.constant 1 : index
    %c0_354 = arith.constant 0 : index
    %315 = vector.load %arg19[%c0_351, %c0_352, %c1_353, %c0_354] : memref<2x2x8x128xf32, #tpu.memory_space<vmem>>, vector<2x1x1x128xf32>
    %316 = vector.shape_cast %315 : vector<2x1x1x128xf32> to vector<2x128xf32>
    %317 = arith.truncf %316 : vector<2x128xf32> to vector<2x128xbf16>
    %c1_355 = arith.constant 1 : index
    %c0_356 = arith.constant 0 : index
    %c0_357 = arith.constant 0 : index
    %318 = vector.load %arg10[%c1_355, %c0_356, %c0_357] : memref<4x128x256xbf16, #tpu.memory_space<vmem>>, vector<1x128x256xbf16>
    %319 = vector.shape_cast %318 : vector<1x128x256xbf16> to vector<128x256xbf16>
    %cst_358 = arith.constant dense<0.000000e+00> : vector<2x256xf32>
    %320 = tpu.matmul %317, %319, %cst_358 {dimension_numbers = #tpu.dot_dimension_numbers<[1], [0], [0], [1], [0, 0, 1, 1], [], []>} : vector<2x128xbf16>, vector<128x256xbf16>, vector<2x256xf32> -> vector<2x256xf32>
    %321 = arith.addf %314, %320 : vector<2x256xf32>
    %c0_359 = arith.constant 0 : index
    %c1_360 = arith.constant 1 : index
    %c0_361 = arith.constant 0 : index
    %c0_362 = arith.constant 0 : index
    %322 = vector.load %arg19[%c0_359, %c1_360, %c0_361, %c0_362] : memref<2x2x8x128xf32, #tpu.memory_space<vmem>>, vector<2x1x1x128xf32>
    %323 = vector.shape_cast %322 : vector<2x1x1x128xf32> to vector<2x128xf32>
    %324 = arith.truncf %323 : vector<2x128xf32> to vector<2x128xbf16>
    %c2_363 = arith.constant 2 : index
    %c0_364 = arith.constant 0 : index
    %c0_365 = arith.constant 0 : index
    %325 = vector.load %arg10[%c2_363, %c0_364, %c0_365] : memref<4x128x256xbf16, #tpu.memory_space<vmem>>, vector<1x128x256xbf16>
    %326 = vector.shape_cast %325 : vector<1x128x256xbf16> to vector<128x256xbf16>
    %cst_366 = arith.constant dense<0.000000e+00> : vector<2x256xf32>
    %327 = tpu.matmul %324, %326, %cst_366 {dimension_numbers = #tpu.dot_dimension_numbers<[1], [0], [0], [1], [0, 0, 1, 1], [], []>} : vector<2x128xbf16>, vector<128x256xbf16>, vector<2x256xf32> -> vector<2x256xf32>
    %328 = arith.addf %321, %327 : vector<2x256xf32>
    %c0_367 = arith.constant 0 : index
    %c1_368 = arith.constant 1 : index
    %c1_369 = arith.constant 1 : index
    %c0_370 = arith.constant 0 : index
    %329 = vector.load %arg19[%c0_367, %c1_368, %c1_369, %c0_370] : memref<2x2x8x128xf32, #tpu.memory_space<vmem>>, vector<2x1x1x128xf32>
    %330 = vector.shape_cast %329 : vector<2x1x1x128xf32> to vector<2x128xf32>
    %331 = arith.truncf %330 : vector<2x128xf32> to vector<2x128xbf16>
    %c3_371 = arith.constant 3 : index
    %c0_372 = arith.constant 0 : index
    %c0_373 = arith.constant 0 : index
    %332 = vector.load %arg10[%c3_371, %c0_372, %c0_373] : memref<4x128x256xbf16, #tpu.memory_space<vmem>>, vector<1x128x256xbf16>
    %333 = vector.shape_cast %332 : vector<1x128x256xbf16> to vector<128x256xbf16>
    %cst_374 = arith.constant dense<0.000000e+00> : vector<2x256xf32>
    %334 = tpu.matmul %331, %333, %cst_374 {dimension_numbers = #tpu.dot_dimension_numbers<[1], [0], [0], [1], [0, 0, 1, 1], [], []>} : vector<2x128xbf16>, vector<128x256xbf16>, vector<2x256xf32> -> vector<2x256xf32>
    %335 = arith.addf %328, %334 : vector<2x256xf32>
    %c0_375 = arith.constant 0 : index
    %c0_376 = arith.constant 0 : index
    %336 = vector.load %arg11[%c0_375, %c0_376] : memref<1x256xf32, #tpu.memory_space<vmem>>, vector<1x256xf32>
    %337 = vector.broadcast %336 : vector<1x256xf32> to vector<2x256xf32>
    %338 = arith.addf %335, %337 : vector<2x256xf32>
    %cst_377 = arith.constant 0.000000e+00 : f32
    %339 = vector.broadcast %cst_377 : f32 to vector<2x256xf32>
    %340 = arith.maximumf %338, %339 : vector<2x256xf32>
    %341 = arith.truncf %340 : vector<2x256xf32> to vector<2x256xbf16>
    %c0_378 = arith.constant 0 : index
    %c0_379 = arith.constant 0 : index
    %342 = vector.load %arg12[%c0_378, %c0_379] : memref<256x4xbf16, #tpu.memory_space<vmem>>, vector<256x4xbf16>
    %cst_380 = arith.constant dense<0.000000e+00> : vector<2x4xf32>
    %343 = tpu.matmul %341, %342, %cst_380 {dimension_numbers = #tpu.dot_dimension_numbers<[1], [0], [0], [1], [0, 0, 1, 1], [], []>} : vector<2x256xbf16>, vector<256x4xbf16>, vector<2x4xf32> -> vector<2x4xf32>
    %c0_381 = arith.constant 0 : index
    %c0_382 = arith.constant 0 : index
    %344 = vector.load %arg13[%c0_381, %c0_382] : memref<1x4xf32, #tpu.memory_space<vmem>>, vector<1x4xf32>
    %345 = vector.broadcast %344 : vector<1x4xf32> to vector<2x4xf32>
    %346 = arith.addf %343, %345 : vector<2x4xf32>
    %c0_383 = arith.constant 0 : index
    %c0_384 = arith.constant 0 : index
    %347 = vector.load %arg14[%c0_383, %c0_384] : memref<2x4xf32, #tpu.memory_space<vmem>>, vector<2x4xf32>
    tpu.vector_store %arg14[%c0_383, %c0_384], %346 {strides = array<i32>} : memref<2x4xf32, #tpu.memory_space<vmem>>, vector<2x4xf32>,
    return
  }
  func.func @transform_0(%arg0: i32) -> (i32, i32, i32, i32) {
    %c0_i32 = arith.constant 0 : i32
    %c0_i32_0 = arith.constant 0 : i32
    %c0_i32_1 = arith.constant 0 : i32
    %c0_i32_2 = arith.constant 0 : i32
    return %arg0, %c0_i32, %c0_i32_0, %c0_i32_1 : i32, i32, i32, i32
  }
  func.func @transform_1(%arg0: i32) -> (i32, i32, i32) {
    %c0_i32 = arith.constant 0 : i32
    %c0_i32_0 = arith.constant 0 : i32
    %c0_i32_1 = arith.constant 0 : i32
    %c0_i32_2 = arith.constant 0 : i32
    return %c0_i32, %c0_i32_0, %c0_i32_1 : i32, i32, i32
  }
  func.func @transform_2(%arg0: i32) -> (i32, i32) {
    %c0_i32 = arith.constant 0 : i32
    %c0_i32_0 = arith.constant 0 : i32
    %c0_i32_1 = arith.constant 0 : i32
    return %c0_i32, %c0_i32_0 : i32, i32
  }
  func.func @transform_3(%arg0: i32) -> (i32, i32, i32) {
    %c0_i32 = arith.constant 0 : i32
    %c0_i32_0 = arith.constant 0 : i32
    %c0_i32_1 = arith.constant 0 : i32
    %c0_i32_2 = arith.constant 0 : i32
    return %c0_i32, %c0_i32_0, %c0_i32_1 : i32, i32, i32
  }
  func.func @transform_4(%arg0: i32) -> (i32, i32) {
    %c0_i32 = arith.constant 0 : i32
    %c0_i32_0 = arith.constant 0 : i32
    %c0_i32_1 = arith.constant 0 : i32
    return %c0_i32, %c0_i32_0 : i32, i32
  }
  func.func @transform_5(%arg0: i32) -> (i32, i32, i32) {
    %c0_i32 = arith.constant 0 : i32
    %c0_i32_0 = arith.constant 0 : i32
    %c0_i32_1 = arith.constant 0 : i32
    %c0_i32_2 = arith.constant 0 : i32
    return %c0_i32, %c0_i32_0, %c0_i32_1 : i32, i32, i32
  }
  func.func @transform_6(%arg0: i32) -> (i32, i32) {
    %c0_i32 = arith.constant 0 : i32
    %c0_i32_0 = arith.constant 0 : i32
    %c0_i32_1 = arith.constant 0 : i32
    return %c0_i32, %c0_i32_0 : i32, i32
  }
  func.func @transform_7(%arg0: i32) -> (i32, i32, i32) {
    %c0_i32 = arith.constant 0 : i32
    %c0_i32_0 = arith.constant 0 : i32
    %c0_i32_1 = arith.constant 0 : i32
    %c0_i32_2 = arith.constant 0 : i32
    return %c0_i32, %c0_i32_0, %c0_i32_1 : i32, i32, i32
  }
  func.func @transform_8(%arg0: i32) -> (i32, i32) {
    %c0_i32 = arith.constant 0 : i32
    %c0_i32_0 = arith.constant 0 : i32
    %c0_i32_1 = arith.constant 0 : i32
    return %c0_i32, %c0_i32_0 : i32, i32
  }
  func.func @transform_9(%arg0: i32) -> (i32, i32, i32) {
    %c0_i32 = arith.constant 0 : i32
    %c0_i32_0 = arith.constant 0 : i32
    %c0_i32_1 = arith.constant 0 : i32
    %c0_i32_2 = arith.constant 0 : i32
    return %c0_i32, %c0_i32_0, %c0_i32_1 : i32, i32, i32
  }
  func.func @transform_10(%arg0: i32) -> (i32, i32) {
    %c0_i32 = arith.constant 0 : i32
    %c0_i32_0 = arith.constant 0 : i32
    %c0_i32_1 = arith.constant 0 : i32
    return %c0_i32, %c0_i32_0 : i32, i32
  }
  func.func @transform_11(%arg0: i32) -> (i32, i32) {
    %c0_i32 = arith.constant 0 : i32
    %c0_i32_0 = arith.constant 0 : i32
    %c0_i32_1 = arith.constant 0 : i32
    return %c0_i32, %c0_i32_0 : i32, i32
  }
  func.func @transform_12(%arg0: i32) -> (i32, i32) {
    %c0_i32 = arith.constant 0 : i32
    %c0_i32_0 = arith.constant 0 : i32
    %c0_i32_1 = arith.constant 0 : i32
    return %c0_i32, %c0_i32_0 : i32, i32
  }
  func.func @transform_13(%arg0: i32) -> (i32, i32) {
    %c0_i32 = arith.constant 0 : i32
    %c0_i32_0 = arith.constant 0 : i32
    return %arg0, %c0_i32 : i32, i32
  }
}

</mosaic_0001>

<bundles_post_ra>
// kernel: middle_action_network_forward.1
= control target key start
LH: loop header
LB: loop body
LE: loop exit
PB: predicated region body
PF: predicated region fallthrough
CT: control target
= control target key end

     0   :  { %18 = vsyncpa [#allocation8], 0  ;;  %s13759_s0 = inlined_call_operand.vmem [shape: f32[2,16,16,4], index: 0, kind: input, shape index: {}]   ;;  %s13760_s1 = inlined_call_operand.vmem [shape: bf16[9,4,64], index: 1, kind: input, shape index: {}]   ;;  %s13761_s2 = inlined_call_operand.vmem [shape: f32[1,64], index: 2, kind: input, shape index: {}]   ;;  %s13762_s3 = inlined_call_operand.hbm [shape: bf16[9,64,128], index: 3, kind: input, shape index: {}]   ;;  %s13763_s4 = inlined_call_operand.vmem [shape: f32[1,128], index: 4, kind: input, shape index: {}]   ;;  %s13764_s5 = inlined_call_operand.vmem [shape: bf16[9,128,128], index: 5, kind: input, shape index: {}]   ;;  %s13765_s6 = inlined_call_operand.vmem [shape: f32[1,128], index: 6, kind: input, shape index: {}]   ;;  %s13766_s7 = inlined_call_operand.hbm [shape: bf16[9,128,128], index: 7, kind: input, shape index: {}]   ;;  %s13767_s8 = inlined_call_operand.vmem [shape: f32[1,128], index: 8, kind: input, shape index: {}]   ;;  %s13768_s9 = inlined_call_operand.hbm [shape: bf16[4,128,256], index: 9, kind: input, shape index: {}]   ;;  %s13769_s10 = inlined_call_operand.vmem [shape: f32[1,256], index: 10, kind: input, shape index: {}]   ;;  %s13770_s11 = inlined_call_operand.vmem [shape: bf16[256,4], index: 11, kind: input, shape index: {}]   ;;  %s13771_s12 = inlined_call_operand.vmem [shape: f32[1,4], index: 12, kind: input, shape index: {}]   ;;  %s13772_s13 = inlined_call_operand.hbm [shape: f32[2,4], index: 13, kind: output, shape index: {}]  }
   0x1   :  { %19 = vsyncpa [#allocation11], 0 }
   0x2   :  { %20 = vsyncpa [#allocation9], 0  ;;  %s50_s27 = sshll.u32 %s13766_s7, 4  ;;  %s10943_s28 = smov [#allocation10]   ;;  %s51_s27 = int_to_ptr.hbm [resolvable:$true] %s50_s27 }
   0x3   :  { %s52_s29 = sshll.u32 %s10943_s28, 4  ;;  %s31_s15 = sshll.u32 %s13762_s3, 4  ;;  %s53_s29 = int_to_ptr.vmem [resolvable:$true] %s52_s29  ;;  %s32_s15 = int_to_ptr.hbm [resolvable:$true] %s31_s15 }
   0x4   :  { %s10944_s16 = smov 64   ;;  %s10945_s17 = smov 4  }
   0x5   :  { %58 = dma.hbm_to_vmem [thread:$0]  %s51_s27, 9216, %s53_s29, [#allocation11], %s10944_s16, %s10944_s16, %s10945_s17  }
   0x6   :  { %s10946_s18 = smov [#allocation7]   ;;  %s65_s22 = sshll.u32 %s13768_s9, 4  ;;  %s66_s22 = int_to_ptr.hbm [resolvable:$true] %s65_s22 }
   0x7   :  { %s33_s19 = sshll.u32 %s10946_s18, 4  ;;  %s10947_s7 = smov [#allocation12]   ;;  %s34_s19 = int_to_ptr.vmem [resolvable:$true] %s33_s19 }
   0x8   :  { %39 = dma.hbm_to_vmem [thread:$0]  %s32_s15, 4608, %s34_s19, [#allocation8], %s10944_s16, %s10944_s16, %s10945_s17  }
   0x9   :  { %s67_s23 = sshll.u32 %s10947_s7, 4  ;;  %s10948_s24 = smov 128   ;;  %s68_s23 = int_to_ptr.vmem [resolvable:$true] %s67_s23 }
   0xa   :  { %s10949_s25 = smov 8  }
   0xb   :  { %73 = dma.hbm_to_vmem [thread:$0]  %s66_s22, 8192, %s68_s23, [#allocation11], %s10948_s24, %s10948_s24, %s10949_s25  }
   0xc   :  { %10937 = dma.done.wait [#allocation8], 4608  }
   0xd   :  { %10938 = vsyncadd [#allocation8], 4294962688 }
   0xe   :  { %10939 = dma.done.wait [#allocation11], 17408  }
   0xf   :  { %10940 = vsyncadd [#allocation11], 4294949888  ;;  %vm4335_vm0 = vcmask 523264   ;;  %vm4338_vm1 = vcmask 517120   ;;  %vm623_vm2 = vcmask 1041408   ;;  %v10950_v2 = vmov 0.0  }
  0x10   :  { %v9029_v0 = vld [vmem:[%s13760_s1 + $0x2] sm:$0x3]  ;;  %4336 = vst.msk [vmem:[#allocation3] sm:$0xff] %vm4335_vm0, %v10950_v2  ;;  %vm93_vm3 = vcmask 31744   ;;  %vm96_vm4 = vcmask 25600   ;;  %v264_v18 = vld [vmem:[%s13759_s0 + $0x1e8] sm:$0xff] }
  0x11   :  { %v625_v1 = vsel %vm623_vm2, %v9029_v0, 0  ;;  %4337 = vst.msk [vmem:[#allocation3 + $0x8] sm:$0xff] %vm4335_vm0, %v10950_v2  ;;  %v9160_v6 = vld [vmem:[%s13760_s1 + $0x8] sm:$0x3]  ;;  %v9094_v8 = vld [vmem:[%s13760_s1 + $0x4] sm:$0x3] }
  0x12   :  { %634 = vmatpush.bf16.msra.mxu0 %v625_v1  ;;  %10825 = vmatpush.bf16.msra.mxu1 %v625_v1  ;;  %4339 = vst.msk [vmem:[#allocation3 + $0x10] sm:$0x3] %vm4338_vm1, %v10950_v2  ;;  %v2119_v7 = vsel %vm623_vm2, %v9160_v6, 0  ;;  %v1259_v9 = vsel %vm623_vm2, %v9094_v8, 0  ;;  %v9127_v10 = vld [vmem:[%s13760_s1 + $0x6] sm:$0x3] }
  0x13   :  { %4340 = vst.msk [vmem:[#allocation3 + $0x18] sm:$0xff] %vm4335_vm0, %v10950_v2  ;;  %1268 = vmatpush.bf16.msra.mxu2 %v1259_v9  ;;  %v1689_v13 = vsel %vm623_vm2, %v9127_v10, 0  ;;  %v428_v15 = vld [vmem:[%s13760_s1] sm:$0x3]  ;;  %v204_v20 = vld [vmem:[%s13759_s0 + $0x8] sm:$0xff]  ;;  %v205_v21 = vld [vmem:[%s13759_s0 + $0x10] sm:$0xff] }
  0x14   :  { %4341 = vst.msk [vmem:[#allocation3 + $0x20] sm:$0xff] %vm4335_vm0, %v10950_v2  ;;  %1698 = vmatpush.bf16.msra.mxu3 %v1689_v13  ;;  %v893_v16 = vsel %vm623_vm2, %v428_v15, 0  ;;  %v263_v17 = vld [vmem:[%s13759_s0 + $0x1e0] sm:$0xff]  ;;  %v206_v22 = vld [vmem:[%s13759_s0 + $0x18] sm:$0xff]  ;;  %v208_v36 = vld [vmem:[%s13759_s0 + $0x28] sm:$0xff]  ;;  %s10951_s25 = smov [#allocation13]  }
  0x15   :  { %4342 = vst.msk [vmem:[#allocation3 + $0x28] sm:$0x3] %vm4338_vm1, %v10950_v2  ;;  %v203_v19 = vld [vmem:[%s13759_s0] sm:$0xff]  ;;  %v209_v49 = vld [vmem:[%s13759_s0 + $0x30] sm:$0xff]  ;;  %v210_v50 = vld [vmem:[%s13759_s0 + $0x38] sm:$0xff]  ;;  %s8854_s3 = sshll.u32 %s10951_s25, 4  ;;  %s8855_s3 = int_to_ptr.vmem [resolvable:$true] %s8854_s3 }
  0x16   :  { %4343 = vst.msk [vmem:[#allocation3 + $0x30] sm:$0xff] %vm4335_vm0, %v10950_v2  ;;  %2128 = vmatpush.bf16.msrb.mxu0 %v2119_v7  ;;  %902 = vmatpush.bf16.msrb.mxu1 %v893_v16  ;;  %v207_v35 = vld [vmem:[%s13759_s0 + $0x20] sm:$0xff]  ;;  %v212_v61 = vld [vmem:[%s13759_s0 + $0x48] sm:$0xff]  ;;  %v213_v7 = vld [vmem:[%s13759_s0 + $0x50] sm:$0xff]  ;;  %s8856_s9 = sshll.u32 %s13772_s13, 4  ;;  %s8857_s9 = int_to_ptr.hbm [resolvable:$true] %s8856_s9 }
  0x17   :  { %4344 = vst.msk [vmem:[#allocation3 + $0x38] sm:$0xff] %vm4335_vm0, %v10950_v2  ;;  %v211_v60 = vld [vmem:[%s13759_s0 + $0x40] sm:$0xff]  ;;  %v214_v8 = vld [vmem:[%s13759_s0 + $0x58] sm:$0xff] }
  0x18   :  { %4345 = vst.msk [vmem:[#allocation3 + $0x40] sm:$0x3] %vm4338_vm1, %v10950_v2 }
  0x19   :  { %4346 = vst.msk [vmem:[#allocation3 + $0x48] sm:$0xff] %vm4335_vm0, %v10950_v2 }
  0x1a   :  { %4347 = vst.msk [vmem:[#allocation3 + $0x50] sm:$0xff] %vm4335_vm0, %v10950_v2 }
  0x1b   :  { %4348 = vst.msk [vmem:[#allocation3 + $0x58] sm:$0x3] %vm4338_vm1, %v10950_v2 }
  0x1c   :  { %4349 = vst.msk [vmem:[#allocation3 + $0x60] sm:$0xff] %vm4335_vm0, %v10950_v2 }
  0x1d   :  { %4350 = vst.msk [vmem:[#allocation3 + $0x68] sm:$0xff] %vm4335_vm0, %v10950_v2 }
  0x1e   :  { %4351 = vst.msk [vmem:[#allocation3 + $0x70] sm:$0x3] %vm4338_vm1, %v10950_v2 }
  0x1f   :  { %4352 = vst.msk [vmem:[#allocation3 + $0x78] sm:$0xff] %vm4335_vm0, %v10950_v2 }
  0x20   :  { %4353 = vst.msk [vmem:[#allocation3 + $0x80] sm:$0xff] %vm4335_vm0, %v10950_v2 }
  0x21   :  { %4354 = vst.msk [vmem:[#allocation3 + $0x88] sm:$0x3] %vm4338_vm1, %v10950_v2 }
  0x22   :  { %4355 = vst.msk [vmem:[#allocation3 + $0x90] sm:$0xff] %vm4335_vm0, %v10950_v2 }
  0x23   :  { %4356 = vst.msk [vmem:[#allocation3 + $0x98] sm:$0xff] %vm4335_vm0, %v10950_v2 }
  0x24   :  { %4357 = vst.msk [vmem:[#allocation3 + $0xa0] sm:$0x3] %vm4338_vm1, %v10950_v2 }
  0x25   :  { %4358 = vst.msk [vmem:[#allocation3 + $0xa8] sm:$0xff] %vm4335_vm0, %v10950_v2 }
  0x26   :  { %4359 = vst.msk [vmem:[#allocation3 + $0xb0] sm:$0xff] %vm4335_vm0, %v10950_v2 }
  0x27   :  { %4360 = vst.msk [vmem:[#allocation3 + $0xb8] sm:$0x3] %vm4338_vm1, %v10950_v2 }
  0x28   :  { %4361 = vst.msk [vmem:[#allocation3 + $0xc0] sm:$0xff] %vm4335_vm0, %v10950_v2 }
  0x29   :  { %4362 = vst.msk [vmem:[#allocation3 + $0xc8] sm:$0xff] %vm4335_vm0, %v10950_v2 }
  0x2a   :  { %4363 = vst.msk [vmem:[#allocation3 + $0xd0] sm:$0x3] %vm4338_vm1, %v10950_v2 }
  0x2b   :  { %4364 = vst.msk [vmem:[#allocation3 + $0xd8] sm:$0xff] %vm4335_vm0, %v10950_v2 }
  0x2c   :  { %4365 = vst.msk [vmem:[#allocation3 + $0xe0] sm:$0xff] %vm4335_vm0, %v10950_v2 }
  0x2d   :  { %4366 = vst.msk [vmem:[#allocation3 + $0xe8] sm:$0x3] %vm4338_vm1, %v10950_v2 }
  0x2e   :  { %4367 = vst.msk [vmem:[#allocation3 + $0xf0] sm:$0xff] %vm4335_vm0, %v10950_v2 }
  0x2f   :  { %4368 = vst.msk [vmem:[#allocation3 + $0xf8] sm:$0xff] %vm4335_vm0, %v10950_v2 }
  0x30   :  { %4369 = vst.msk [vmem:[#allocation3 + $0x100] sm:$0x3] %vm4338_vm1, %v10950_v2 }
  0x31   :  { %4370 = vst.msk [vmem:[#allocation3 + $0x108] sm:$0xff] %vm4335_vm0, %v10950_v2 }
  0x32   :  { %4371 = vst.msk [vmem:[#allocation3 + $0x110] sm:$0xff] %vm4335_vm0, %v10950_v2 }
  0x33   :  { %4372 = vst.msk [vmem:[#allocation3 + $0x118] sm:$0x3] %vm4338_vm1, %v10950_v2 }
  0x34   :  { %4373 = vst.msk [vmem:[#allocation3 + $0x120] sm:$0xff] %vm4335_vm0, %v10950_v2 }
  0x35   :  { %4374 = vst.msk [vmem:[#allocation3 + $0x128] sm:$0xff] %vm4335_vm0, %v10950_v2 }
  0x36   :  { %4375 = vst.msk [vmem:[#allocation3 + $0x130] sm:$0x3] %vm4338_vm1, %v10950_v2 }
  0x37   :  { %4376 = vst.msk [vmem:[#allocation3 + $0x138] sm:$0xff] %vm4335_vm0, %v10950_v2 }
  0x38   :  { %4377 = vst.msk [vmem:[#allocation3 + $0x140] sm:$0xff] %vm4335_vm0, %v10950_v2 }
  0x39   :  { %4378 = vst.msk [vmem:[#allocation3 + $0x148] sm:$0x3] %vm4338_vm1, %v10950_v2 }
  0x3a   :  { %4379 = vst.msk [vmem:[#allocation3 + $0x150] sm:$0xff] %vm4335_vm0, %v10950_v2 }
  0x3b   :  { %4380 = vst.msk [vmem:[#allocation3 + $0x158] sm:$0xff] %vm4335_vm0, %v10950_v2 }
  0x3c   :  { %4381 = vst.msk [vmem:[#allocation3 + $0x160] sm:$0x3] %vm4338_vm1, %v10950_v2 }
  0x3d   :  { %4382 = vst.msk [vmem:[#allocation3 + $0x168] sm:$0xff] %vm4335_vm0, %v10950_v2 }
  0x3e   :  { %4383 = vst.msk [vmem:[#allocation3 + $0x170] sm:$0xff] %vm4335_vm0, %v10950_v2 }
  0x3f   :  { %4384 = vst.msk [vmem:[#allocation3 + $0x178] sm:$0x3] %vm4338_vm1, %v10950_v2 }
  0x40   :  { %4385 = vst.msk [vmem:[#allocation3 + $0x180] sm:$0xff] %vm4335_vm0, %v10950_v2 }
  0x41   :  { %4386 = vst.msk [vmem:[#allocation3 + $0x188] sm:$0xff] %vm4335_vm0, %v10950_v2 }
  0x42   :  { %4387 = vst.msk [vmem:[#allocation3 + $0x190] sm:$0x3] %vm4338_vm1, %v10950_v2 }
  0x43   :  { %4391 = vst.msk [vmem:[#allocation3 + $0x1b0] sm:$0xff] %vm4335_vm0, %v10950_v2 }
  0x44   :  { %4392 = vst.msk [vmem:[#allocation3 + $0x1b8] sm:$0xff] %vm4335_vm0, %v10950_v2 }
  0x45   :  { %4393 = vst.msk [vmem:[#allocation3 + $0x1c0] sm:$0x3] %vm4338_vm1, %v10950_v2 }
  0x46   :  { %4394 = vst.msk [vmem:[#allocation3 + $0x1c8] sm:$0xff] %vm4335_vm0, %v10950_v2 }
  0x47   :  { %4395 = vst.msk [vmem:[#allocation3 + $0x1d0] sm:$0xff] %vm4335_vm0, %v10950_v2 }
  0x48   :  { %4396 = vst.msk [vmem:[#allocation3 + $0x1d8] sm:$0x3] %vm4338_vm1, %v10950_v2 }
  0x49   :  { %4397 = vst.msk [vmem:[#allocation3 + $0x1e0] sm:$0xff] %vm4335_vm0, %v10950_v2 }
  0x4a   :  { %4398 = vst.msk [vmem:[#allocation3 + $0x1e8] sm:$0xff] %vm4335_vm0, %v10950_v2 }
  0x4b   :  { %4399 = vst.msk [vmem:[#allocation3 + $0x1f0] sm:$0x3] %vm4338_vm1, %v10950_v2 }
  0x4c   :  { %4400 = vst.msk [vmem:[#allocation3 + $0x1f8] sm:$0xff] %vm4335_vm0, %v10950_v2 }
  0x4d   :  { %4401 = vst.msk [vmem:[#allocation3 + $0x200] sm:$0xff] %vm4335_vm0, %v10950_v2 }
  0x4e   :  { %4402 = vst.msk [vmem:[#allocation3 + $0x208] sm:$0x3] %vm4338_vm1, %v10950_v2 }
  0x4f   :  { %4403 = vst.msk [vmem:[#allocation3 + $0x210] sm:$0xff] %vm4335_vm0, %v10950_v2 }
  0x50   :  { %4404 = vst.msk [vmem:[#allocation3 + $0x218] sm:$0xff] %vm4335_vm0, %v10950_v2 }
  0x51   :  { %4405 = vst.msk [vmem:[#allocation3 + $0x220] sm:$0x3] %vm4338_vm1, %v10950_v2 }
  0x52   :  { %4406 = vst.msk [vmem:[#allocation3 + $0x228] sm:$0xff] %vm4335_vm0, %v10950_v2 }
  0x53   :  { %4407 = vst.msk [vmem:[#allocation3 + $0x230] sm:$0xff] %vm4335_vm0, %v10950_v2 }
  0x54   :  { %4408 = vst.msk [vmem:[#allocation3 + $0x238] sm:$0x3] %vm4338_vm1, %v10950_v2 }
  0x55   :  { %4409 = vst.msk [vmem:[#allocation3 + $0x240] sm:$0xff] %vm4335_vm0, %v10950_v2 }
  0x56   :  { %4410 = vst.msk [vmem:[#allocation3 + $0x248] sm:$0xff] %vm4335_vm0, %v10950_v2 }
  0x57   :  { %4411 = vst.msk [vmem:[#allocation3 + $0x250] sm:$0x3] %vm4338_vm1, %v10950_v2 }
  0x58   :  { %4412 = vst.msk [vmem:[#allocation3 + $0x258] sm:$0xff] %vm4335_vm0, %v10950_v2 }
  0x59   :  { %4413 = vst.msk [vmem:[#allocation3 + $0x260] sm:$0xff] %vm4335_vm0, %v10950_v2 }
  0x5a   :  { %4414 = vst.msk [vmem:[#allocation3 + $0x268] sm:$0x3] %vm4338_vm1, %v10950_v2 }
  0x5b   :  { %4415 = vst.msk [vmem:[#allocation3 + $0x270] sm:$0xff] %vm4335_vm0, %v10950_v2 }
  0x5c   :  { %4416 = vst.msk [vmem:[#allocation3 + $0x278] sm:$0xff] %vm4335_vm0, %v10950_v2 }
  0x5d   :  { %4417 = vst.msk [vmem:[#allocation3 + $0x280] sm:$0x3] %vm4338_vm1, %v10950_v2 }
  0x5e   :  { %4418 = vst.msk [vmem:[#allocation3 + $0x288] sm:$0xff] %vm4335_vm0, %v10950_v2 }
  0x5f   :  { %4419 = vst.msk [vmem:[#allocation3 + $0x290] sm:$0xff] %vm4335_vm0, %v10950_v2 }
  0x60   :  { %4420 = vst.msk [vmem:[#allocation3 + $0x298] sm:$0x3] %vm4338_vm1, %v10950_v2 }
  0x61   :  { %4421 = vst.msk [vmem:[#allocation3 + $0x2a0] sm:$0xff] %vm4335_vm0, %v10950_v2 }
  0x62   :  { %4422 = vst.msk [vmem:[#allocation3 + $0x2a8] sm:$0xff] %vm4335_vm0, %v10950_v2 }
  0x63   :  { %4423 = vst.msk [vmem:[#allocation3 + $0x2b0] sm:$0x3] %vm4338_vm1, %v10950_v2 }
  0x64   :  { %4424 = vst.msk [vmem:[#allocation3 + $0x2b8] sm:$0xff] %vm4335_vm0, %v10950_v2 }
  0x65   :  { %4425 = vst.msk [vmem:[#allocation3 + $0x2c0] sm:$0xff] %vm4335_vm0, %v10950_v2 }
  0x66   :  { %4426 = vst.msk [vmem:[#allocation3 + $0x2c8] sm:$0x3] %vm4338_vm1, %v10950_v2 }
  0x67   :  { %4427 = vst.msk [vmem:[#allocation3 + $0x2d0] sm:$0xff] %vm4335_vm0, %v10950_v2 }
  0x68   :  { %4428 = vst.msk [vmem:[#allocation3 + $0x2d8] sm:$0xff] %vm4335_vm0, %v10950_v2 }
  0x69   :  { %4429 = vst.msk [vmem:[#allocation3 + $0x2e0] sm:$0x3] %vm4338_vm1, %v10950_v2 }
  0x6a   :  { %4430 = vst.msk [vmem:[#allocation3 + $0x2e8] sm:$0xff] %vm4335_vm0, %v10950_v2 }
  0x6b   :  { %4431 = vst.msk [vmem:[#allocation3 + $0x2f0] sm:$0xff] %vm4335_vm0, %v10950_v2 }
  0x6c   :  { %4432 = vst.msk [vmem:[#allocation3 + $0x2f8] sm:$0x3] %vm4338_vm1, %v10950_v2 }
  0x6d   :  { %4433 = vst.msk [vmem:[#allocation3 + $0x300] sm:$0xff] %vm4335_vm0, %v10950_v2 }
  0x6e   :  { %4434 = vst.msk [vmem:[#allocation3 + $0x308] sm:$0xff] %vm4335_vm0, %v10950_v2 }
  0x6f   :  { %4435 = vst.msk [vmem:[#allocation3 + $0x310] sm:$0x3] %vm4338_vm1, %v10950_v2 }
  0x70   :  { %4436 = vst.msk [vmem:[#allocation3 + $0x318] sm:$0xff] %vm4335_vm0, %v10950_v2 }
  0x71   :  { %4437 = vst.msk [vmem:[#allocation3 + $0x320] sm:$0xff] %vm4335_vm0, %v10950_v2 }
  0x72   :  { %4438 = vst.msk [vmem:[#allocation3 + $0x328] sm:$0x3] %vm4338_vm1, %v10950_v2 }
  0x73   :  { %4439 = vst.msk [vmem:[#allocation3 + $0x330] sm:$0xff] %vm4335_vm0, %v10950_v2 }
  0x74   :  { %4440 = vst.msk [vmem:[#allocation3 + $0x338] sm:$0xff] %vm4335_vm0, %v10950_v2 }
  0x75   :  { %4441 = vst.msk [vmem:[#allocation3 + $0x340] sm:$0x3] %vm4338_vm1, %v10950_v2 }
  0x76   :  { %6001 = vst [vmem:[#allocation4] sm:$0xff] %v10950_v2 }
  0x77   :  { %6002 = vst [vmem:[#allocation4 + $0x8] sm:$0xff] %v10950_v2 }
  0x78   :  { %6003 = vst [vmem:[#allocation4 + $0x10] sm:$0x3] %v10950_v2 }
  0x79   :  { %6004 = vst [vmem:[#allocation4 + $0x18] sm:$0xff] %v10950_v2 }
  0x7a   :  { %6005 = vst [vmem:[#allocation4 + $0x20] sm:$0xff] %v10950_v2 }
  0x7b   :  { %6006 = vst [vmem:[#allocation4 + $0x28] sm:$0x3] %v10950_v2 }
  0x7c   :  { %6007 = vst [vmem:[#allocation4 + $0x30] sm:$0xff] %v10950_v2 }
  0x7d   :  { %6008 = vst [vmem:[#allocation4 + $0x38] sm:$0xff] %v10950_v2 }
  0x7e   :  { %6009 = vst [vmem:[#allocation4 + $0x40] sm:$0x3] %v10950_v2 }
  0x7f   :  { %6010 = vst [vmem:[#allocation4 + $0x48] sm:$0xff] %v10950_v2 }
  0x80   :  { %6011 = vst [vmem:[#allocation4 + $0x50] sm:$0xff] %v10950_v2 }
  0x81   :  { %6012 = vst [vmem:[#allocation4 + $0x58] sm:$0x3] %v10950_v2 }
  0x82   :  { %6013 = vst [vmem:[#allocation4 + $0x60] sm:$0xff] %v10950_v2 }
  0x83   :  { %6014 = vst [vmem:[#allocation4 + $0x68] sm:$0xff] %v10950_v2 }
  0x84   :  { %6015 = vst [vmem:[#allocation4 + $0x70] sm:$0x3] %v10950_v2 }
  0x85   :  { %6016 = vst [vmem:[#allocation4 + $0x78] sm:$0xff] %v10950_v2 }
  0x86   :  { %6017 = vst [vmem:[#allocation4 + $0x80] sm:$0xff] %v10950_v2 }
  0x87   :  { %6018 = vst [vmem:[#allocation4 + $0x88] sm:$0x3] %v10950_v2 }
  0x88   :  { %6019 = vst [vmem:[#allocation4 + $0x90] sm:$0xff] %v10950_v2 }
  0x89   :  { %6020 = vst [vmem:[#allocation4 + $0x98] sm:$0xff] %v10950_v2 }
  0x8a   :  { %6021 = vst [vmem:[#allocation4 + $0xa0] sm:$0x3] %v10950_v2 }
  0x8b   :  { %6022 = vst [vmem:[#allocation4 + $0xa8] sm:$0xff] %v10950_v2 }
  0x8c   :  { %6023 = vst [vmem:[#allocation4 + $0xb0] sm:$0xff] %v10950_v2 }
  0x8d   :  { %6024 = vst [vmem:[#allocation4 + $0xb8] sm:$0x3] %v10950_v2 }
  0x8e   :  { %6025 = vst [vmem:[#allocation4 + $0xc0] sm:$0xff] %v10950_v2 }
  0x8f   :  { %6026 = vst [vmem:[#allocation4 + $0xc8] sm:$0xff] %v10950_v2 }
  0x90   :  { %6027 = vst [vmem:[#allocation4 + $0xd0] sm:$0x3] %v10950_v2 }
  0x91   :  { %6031 = vst [vmem:[#allocation4 + $0xf0] sm:$0xff] %v10950_v2 }
  0x92   :  { %6032 = vst [vmem:[#allocation4 + $0xf8] sm:$0xff] %v10950_v2 }
  0x93   :  { %6033 = vst [vmem:[#allocation4 + $0x100] sm:$0x3] %v10950_v2 }
  0x94   :  { %6034 = vst [vmem:[#allocation4 + $0x108] sm:$0xff] %v10950_v2 }
  0x95   :  { %6035 = vst [vmem:[#allocation4 + $0x110] sm:$0xff] %v10950_v2 }
  0x96   :  { %6036 = vst [vmem:[#allocation4 + $0x118] sm:$0x3] %v10950_v2 }
  0x97   :  { %6037 = vst [vmem:[#allocation4 + $0x120] sm:$0xff] %v10950_v2 }
  0x98   :  { %6038 = vst [vmem:[#allocation4 + $0x128] sm:$0xff] %v10950_v2 }
  0x99   :  { %6039 = vst [vmem:[#allocation4 + $0x130] sm:$0x3] %v10950_v2 }
  0x9a   :  { %6040 = vst [vmem:[#allocation4 + $0x138] sm:$0xff] %v10950_v2 }
  0x9b   :  { %6041 = vst [vmem:[#allocation4 + $0x140] sm:$0xff] %v10950_v2 }
  0x9c   :  { %6042 = vst [vmem:[#allocation4 + $0x148] sm:$0x3] %v10950_v2 }
  0x9d   :  { %6043 = vst [vmem:[#allocation4 + $0x150] sm:$0xff] %v10950_v2 }
  0x9e   :  { %6044 = vst [vmem:[#allocation4 + $0x158] sm:$0xff] %v10950_v2 }
  0x9f   :  { %6045 = vst [vmem:[#allocation4 + $0x160] sm:$0x3] %v10950_v2 }
  0xa0   :  { %6046 = vst [vmem:[#allocation4 + $0x168] sm:$0xff] %v10950_v2 }
  0xa1   :  { %6047 = vst [vmem:[#allocation4 + $0x170] sm:$0xff] %v10950_v2 }
  0xa2   :  { %6048 = vst [vmem:[#allocation4 + $0x178] sm:$0x3] %v10950_v2 }
  0xa3   :  { %6049 = vst [vmem:[#allocation4 + $0x180] sm:$0xff] %v10950_v2 }
  0xa4   :  { %6050 = vst [vmem:[#allocation4 + $0x188] sm:$0xff] %v10950_v2 }
  0xa5   :  { %6051 = vst [vmem:[#allocation4 + $0x190] sm:$0x3] %v10950_v2 }
  0xa6   :  { %6052 = vst [vmem:[#allocation4 + $0x198] sm:$0xff] %v10950_v2 }
  0xa7   :  { %6053 = vst [vmem:[#allocation4 + $0x1a0] sm:$0xff] %v10950_v2 }
  0xa8   :  { %6054 = vst [vmem:[#allocation4 + $0x1a8] sm:$0x3] %v10950_v2 }
  0xa9   :  { %6055 = vst [vmem:[#allocation4 + $0x1b0] sm:$0xff] %v10950_v2 }
  0xaa   :  { %6056 = vst [vmem:[#allocation4 + $0x1b8] sm:$0xff] %v10950_v2 }
  0xab   :  { %6057 = vst [vmem:[#allocation4 + $0x1c0] sm:$0x3] %v10950_v2 }
  0xac   :  { %7193 = vst [vmem:[#allocation5] sm:$0xff] %v10950_v2 }
  0xad   :  { %7194 = vst [vmem:[#allocation5 + $0x8] sm:$0xff] %v10950_v2 }
  0xae   :  { %7195 = vst [vmem:[#allocation5 + $0x10] sm:$0x3] %v10950_v2 }
  0xaf   :  { %7196 = vst [vmem:[#allocation5 + $0x18] sm:$0xff] %v10950_v2 }
  0xb0   :  { %7197 = vst [vmem:[#allocation5 + $0x20] sm:$0xff] %v10950_v2 }
  0xb1   :  { %7198 = vst [vmem:[#allocation5 + $0x28] sm:$0x3] %v10950_v2 }
  0xb2   :  { %7199 = vst [vmem:[#allocation5 + $0x30] sm:$0xff] %v10950_v2 }
  0xb3   :  { %7200 = vst [vmem:[#allocation5 + $0x38] sm:$0xff] %v10950_v2 }
  0xb4   :  { %7201 = vst [vmem:[#allocation5 + $0x40] sm:$0x3] %v10950_v2 }
  0xb5   :  { %7202 = vst [vmem:[#allocation5 + $0x48] sm:$0xff] %v10950_v2 }
  0xb6   :  { %7203 = vst [vmem:[#allocation5 + $0x50] sm:$0xff] %v10950_v2 }
  0xb7   :  { %7204 = vst [vmem:[#allocation5 + $0x58] sm:$0x3] %v10950_v2 }
  0xb8   :  { %7205 = vst [vmem:[#allocation5 + $0x60] sm:$0xff] %v10950_v2 }
  0xb9   :  { %7206 = vst [vmem:[#allocation5 + $0x68] sm:$0xff] %v10950_v2 }
  0xba   :  { %7207 = vst [vmem:[#allocation5 + $0x70] sm:$0x3] %v10950_v2 }
  0xbb   :  { %7211 = vst [vmem:[#allocation5 + $0x90] sm:$0xff] %v10950_v2 }
  0xbc   :  { %7212 = vst [vmem:[#allocation5 + $0x98] sm:$0xff] %v10950_v2 }
  0xbd   :  { %7213 = vst [vmem:[#allocation5 + $0xa0] sm:$0x3] %v10950_v2 }
  0xbe   :  { %7214 = vst [vmem:[#allocation5 + $0xa8] sm:$0xff] %v10950_v2 }
  0xbf   :  { %7215 = vst [vmem:[#allocation5 + $0xb0] sm:$0xff] %v10950_v2 }
  0xc0   :  { %7216 = vst [vmem:[#allocation5 + $0xb8] sm:$0x3] %v10950_v2 }
  0xc1   :  { %7217 = vst [vmem:[#allocation5 + $0xc0] sm:$0xff] %v10950_v2 }
  0xc2   :  { %7218 = vst [vmem:[#allocation5 + $0xc8] sm:$0xff] %v10950_v2 }
  0xc3   :  { %7219 = vst [vmem:[#allocation5 + $0xd0] sm:$0x3] %v10950_v2 }
  0xc4   :  { %7220 = vst [vmem:[#allocation5 + $0xd8] sm:$0xff] %v10950_v2 }
  0xc5   :  { %7221 = vst [vmem:[#allocation5 + $0xe0] sm:$0xff] %v10950_v2 }
  0xc6   :  { %7222 = vst [vmem:[#allocation5 + $0xe8] sm:$0x3] %v10950_v2 }
  0xc7   :  { %7223 = vst [vmem:[#allocation5 + $0xf0] sm:$0xff] %v10950_v2 }
  0xc8   :  { %7224 = vst [vmem:[#allocation5 + $0xf8] sm:$0xff] %v10950_v2 }
  0xc9   :  { %7225 = vst [vmem:[#allocation5 + $0x100] sm:$0x3] %v10950_v2 }
  0xca   :  { %94 = vst.msk [vmem:[#allocation2] sm:$0xff] %vm93_vm3, %v10950_v2 }
  0xcb   :  { %95 = vst.msk [vmem:[#allocation2 + $0x8] sm:$0xff] %vm93_vm3, %v10950_v2 }
  0xcc   :  { %97 = vst.msk [vmem:[#allocation2 + $0x10] sm:$0x3] %vm96_vm4, %v10950_v2 }
  0xcd   :  { %98 = vst.msk [vmem:[#allocation2 + $0x18] sm:$0xff] %vm93_vm3, %v10950_v2 }
  0xce   :  { %99 = vst.msk [vmem:[#allocation2 + $0x20] sm:$0xff] %vm93_vm3, %v10950_v2 }
  0xcf   :  { %100 = vst.msk [vmem:[#allocation2 + $0x28] sm:$0x3] %vm96_vm4, %v10950_v2 }
  0xd0   :  { %101 = vst.msk [vmem:[#allocation2 + $0x30] sm:$0xff] %vm93_vm3, %v10950_v2 }
  0xd1   :  { %102 = vst.msk [vmem:[#allocation2 + $0x38] sm:$0xff] %vm93_vm3, %v10950_v2  ;;  %v332_v37 = vld [vmem:[#allocation2] sm:$0xff] }
  0xd2   :  { %v429_v3 = vld [vmem:[#allocation2 + $0x1] sm:$0xff]  ;;  %103 = vst.msk [vmem:[#allocation2 + $0x40] sm:$0x3] %vm96_vm4, %v10950_v2 }
  0xd3   :  { %v430_v4 = vld [vmem:[#allocation2 + $0x9] sm:$0xff]  ;;  %104 = vst.msk [vmem:[#allocation2 + $0x48] sm:$0xff] %vm93_vm3, %v10950_v2 }
  0xd4   :  { %v493_v5 = vpack.c.bf16 %v430_v4, %v429_v3  ;;  %105 = vst.msk [vmem:[#allocation2 + $0x50] sm:$0xff] %vm93_vm3, %v10950_v2  ;;  %v1064_v11 = vld [vmem:[#allocation2 + $0x2] sm:$0xff]  ;;  %v1065_v12 = vld [vmem:[#allocation2 + $0xa] sm:$0xff] }
  0xd5   :  { %106 = vst.msk [vmem:[#allocation2 + $0x58] sm:$0x3] %vm96_vm4, %v10950_v2  ;;  %v1128_v14 = vpack.c.bf16 %v1065_v12, %v1064_v11  ;;  %v333_v38 = vld [vmem:[#allocation2 + $0x8] sm:$0xff] }
  0xd6   :  { %9030 = vmatmul.msk.bf16.vlgmr.msra.gmra.mxu0 %vm93_vm3, %v493_v5  ;;  %107 = vst.msk [vmem:[#allocation2 + $0x60] sm:$0xff] %vm93_vm3, %v10950_v2  ;;  %v396_v43 = vpack.c.bf16 %v333_v38, %v332_v37 }
  0xd7   :  { %108 = vst.msk [vmem:[#allocation2 + $0x68] sm:$0xff] %vm93_vm3, %v10950_v2  ;;  %9095 = vmatmul.msk.bf16.vlgmr.msra.gmra.mxu2 %vm93_vm3, %v1128_v14 }
  0xd8   :  { %109 = vst.msk [vmem:[#allocation2 + $0x70] sm:$0x3] %vm96_vm4, %v10950_v2 }
  0xd9   :  { %110 = vst.msk [vmem:[#allocation2 + $0x78] sm:$0xff] %vm93_vm3, %v10950_v2 }
  0xda   :  { %111 = vst.msk [vmem:[#allocation2 + $0x80] sm:$0xff] %vm93_vm3, %v10950_v2 }
  0xdb   :  { %112 = vst.msk [vmem:[#allocation2 + $0x88] sm:$0x3] %vm96_vm4, %v10950_v2 }
  0xdc   :  { %113 = vst.msk [vmem:[#allocation2 + $0x90] sm:$0xff] %vm93_vm3, %v10950_v2 }
  0xdd   :  { %114 = vst.msk [vmem:[#allocation2 + $0x98] sm:$0xff] %vm93_vm3, %v10950_v2 }
  0xde   :  { %115 = vst.msk [vmem:[#allocation2 + $0xa0] sm:$0x3] %vm96_vm4, %v10950_v2 }
  0xdf   :  { %116 = vst.msk [vmem:[#allocation2 + $0xa8] sm:$0xff] %vm93_vm3, %v10950_v2 }
  0xe0   :  { %117 = vst.msk [vmem:[#allocation2 + $0xb0] sm:$0xff] %vm93_vm3, %v10950_v2 }
  0xe1   :  { %118 = vst.msk [vmem:[#allocation2 + $0xb8] sm:$0x3] %vm96_vm4, %v10950_v2 }
  0xe2   :  { %119 = vst.msk [vmem:[#allocation2 + $0xc0] sm:$0xff] %vm93_vm3, %v10950_v2 }
  0xe3   :  { %120 = vst.msk [vmem:[#allocation2 + $0xc8] sm:$0xff] %vm93_vm3, %v10950_v2 }
  0xe4   :  { %121 = vst.msk [vmem:[#allocation2 + $0xd0] sm:$0x3] %vm96_vm4, %v10950_v2 }
  0xe5   :  { %122 = vst.msk [vmem:[#allocation2 + $0xd8] sm:$0xff] %vm93_vm3, %v10950_v2 }
  0xe6   :  { %123 = vst.msk [vmem:[#allocation2 + $0xe0] sm:$0xff] %vm93_vm3, %v10950_v2 }
  0xe7   :  { %124 = vst.msk [vmem:[#allocation2 + $0xe8] sm:$0x3] %vm96_vm4, %v10950_v2 }
  0xe8   :  { %125 = vst.msk [vmem:[#allocation2 + $0xf0] sm:$0xff] %vm93_vm3, %v10950_v2 }
  0xe9   :  { %126 = vst.msk [vmem:[#allocation2 + $0xf8] sm:$0xff] %vm93_vm3, %v10950_v2 }
  0xea   :  { %127 = vst.msk [vmem:[#allocation2 + $0x100] sm:$0x3] %vm96_vm4, %v10950_v2 }
  0xeb   :  { %128 = vst.msk [vmem:[#allocation2 + $0x108] sm:$0xff] %vm93_vm3, %v10950_v2 }
  0xec   :  { %129 = vst.msk [vmem:[#allocation2 + $0x110] sm:$0xff] %vm93_vm3, %v10950_v2 }
  0xed   :  { %130 = vst.msk [vmem:[#allocation2 + $0x118] sm:$0x3] %vm96_vm4, %v10950_v2 }
  0xee   :  { %131 = vst.msk [vmem:[#allocation2 + $0x120] sm:$0xff] %vm93_vm3, %v10950_v2 }
  0xef   :  { %132 = vst.msk [vmem:[#allocation2 + $0x128] sm:$0xff] %vm93_vm3, %v10950_v2 }
  0xf0   :  { %133 = vst.msk [vmem:[#allocation2 + $0x130] sm:$0x3] %vm96_vm4, %v10950_v2 }
  0xf1   :  { %134 = vst.msk [vmem:[#allocation2 + $0x138] sm:$0xff] %vm93_vm3, %v10950_v2 }
  0xf2   :  { %135 = vst.msk [vmem:[#allocation2 + $0x140] sm:$0xff] %vm93_vm3, %v10950_v2 }
  0xf3   :  { %136 = vst.msk [vmem:[#allocation2 + $0x148] sm:$0x3] %vm96_vm4, %v10950_v2 }
  0xf4   :  { %137 = vst.msk [vmem:[#allocation2 + $0x150] sm:$0xff] %vm93_vm3, %v10950_v2 }
  0xf5   :  { %138 = vst.msk [vmem:[#allocation2 + $0x158] sm:$0xff] %vm93_vm3, %v10950_v2 }
  0xf6   :  { %139 = vst.msk [vmem:[#allocation2 + $0x160] sm:$0x3] %vm96_vm4, %v10950_v2 }
  0xf7   :  { %140 = vst.msk [vmem:[#allocation2 + $0x168] sm:$0xff] %vm93_vm3, %v10950_v2 }
  0xf8   :  { %141 = vst.msk [vmem:[#allocation2 + $0x170] sm:$0xff] %vm93_vm3, %v10950_v2 }
  0xf9   :  { %142 = vst.msk [vmem:[#allocation2 + $0x178] sm:$0x3] %vm96_vm4, %v10950_v2 }
  0xfa   :  { %143 = vst.msk [vmem:[#allocation2 + $0x180] sm:$0xff] %vm93_vm3, %v10950_v2 }
  0xfb   :  { %144 = vst.msk [vmem:[#allocation2 + $0x188] sm:$0xff] %vm93_vm3, %v10950_v2 }
  0xfc   :  { %145 = vst.msk [vmem:[#allocation2 + $0x190] sm:$0x3] %vm96_vm4, %v10950_v2 }
  0xfd   :  { %146 = vst.msk [vmem:[#allocation2 + $0x198] sm:$0xff] %vm93_vm3, %v10950_v2 }
  0xfe   :  { %147 = vst.msk [vmem:[#allocation2 + $0x1a0] sm:$0xff] %vm93_vm3, %v10950_v2 }
  0xff   :  { %148 = vst.msk [vmem:[#allocation2 + $0x1a8] sm:$0x3] %vm96_vm4, %v10950_v2 }
 0x100   :  { %149 = vst.msk [vmem:[#allocation2 + $0x1b0] sm:$0xff] %vm93_vm3, %v10950_v2 }
 0x101   :  { %150 = vst.msk [vmem:[#allocation2 + $0x1b8] sm:$0xff] %vm93_vm3, %v10950_v2 }
 0x102   :  { %151 = vst.msk [vmem:[#allocation2 + $0x1c0] sm:$0x3] %vm96_vm4, %v10950_v2 }
 0x103   :  { %152 = vst.msk [vmem:[#allocation2 + $0x1c8] sm:$0xff] %vm93_vm3, %v10950_v2 }
 0x104   :  { %153 = vst.msk [vmem:[#allocation2 + $0x1d0] sm:$0xff] %vm93_vm3, %v10950_v2 }
 0x105   :  { %154 = vst.msk [vmem:[#allocation2 + $0x1d8] sm:$0x3] %vm96_vm4, %v10950_v2 }
 0x106   :  { %155 = vst.msk [vmem:[#allocation2 + $0x1e0] sm:$0xff] %vm93_vm3, %v10950_v2 }
 0x107   :  { %156 = vst.msk [vmem:[#allocation2 + $0x1e8] sm:$0xff] %vm93_vm3, %v10950_v2 }
 0x108   :  { %157 = vst.msk [vmem:[#allocation2 + $0x1f0] sm:$0x3] %vm96_vm4, %v10950_v2 }
 0x109   :  { %158 = vst.msk [vmem:[#allocation2 + $0x1f8] sm:$0xff] %vm93_vm3, %v10950_v2 }
 0x10a   :  { %159 = vst.msk [vmem:[#allocation2 + $0x200] sm:$0xff] %vm93_vm3, %v10950_v2 }
 0x10b   :  { %160 = vst.msk [vmem:[#allocation2 + $0x208] sm:$0x3] %vm96_vm4, %v10950_v2 }
 0x10c   :  { %161 = vst.msk [vmem:[#allocation2 + $0x210] sm:$0xff] %vm93_vm3, %v10950_v2 }
 0x10d   :  { %162 = vst.msk [vmem:[#allocation2 + $0x218] sm:$0xff] %vm93_vm3, %v10950_v2 }
 0x10e   :  { %163 = vst.msk [vmem:[#allocation2 + $0x220] sm:$0x3] %vm96_vm4, %v10950_v2 }
 0x10f   :  { %164 = vst.msk [vmem:[#allocation2 + $0x228] sm:$0xff] %vm93_vm3, %v10950_v2 }
 0x110   :  { %165 = vst.msk [vmem:[#allocation2 + $0x230] sm:$0xff] %vm93_vm3, %v10950_v2 }
 0x111   :  { %166 = vst.msk [vmem:[#allocation2 + $0x238] sm:$0x3] %vm96_vm4, %v10950_v2 }
 0x112   :  { %167 = vst.msk [vmem:[#allocation2 + $0x240] sm:$0xff] %vm93_vm3, %v10950_v2 }
 0x113   :  { %168 = vst.msk [vmem:[#allocation2 + $0x248] sm:$0xff] %vm93_vm3, %v10950_v2 }
 0x114   :  { %169 = vst.msk [vmem:[#allocation2 + $0x250] sm:$0x3] %vm96_vm4, %v10950_v2 }
 0x115   :  { %170 = vst.msk [vmem:[#allocation2 + $0x258] sm:$0xff] %vm93_vm3, %v10950_v2 }
 0x116   :  { %171 = vst.msk [vmem:[#allocation2 + $0x260] sm:$0xff] %vm93_vm3, %v10950_v2 }
 0x117   :  { %172 = vst.msk [vmem:[#allocation2 + $0x268] sm:$0x3] %vm96_vm4, %v10950_v2 }
 0x118   :  { %173 = vst.msk [vmem:[#allocation2 + $0x270] sm:$0xff] %vm93_vm3, %v10950_v2 }
 0x119   :  { %174 = vst.msk [vmem:[#allocation2 + $0x278] sm:$0xff] %vm93_vm3, %v10950_v2 }
 0x11a   :  { %175 = vst.msk [vmem:[#allocation2 + $0x280] sm:$0x3] %vm96_vm4, %v10950_v2 }
 0x11b   :  { %176 = vst.msk [vmem:[#allocation2 + $0x288] sm:$0xff] %vm93_vm3, %v10950_v2 }
 0x11c   :  { %177 = vst.msk [vmem:[#allocation2 + $0x290] sm:$0xff] %vm93_vm3, %v10950_v2 }
 0x11d   :  { %178 = vst.msk [vmem:[#allocation2 + $0x298] sm:$0x3] %vm96_vm4, %v10950_v2 }
 0x11e   :  { %179 = vst.msk [vmem:[#allocation2 + $0x2a0] sm:$0xff] %vm93_vm3, %v10950_v2 }
 0x11f   :  { %180 = vst.msk [vmem:[#allocation2 + $0x2a8] sm:$0xff] %vm93_vm3, %v10950_v2 }
 0x120   :  { %181 = vst.msk [vmem:[#allocation2 + $0x2b0] sm:$0x3] %vm96_vm4, %v10950_v2 }
 0x121   :  { %182 = vst.msk [vmem:[#allocation2 + $0x2b8] sm:$0xff] %vm93_vm3, %v10950_v2 }
 0x122   :  { %183 = vst.msk [vmem:[#allocation2 + $0x2c0] sm:$0xff] %vm93_vm3, %v10950_v2 }
 0x123   :  { %184 = vst.msk [vmem:[#allocation2 + $0x2c8] sm:$0x3] %vm96_vm4, %v10950_v2 }
 0x124   :  { %185 = vst.msk [vmem:[#allocation2 + $0x2d0] sm:$0xff] %vm93_vm3, %v10950_v2 }
 0x125   :  { %186 = vst.msk [vmem:[#allocation2 + $0x2d8] sm:$0xff] %vm93_vm3, %v10950_v2 }
 0x126   :  { %187 = vst.msk [vmem:[#allocation2 + $0x2e0] sm:$0x3] %vm96_vm4, %v10950_v2 }
 0x127   :  { %188 = vst.msk [vmem:[#allocation2 + $0x2e8] sm:$0xff] %vm93_vm3, %v10950_v2 }
 0x128   :  { %189 = vst.msk [vmem:[#allocation2 + $0x2f0] sm:$0xff] %vm93_vm3, %v10950_v2 }
 0x129   :  { %190 = vst.msk [vmem:[#allocation2 + $0x2f8] sm:$0x3] %vm96_vm4, %v10950_v2 }
 0x12a   :  { %191 = vst.msk [vmem:[#allocation2 + $0x300] sm:$0xff] %vm93_vm3, %v10950_v2 }
 0x12b   :  { %192 = vst.msk [vmem:[#allocation2 + $0x308] sm:$0xff] %vm93_vm3, %v10950_v2 }
 0x12c   :  { %193 = vst.msk [vmem:[#allocation2 + $0x310] sm:$0x3] %vm96_vm4, %v10950_v2 }
 0x12d   :  { %194 = vst.msk [vmem:[#allocation2 + $0x318] sm:$0xff] %vm93_vm3, %v10950_v2 }
 0x12e   :  { %195 = vst.msk [vmem:[#allocation2 + $0x320] sm:$0xff] %vm93_vm3, %v10950_v2 }
 0x12f   :  { %196 = vst.msk [vmem:[#allocation2 + $0x328] sm:$0x3] %vm96_vm4, %v10950_v2 }
 0x130   :  { %197 = vst.msk [vmem:[#allocation2 + $0x330] sm:$0xff] %vm93_vm3, %v10950_v2 }
 0x131   :  { %198 = vst.msk [vmem:[#allocation2 + $0x338] sm:$0xff] %vm93_vm3, %v10950_v2 }
 0x132   :  { %199 = vst.msk [vmem:[#allocation2 + $0x340] sm:$0x3] %vm96_vm4, %v10950_v2 }
 0x133   :  { %200 = vst.msk [vmem:[#allocation2 + $0x348] sm:$0xff] %vm93_vm3, %v10950_v2 }
 0x134   :  { %201 = vst.msk [vmem:[#allocation2 + $0x350] sm:$0xff] %vm93_vm3, %v10950_v2 }
 0x135   :  { %202 = vst.msk [vmem:[#allocation2 + $0x358] sm:$0x3] %vm96_vm4, %v10950_v2 }
 0x136   :  { %328 = vst.msk [vmem:[#allocation2 + $0x319] sm:$0xff] %vm93_vm3, %v263_v17 }
 0x137   :  { %329 = vst.msk [vmem:[#allocation2 + $0x321] sm:$0xff] %vm93_vm3, %v264_v18  ;;  %v215_v18 = vld [vmem:[%s13759_s0 + $0x60] sm:$0xff] }
 0x138   :  { %268 = vst.msk [vmem:[#allocation2 + $0x19] sm:$0xff] %vm93_vm3, %v203_v19  ;;  %v216_v19 = vld [vmem:[%s13759_s0 + $0x68] sm:$0xff] }
 0x139   :  { %269 = vst.msk [vmem:[#allocation2 + $0x21] sm:$0xff] %vm93_vm3, %v204_v20 }
 0x13a   :  { %270 = vst.msk [vmem:[#allocation2 + $0x31] sm:$0xff] %vm93_vm3, %v205_v21 }
 0x13b   :  { %271 = vst.msk [vmem:[#allocation2 + $0x39] sm:$0xff] %vm93_vm3, %v206_v22 }
 0x13c   :  { %272 = vst.msk [vmem:[#allocation2 + $0x49] sm:$0xff] %vm93_vm3, %v207_v35 }
 0x13d   :  { %v491_v23 = vld [vmem:[#allocation2 + $0x319] sm:$0xff]  ;;  %273 = vst.msk [vmem:[#allocation2 + $0x51] sm:$0xff] %vm93_vm3, %v208_v36 }
 0x13e   :  { %v492_v24 = vld [vmem:[#allocation2 + $0x321] sm:$0xff]  ;;  %274 = vst.msk [vmem:[#allocation2 + $0x61] sm:$0xff] %vm93_vm3, %v209_v49 }
 0x13f   :  { %v524_v25 = vpack.c.bf16 %v492_v24, %v491_v23  ;;  %v431_v26 = vld [vmem:[#allocation2 + $0x19] sm:$0xff]  ;;  %275 = vst.msk [vmem:[#allocation2 + $0x69] sm:$0xff] %vm93_vm3, %v210_v50 }
 0x140   :  { %v1494_v27 = vld [vmem:[#allocation2 + $0x18] sm:$0xff]  ;;  %v432_v28 = vld [vmem:[#allocation2 + $0x21] sm:$0xff]  ;;  %276 = vst.msk [vmem:[#allocation2 + $0x79] sm:$0xff] %vm93_vm3, %v211_v60 }
 0x141   :  { %v1495_v29 = vld [vmem:[#allocation2 + $0x20] sm:$0xff]  ;;  %9061 = vmatmul.msk.bf16.vlgmr.msra.gmra.mxu1 %vm93_vm3, %v524_v25  ;;  %v494_v31 = vpack.c.bf16 %v432_v28, %v431_v26  ;;  %v433_v39 = vld [vmem:[#allocation2 + $0x31] sm:$0xff]  ;;  %277 = vst.msk [vmem:[#allocation2 + $0x81] sm:$0xff] %vm93_vm3, %v212_v61 }
 0x142   :  { %v1066_v30 = vld [vmem:[#allocation2 + $0x1a] sm:$0xff]  ;;  %v1558_v32 = vpack.c.bf16 %v1495_v29, %v1494_v27  ;;  %v1067_v33 = vld [vmem:[#allocation2 + $0x22] sm:$0xff]  ;;  %v1496_v41 = vld [vmem:[#allocation2 + $0x30] sm:$0xff]  ;;  %278 = vst.msk [vmem:[#allocation2 + $0x91] sm:$0xff] %vm93_vm3, %v213_v7 }
 0x143   :  { %v1129_v34 = vpack.c.bf16 %v1067_v33, %v1066_v30  ;;  %9031 = vmatmul.msk.bf16.gmra.mxu0 %vm93_vm3, %v494_v31  ;;  %v434_v40 = vld [vmem:[#allocation2 + $0x39] sm:$0xff]  ;;  %v435_v51 = vld [vmem:[#allocation2 + $0x49] sm:$0xff]  ;;  %279 = vst.msk [vmem:[#allocation2 + $0x99] sm:$0xff] %vm93_vm3, %v214_v8 }
 0x144   :  { %9128 = vmatmul.msk.bf16.vlgmr.msra.gmra.mxu3 %vm93_vm3, %v1558_v32  ;;  %v1497_v42 = vld [vmem:[#allocation2 + $0x38] sm:$0xff]  ;;  %v495_v46 = vpack.c.bf16 %v434_v40, %v433_v39  ;;  %v1498_v53 = vld [vmem:[#allocation2 + $0x48] sm:$0xff]  ;;  %v1499_v54 = vld [vmem:[#allocation2 + $0x50] sm:$0xff]  ;;  %280 = vst.msk [vmem:[#allocation2 + $0xa9] sm:$0xff] %vm93_vm3, %v215_v18 }
 0x145   :  { %9096 = vmatmul.msk.bf16.gmra.mxu2 %vm93_vm3, %v1129_v34  ;;  %v1068_v44 = vld [vmem:[#allocation2 + $0x32] sm:$0xff]  ;;  %v1069_v45 = vld [vmem:[#allocation2 + $0x3a] sm:$0xff]  ;;  %v1559_v47 = vpack.c.bf16 %v1497_v42, %v1496_v41  ;;  %v1070_v55 = vld [vmem:[#allocation2 + $0x4a] sm:$0xff]  ;;  %v1560_v58 = vpack.c.bf16 %v1499_v54, %v1498_v53  ;;  %281 = vst.msk [vmem:[#allocation2 + $0xb1] sm:$0xff] %vm93_vm3, %v216_v19 }
 0x146   :  { %v1130_v48 = vpack.c.bf16 %v1069_v45, %v1068_v44  ;;  %v436_v52 = vld [vmem:[#allocation2 + $0x51] sm:$0xff]  ;;  %v437_v62 = vld [vmem:[#allocation2 + $0x61] sm:$0xff]  ;;  %v438_v63 = vld [vmem:[#allocation2 + $0x69] sm:$0xff] }
 0x147   :  { %v1071_v56 = vld [vmem:[#allocation2 + $0x52] sm:$0xff]  ;;  %v496_v57 = vpack.c.bf16 %v436_v52, %v435_v51  ;;  %v1500_v0 = vld [vmem:[#allocation2 + $0x60] sm:$0xff]  ;;  %v1501_v1 = vld [vmem:[#allocation2 + $0x68] sm:$0xff]  ;;  %v497_v4 = vpack.c.bf16 %v438_v63, %v437_v62 }
 0x148   :  { %v1131_v59 = vpack.c.bf16 %v1071_v56, %v1070_v55  ;;  %v1072_v2 = vld [vmem:[#allocation2 + $0x62] sm:$0xff]  ;;  %v1073_v3 = vld [vmem:[#allocation2 + $0x6a] sm:$0xff]  ;;  %v1561_v5 = vpack.c.bf16 %v1501_v1, %v1500_v0  ;;  %v439_v9 = vld [vmem:[#allocation2 + $0x79] sm:$0xff] }
 0x149   :  { %v1132_v6 = vpack.c.bf16 %v1073_v3, %v1072_v2  ;;  %v440_v10 = vld [vmem:[#allocation2 + $0x81] sm:$0xff]  ;;  %v1502_v11 = vld [vmem:[#allocation2 + $0x78] sm:$0xff]  ;;  %v1504_v22 = vld [vmem:[#allocation2 + $0x90] sm:$0xff] }
 0x14a   :  { %v1503_v12 = vld [vmem:[#allocation2 + $0x80] sm:$0xff]  ;;  %v498_v15 = vpack.c.bf16 %v440_v10, %v439_v9  ;;  %v441_v20 = vld [vmem:[#allocation2 + $0x91] sm:$0xff]  ;;  %v220_v41 = vld [vmem:[%s13759_s0 + $0x88] sm:$0xff] }
 0x14b   :  { %v1074_v13 = vld [vmem:[#allocation2 + $0x7a] sm:$0xff]  ;;  %v1075_v14 = vld [vmem:[#allocation2 + $0x82] sm:$0xff]  ;;  %v1562_v16 = vpack.c.bf16 %v1503_v12, %v1502_v11  ;;  %v1076_v24 = vld [vmem:[#allocation2 + $0x92] sm:$0xff]  ;;  %285 = vst.msk [vmem:[#allocation2 + $0xe1] sm:$0xff] %vm93_vm3, %v220_v41 }
 0x14c   :  { %v1133_v17 = vpack.c.bf16 %v1075_v14, %v1074_v13  ;;  %v442_v21 = vld [vmem:[#allocation2 + $0x99] sm:$0xff]  ;;  %v217_v29 = vld [vmem:[%s13759_s0 + $0x70] sm:$0xff]  ;;  %v1506_v33 = vld [vmem:[#allocation2 + $0xa8] sm:$0xff] }
 0x14d   :  { %v1505_v23 = vld [vmem:[#allocation2 + $0x98] sm:$0xff]  ;;  %v499_v26 = vpack.c.bf16 %v442_v21, %v441_v20  ;;  %282 = vst.msk [vmem:[#allocation2 + $0xc1] sm:$0xff] %vm93_vm3, %v217_v29  ;;  %v443_v31 = vld [vmem:[#allocation2 + $0xa9] sm:$0xff]  ;;  %v219_v40 = vld [vmem:[%s13759_s0 + $0x80] sm:$0xff] }
 0x14e   :  { %v1077_v25 = vld [vmem:[#allocation2 + $0x9a] sm:$0xff]  ;;  %v1563_v27 = vpack.c.bf16 %v1505_v23, %v1504_v22  ;;  %v1507_v34 = vld [vmem:[#allocation2 + $0xb0] sm:$0xff]  ;;  %284 = vst.msk [vmem:[#allocation2 + $0xd9] sm:$0xff] %vm93_vm3, %v219_v40 }
 0x14f   :  { %v1134_v28 = vpack.c.bf16 %v1077_v25, %v1076_v24  ;;  %v218_v30 = vld [vmem:[%s13759_s0 + $0x78] sm:$0xff]  ;;  %v1078_v35 = vld [vmem:[#allocation2 + $0xaa] sm:$0xff]  ;;  %v1564_v38 = vpack.c.bf16 %v1507_v34, %v1506_v33 }
 0x150   :  { %283 = vst.msk [vmem:[#allocation2 + $0xc9] sm:$0xff] %vm93_vm3, %v218_v30  ;;  %v1079_v36 = vld [vmem:[#allocation2 + $0xb2] sm:$0xff] }
 0x151   :  { %9062 = vmatmul.msk.bf16.vlgmr.msrb.gmra.mxu1 %vm93_vm3, %v396_v43  ;;  %v1135_v39 = vpack.c.bf16 %v1079_v36, %v1078_v35  ;;  %v221_v52 = vld [vmem:[%s13759_s0 + $0x90] sm:$0xff]  ;;  %v222_v53 = vld [vmem:[%s13759_s0 + $0x98] sm:$0xff] }
 0x152   :  { %286 = vst.msk [vmem:[#allocation2 + $0xf1] sm:$0xff] %vm93_vm3, %v221_v52  ;;  %v1083_v62 = vld [vmem:[#allocation2 + $0xe2] sm:$0xff]  ;;  %v225_v24 = vld [vmem:[%s13759_s0 + $0xb0] sm:$0xff]  ;;  %v226_v25 = vld [vmem:[%s13759_s0 + $0xb8] sm:$0xff] }
 0x153   :  { %9032 = vmatmul.msk.bf16.gmra.mxu0 %vm93_vm3, %v495_v46  ;;  %v636_v43 = vpop.f32.mrf.mxu0  ;;  %287 = vst.msk [vmem:[#allocation2 + $0xf9] sm:$0xff] %vm93_vm3, %v222_v53 }
 0x154   :  { %9129 = vmatmul.msk.bf16.gmra.mxu3 %vm93_vm3, %v1559_v47  ;;  %v445_v42 = vld [vmem:[#allocation2 + $0xc1] sm:$0xff]  ;;  %290 = vst.msk [vmem:[#allocation2 + $0x121] sm:$0xff] %vm93_vm3, %v225_v24 }
 0x155   :  { %9097 = vmatmul.msk.bf16.gmra.mxu2 %vm93_vm3, %v1130_v48  ;;  %v1508_v45 = vld [vmem:[#allocation2 + $0xc0] sm:$0xff]  ;;  %291 = vst.msk [vmem:[#allocation2 + $0x129] sm:$0xff] %vm93_vm3, %v226_v25 }
 0x156   :  { %v447_v56 = vld [vmem:[#allocation2 + $0xd9] sm:$0xff] }
 0x157   :  { %v446_v44 = vld [vmem:[#allocation2 + $0xc9] sm:$0xff]  ;;  %v1082_v61 = vld [vmem:[#allocation2 + $0xda] sm:$0xff] }
 0x158   :  { %v1509_v46 = vld [vmem:[#allocation2 + $0xc8] sm:$0xff]  ;;  %v501_v49 = vpack.c.bf16 %v446_v44, %v445_v42  ;;  %v1137_v3 = vpack.c.bf16 %v1083_v62, %v1082_v61 }
 0x159   :  { %v1081_v48 = vld [vmem:[#allocation2 + $0xca] sm:$0xff]  ;;  %v1565_v50 = vpack.c.bf16 %v1509_v46, %v1508_v45 }
 0x15a   :  { %v1270_v54 = vpop.f32.mrf.mxu2  ;;  %v449_v10 = vld [vmem:[#allocation2 + $0xf1] sm:$0xff]  ;;  %v450_v11 = vld [vmem:[#allocation2 + $0xf9] sm:$0xff] }
 0x15b   :  { %v638_v55 = vpop.f32.mrf.mxu0  ;;  %v1512_v12 = vld [vmem:[#allocation2 + $0xf0] sm:$0xff]  ;;  %v1513_v13 = vld [vmem:[#allocation2 + $0xf8] sm:$0xff]  ;;  %v503_v19 = vpack.c.bf16 %v450_v11, %v449_v10  ;;  %v1516_v62 = vld [vmem:[#allocation2 + $0x120] sm:$0xff] }
 0x15c   :  { %v1084_v14 = vld [vmem:[#allocation2 + $0xf2] sm:$0xff]  ;;  %v11696_v20 = vpack.c.bf16 %v1513_v13, %v1512_v12  ;;  %v454_v61 = vld [vmem:[#allocation2 + $0x129] sm:$0xff] }
 0x15d   :  { %v229_v12 = vld [vmem:[%s13759_s0 + $0xd0] sm:$0xff]  ;;  %v230_v13 = vld [vmem:[%s13759_s0 + $0xd8] sm:$0xff] }
 0x15e   :  { %294 = vst.msk [vmem:[#allocation2 + $0x151] sm:$0xff] %vm93_vm3, %v229_v12 }
 0x15f   :  { %295 = vst.msk [vmem:[#allocation2 + $0x159] sm:$0xff] %vm93_vm3, %v230_v13 }
 0x161   :  { %9063 = vmatmul.msk.bf16.gmra.mxu1 %vm93_vm3, %v1558_v32  ;;  %v444_v32 = vld [vmem:[#allocation2 + $0xb1] sm:$0xff] }
 0x162   :  { %v500_v37 = vpack.c.bf16 %v444_v32, %v443_v31  ;;  %v1272_v60 = vpop.f32.mrf.mxu2 }
 0x163   :  { %9033 = vmatmul.msk.bf16.gmra.mxu0 %vm93_vm3, %v496_v57  ;;  %v448_v57 = vld [vmem:[#allocation2 + $0xe1] sm:$0xff] }
 0x164   :  { %9130 = vmatmul.msk.bf16.gmra.mxu3 %vm93_vm3, %v1560_v58  ;;  %v502_v0 = vpack.c.bf16 %v448_v57, %v447_v56 }
 0x165   :  { %9098 = vmatmul.msk.bf16.gmra.mxu2 %vm93_vm3, %v1131_v59  ;;  %v1511_v59 = vld [vmem:[#allocation2 + $0xe0] sm:$0xff] }
 0x171   :  { %9064 = vmatmul.msk.bf16.gmra.mxu1 %vm93_vm3, %v1559_v47  ;;  %v1080_v47 = vld [vmem:[#allocation2 + $0xc2] sm:$0xff] }
 0x172   :  { %v1136_v51 = vpack.c.bf16 %v1081_v48, %v1080_v47 }
 0x173   :  { %9034 = vmatmul.msk.bf16.gmra.mxu0 %vm93_vm3, %v497_v4  ;;  %v223_v4 = vld [vmem:[%s13759_s0 + $0xa0] sm:$0xff] }
 0x174   :  { %9131 = vmatmul.msk.bf16.gmra.mxu3 %vm93_vm3, %v1561_v5  ;;  %288 = vst.msk [vmem:[#allocation2 + $0x109] sm:$0xff] %vm93_vm3, %v223_v4 }
 0x175   :  { %9099 = vmatmul.msk.bf16.gmra.mxu2 %vm93_vm3, %v1132_v6 }
 0x17b   :  { %v451_v35 = vld [vmem:[#allocation2 + $0x109] sm:$0xff] }
 0x181   :  { %9065 = vmatmul.msk.bf16.gmra.mxu1 %vm93_vm3, %v1560_v58  ;;  %v1510_v58 = vld [vmem:[#allocation2 + $0xd8] sm:$0xff] }
 0x182   :  { %v11679_v1 = vpack.c.bf16 %v1511_v59, %v1510_v58 }
 0x183   :  { %9035 = vmatmul.msk.bf16.gmra.mxu0 %vm93_vm3, %v498_v15  ;;  %v1085_v15 = vld [vmem:[#allocation2 + $0xfa] sm:$0xff] }
 0x184   :  { %9132 = vmatmul.msk.bf16.gmra.mxu3 %vm93_vm3, %v1562_v16  ;;  %v1138_v23 = vpack.c.bf16 %v1085_v15, %v1084_v14 }
 0x185   :  { %9100 = vmatmul.msk.bf16.gmra.mxu2 %vm93_vm3, %v1133_v17 }
 0x191   :  { %9066 = vmatmul.msk.bf16.gmra.mxu1 %vm93_vm3, %v1561_v5  ;;  %v224_v5 = vld [vmem:[%s13759_s0 + $0xa8] sm:$0xff] }
 0x192   :  { %289 = vst.msk [vmem:[#allocation2 + $0x111] sm:$0xff] %vm93_vm3, %v224_v5 }
 0x193   :  { %9036 = vmatmul.msk.bf16.gmra.mxu0 %vm93_vm3, %v499_v26 }
 0x194   :  { %9133 = vmatmul.msk.bf16.gmra.mxu3 %vm93_vm3, %v1563_v27 }
 0x195   :  { %9101 = vmatmul.msk.bf16.gmra.mxu2 %vm93_vm3, %v1134_v28 }
 0x199   :  { %v452_v36 = vld [vmem:[#allocation2 + $0x111] sm:$0xff] }
 0x19a   :  { %v1087_v40 = vld [vmem:[#allocation2 + $0x112] sm:$0xff]  ;;  %v504_v44 = vpack.c.bf16 %v452_v36, %v451_v35 }
 0x1a1   :  { %9067 = vmatmul.msk.bf16.gmra.mxu1 %vm93_vm3, %v1562_v16 }
 0x1a3   :  { %9037 = vmatmul.msk.bf16.gmra.mxu0 %vm93_vm3, %v500_v37  ;;  %v1514_v37 = vld [vmem:[#allocation2 + $0x108] sm:$0xff] }
 0x1a4   :  { %9134 = vmatmul.msk.bf16.gmra.mxu3 %vm93_vm3, %v1564_v38 }
 0x1a5   :  { %9102 = vmatmul.msk.bf16.gmra.mxu2 %vm93_vm3, %v1135_v39  ;;  %v1086_v39 = vld [vmem:[#allocation2 + $0x10a] sm:$0xff] }
 0x1a6   :  { %v1139_v48 = vpack.c.bf16 %v1087_v40, %v1086_v39  ;;  %v231_v39 = vld [vmem:[%s13759_s0 + $0xe0] sm:$0xff]  ;;  %v232_v40 = vld [vmem:[%s13759_s0 + $0xe8] sm:$0xff] }
 0x1a7   :  { %296 = vst.msk [vmem:[#allocation2 + $0x169] sm:$0xff] %vm93_vm3, %v231_v39 }
 0x1a8   :  { %297 = vst.msk [vmem:[#allocation2 + $0x171] sm:$0xff] %vm93_vm3, %v232_v40 }
 0x1b1   :  { %9068 = vmatmul.msk.bf16.gmra.mxu1 %vm93_vm3, %v1563_v27 }
 0x1b3   :  { %9038 = vmatmul.msk.bf16.gmra.mxu0 %vm93_vm3, %v501_v49  ;;  %v227_v49 = vld [vmem:[%s13759_s0 + $0xc0] sm:$0xff] }
 0x1b4   :  { %9135 = vmatmul.msk.bf16.gmra.mxu3 %vm93_vm3, %v1565_v50  ;;  %292 = vst.msk [vmem:[#allocation2 + $0x139] sm:$0xff] %vm93_vm3, %v227_v49 }
 0x1b5   :  { %9103 = vmatmul.msk.bf16.gmra.mxu2 %vm93_vm3, %v1136_v51 }
 0x1bb   :  { %v1518_v25 = vld [vmem:[#allocation2 + $0x138] sm:$0xff] }
 0x1be   :  { %v11677_v63 = vpop.f32.mrf.mxu1 }
 0x1c0   :  { %v641_v2 = vpop.f32.mrf.mxu0 }
 0x1c1   :  { %9069 = vmatmul.msk.bf16.gmra.mxu1 %vm93_vm3, %v1564_v38  ;;  %v1515_v38 = vld [vmem:[#allocation2 + $0x110] sm:$0xff] }
 0x1c2   :  { %v11715_v45 = vpack.c.bf16 %v1515_v38, %v1514_v37 }
 0x1c3   :  { %9039 = vmatmul.msk.bf16.gmra.mxu0 %vm93_vm3, %v502_v0  ;;  %v1517_v0 = vld [vmem:[#allocation2 + $0x128] sm:$0xff] }
 0x1c4   :  { %9136 = vmatmul.msk.bf16.gmra.mxu3 %vm93_vm3, %v11679_v1 }
 0x1c5   :  { %9104 = vmatmul.msk.bf16.gmra.mxu2 %vm93_vm3, %v1137_v3 }
 0x1c6   :  { %v11694_v6 = vpop.f32.mrf.mxu1 }
 0x1c7   :  { %v1700_v7 = vpop.f32.mrf.mxu3 }
 0x1c8   :  { %v1275_v8 = vpop.f32.mrf.mxu2  ;;  %v643_v9 = vpop.f32.mrf.mxu0 }
 0x1ce   :  { %v904_v16 = vpop.f32.mrf.mxu1 }
 0x1cf   :  { %v1702_v17 = vpop.f32.mrf.mxu3  ;;  %v905_v18 = vadd.f32 %v904_v16, %v636_v43 }
 0x1d0   :  { %v1277_v21 = vpop.f32.mrf.mxu2  ;;  %v646_v22 = vpop.f32.mrf.mxu0 }
 0x1d1   :  { %v1430_v26 = vadd.f32 %v1270_v54, %v905_v18  ;;  %9070 = vmatmul.msk.bf16.gmra.mxu1 %vm93_vm3, %v1565_v50  ;;  %v228_v50 = vld [vmem:[%s13759_s0 + $0xc8] sm:$0xff] }
 0x1d2   :  { %293 = vst.msk [vmem:[#allocation2 + $0x141] sm:$0xff] %vm93_vm3, %v228_v50  ;;  %v457_v50 = vld [vmem:[#allocation2 + $0x151] sm:$0xff] }
 0x1d3   :  { %v11707_v27 = vadd.f32 %v1700_v7, %v1430_v26  ;;  %9040 = vmatmul.msk.bf16.gmra.mxu0 %vm93_vm3, %v503_v19 }
 0x1d4   :  { %9137 = vmatmul.msk.bf16.gmra.mxu3 %vm93_vm3, %v11696_v20 }
 0x1d5   :  { %9105 = vmatmul.msk.bf16.gmra.mxu2 %vm93_vm3, %v1138_v23  ;;  %v455_v23 = vld [vmem:[#allocation2 + $0x139] sm:$0xff] }
 0x1d6   :  { %v906_v28 = vpop.f32.mrf.mxu1 }
 0x1d7   :  { %v1705_v29 = vpop.f32.mrf.mxu3  ;;  %v907_v30 = vadd.f32 %v906_v28, %v638_v55 }
 0x1d8   :  { %v1280_v31 = vpop.f32.mrf.mxu2  ;;  %v648_v32 = vpop.f32.mrf.mxu0 }
 0x1d9   :  { %v1431_v33 = vadd.f32 %v1272_v60, %v907_v30  ;;  %v453_v60 = vld [vmem:[#allocation2 + $0x121] sm:$0xff] }
 0x1da   :  { %v505_v7 = vpack.c.bf16 %v454_v61, %v453_v60  ;;  %v456_v24 = vld [vmem:[#allocation2 + $0x141] sm:$0xff] }
 0x1db   :  { %v11713_v34 = vadd.f32 %v1702_v17, %v1431_v33  ;;  %v1519_v26 = vld [vmem:[#allocation2 + $0x140] sm:$0xff]  ;;  %v506_v35 = vpack.c.bf16 %v456_v24, %v455_v23  ;;  %v1095_v23 = vld [vmem:[#allocation2 + $0x172] sm:$0xff] }
 0x1dc   :  { %v1090_v28 = vld [vmem:[#allocation2 + $0x13a] sm:$0xff]  ;;  %v11755_v36 = vpack.c.bf16 %v1519_v26, %v1518_v25 }
 0x1de   :  { %v909_v41 = vpop.f32.mrf.mxu1 }
 0x1df   :  { %v1707_v42 = vpop.f32.mrf.mxu3  ;;  %v910_v43 = vadd.f32 %v909_v41, %v641_v2  ;;  %v1089_v2 = vld [vmem:[#allocation2 + $0x12a] sm:$0xff] }
 0x1e0   :  { %v1282_v46 = vpop.f32.mrf.mxu2  ;;  %v651_v47 = vpop.f32.mrf.mxu0 }
 0x1e1   :  { %v1432_v51 = vadd.f32 %v1275_v8, %v910_v43  ;;  %9071 = vmatmul.msk.bf16.gmra.mxu1 %vm93_vm3, %v11679_v1  ;;  %v1088_v1 = vld [vmem:[#allocation2 + $0x122] sm:$0xff]  ;;  %v11735_v8 = vpack.c.bf16 %v1517_v0, %v1516_v62 }
 0x1e3   :  { %v11727_v52 = vadd.f32 %v1705_v29, %v1432_v51  ;;  %9041 = vmatmul.msk.bf16.gmra.mxu0 %vm93_vm3, %v504_v44  ;;  %v1091_v29 = vld [vmem:[#allocation2 + $0x142] sm:$0xff]  ;;  %v458_v51 = vld [vmem:[#allocation2 + $0x159] sm:$0xff] }
 0x1e4   :  { %9138 = vmatmul.msk.bf16.gmra.mxu3 %vm93_vm3, %v11715_v45  ;;  %v507_v62 = vpack.c.bf16 %v458_v51, %v457_v50  ;;  %v1096_v51 = vld [vmem:[#allocation2 + $0x1b2] sm:$0xff] }
 0x1e5   :  { %9106 = vmatmul.msk.bf16.gmra.mxu2 %vm93_vm3, %v1139_v48 }
 0x1e6   :  { %v911_v53 = vpop.f32.mrf.mxu1 }
 0x1e7   :  { %v1710_v54 = vpop.f32.mrf.mxu3  ;;  %v912_v55 = vadd.f32 %v911_v53, %v643_v9  ;;  %v1140_v9 = vpack.c.bf16 %v1089_v2, %v1088_v1  ;;  %v1520_v53 = vld [vmem:[#allocation2 + $0x150] sm:$0xff] }
 0x1e8   :  { %v1285_v56 = vpop.f32.mrf.mxu2  ;;  %v653_v57 = vpop.f32.mrf.mxu0 }
 0x1e9   :  { %v1433_v58 = vadd.f32 %v1277_v21, %v912_v55  ;;  %v1092_v55 = vld [vmem:[#allocation2 + $0x152] sm:$0xff] }
 0x1eb   :  { %v11733_v59 = vadd.f32 %v1707_v42, %v1433_v58 }
 0x1ee   :  { %v914_v3 = vpop.f32.mrf.mxu1 }
 0x1ef   :  { %v1712_v4 = vpop.f32.mrf.mxu3  ;;  %v915_v5 = vadd.f32 %v914_v3, %v646_v22 }
 0x1f0   :  { %v1287_v10 = vpop.f32.mrf.mxu2  ;;  %v656_v11 = vpop.f32.mrf.mxu0 }
 0x1f1   :  { %v1434_v14 = vadd.f32 %v1280_v31, %v915_v5  ;;  %9072 = vmatmul.msk.bf16.gmra.mxu1 %vm93_vm3, %v11696_v20  ;;  %v233_v5 = vld [vmem:[%s13759_s0 + $0xf0] sm:$0xff] }
 0x1f2   :  { %298 = vst.msk [vmem:[#allocation2 + $0x181] sm:$0xff] %vm93_vm3, %v233_v5 }
 0x1f3   :  { %v11747_v15 = vadd.f32 %v1710_v54, %v1434_v14  ;;  %9042 = vmatmul.msk.bf16.gmra.mxu0 %vm93_vm3, %v505_v7  ;;  %v1521_v54 = vld [vmem:[#allocation2 + $0x158] sm:$0xff] }
 0x1f4   :  { %9139 = vmatmul.msk.bf16.gmra.mxu3 %vm93_vm3, %v11735_v8  ;;  %v11775_v0 = vpack.c.bf16 %v1521_v54, %v1520_v53  ;;  %v234_v7 = vld [vmem:[%s13759_s0 + $0xf8] sm:$0xff] }
 0x1f5   :  { %9107 = vmatmul.msk.bf16.gmra.mxu2 %vm93_vm3, %v1140_v9  ;;  %299 = vst.msk [vmem:[#allocation2 + $0x189] sm:$0xff] %vm93_vm3, %v234_v7  ;;  %v1097_v53 = vld [vmem:[#allocation2 + $0x1ba] sm:$0xff] }
 0x1f6   :  { %v916_v16 = vpop.f32.mrf.mxu1 }
 0x1f7   :  { %v1715_v17 = vpop.f32.mrf.mxu3  ;;  %v917_v18 = vadd.f32 %v916_v16, %v648_v32  ;;  %v1141_v32 = vpack.c.bf16 %v1091_v29, %v1090_v28  ;;  %v459_v16 = vld [vmem:[#allocation2 + $0x169] sm:$0xff] }
 0x1f8   :  { %v1290_v19 = vpop.f32.mrf.mxu2  ;;  %v658_v21 = vpop.f32.mrf.mxu0 }
 0x1f9   :  { %v1435_v22 = vadd.f32 %v1282_v46, %v917_v18  ;;  %v1522_v18 = vld [vmem:[#allocation2 + $0x168] sm:$0xff] }
 0x1fb   :  { %v11753_v20 = vadd.f32 %v1712_v4, %v1435_v22  ;;  %v1094_v22 = vld [vmem:[#allocation2 + $0x16a] sm:$0xff] }
 0x1fc   :  { %v1525_v50 = vld [vmem:[#allocation2 + $0x188] sm:$0xff] }
 0x1fe   :  { %v919_v30 = vpop.f32.mrf.mxu1 }
 0x1ff   :  { %v1717_v31 = vpop.f32.mrf.mxu3  ;;  %v920_v33 = vadd.f32 %v919_v30, %v651_v47 }
 0x200   :  { %v1292_v37 = vpop.f32.mrf.mxu2  ;;  %v661_v38 = vpop.f32.mrf.mxu0 }
 0x201   :  { %v1436_v41 = vadd.f32 %v1285_v56, %v920_v33  ;;  %9073 = vmatmul.msk.bf16.gmra.mxu1 %vm93_vm3, %v11715_v45  ;;  %v1093_v56 = vld [vmem:[#allocation2 + $0x15a] sm:$0xff] }
 0x202   :  { %v235_v33 = vld [vmem:[%s13759_s0 + $0x100] sm:$0xff] }
 0x203   :  { %v11767_v42 = vadd.f32 %v1715_v17, %v1436_v41  ;;  %9043 = vmatmul.msk.bf16.gmra.mxu0 %vm93_vm3, %v506_v35  ;;  %v460_v17 = vld [vmem:[#allocation2 + $0x171] sm:$0xff]  ;;  %v236_v35 = vld [vmem:[%s13759_s0 + $0x108] sm:$0xff]  ;;  %300 = vst.msk [vmem:[#allocation2 + $0x1c9] sm:$0xff] %vm93_vm3, %v235_v33 }
 0x204   :  { %9140 = vmatmul.msk.bf16.gmra.mxu3 %vm93_vm3, %v11755_v36  ;;  %v508_v28 = vpack.c.bf16 %v460_v17, %v459_v16  ;;  %301 = vst.msk [vmem:[#allocation2 + $0x1d1] sm:$0xff] %vm93_vm3, %v236_v35  ;;  %v240_v35 = vld [vmem:[%s13759_s0 + $0x128] sm:$0xff] }
 0x205   :  { %9108 = vmatmul.msk.bf16.gmra.mxu2 %vm93_vm3, %v1141_v32  ;;  %305 = vst.msk [vmem:[#allocation2 + $0x201] sm:$0xff] %vm93_vm3, %v240_v35 }
 0x206   :  { %v921_v43 = vpop.f32.mrf.mxu1 }
 0x207   :  { %v1720_v44 = vpop.f32.mrf.mxu3  ;;  %v922_v46 = vadd.f32 %v921_v43, %v653_v57  ;;  %v1142_v57 = vpack.c.bf16 %v1093_v56, %v1092_v55 }
 0x208   :  { %v1295_v47 = vpop.f32.mrf.mxu2  ;;  %v663_v48 = vpop.f32.mrf.mxu0 }
 0x209   :  { %v1437_v49 = vadd.f32 %v1287_v10, %v922_v46  ;;  %v461_v46 = vld [vmem:[#allocation2 + $0x1b1] sm:$0xff] }
 0x20a   :  { %v1526_v17 = vld [vmem:[#allocation2 + $0x1c8] sm:$0xff] }
 0x20b   :  { %v11773_v45 = vadd.f32 %v1717_v31, %v1437_v49  ;;  %v1524_v49 = vld [vmem:[#allocation2 + $0x180] sm:$0xff]  ;;  %v464_v16 = vld [vmem:[#allocation2 + $0x1d1] sm:$0xff] }
 0x20e   :  { %v924_v58 = vpop.f32.mrf.mxu1 }
 0x20f   :  { %v1722_v60 = vpop.f32.mrf.mxu3  ;;  %v925_v61 = vadd.f32 %v924_v58, %v656_v11 }
 0x210   :  { %v1297_v1 = vpop.f32.mrf.mxu2  ;;  %v666_v2 = vpop.f32.mrf.mxu0 }
 0x211   :  { %v1438_v3 = vadd.f32 %v1290_v19, %v925_v61  ;;  %9074 = vmatmul.msk.bf16.gmra.mxu1 %vm93_vm3, %v11735_v8  ;;  %v1523_v19 = vld [vmem:[#allocation2 + $0x170] sm:$0xff] }
 0x212   :  { %v11795_v29 = vpack.c.bf16 %v1523_v19, %v1522_v18  ;;  %v1527_v18 = vld [vmem:[#allocation2 + $0x1d0] sm:$0xff] }
 0x213   :  { %v11779_v4 = vadd.f32 %v1720_v44, %v1438_v3  ;;  %9044 = vmatmul.msk.bf16.gmra.mxu0 %vm93_vm3, %v507_v62  ;;  %v1098_v19 = vld [vmem:[#allocation2 + $0x1ca] sm:$0xff] }
 0x214   :  { %9141 = vmatmul.msk.bf16.gmra.mxu3 %vm93_vm3, %v11775_v0 }
 0x215   :  { %9109 = vmatmul.msk.bf16.gmra.mxu2 %vm93_vm3, %v1142_v57  ;;  %v1144_v57 = vpack.c.bf16 %v1097_v53, %v1096_v51 }
 0x216   :  { %v926_v8 = vpop.f32.mrf.mxu1 }
 0x217   :  { %v1725_v10 = vpop.f32.mrf.mxu3  ;;  %v927_v11 = vadd.f32 %v926_v8, %v658_v21  ;;  %v1143_v21 = vpack.c.bf16 %v1095_v23, %v1094_v22  ;;  %v1099_v22 = vld [vmem:[#allocation2 + $0x1d2] sm:$0xff] }
 0x218   :  { %v1300_v9 = vpop.f32.mrf.mxu2  ;;  %v668_v12 = vpop.f32.mrf.mxu0  ;;  %v1145_v33 = vpack.c.bf16 %v1099_v22, %v1098_v19 }
 0x219   :  { %v1439_v13 = vadd.f32 %v1292_v37, %v927_v11 }
 0x21b   :  { %v11793_v14 = vadd.f32 %v1722_v60, %v1439_v13  ;;  %v1573_v60 = vpack.c.bf16 %v1525_v50, %v1524_v49  ;;  %v463_v13 = vld [vmem:[#allocation2 + $0x1c9] sm:$0xff] }
 0x21e   :  { %v929_v24 = vpop.f32.mrf.mxu1 }
 0x21f   :  { %v1727_v25 = vpop.f32.mrf.mxu3  ;;  %v930_v26 = vadd.f32 %v929_v24, %v661_v38 }
 0x220   :  { %v1302_v30 = vpop.f32.mrf.mxu2  ;;  %v671_v31 = vpop.f32.mrf.mxu0 }
 0x221   :  { %v1440_v37 = vadd.f32 %v1295_v47, %v930_v26  ;;  %9075 = vmatmul.msk.bf16.gmra.mxu1 %vm93_vm3, %v11755_v36  ;;  %v462_v47 = vld [vmem:[#allocation2 + $0x1b9] sm:$0xff]  ;;  %v510_v26 = vpack.c.bf16 %v464_v16, %v463_v13 }
 0x222   :  { %v509_v58 = vpack.c.bf16 %v462_v47, %v461_v46  ;;  %v364_v46 = vld [vmem:[#allocation2 + $0x1b0] sm:$0xff]  ;;  %v365_v47 = vld [vmem:[#allocation2 + $0x1b8] sm:$0xff] }
 0x223   :  { %v11807_v38 = vadd.f32 %v1725_v10, %v1440_v37  ;;  %9045 = vmatmul.msk.bf16.gmra.mxu0 %vm93_vm3, %v508_v28  ;;  %v11834_v28 = vpack.c.bf16 %v1527_v18, %v1526_v17 }
 0x224   :  { %9142 = vmatmul.msk.bf16.gmra.mxu3 %vm93_vm3, %v11795_v29 }
 0x225   :  { %9110 = vmatmul.msk.bf16.gmra.mxu2 %vm93_vm3, %v1143_v21 }
 0x226   :  { %v931_v32 = vpop.f32.mrf.mxu1 }
 0x227   :  { %v1730_v39 = vpop.f32.mrf.mxu3  ;;  %v932_v40 = vadd.f32 %v931_v32, %v663_v48  ;;  %v237_v48 = vld [vmem:[%s13759_s0 + $0x110] sm:$0xff] }
 0x228   :  { %v1305_v41 = vpop.f32.mrf.mxu2  ;;  %v673_v43 = vpop.f32.mrf.mxu0  ;;  %302 = vst.msk [vmem:[#allocation2 + $0x1e1] sm:$0xff] %vm93_vm3, %v237_v48 }
 0x229   :  { %v1441_v44 = vadd.f32 %v1297_v1, %v932_v40  ;;  %v238_v1 = vld [vmem:[%s13759_s0 + $0x118] sm:$0xff] }
 0x22a   :  { %303 = vst.msk [vmem:[#allocation2 + $0x1e9] sm:$0xff] %vm93_vm3, %v238_v1 }
 0x22b   :  { %v11813_v36 = vadd.f32 %v1727_v25, %v1441_v44 }
 0x22e   :  { %v934_v54 = vpop.f32.mrf.mxu1 }
 0x22f   :  { %v1732_v55 = vpop.f32.mrf.mxu3  ;;  %v935_v56 = vadd.f32 %v934_v54, %v666_v2  ;;  %v465_v50 = vld [vmem:[#allocation2 + $0x1e1] sm:$0xff] }
 0x230   :  { %v1307_v61 = vpop.f32.mrf.mxu2  ;;  %v676_v62 = vpop.f32.mrf.mxu0  ;;  %v1528_v53 = vld [vmem:[#allocation2 + $0x1e0] sm:$0xff] }
 0x231   :  { %v1442_v3 = vadd.f32 %v1300_v9, %v935_v56  ;;  %9076 = vmatmul.msk.bf16.gmra.mxu1 %vm93_vm3, %v11775_v0  ;;  %v466_v51 = vld [vmem:[#allocation2 + $0x1e9] sm:$0xff] }
 0x232   :  { %v1529_v54 = vld [vmem:[#allocation2 + $0x1e8] sm:$0xff]  ;;  %v511_v1 = vpack.c.bf16 %v466_v51, %v465_v50 }
 0x233   :  { %v11825_v2 = vadd.f32 %v1730_v39, %v1442_v3  ;;  %9046 = vmatmul.msk.bf16.gmra.mxu0 %vm93_vm3, %v509_v58  ;;  %v1100_v56 = vld [vmem:[#allocation2 + $0x1e2] sm:$0xff]  ;;  %v1101_v58 = vld [vmem:[#allocation2 + $0x1ea] sm:$0xff] }
 0x234   :  { %9143 = vmatmul.msk.bf16.gmra.mxu3 %vm93_vm3, %v1573_v60 }
 0x235   :  { %9111 = vmatmul.msk.bf16.gmra.mxu2 %vm93_vm3, %v1144_v57 }
 0x236   :  { %v936_v5 = vpop.f32.mrf.mxu1 }
 0x237   :  { %v1735_v7 = vpop.f32.mrf.mxu3  ;;  %v937_v8 = vadd.f32 %v936_v5, %v668_v12 }
 0x238   :  { %v1310_v10 = vpop.f32.mrf.mxu2  ;;  %v11830_v11 = vpop.f32.mrf.mxu0 }
 0x239   :  { %v1443_v9 = vadd.f32 %v1302_v30, %v937_v8  ;;  %v239_v30 = vld [vmem:[%s13759_s0 + $0x120] sm:$0xff]  ;;  %v242_v8 = vld [vmem:[%s13759_s0 + $0x138] sm:$0xff] }
 0x23a   :  { %304 = vst.msk [vmem:[#allocation2 + $0x1f9] sm:$0xff] %vm93_vm3, %v239_v30  ;;  %v1103_v30 = vld [vmem:[#allocation2 + $0x202] sm:$0xff] }
 0x23b   :  { %v11832_v0 = vadd.f32 %v1732_v55, %v1443_v9  ;;  %v412_v55 = vpack.c.bf16 %v365_v47, %v364_v46  ;;  %307 = vst.msk [vmem:[#allocation2 + $0x219] sm:$0xff] %vm93_vm3, %v242_v8  ;;  %v244_v47 = vld [vmem:[%s13759_s0 + $0x148] sm:$0xff] }
 0x23c   :  { %309 = vst.msk [vmem:[#allocation2 + $0x231] sm:$0xff] %vm93_vm3, %v244_v47 }
 0x23e   :  { %v939_v23 = vpop.f32.mrf.mxu1 }
 0x23f   :  { %v1737_v24 = vpop.f32.mrf.mxu3  ;;  %v940_v25 = vadd.f32 %v939_v23, %v671_v31 }
 0x240   :  { %v1312_v21 = vpop.f32.mrf.mxu2  ;;  %v681_v12 = vpop.f32.mrf.mxu0 }
 0x241   :  { %v1444_v37 = vadd.f32 %v1305_v41, %v940_v25  ;;  %9077 = vmatmul.msk.bf16.gmra.mxu1 %vm93_vm3, %v11795_v29  ;;  %v467_v23 = vld [vmem:[#allocation2 + $0x1f9] sm:$0xff] }
 0x242   :  { %v1530_v25 = vld [vmem:[#allocation2 + $0x1f8] sm:$0xff] }
 0x243   :  { %v11846_v31 = vadd.f32 %v1735_v7, %v1444_v37  ;;  %9047 = vmatmul.msk.bf16.gmra.mxu0 %vm93_vm3, %v510_v26  ;;  %v241_v7 = vld [vmem:[%s13759_s0 + $0x130] sm:$0xff]  ;;  %v1531_v26 = vld [vmem:[#allocation2 + $0x200] sm:$0xff] }
 0x244   :  { %9144 = vmatmul.msk.bf16.gmra.mxu3 %vm93_vm3, %v11834_v28  ;;  %306 = vst.msk [vmem:[#allocation2 + $0x211] sm:$0xff] %vm93_vm3, %v241_v7  ;;  %v1107_v47 = vld [vmem:[#allocation2 + $0x232] sm:$0xff] }
 0x245   :  { %9112 = vmatmul.msk.bf16.gmra.mxu2 %vm93_vm3, %v1145_v33  ;;  %v1102_v33 = vld [vmem:[#allocation2 + $0x1fa] sm:$0xff] }
 0x246   :  { %v941_v32 = vpop.f32.mrf.mxu1 }
 0x247   :  { %v1740_v39 = vpop.f32.mrf.mxu3  ;;  %v942_v40 = vadd.f32 %v941_v32, %v673_v43  ;;  %v11856_v43 = vpack.c.bf16 %v1529_v54, %v1528_v53 }
 0x248   :  { %v1315_v41 = vpop.f32.mrf.mxu2  ;;  %v11852_v44 = vpop.f32.mrf.mxu0 }
 0x249   :  { %v1445_v29 = vadd.f32 %v1307_v61, %v942_v40  ;;  %v1146_v61 = vpack.c.bf16 %v1101_v58, %v1100_v56  ;;  %v11876_v40 = vpack.c.bf16 %v1531_v26, %v1530_v25 }
 0x24b   :  { %v11854_v49 = vadd.f32 %v1737_v24, %v1445_v29  ;;  %v468_v24 = vld [vmem:[#allocation2 + $0x201] sm:$0xff]  ;;  %v469_v58 = vld [vmem:[#allocation2 + $0x211] sm:$0xff] }
 0x24e   :  { %v944_v60 = vpop.f32.mrf.mxu1 }
 0x24f   :  { %v1742_v57 = vpop.f32.mrf.mxu3  ;;  %v945_v48 = vadd.f32 %v944_v60, %v676_v62  ;;  %v470_v60 = vld [vmem:[#allocation2 + $0x219] sm:$0xff] }
 0x250   :  { %v1317_v3 = vpop.f32.mrf.mxu2  ;;  %v686_v5 = vpop.f32.mrf.mxu0 }
 0x251   :  { %v1446_v9 = vadd.f32 %v1310_v10, %v945_v48  ;;  %9078 = vmatmul.msk.bf16.gmra.mxu1 %vm93_vm3, %v412_v55  ;;  %v1533_v48 = vld [vmem:[#allocation2 + $0x218] sm:$0xff] }
 0x253   :  { %v11867_v62 = vadd.f32 %v1740_v39, %v1446_v9  ;;  %9048 = vmatmul.msk.bf16.gmra.mxu0 %vm93_vm3, %v511_v1  ;;  %v512_v39 = vpack.c.bf16 %v468_v24, %v467_v23  ;;  %v1104_v1 = vld [vmem:[#allocation2 + $0x212] sm:$0xff] }
 0x254   :  { %9145 = vmatmul.msk.bf16.gmra.mxu3 %vm93_vm3, %v11856_v43  ;;  %v246_v23 = vld [vmem:[%s13759_s0 + $0x158] sm:$0xff] }
 0x255   :  { %9113 = vmatmul.msk.bf16.gmra.mxu2 %vm93_vm3, %v1146_v61  ;;  %v1105_v61 = vld [vmem:[#allocation2 + $0x21a] sm:$0xff]  ;;  %311 = vst.msk [vmem:[#allocation2 + $0x249] sm:$0xff] %vm93_vm3, %v246_v23 }
 0x256   :  { %v946_v13 = vpop.f32.mrf.mxu1 }
 0x257   :  { %v1745_v16 = vpop.f32.mrf.mxu3  ;;  %v947_v17 = vadd.f32 %v946_v13, %v11830_v11  ;;  %v1147_v11 = vpack.c.bf16 %v1103_v30, %v1102_v33  ;;  %v513_v13 = vpack.c.bf16 %v470_v60, %v469_v58 }
 0x258   :  { %v1320_v10 = vpop.f32.mrf.mxu2  ;;  %v688_v18 = vpop.f32.mrf.mxu0 }
 0x259   :  { %v1447_v19 = vadd.f32 %v1312_v21, %v947_v17  ;;  %v243_v21 = vld [vmem:[%s13759_s0 + $0x140] sm:$0xff] }
 0x25a   :  { %308 = vst.msk [vmem:[#allocation2 + $0x229] sm:$0xff] %vm93_vm3, %v243_v21 }
 0x25b   :  { %v11874_v22 = vadd.f32 %v1742_v57, %v1447_v19  ;;  %v1532_v57 = vld [vmem:[#allocation2 + $0x210] sm:$0xff] }
 0x25e   :  { %v949_v35 = vpop.f32.mrf.mxu1 }
 0x25f   :  { %v1747_v37 = vpop.f32.mrf.mxu3  ;;  %v950_v32 = vadd.f32 %v949_v35, %v681_v12 }
 0x260   :  { %v1322_v29 = vpop.f32.mrf.mxu2  ;;  %v691_v46 = vpop.f32.mrf.mxu0 }
 0x261   :  { %v1448_v50 = vadd.f32 %v1315_v41, %v950_v32  ;;  %9079 = vmatmul.msk.bf16.gmra.mxu1 %vm93_vm3, %v11834_v28  ;;  %v472_v32 = vld [vmem:[#allocation2 + $0x231] sm:$0xff] }
 0x262   :  { %v1106_v21 = vld [vmem:[#allocation2 + $0x22a] sm:$0xff] }
 0x263   :  { %v11888_v12 = vadd.f32 %v1745_v16, %v1448_v50  ;;  %9049 = vmatmul.msk.bf16.gmra.mxu0 %vm93_vm3, %v512_v39  ;;  %v11897_v16 = vpack.c.bf16 %v1533_v48, %v1532_v57  ;;  %v1534_v39 = vld [vmem:[#allocation2 + $0x228] sm:$0xff] }
 0x264   :  { %9146 = vmatmul.msk.bf16.gmra.mxu3 %vm93_vm3, %v11876_v40  ;;  %v248_v57 = vld [vmem:[%s13759_s0 + $0x168] sm:$0xff] }
 0x265   :  { %9114 = vmatmul.msk.bf16.gmra.mxu2 %vm93_vm3, %v1147_v11  ;;  %v1535_v11 = vld [vmem:[#allocation2 + $0x230] sm:$0xff]  ;;  %313 = vst.msk [vmem:[#allocation2 + $0x261] sm:$0xff] %vm93_vm3, %v248_v57 }
 0x266   :  { %v951_v51 = vpop.f32.mrf.mxu1 }
 0x267   :  { %v1750_v53 = vpop.f32.mrf.mxu3  ;;  %v952_v41 = vadd.f32 %v951_v51, %v11852_v44  ;;  %v1148_v44 = vpack.c.bf16 %v1105_v61, %v1104_v1 }
 0x268   :  { %v1325_v54 = vpop.f32.mrf.mxu2  ;;  %v693_v55 = vpop.f32.mrf.mxu0 }
 0x269   :  { %v1449_v28 = vadd.f32 %v1317_v3, %v952_v41  ;;  %v245_v3 = vld [vmem:[%s13759_s0 + $0x150] sm:$0xff] }
 0x26a   :  { %310 = vst.msk [vmem:[#allocation2 + $0x241] sm:$0xff] %vm93_vm3, %v245_v3 }
 0x26b   :  { %v11895_v56 = vadd.f32 %v1747_v37, %v1449_v28  ;;  %v471_v37 = vld [vmem:[#allocation2 + $0x229] sm:$0xff]  ;;  %v11917_v28 = vpack.c.bf16 %v1535_v11, %v1534_v39 }
 0x26c   :  { %v514_v41 = vpack.c.bf16 %v472_v32, %v471_v37  ;;  %v476_v57 = vld [vmem:[#allocation2 + $0x261] sm:$0xff] }
 0x26e   :  { %v954_v7 = vpop.f32.mrf.mxu1 }
 0x26f   :  { %v1752_v8 = vpop.f32.mrf.mxu3  ;;  %v955_v9 = vadd.f32 %v954_v7, %v686_v5 }
 0x270   :  { %v1327_v17 = vpop.f32.mrf.mxu2  ;;  %v696_v19 = vpop.f32.mrf.mxu0 }
 0x271   :  { %v1450_v24 = vadd.f32 %v1320_v10, %v955_v9  ;;  %9080 = vmatmul.msk.bf16.gmra.mxu1 %vm93_vm3, %v11856_v43  ;;  %v1536_v3 = vld [vmem:[#allocation2 + $0x240] sm:$0xff]  ;;  %v1537_v23 = vld [vmem:[#allocation2 + $0x248] sm:$0xff] }
 0x272   :  { %v11937_v32 = vpack.c.bf16 %v1537_v23, %v1536_v3 }
 0x273   :  { %v11909_v5 = vadd.f32 %v1750_v53, %v1450_v24  ;;  %9050 = vmatmul.msk.bf16.gmra.mxu0 %vm93_vm3, %v513_v13  ;;  %v473_v13 = vld [vmem:[#allocation2 + $0x241] sm:$0xff] }
 0x274   :  { %9147 = vmatmul.msk.bf16.gmra.mxu3 %vm93_vm3, %v11897_v16  ;;  %v1108_v24 = vld [vmem:[#allocation2 + $0x242] sm:$0xff] }
 0x275   :  { %9115 = vmatmul.msk.bf16.gmra.mxu2 %vm93_vm3, %v1148_v44  ;;  %v474_v44 = vld [vmem:[#allocation2 + $0x249] sm:$0xff] }
 0x276   :  { %v956_v25 = vpop.f32.mrf.mxu1  ;;  %v515_v37 = vpack.c.bf16 %v474_v44, %v473_v13 }
 0x277   :  { %v1755_v26 = vpop.f32.mrf.mxu3  ;;  %v957_v33 = vadd.f32 %v956_v25, %v688_v18  ;;  %v1149_v18 = vpack.c.bf16 %v1107_v47, %v1106_v21  ;;  %v1109_v25 = vld [vmem:[#allocation2 + $0x24a] sm:$0xff]  ;;  %v250_v21 = vld [vmem:[%s13759_s0 + $0x178] sm:$0xff] }
 0x278   :  { %v1330_v10 = vpop.f32.mrf.mxu2  ;;  %v698_v30 = vpop.f32.mrf.mxu0  ;;  %315 = vst.msk [vmem:[#allocation2 + $0x279] sm:$0xff] %vm93_vm3, %v250_v21 }
 0x279   :  { %v1451_v35 = vadd.f32 %v1322_v29, %v957_v33  ;;  %v247_v29 = vld [vmem:[%s13759_s0 + $0x160] sm:$0xff] }
 0x27a   :  { %312 = vst.msk [vmem:[#allocation2 + $0x259] sm:$0xff] %vm93_vm3, %v247_v29 }
 0x27b   :  { %v11915_v43 = vadd.f32 %v1752_v8, %v1451_v35 }
 0x27e   :  { %v959_v50 = vpop.f32.mrf.mxu1 }
 0x27f   :  { %v1757_v51 = vpop.f32.mrf.mxu3  ;;  %v960_v53 = vadd.f32 %v959_v50, %v691_v46 }
 0x280   :  { %v1332_v58 = vpop.f32.mrf.mxu2  ;;  %v701_v60 = vpop.f32.mrf.mxu0 }
 0x281   :  { %v1452_v48 = vadd.f32 %v1325_v54, %v960_v53  ;;  %9081 = vmatmul.msk.bf16.gmra.mxu1 %vm93_vm3, %v11876_v40  ;;  %v475_v29 = vld [vmem:[#allocation2 + $0x259] sm:$0xff] }
 0x282   :  { %v516_v3 = vpack.c.bf16 %v476_v57, %v475_v29  ;;  %v1113_v29 = vld [vmem:[#allocation2 + $0x27a] sm:$0xff] }
 0x283   :  { %v11929_v46 = vadd.f32 %v1755_v26, %v1452_v48  ;;  %9051 = vmatmul.msk.bf16.gmra.mxu0 %vm93_vm3, %v514_v41  ;;  %v1538_v48 = vld [vmem:[#allocation2 + $0x258] sm:$0xff] }
 0x284   :  { %9148 = vmatmul.msk.bf16.gmra.mxu3 %vm93_vm3, %v11917_v28 }
 0x285   :  { %9116 = vmatmul.msk.bf16.gmra.mxu2 %vm93_vm3, %v1149_v18 }
 0x286   :  { %v961_v1 = vpop.f32.mrf.mxu1 }
 0x287   :  { %v1760_v61 = vpop.f32.mrf.mxu3  ;;  %v962_v7 = vadd.f32 %v961_v1, %v693_v55  ;;  %v1150_v55 = vpack.c.bf16 %v1109_v25, %v1108_v24  ;;  %v1539_v1 = vld [vmem:[#allocation2 + $0x260] sm:$0xff] }
 0x288   :  { %v1335_v54 = vpop.f32.mrf.mxu2  ;;  %v703_v8 = vpop.f32.mrf.mxu0  ;;  %v11957_v23 = vpack.c.bf16 %v1539_v1, %v1538_v48 }
 0x289   :  { %v1453_v9 = vadd.f32 %v1327_v17, %v962_v7  ;;  %v249_v17 = vld [vmem:[%s13759_s0 + $0x170] sm:$0xff]  ;;  %v1111_v7 = vld [vmem:[#allocation2 + $0x262] sm:$0xff] }
 0x28a   :  { %314 = vst.msk [vmem:[#allocation2 + $0x271] sm:$0xff] %vm93_vm3, %v249_v17 }
 0x28b   :  { %v11935_v40 = vadd.f32 %v1757_v51, %v1453_v9 }
 0x28e   :  { %v964_v26 = vpop.f32.mrf.mxu1 }
 0x28f   :  { %v1762_v33 = vpop.f32.mrf.mxu3  ;;  %v965_v35 = vadd.f32 %v964_v26, %v696_v19  ;;  %v252_v26 = vld [vmem:[%s13759_s0 + $0x188] sm:$0xff] }
 0x290   :  { %v1337_v39 = vpop.f32.mrf.mxu2  ;;  %v706_v11 = vpop.f32.mrf.mxu0  ;;  %317 = vst.msk [vmem:[#allocation2 + $0x291] sm:$0xff] %vm93_vm3, %v252_v26 }
 0x291   :  { %v1454_v47 = vadd.f32 %v1330_v10, %v965_v35  ;;  %9082 = vmatmul.msk.bf16.gmra.mxu1 %vm93_vm3, %v11897_v16 }
 0x293   :  { %v11949_v19 = vadd.f32 %v1760_v61, %v1454_v47  ;;  %9052 = vmatmul.msk.bf16.gmra.mxu0 %vm93_vm3, %v515_v37  ;;  %v1110_v61 = vld [vmem:[#allocation2 + $0x25a] sm:$0xff]  ;;  %v477_v47 = vld [vmem:[#allocation2 + $0x271] sm:$0xff] }
 0x294   :  { %9149 = vmatmul.msk.bf16.gmra.mxu3 %vm93_vm3, %v11937_v32 }
 0x295   :  { %9117 = vmatmul.msk.bf16.gmra.mxu2 %vm93_vm3, %v1150_v55 }
 0x296   :  { %v966_v50 = vpop.f32.mrf.mxu1 }
 0x297   :  { %v1765_v51 = vpop.f32.mrf.mxu3  ;;  %v967_v53 = vadd.f32 %v966_v50, %v698_v30  ;;  %v1151_v30 = vpack.c.bf16 %v1111_v7, %v1110_v61  ;;  %v478_v50 = vld [vmem:[#allocation2 + $0x279] sm:$0xff] }
 0x298   :  { %v1340_v10 = vpop.f32.mrf.mxu2  ;;  %v708_v41 = vpop.f32.mrf.mxu0  ;;  %v517_v61 = vpack.c.bf16 %v478_v50, %v477_v47 }
 0x299   :  { %v1455_v18 = vadd.f32 %v1332_v58, %v967_v53  ;;  %v251_v58 = vld [vmem:[%s13759_s0 + $0x180] sm:$0xff]  ;;  %v1540_v53 = vld [vmem:[#allocation2 + $0x270] sm:$0xff] }
 0x29a   :  { %316 = vst.msk [vmem:[#allocation2 + $0x289] sm:$0xff] %vm93_vm3, %v251_v58 }
 0x29b   :  { %v11955_v16 = vadd.f32 %v1762_v33, %v1455_v18  ;;  %v1112_v18 = vld [vmem:[#allocation2 + $0x272] sm:$0xff] }
 0x29e   :  { %v969_v9 = vpop.f32.mrf.mxu1 }
 0x29f   :  { %v1767_v13 = vpop.f32.mrf.mxu3  ;;  %v970_v44 = vadd.f32 %v969_v9, %v701_v60 }
 0x2a0   :  { %v1342_v24 = vpop.f32.mrf.mxu2  ;;  %v711_v25 = vpop.f32.mrf.mxu0 }
 0x2a1   :  { %v1456_v33 = vadd.f32 %v1335_v54, %v970_v44  ;;  %9083 = vmatmul.msk.bf16.gmra.mxu1 %vm93_vm3, %v11917_v28  ;;  %v1542_v47 = vld [vmem:[#allocation2 + $0x288] sm:$0xff] }
 0x2a2   :  { %v1114_v50 = vld [vmem:[#allocation2 + $0x28a] sm:$0xff] }
 0x2a3   :  { %v11969_v60 = vadd.f32 %v1765_v51, %v1456_v33  ;;  %9053 = vmatmul.msk.bf16.gmra.mxu0 %vm93_vm3, %v516_v3  ;;  %v1541_v51 = vld [vmem:[#allocation2 + $0x278] sm:$0xff] }
 0x2a4   :  { %9150 = vmatmul.msk.bf16.gmra.mxu3 %vm93_vm3, %v11957_v23  ;;  %v11977_v7 = vpack.c.bf16 %v1541_v51, %v1540_v53  ;;  %v1115_v53 = vld [vmem:[#allocation2 + $0x292] sm:$0xff] }
 0x2a5   :  { %9118 = vmatmul.msk.bf16.gmra.mxu2 %vm93_vm3, %v1151_v30 }
 0x2a6   :  { %v971_v35 = vpop.f32.mrf.mxu1 }
 0x2a7   :  { %v1770_v37 = vpop.f32.mrf.mxu3  ;;  %v972_v55 = vadd.f32 %v971_v35, %v703_v8  ;;  %v1152_v8 = vpack.c.bf16 %v1113_v29, %v1112_v18 }
 0x2a8   :  { %v1345_v54 = vpop.f32.mrf.mxu2  ;;  %v713_v17 = vpop.f32.mrf.mxu0 }
 0x2a9   :  { %v1457_v21 = vadd.f32 %v1337_v39, %v972_v55  ;;  %v253_v39 = vld [vmem:[%s13759_s0 + $0x190] sm:$0xff] }
 0x2aa   :  { %318 = vst.msk [vmem:[#allocation2 + $0x2a1] sm:$0xff] %vm93_vm3, %v253_v39  ;;  %v479_v55 = vld [vmem:[#allocation2 + $0x289] sm:$0xff] }
 0x2ab   :  { %v11975_v28 = vadd.f32 %v1767_v13, %v1457_v21  ;;  %v254_v13 = vld [vmem:[%s13759_s0 + $0x198] sm:$0xff] }
 0x2ac   :  { %319 = vst.msk [vmem:[#allocation2 + $0x2a9] sm:$0xff] %vm93_vm3, %v254_v13  ;;  %v480_v21 = vld [vmem:[#allocation2 + $0x291] sm:$0xff] }
 0x2ae   :  { %v974_v57 = vpop.f32.mrf.mxu1 }
 0x2af   :  { %v1772_v48 = vpop.f32.mrf.mxu3  ;;  %v975_v1 = vadd.f32 %v974_v57, %v706_v11  ;;  %v518_v57 = vpack.c.bf16 %v480_v21, %v479_v55 }
 0x2b0   :  { %v1347_v9 = vpop.f32.mrf.mxu2  ;;  %v716_v44 = vpop.f32.mrf.mxu0 }
 0x2b1   :  { %v1458_v3 = vadd.f32 %v1340_v10, %v975_v1  ;;  %9084 = vmatmul.msk.bf16.gmra.mxu1 %vm93_vm3, %v11937_v32  ;;  %v481_v55 = vld [vmem:[#allocation2 + $0x2a1] sm:$0xff] }
 0x2b3   :  { %v11989_v11 = vadd.f32 %v1770_v37, %v1458_v3  ;;  %9054 = vmatmul.msk.bf16.gmra.mxu0 %vm93_vm3, %v517_v61  ;;  %v1543_v37 = vld [vmem:[#allocation2 + $0x290] sm:$0xff] }
 0x2b4   :  { %9151 = vmatmul.msk.bf16.gmra.mxu3 %vm93_vm3, %v11977_v7  ;;  %v11997_v1 = vpack.c.bf16 %v1543_v37, %v1542_v47  ;;  %v482_v21 = vld [vmem:[#allocation2 + $0x2a9] sm:$0xff]  ;;  %v1544_v47 = vld [vmem:[#allocation2 + $0x2a0] sm:$0xff] }
 0x2b5   :  { %9119 = vmatmul.msk.bf16.gmra.mxu2 %vm93_vm3, %v1152_v8  ;;  %v1116_v37 = vld [vmem:[#allocation2 + $0x2a2] sm:$0xff] }
 0x2b6   :  { %v976_v30 = vpop.f32.mrf.mxu1 }
 0x2b7   :  { %v1775_v58 = vpop.f32.mrf.mxu3  ;;  %v977_v26 = vadd.f32 %v976_v30, %v708_v41  ;;  %v1153_v41 = vpack.c.bf16 %v1115_v53, %v1114_v50  ;;  %v1117_v50 = vld [vmem:[#allocation2 + $0x2aa] sm:$0xff] }
 0x2b8   :  { %v1350_v10 = vpop.f32.mrf.mxu2  ;;  %v718_v33 = vpop.f32.mrf.mxu0 }
 0x2b9   :  { %v1459_v35 = vadd.f32 %v1342_v24, %v977_v26  ;;  %v255_v24 = vld [vmem:[%s13759_s0 + $0x1a0] sm:$0xff] }
 0x2ba   :  { %320 = vst.msk [vmem:[#allocation2 + $0x2b9] sm:$0xff] %vm93_vm3, %v255_v24 }
 0x2bb   :  { %v11995_v32 = vadd.f32 %v1772_v48, %v1459_v35  ;;  %v256_v48 = vld [vmem:[%s13759_s0 + $0x1a8] sm:$0xff] }
 0x2bc   :  { %321 = vst.msk [vmem:[#allocation2 + $0x2c1] sm:$0xff] %vm93_vm3, %v256_v48 }
 0x2be   :  { %v979_v51 = vpop.f32.mrf.mxu1 }
 0x2bf   :  { %v1777_v18 = vpop.f32.mrf.mxu3  ;;  %v980_v29 = vadd.f32 %v979_v51, %v711_v25 }
 0x2c0   :  { %v1352_v61 = vpop.f32.mrf.mxu2  ;;  %v721_v8 = vpop.f32.mrf.mxu0 }
 0x2c1   :  { %v1460_v39 = vadd.f32 %v1345_v54, %v980_v29  ;;  %9085 = vmatmul.msk.bf16.gmra.mxu1 %vm93_vm3, %v11957_v23 }
 0x2c3   :  { %v12009_v25 = vadd.f32 %v1775_v58, %v1460_v39  ;;  %9055 = vmatmul.msk.bf16.gmra.mxu0 %vm93_vm3, %v518_v57  ;;  %v1545_v58 = vld [vmem:[#allocation2 + $0x2a8] sm:$0xff]  ;;  %v519_v57 = vpack.c.bf16 %v482_v21, %v481_v55 }
 0x2c4   :  { %9152 = vmatmul.msk.bf16.gmra.mxu3 %vm93_vm3, %v11997_v1  ;;  %v12017_v24 = vpack.c.bf16 %v1545_v58, %v1544_v47  ;;  %v483_v47 = vld [vmem:[#allocation2 + $0x2b9] sm:$0xff]  ;;  %v484_v58 = vld [vmem:[#allocation2 + $0x2c1] sm:$0xff] }
 0x2c5   :  { %9120 = vmatmul.msk.bf16.gmra.mxu2 %vm93_vm3, %v1153_v41 }
 0x2c6   :  { %v981_v13 = vpop.f32.mrf.mxu1 }
 0x2c7   :  { %v1780_v3 = vpop.f32.mrf.mxu3  ;;  %v982_v30 = vadd.f32 %v981_v13, %v713_v17  ;;  %v1154_v17 = vpack.c.bf16 %v1117_v50, %v1116_v37  ;;  %v1546_v37 = vld [vmem:[#allocation2 + $0x2b8] sm:$0xff] }
 0x2c8   :  { %v1355_v54 = vpop.f32.mrf.mxu2  ;;  %v723_v26 = vpop.f32.mrf.mxu0  ;;  %v1118_v50 = vld [vmem:[#allocation2 + $0x2ba] sm:$0xff] }
 0x2c9   :  { %v1461_v35 = vadd.f32 %v1347_v9, %v982_v30  ;;  %v257_v9 = vld [vmem:[%s13759_s0 + $0x1b0] sm:$0xff] }
 0x2ca   :  { %322 = vst.msk [vmem:[#allocation2 + $0x2d1] sm:$0xff] %vm93_vm3, %v257_v9 }
 0x2cb   :  { %v12015_v23 = vadd.f32 %v1777_v18, %v1461_v35  ;;  %v258_v18 = vld [vmem:[%s13759_s0 + $0x1b8] sm:$0xff] }
 0x2cc   :  { %323 = vst.msk [vmem:[#allocation2 + $0x2d9] sm:$0xff] %vm93_vm3, %v258_v18  ;;  %v520_v18 = vpack.c.bf16 %v484_v58, %v483_v47 }
 0x2cd   :  { %13773 = vst [vmem:[#allocation17_spill] sm:$0xff] %v12015_v23 }
 0x2ce   :  { %v984_v53 = vpop.f32.mrf.mxu1 }
 0x2cf   :  { %v1782_v51 = vpop.f32.mrf.mxu3  ;;  %v985_v29 = vadd.f32 %v984_v53, %v716_v44  ;;  %v1119_v53 = vld [vmem:[#allocation2 + $0x2c2] sm:$0xff] }
 0x2d0   :  { %v1357_v41 = vpop.f32.mrf.mxu2  ;;  %v726_v48 = vpop.f32.mrf.mxu0 }
 0x2d1   :  { %v1462_v39 = vadd.f32 %v1350_v10, %v985_v29  ;;  %9086 = vmatmul.msk.bf16.gmra.mxu1 %vm93_vm3, %v11977_v7 }
 0x2d3   :  { %v12029_v44 = vadd.f32 %v1780_v3, %v1462_v39  ;;  %9056 = vmatmul.msk.bf16.gmra.mxu0 %vm93_vm3, %v519_v57  ;;  %v1547_v3 = vld [vmem:[#allocation2 + $0x2c0] sm:$0xff] }
 0x2d4   :  { %9153 = vmatmul.msk.bf16.gmra.mxu3 %vm93_vm3, %v12017_v24  ;;  %v12037_v39 = vpack.c.bf16 %v1547_v3, %v1546_v37  ;;  %v485_v3 = vld [vmem:[#allocation2 + $0x2d1] sm:$0xff] }
 0x2d5   :  { %13774 = vst [vmem:[#allocation18_spill] sm:$0xff] %v12029_v44  ;;  %9121 = vmatmul.msk.bf16.gmra.mxu2 %vm93_vm3, %v1154_v17 }
 0x2d6   :  { %v986_v13 = vpop.f32.mrf.mxu1 }
 0x2d7   :  { %v1785_v30 = vpop.f32.mrf.mxu3  ;;  %v987_v35 = vadd.f32 %v986_v13, %v718_v33  ;;  %v1155_v33 = vpack.c.bf16 %v1119_v53, %v1118_v50  ;;  %v486_v50 = vld [vmem:[#allocation2 + $0x2d9] sm:$0xff] }
 0x2d8   :  { %v1360_v10 = vpop.f32.mrf.mxu2  ;;  %v728_v55 = vpop.f32.mrf.mxu0  ;;  %v1549_v53 = vld [vmem:[#allocation2 + $0x2d8] sm:$0xff] }
 0x2d9   :  { %v1463_v21 = vadd.f32 %v1352_v61, %v987_v35  ;;  %v259_v61 = vld [vmem:[%s13759_s0 + $0x1c0] sm:$0xff] }
 0x2da   :  { %324 = vst.msk [vmem:[#allocation2 + $0x2e9] sm:$0xff] %vm93_vm3, %v259_v61 }
 0x2db   :  { %v12035_v7 = vadd.f32 %v1782_v51, %v1463_v21  ;;  %v260_v51 = vld [vmem:[%s13759_s0 + $0x1c8] sm:$0xff] }
 0x2dc   :  { %325 = vst.msk [vmem:[#allocation2 + $0x2f1] sm:$0xff] %vm93_vm3, %v260_v51 }
 0x2dd   :  { %13775 = vst [vmem:[#allocation19_spill] sm:$0xff] %v12035_v7 }
 0x2de   :  { %v989_v29 = vpop.f32.mrf.mxu1 }
 0x2df   :  { %v1787_v57 = vpop.f32.mrf.mxu3  ;;  %v990_v9 = vadd.f32 %v989_v29, %v721_v8  ;;  %v1120_v29 = vld [vmem:[#allocation2 + $0x2d2] sm:$0xff] }
 0x2e0   :  { %v1362_v17 = vpop.f32.mrf.mxu2  ;;  %v731_v44 = vpop.f32.mrf.mxu0 }
 0x2e1   :  { %v1464_v13 = vadd.f32 %v1355_v54, %v990_v9  ;;  %9087 = vmatmul.msk.bf16.gmra.mxu1 %vm93_vm3, %v11997_v1  ;;  %v1121_v9 = vld [vmem:[#allocation2 + $0x2da] sm:$0xff] }
 0x2e3   :  { %v12049_v8 = vadd.f32 %v1785_v30, %v1464_v13  ;;  %9057 = vmatmul.msk.bf16.gmra.mxu0 %vm93_vm3, %v520_v18  ;;  %v1548_v30 = vld [vmem:[#allocation2 + $0x2d0] sm:$0xff]  ;;  %v521_v13 = vpack.c.bf16 %v486_v50, %v485_v3 }
 0x2e4   :  { %9154 = vmatmul.msk.bf16.gmra.mxu3 %vm93_vm3, %v12037_v39 }
 0x2e5   :  { %13776 = vst [vmem:[#allocation20_spill] sm:$0xff] %v12049_v8  ;;  %9122 = vmatmul.msk.bf16.gmra.mxu2 %vm93_vm3, %v1155_v33  ;;  %v12059_v33 = vpack.c.bf16 %v1549_v53, %v1548_v30 }
 0x2e6   :  { %v991_v35 = vpop.f32.mrf.mxu1 }
 0x2e7   :  { %v1790_v21 = vpop.f32.mrf.mxu3  ;;  %v992_v47 = vadd.f32 %v991_v35, %v723_v26  ;;  %v1156_v35 = vpack.c.bf16 %v1121_v9, %v1120_v29  ;;  %v487_v29 = vld [vmem:[#allocation2 + $0x2e9] sm:$0xff]  ;;  %v488_v9 = vld [vmem:[#allocation2 + $0x2f1] sm:$0xff] }
 0x2e8   :  { %v1365_v54 = vpop.f32.mrf.mxu2  ;;  %v12055_v58 = vpop.f32.mrf.mxu0 }
 0x2e9   :  { %v1465_v1 = vadd.f32 %v1357_v41, %v992_v47  ;;  %v261_v41 = vld [vmem:[%s13759_s0 + $0x1d0] sm:$0xff] }
 0x2ea   :  { %326 = vst.msk [vmem:[#allocation2 + $0x301] sm:$0xff] %vm93_vm3, %v261_v41 }
 0x2eb   :  { %v12057_v37 = vadd.f32 %v1787_v57, %v1465_v1  ;;  %v262_v57 = vld [vmem:[%s13759_s0 + $0x1d8] sm:$0xff] }
 0x2ec   :  { %327 = vst.msk [vmem:[#allocation2 + $0x309] sm:$0xff] %vm93_vm3, %v262_v57 }
 0x2ed   :  { %13777 = vst [vmem:[#allocation21_spill] sm:$0xff] %v12057_v37 }
 0x2ee   :  { %v994_v18 = vpop.f32.mrf.mxu1 }
 0x2ef   :  { %v1792_v61 = vpop.f32.mrf.mxu3  ;;  %v995_v51 = vadd.f32 %v994_v18, %v726_v48  ;;  %v1551_v18 = vld [vmem:[#allocation2 + $0x2f0] sm:$0xff] }
 0x2f0   :  { %v1367_v8 = vpop.f32.mrf.mxu2  ;;  %v12061_v26 = vpop.f32.mrf.mxu0 }
 0x2f1   :  { %v1466_v47 = vadd.f32 %v1360_v10, %v995_v51  ;;  %9088 = vmatmul.msk.bf16.gmra.mxu1 %vm93_vm3, %v12017_v24  ;;  %v1122_v51 = vld [vmem:[#allocation2 + $0x2ea] sm:$0xff] }
 0x2f3   :  { %v12073_v48 = vadd.f32 %v1790_v21, %v1466_v47  ;;  %9058 = vmatmul.msk.bf16.gmra.mxu0 %vm93_vm3, %v521_v13  ;;  %v1550_v21 = vld [vmem:[#allocation2 + $0x2e8] sm:$0xff]  ;;  %v1123_v13 = vld [vmem:[#allocation2 + $0x2f2] sm:$0xff] }
 0x2f4   :  { %9155 = vmatmul.msk.bf16.gmra.mxu3 %vm93_vm3, %v12059_v33 }
 0x2f5   :  { %13778 = vst [vmem:[#allocation22_spill] sm:$0xff] %v12073_v48  ;;  %9123 = vmatmul.msk.bf16.gmra.mxu2 %vm93_vm3, %v1156_v35  ;;  %v522_v48 = vpack.c.bf16 %v488_v9, %v487_v29  ;;  %v12083_v35 = vpack.c.bf16 %v1551_v18, %v1550_v21 }
 0x2f6   :  { %v996_v1 = vpop.f32.mrf.mxu1 }
 0x2f7   :  { %v1795_v3 = vpop.f32.mrf.mxu3  ;;  %v997_v50 = vadd.f32 %v996_v1, %v728_v55  ;;  %v1157_v1 = vpack.c.bf16 %v1123_v13, %v1122_v51  ;;  %v489_v51 = vld [vmem:[#allocation2 + $0x301] sm:$0xff]  ;;  %v9292_v13 = vld [vmem:[%s13760_s1 + $0x10] sm:$0x3] }
 0x2f8   :  { %v1370_v10 = vpop.f32.mrf.mxu2  ;;  %v12079_v30 = vpop.f32.mrf.mxu0 }
 0x2f9   :  { %v1467_v24 = vadd.f32 %v1362_v17, %v997_v50  ;;  %v9226_v17 = vld [vmem:[%s13760_s1 + $0xc] sm:$0x3] }
 0x2fb   :  { %v12081_v53 = vadd.f32 %v1792_v61, %v1467_v24  ;;  %v2980_v61 = vsel %vm623_vm2, %v9226_v17, 0  ;;  %v3840_v17 = vsel %vm623_vm2, %v9292_v13, 0 }
 0x2fc   :  { %2989 = vmatpush.bf16.msrb.mxu2 %v2980_v61  ;;  %3849 = vmatpush.bf16.msra.mxu0 %v3840_v17  ;;  %v1124_v61 = vld [vmem:[#allocation2 + $0x302] sm:$0xff]  ;;  %v1924_v17 = vld [vmem:[#allocation2 + $0x19] sm:$0xff] }
 0x2fd   :  { %13779 = vst [vmem:[#allocation23_spill] sm:$0xff] %v12081_v53 }
 0x2fe   :  { %v999_v41 = vpop.f32.mrf.mxu1 }
 0x2ff   :  { %v1797_v57 = vpop.f32.mrf.mxu3  ;;  %v1000_v47 = vadd.f32 %v999_v41, %v731_v44  ;;  %v9259_v44 = vld [vmem:[%s13760_s1 + $0xe] sm:$0x3] }
 0x300   :  { %v1372_v37 = vpop.f32.mrf.mxu2  ;;  %v12085_v55 = vpop.f32.mrf.mxu0  ;;  %v490_v41 = vld [vmem:[#allocation2 + $0x309] sm:$0xff] }
 0x301   :  { %v1468_v7 = vadd.f32 %v1365_v54, %v1000_v47  ;;  %9089 = vmatmul.msk.bf16.gmra.mxu1 %vm93_vm3, %v12037_v39  ;;  %v9193_v39 = vld [vmem:[%s13760_s1 + $0xa] sm:$0x3]  ;;  %v3410_v54 = vsel %vm623_vm2, %v9259_v44, 0  ;;  %v1552_v47 = vld [vmem:[#allocation2 + $0x300] sm:$0xff] }
 0x302   :  { %3419 = vmatpush.bf16.msrb.mxu3 %v3410_v54  ;;  %v1125_v44 = vld [vmem:[#allocation2 + $0x30a] sm:$0xff] }
 0x303   :  { %v12093_v50 = vadd.f32 %v1795_v3, %v1468_v7  ;;  %9059 = vmatmul.msk.bf16.gmra.mxu0 %vm93_vm3, %v522_v48  ;;  %v2549_v7 = vsel %vm623_vm2, %v9193_v39, 0 }
 0x304   :  { %9156 = vmatmul.msk.bf16.gmra.mxu3 %vm93_vm3, %v12083_v35  ;;  %2558 = vmatpush.bf16.msra.mxu1 %v2549_v7 }
 0x305   :  { %13780 = vst [vmem:[#allocation24_spill] sm:$0xff] %v12093_v50  ;;  %9124 = vmatmul.msk.bf16.gmra.mxu2 %vm93_vm3, %v1157_v1  ;;  %v1553_v1 = vld [vmem:[#allocation2 + $0x308] sm:$0xff] }
 0x306   :  { %v1001_v48 = vpop.f32.mrf.mxu1 }
 0x307   :  { %v1800_v3 = vpop.f32.mrf.mxu3  ;;  %v1002_v24 = vadd.f32 %v1001_v48, %v12055_v58 }
 0x308   :  { %v1375_v29 = vpop.f32.mrf.mxu2  ;;  %v743_v9 = vpop.f32.mrf.mxu0 }
 0x309   :  { %v1469_v21 = vadd.f32 %v1367_v8, %v1002_v24  ;;  %v523_v8 = vpack.c.bf16 %v490_v41, %v489_v51  ;;  %v1158_v24 = vpack.c.bf16 %v1125_v44, %v1124_v61  ;;  %v1925_v61 = vld [vmem:[#allocation2 + $0x21] sm:$0xff]  ;;  %v1554_v44 = vld [vmem:[#allocation2 + $0x318] sm:$0xff] }
 0x30b   :  { %v12108_v18 = vadd.f32 %v1797_v57, %v1469_v21  ;;  %v12115_v57 = vpack.c.bf16 %v1553_v1, %v1552_v47 }
 0x30d   :  { %13781 = vst [vmem:[#allocation25_spill] sm:$0xff] %v12108_v18 }
 0x30e   :  { %v1004_v39 = vpop.f32.mrf.mxu1 }
 0x30f   :  { %v1802_v58 = vpop.f32.mrf.mxu3  ;;  %v1005_v54 = vadd.f32 %v1004_v39, %v12061_v26  ;;  %v265_v26 = vld [vmem:[%s13759_s0 + $0x1f0] sm:$0xff]  ;;  %v1555_v39 = vld [vmem:[#allocation2 + $0x320] sm:$0xff] }
 0x310   :  { %v1377_v7 = vpop.f32.mrf.mxu2  ;;  %v746_v48 = vpop.f32.mrf.mxu0  ;;  %330 = vst.msk [vmem:[#allocation2 + $0x331] sm:$0xff] %vm93_vm3, %v265_v26  ;;  %v1588_v50 = vpack.c.bf16 %v1555_v39, %v1554_v44  ;;  %v1927_v39 = vld [vmem:[#allocation2 + $0x39] sm:$0xff] }
 0x311   :  { %v1470_v21 = vadd.f32 %v1370_v10, %v1005_v54  ;;  %9090 = vmatmul.msk.bf16.gmra.mxu1 %vm93_vm3, %v12059_v33  ;;  %v266_v10 = vld [vmem:[%s13759_s0 + $0x1f8] sm:$0xff] }
 0x312   :  { %331 = vst.msk [vmem:[#allocation2 + $0x339] sm:$0xff] %vm93_vm3, %v266_v10  ;;  %v1126_v54 = vld [vmem:[#allocation2 + $0x31a] sm:$0xff] }
 0x313   :  { %v12119_v18 = vadd.f32 %v1800_v3, %v1470_v21  ;;  %9060 = vmatmul.msk.bf16.gmra.mxu0 %vm93_vm3, %v523_v8  ;;  %v1127_v8 = vld [vmem:[#allocation2 + $0x322] sm:$0xff] }
 0x314   :  { %9157 = vmatmul.msk.bf16.gmra.mxu3 %vm93_vm3, %v12115_v57 }
 0x315   :  { %13782 = vst [vmem:[#allocation26_spill] sm:$0xff] %v12119_v18  ;;  %9125 = vmatmul.msk.bf16.gmra.mxu2 %vm93_vm3, %v1158_v24  ;;  %v1988_v18 = vpack.c.bf16 %v1925_v61, %v1924_v17 }
 0x316   :  { %v1006_v33 = vpop.f32.mrf.mxu1 }
 0x317   :  { %v1805_v3 = vpop.f32.mrf.mxu3  ;;  %v1007_v51 = vadd.f32 %v1006_v33, %v12079_v30  ;;  %v1159_v30 = vpack.c.bf16 %v1127_v8, %v1126_v54  ;;  %v1556_v54 = vld [vmem:[#allocation2 + $0x330] sm:$0xff]  ;;  %v2786_v8 = vld [vmem:[#allocation2 + $0x38] sm:$0xff] }
 0x318   :  { %v1380_v13 = vpop.f32.mrf.mxu2  ;;  %v748_v41 = vpop.f32.mrf.mxu0 }
 0x319   :  { %v1471_v47 = vadd.f32 %v1372_v37, %v1007_v51 }
 0x31b   :  { %v12134_v1 = vadd.f32 %v1802_v58, %v1471_v47 }
 0x31d   :  { %13783 = vst [vmem:[#allocation27_spill] sm:$0xff] %v12134_v1 }
 0x31e   :  { %v1009_v24 = vpop.f32.mrf.mxu1 }
 0x31f   :  { %v1807_v21 = vpop.f32.mrf.mxu3  ;;  %v1010_v26 = vadd.f32 %v1009_v24, %v12085_v55 }
 0x320   :  { %v1382_v10 = vpop.f32.mrf.mxu2  ;;  %v751_v53 = vpop.f32.mrf.mxu0 }
 0x321   :  { %v1472_v33 = vadd.f32 %v1375_v29, %v1010_v26  ;;  %9091 = vmatmul.msk.bf16.gmra.mxu1 %vm93_vm3, %v12083_v35  ;;  %v1926_v29 = vld [vmem:[#allocation2 + $0x31] sm:$0xff] }
 0x322   :  { %v1557_v35 = vld [vmem:[#allocation2 + $0x338] sm:$0xff] }
 0x323   :  { %v12139_v37 = vadd.f32 %v1805_v3, %v1472_v33  ;;  %9161 = vmatmul.msk.bf16.vlgmr.msrb.gmra.mxu0 %vm93_vm3, %v1988_v18  ;;  %v2785_v3 = vld [vmem:[#allocation2 + $0x30] sm:$0xff]  ;;  %v1989_v33 = vpack.c.bf16 %v1927_v39, %v1926_v29 }
 0x324   :  { %9158 = vmatmul.msk.bf16.gmra.mxu3 %vm93_vm3, %v1588_v50  ;;  %v2849_v23 = vpack.c.bf16 %v2786_v8, %v2785_v3 }
 0x325   :  { %13784 = vst [vmem:[#allocation28_spill] sm:$0xff] %v12139_v37  ;;  %9126 = vmatmul.msk.bf16.gmra.mxu2 %vm93_vm3, %v1159_v30  ;;  %v1589_v37 = vpack.c.bf16 %v1557_v35, %v1556_v54  ;;  %v1929_v54 = vld [vmem:[#allocation2 + $0x51] sm:$0xff]  ;;  %v2787_v35 = vld [vmem:[#allocation2 + $0x48] sm:$0xff] }
 0x326   :  { %v1011_v58 = vpop.f32.mrf.mxu1 }
 0x327   :  { %v1810_v51 = vpop.f32.mrf.mxu3  ;;  %v1012_v55 = vadd.f32 %v1011_v58, %v743_v9 }
 0x328   :  { %v1385_v47 = vpop.f32.mrf.mxu2  ;;  %v753_v17 = vpop.f32.mrf.mxu0 }
 0x329   :  { %v1473_v61 = vadd.f32 %v1377_v7, %v1012_v55 }
 0x32b   :  { %v12144_v44 = vadd.f32 %v1807_v21, %v1473_v61 }
 0x32e   :  { %v1014_v24 = vpop.f32.mrf.mxu1 }
 0x32f   :  { %v1812_v18 = vpop.f32.mrf.mxu3  ;;  %v1015_v26 = vadd.f32 %v1014_v24, %v746_v48 }
 0x330   :  { %v1387_v30 = vpop.f32.mrf.mxu2  ;;  %v756_v1 = vpop.f32.mrf.mxu0 }
 0x331   :  { %v1474_v9 = vadd.f32 %v1380_v13, %v1015_v26  ;;  %9092 = vmatmul.msk.bf16.gmra.mxu1 %vm93_vm3, %v12115_v57  ;;  %v1928_v13 = vld [vmem:[#allocation2 + $0x49] sm:$0xff] }
 0x332   :  { %v2788_v57 = vld [vmem:[#allocation2 + $0x50] sm:$0xff]  ;;  %v1990_v24 = vpack.c.bf16 %v1929_v54, %v1928_v13  ;;  %v2354_v13 = vld [vmem:[#allocation2 + $0x1a] sm:$0xff]  ;;  %v2355_v54 = vld [vmem:[#allocation2 + $0x22] sm:$0xff] }
 0x333   :  { %v12148_v7 = vadd.f32 %v1810_v51, %v1474_v9  ;;  %9162 = vmatmul.msk.bf16.gmra.mxu0 %vm93_vm3, %v1989_v33  ;;  %v2850_v9 = vpack.c.bf16 %v2788_v57, %v2787_v35  ;;  %v2789_v57 = vld [vmem:[#allocation2 + $0x60] sm:$0xff] }
 0x334   :  { %9159 = vmatmul.msk.bf16.gmra.mxu3 %vm93_vm3, %v1589_v37 }
 0x335   :  { %13785 = vst [vmem:[#allocation29_spill] sm:$0xff] %v12148_v7  ;;  %9227 = vmatmul.msk.bf16.vlgmr.msrb.gmra.mxu2 %vm93_vm3, %v2849_v23 }
 0x336   :  { %v1016_v21 = vpop.f32.mrf.mxu1 }
 0x337   :  { %v1815_v58 = vpop.f32.mrf.mxu3  ;;  %v1017_v48 = vadd.f32 %v1016_v21, %v748_v41 }
 0x338   :  { %v1390_v55 = vpop.f32.mrf.mxu2  ;;  %v758_v61 = vpop.f32.mrf.mxu0 }
 0x339   :  { %v1475_v29 = vadd.f32 %v1382_v10, %v1017_v48 }
 0x33b   :  { %v12153_v39 = vadd.f32 %v1812_v18, %v1475_v29 }
 0x33d   :  { %13786 = vst [vmem:[#allocation30_spill] sm:$0xff] %v12153_v39 }
 0x33e   :  { %v1019_v51 = vpop.f32.mrf.mxu1 }
 0x33f   :  { %v1817_v3 = vpop.f32.mrf.mxu3  ;;  %v1020_v8 = vadd.f32 %v1019_v51, %v751_v53  ;;  %v2790_v51 = vld [vmem:[#allocation2 + $0x68] sm:$0xff] }
 0x340   :  { %v1392_v26 = vpop.f32.mrf.mxu2  ;;  %v761_v37 = vpop.f32.mrf.mxu0  ;;  %v2851_v7 = vpack.c.bf16 %v2790_v51, %v2789_v57  ;;  %v2791_v57 = vld [vmem:[#allocation2 + $0x78] sm:$0xff]  ;;  %v2792_v51 = vld [vmem:[#allocation2 + $0x80] sm:$0xff] }
 0x341   :  { %v1476_v23 = vadd.f32 %v1385_v47, %v1020_v8  ;;  %9093 = vmatmul.msk.bf16.gmra.mxu1 %vm93_vm3, %v1588_v50  ;;  %v1930_v47 = vld [vmem:[#allocation2 + $0x61] sm:$0xff]  ;;  %v1931_v50 = vld [vmem:[#allocation2 + $0x69] sm:$0xff] }
 0x343   :  { %v12156_v41 = vadd.f32 %v1815_v58, %v1476_v23  ;;  %9163 = vmatmul.msk.bf16.gmra.mxu0 %vm93_vm3, %v1990_v24  ;;  %v2418_v58 = vpack.c.bf16 %v2355_v54, %v2354_v13  ;;  %v2356_v54 = vld [vmem:[#allocation2 + $0x32] sm:$0xff] }
 0x344   :  { %9260 = vmatmul.msk.bf16.vlgmr.msrb.gmra.mxu3 %vm93_vm3, %v1989_v33 }
 0x345   :  { %13787 = vst [vmem:[#allocation31_spill] sm:$0xff] %v12156_v41  ;;  %9228 = vmatmul.msk.bf16.gmra.mxu2 %vm93_vm3, %v2850_v9  ;;  %v1991_v41 = vpack.c.bf16 %v1931_v50, %v1930_v47  ;;  %v2357_v47 = vld [vmem:[#allocation2 + $0x3a] sm:$0xff] }
 0x346   :  { %v1021_v10 = vpop.f32.mrf.mxu1 }
 0x347   :  { %v1820_v18 = vpop.f32.mrf.mxu3  ;;  %v1022_v21 = vadd.f32 %v1021_v10, %v753_v17 }
 0x348   :  { %v1395_v48 = vpop.f32.mrf.mxu2  ;;  %v763_v53 = vpop.f32.mrf.mxu0 }
 0x349   :  { %v1477_v29 = vadd.f32 %v1387_v30, %v1022_v21 }
 0x34b   :  { %v12161_v35 = vadd.f32 %v1817_v3, %v1477_v29 }
 0x34d   :  { %13788 = vst [vmem:[#allocation32_spill] sm:$0xff] %v12161_v35  ;;  %v2852_v35 = vpack.c.bf16 %v2792_v51, %v2791_v57  ;;  %v2793_v57 = vld [vmem:[#allocation2 + $0x90] sm:$0xff]  ;;  %v2794_v51 = vld [vmem:[#allocation2 + $0x98] sm:$0xff] }
 0x34e   :  { %v1024_v8 = vpop.f32.mrf.mxu1 }
 0x34f   :  { %v1822_v23 = vpop.f32.mrf.mxu3  ;;  %v1025_v33 = vadd.f32 %v1024_v8, %v756_v1 }
 0x350   :  { %v1397_v9 = vpop.f32.mrf.mxu2  ;;  %v766_v39 = vpop.f32.mrf.mxu0 }
 0x351   :  { %v1478_v17 = vadd.f32 %v1390_v55, %v1025_v33  ;;  %9194 = vmatmul.msk.bf16.vlgmr.msra.gmra.mxu1 %vm93_vm3, %v2418_v58  ;;  %v1932_v55 = vld [vmem:[#allocation2 + $0x79] sm:$0xff]  ;;  %v1933_v58 = vld [vmem:[#allocation2 + $0x81] sm:$0xff] }
 0x353   :  { %v12164_v30 = vadd.f32 %v1820_v18, %v1478_v17  ;;  %9164 = vmatmul.msk.bf16.gmra.mxu0 %vm93_vm3, %v1991_v41  ;;  %v2419_v18 = vpack.c.bf16 %v2357_v47, %v2356_v54  ;;  %v1992_v17 = vpack.c.bf16 %v1933_v58, %v1932_v55  ;;  %v2358_v47 = vld [vmem:[#allocation2 + $0x4a] sm:$0xff]  ;;  %v2359_v55 = vld [vmem:[#allocation2 + $0x52] sm:$0xff] }
 0x354   :  { %9261 = vmatmul.msk.bf16.gmra.mxu3 %vm93_vm3, %v1990_v24 }
 0x355   :  { %13789 = vst [vmem:[#allocation33_spill] sm:$0xff] %v12164_v30  ;;  %9229 = vmatmul.msk.bf16.gmra.mxu2 %vm93_vm3, %v2851_v7 }
 0x356   :  { %v1026_v3 = vpop.f32.mrf.mxu1 }
 0x357   :  { %v1825_v10 = vpop.f32.mrf.mxu3  ;;  %v1027_v21 = vadd.f32 %v1026_v3, %v758_v61 }
 0x358   :  { %v1400_v29 = vpop.f32.mrf.mxu2  ;;  %v768_v1 = vpop.f32.mrf.mxu0 }
 0x359   :  { %v1479_v13 = vadd.f32 %v1392_v26, %v1027_v21 }
 0x35b   :  { %v12169_v50 = vadd.f32 %v1822_v23, %v1479_v13 }
 0x35d   :  { %13790 = vst [vmem:[#allocation34_spill] sm:$0xff] %v12169_v50  ;;  %v2853_v50 = vpack.c.bf16 %v2794_v51, %v2793_v57  ;;  %v2795_v57 = vld [vmem:[#allocation2 + $0xa8] sm:$0xff]  ;;  %v2796_v51 = vld [vmem:[#allocation2 + $0xb0] sm:$0xff] }
 0x35e   :  { %v1029_v8 = vpop.f32.mrf.mxu1 }
 0x35f   :  { %v1827_v33 = vpop.f32.mrf.mxu3  ;;  %v1030_v24 = vadd.f32 %v1029_v8, %v761_v37 }
 0x360   :  { %v1402_v7 = vpop.f32.mrf.mxu2  ;;  %v771_v30 = vpop.f32.mrf.mxu0 }
 0x361   :  { %v1480_v61 = vadd.f32 %v1395_v48, %v1030_v24  ;;  %9195 = vmatmul.msk.bf16.gmra.mxu1 %vm93_vm3, %v2419_v18  ;;  %v1934_v48 = vld [vmem:[#allocation2 + $0x91] sm:$0xff]  ;;  %v1935_v18 = vld [vmem:[#allocation2 + $0x99] sm:$0xff] }
 0x363   :  { %v12172_v26 = vadd.f32 %v1825_v10, %v1480_v61  ;;  %9165 = vmatmul.msk.bf16.gmra.mxu0 %vm93_vm3, %v1992_v17  ;;  %v2420_v10 = vpack.c.bf16 %v2359_v55, %v2358_v47  ;;  %v1993_v61 = vpack.c.bf16 %v1935_v18, %v1934_v48  ;;  %v2360_v55 = vld [vmem:[#allocation2 + $0x62] sm:$0xff]  ;;  %v2361_v48 = vld [vmem:[#allocation2 + $0x6a] sm:$0xff] }
 0x364   :  { %9262 = vmatmul.msk.bf16.gmra.mxu3 %vm93_vm3, %v1991_v41 }
 0x365   :  { %13791 = vst [vmem:[#allocation35_spill] sm:$0xff] %v12172_v26  ;;  %9230 = vmatmul.msk.bf16.gmra.mxu2 %vm93_vm3, %v2852_v35 }
 0x366   :  { %v1031_v23 = vpop.f32.mrf.mxu1 }
 0x367   :  { %v1830_v3 = vpop.f32.mrf.mxu3  ;;  %v1032_v21 = vadd.f32 %v1031_v23, %v763_v53 }
 0x368   :  { %v1405_v13 = vpop.f32.mrf.mxu2  ;;  %v773_v37 = vpop.f32.mrf.mxu0 }
 0x369   :  { %v1481_v54 = vadd.f32 %v1397_v9, %v1032_v21 }
 0x36b   :  { %v12177_v58 = vadd.f32 %v1827_v33, %v1481_v54 }
 0x36d   :  { %13792 = vst [vmem:[#allocation36_spill] sm:$0xff] %v12177_v58  ;;  %v2854_v58 = vpack.c.bf16 %v2796_v51, %v2795_v57  ;;  %v2797_v57 = vld [vmem:[#allocation2 + $0xc0] sm:$0xff]  ;;  %v2798_v51 = vld [vmem:[#allocation2 + $0xc8] sm:$0xff] }
 0x36e   :  { %v1034_v8 = vpop.f32.mrf.mxu1 }
 0x36f   :  { %v1832_v24 = vpop.f32.mrf.mxu3  ;;  %v1035_v41 = vadd.f32 %v1034_v8, %v766_v39 }
 0x370   :  { %v1407_v35 = vpop.f32.mrf.mxu2  ;;  %v776_v26 = vpop.f32.mrf.mxu0 }
 0x371   :  { %v1482_v53 = vadd.f32 %v1400_v29, %v1035_v41  ;;  %9196 = vmatmul.msk.bf16.gmra.mxu1 %vm93_vm3, %v2420_v10  ;;  %v1936_v29 = vld [vmem:[#allocation2 + $0xa9] sm:$0xff]  ;;  %v1937_v10 = vld [vmem:[#allocation2 + $0xb1] sm:$0xff] }
 0x373   :  { %v12180_v9 = vadd.f32 %v1830_v3, %v1482_v53  ;;  %9166 = vmatmul.msk.bf16.gmra.mxu0 %vm93_vm3, %v1993_v61  ;;  %v2421_v3 = vpack.c.bf16 %v2361_v48, %v2360_v55  ;;  %v1994_v53 = vpack.c.bf16 %v1937_v10, %v1936_v29  ;;  %v2362_v48 = vld [vmem:[#allocation2 + $0x7a] sm:$0xff]  ;;  %v2363_v29 = vld [vmem:[#allocation2 + $0x82] sm:$0xff] }
 0x374   :  { %9263 = vmatmul.msk.bf16.gmra.mxu3 %vm93_vm3, %v1992_v17 }
 0x375   :  { %13793 = vst [vmem:[#allocation37_spill] sm:$0xff] %v12180_v9  ;;  %9231 = vmatmul.msk.bf16.gmra.mxu2 %vm93_vm3, %v2853_v50 }
 0x376   :  { %v1036_v33 = vpop.f32.mrf.mxu1 }
 0x377   :  { %v1835_v23 = vpop.f32.mrf.mxu3  ;;  %v1037_v21 = vadd.f32 %v1036_v33, %v768_v1 }
 0x378   :  { %v1410_v54 = vpop.f32.mrf.mxu2  ;;  %v778_v39 = vpop.f32.mrf.mxu0 }
 0x379   :  { %v1483_v47 = vadd.f32 %v1402_v7, %v1037_v21 }
 0x37b   :  { %v12185_v18 = vadd.f32 %v1832_v24, %v1483_v47 }
 0x37d   :  { %13794 = vst [vmem:[#allocation38_spill] sm:$0xff] %v12185_v18  ;;  %v2855_v18 = vpack.c.bf16 %v2798_v51, %v2797_v57  ;;  %v2799_v57 = vld [vmem:[#allocation2 + $0xd8] sm:$0xff]  ;;  %v2800_v51 = vld [vmem:[#allocation2 + $0xe0] sm:$0xff] }
 0x37e   :  { %v1039_v8 = vpop.f32.mrf.mxu1 }
 0x37f   :  { %v1837_v41 = vpop.f32.mrf.mxu3  ;;  %v1040_v17 = vadd.f32 %v1039_v8, %v771_v30 }
 0x380   :  { %v1412_v50 = vpop.f32.mrf.mxu2  ;;  %v781_v9 = vpop.f32.mrf.mxu0 }
 0x381   :  { %v1484_v1 = vadd.f32 %v1405_v13, %v1040_v17  ;;  %9197 = vmatmul.msk.bf16.gmra.mxu1 %vm93_vm3, %v2421_v3  ;;  %v1938_v13 = vld [vmem:[#allocation2 + $0xc1] sm:$0xff]  ;;  %v1939_v3 = vld [vmem:[#allocation2 + $0xc9] sm:$0xff] }
 0x383   :  { %v12188_v7 = vadd.f32 %v1835_v23, %v1484_v1  ;;  %9167 = vmatmul.msk.bf16.gmra.mxu0 %vm93_vm3, %v1994_v53  ;;  %v2422_v23 = vpack.c.bf16 %v2363_v29, %v2362_v48  ;;  %v1995_v1 = vpack.c.bf16 %v1939_v3, %v1938_v13  ;;  %v2364_v29 = vld [vmem:[#allocation2 + $0x92] sm:$0xff]  ;;  %v2365_v13 = vld [vmem:[#allocation2 + $0x9a] sm:$0xff] }
 0x384   :  { %9264 = vmatmul.msk.bf16.gmra.mxu3 %vm93_vm3, %v1993_v61 }
 0x385   :  { %13795 = vst [vmem:[#allocation39_spill] sm:$0xff] %v12188_v7  ;;  %9232 = vmatmul.msk.bf16.gmra.mxu2 %vm93_vm3, %v2854_v58 }
 0x386   :  { %v1041_v24 = vpop.f32.mrf.mxu1 }
 0x387   :  { %v1840_v33 = vpop.f32.mrf.mxu3  ;;  %v1042_v21 = vadd.f32 %v1041_v24, %v773_v37 }
 0x388   :  { %v1415_v47 = vpop.f32.mrf.mxu2  ;;  %v783_v30 = vpop.f32.mrf.mxu0 }
 0x389   :  { %v1485_v55 = vadd.f32 %v1407_v35, %v1042_v21 }
 0x38b   :  { %v12193_v10 = vadd.f32 %v1837_v41, %v1485_v55 }
 0x38d   :  { %13796 = vst [vmem:[#allocation40_spill] sm:$0xff] %v12193_v10  ;;  %v2856_v10 = vpack.c.bf16 %v2800_v51, %v2799_v57  ;;  %v2801_v57 = vld [vmem:[#allocation2 + $0xf0] sm:$0xff] }
 0x38e   :  { %v1044_v8 = vpop.f32.mrf.mxu1 }
 0x38f   :  { %v1842_v17 = vpop.f32.mrf.mxu3  ;;  %v1045_v61 = vadd.f32 %v1044_v8, %v776_v26 }
 0x390   :  { %v1417_v58 = vpop.f32.mrf.mxu2  ;;  %v786_v7 = vpop.f32.mrf.mxu0 }
 0x391   :  { %v1486_v37 = vadd.f32 %v1410_v54, %v1045_v61  ;;  %9198 = vmatmul.msk.bf16.gmra.mxu1 %vm93_vm3, %v2422_v23  ;;  %v1940_v54 = vld [vmem:[#allocation2 + $0xd9] sm:$0xff]  ;;  %v1941_v23 = vld [vmem:[#allocation2 + $0xe1] sm:$0xff] }
 0x393   :  { %v12196_v35 = vadd.f32 %v1840_v33, %v1486_v37  ;;  %9168 = vmatmul.msk.bf16.gmra.mxu0 %vm93_vm3, %v1995_v1  ;;  %v2423_v33 = vpack.c.bf16 %v2365_v13, %v2364_v29  ;;  %v1996_v37 = vpack.c.bf16 %v1941_v23, %v1940_v54  ;;  %v2366_v54 = vld [vmem:[#allocation2 + $0xaa] sm:$0xff]  ;;  %v1943_v23 = vld [vmem:[#allocation2 + $0xf9] sm:$0xff] }
 0x394   :  { %9265 = vmatmul.msk.bf16.gmra.mxu3 %vm93_vm3, %v1994_v53 }
 0x395   :  { %13797 = vst [vmem:[#allocation41_spill] sm:$0xff] %v12196_v35  ;;  %9233 = vmatmul.msk.bf16.gmra.mxu2 %vm93_vm3, %v2855_v18 }
 0x396   :  { %v1046_v41 = vpop.f32.mrf.mxu1 }
 0x397   :  { %v1845_v24 = vpop.f32.mrf.mxu3  ;;  %v1047_v21 = vadd.f32 %v1046_v41, %v778_v39 }
 0x398   :  { %v1420_v55 = vpop.f32.mrf.mxu2  ;;  %v788_v26 = vpop.f32.mrf.mxu0 }
 0x399   :  { %v1487_v48 = vadd.f32 %v1412_v50, %v1047_v21 }
 0x39b   :  { %v12201_v3 = vadd.f32 %v1842_v17, %v1487_v48 }
 0x39e   :  { %v1049_v8 = vpop.f32.mrf.mxu1 }
 0x39f   :  { %v1847_v61 = vpop.f32.mrf.mxu3  ;;  %v1050_v53 = vadd.f32 %v1049_v8, %v781_v9 }
 0x3a0   :  { %v1422_v18 = vpop.f32.mrf.mxu2  ;;  %v2130_v35 = vpop.f32.mrf.mxu0 }
 0x3a1   :  { %v1488_v39 = vadd.f32 %v1415_v47, %v1050_v53  ;;  %9199 = vmatmul.msk.bf16.gmra.mxu1 %vm93_vm3, %v2423_v33  ;;  %v12205_v50 = vadd.f32 %v2130_v35, %v11707_v27  ;;  %v2367_v27 = vld [vmem:[#allocation2 + $0xb2] sm:$0xff] }
 0x3a2   :  { %v2424_v33 = vpack.c.bf16 %v2367_v27, %v2366_v54 }
 0x3a3   :  { %v12207_v17 = vadd.f32 %v1845_v24, %v1488_v39  ;;  %9169 = vmatmul.msk.bf16.gmra.mxu0 %vm93_vm3, %v1996_v37  ;;  %v1942_v24 = vld [vmem:[#allocation2 + $0xf1] sm:$0xff] }
 0x3a4   :  { %9266 = vmatmul.msk.bf16.gmra.mxu3 %vm93_vm3, %v1995_v1  ;;  %v2802_v1 = vld [vmem:[#allocation2 + $0xf8] sm:$0xff]  ;;  %v1997_v53 = vpack.c.bf16 %v1943_v23, %v1942_v24  ;;  %v2368_v24 = vld [vmem:[#allocation2 + $0xc2] sm:$0xff] }
 0x3a5   :  { %9234 = vmatmul.msk.bf16.gmra.mxu2 %vm93_vm3, %v2856_v10 }
 0x3a6   :  { %v1051_v41 = vpop.f32.mrf.mxu1 }
 0x3a7   :  { %v1850_v9 = vpop.f32.mrf.mxu3  ;;  %v1052_v21 = vadd.f32 %v1051_v41, %v783_v30  ;;  %v2857_v41 = vpack.c.bf16 %v2802_v1, %v2801_v57  ;;  %v2803_v1 = vld [vmem:[#allocation2 + $0x108] sm:$0xff] }
 0x3a8   :  { %v1425_v48 = vpop.f32.mrf.mxu2  ;;  %v2132_v29 = vpop.f32.mrf.mxu0 }
 0x3a9   :  { %v1489_v13 = vadd.f32 %v1417_v58, %v1052_v21  ;;  %v12213_v47 = vadd.f32 %v2132_v29, %v11713_v34 }
 0x3ab   :  { %v12215_v35 = vadd.f32 %v1847_v61, %v1489_v13 }
 0x3ae   :  { %v1054_v51 = vpop.f32.mrf.mxu1 }
 0x3af   :  { %v1852_v10 = vpop.f32.mrf.mxu3  ;;  %v1055_v8 = vadd.f32 %v1054_v51, %v786_v7 }
 0x3b0   :  { %v1427_v30 = vpop.f32.mrf.mxu2  ;;  %v2135_v39 = vpop.f32.mrf.mxu0 }
 0x3b1   :  { %v1490_v58 = vadd.f32 %v1420_v55, %v1055_v8  ;;  %9200 = vmatmul.msk.bf16.gmra.mxu1 %vm93_vm3, %v2424_v33  ;;  %v12219_v34 = vadd.f32 %v2135_v39, %v11727_v52  ;;  %v2369_v52 = vld [vmem:[#allocation2 + $0xca] sm:$0xff] }
 0x3b2   :  { %v1945_v33 = vld [vmem:[#allocation2 + $0x111] sm:$0xff]  ;;  %v2425_v57 = vpack.c.bf16 %v2369_v52, %v2368_v24 }
 0x3b3   :  { %v12221_v61 = vadd.f32 %v1850_v9, %v1490_v58  ;;  %9170 = vmatmul.msk.bf16.gmra.mxu0 %vm93_vm3, %v1997_v53  ;;  %v1944_v9 = vld [vmem:[#allocation2 + $0x109] sm:$0xff] }
 0x3b4   :  { %9267 = vmatmul.msk.bf16.gmra.mxu3 %vm93_vm3, %v1996_v37  ;;  %v2804_v37 = vld [vmem:[#allocation2 + $0x110] sm:$0xff] }
 0x3b5   :  { %9235 = vmatmul.msk.bf16.gmra.mxu2 %vm93_vm3, %v2857_v41 }
 0x3b6   :  { %v1056_v21 = vpop.f32.mrf.mxu1 }
 0x3b7   :  { %v1855_v7 = vpop.f32.mrf.mxu3  ;;  %v1057_v29 = vadd.f32 %v1056_v21, %v788_v26  ;;  %v1998_v26 = vpack.c.bf16 %v1945_v33, %v1944_v9  ;;  %v2371_v9 = vld [vmem:[#allocation2 + $0xe2] sm:$0xff] }
 0x3b8   :  { %v2991_v13 = vpop.f32.mrf.mxu2  ;;  %v2137_v54 = vpop.f32.mrf.mxu0  ;;  %v1946_v33 = vld [vmem:[#allocation2 + $0x121] sm:$0xff] }
 0x3b9   :  { %v1491_v27 = vadd.f32 %v1422_v18, %v1057_v29  ;;  %v12227_v55 = vadd.f32 %v2137_v54, %v11733_v59  ;;  %v2858_v18 = vpack.c.bf16 %v2804_v37, %v2803_v1  ;;  %v2806_v37 = vld [vmem:[#allocation2 + $0x128] sm:$0xff] }
 0x3bb   :  { %v12229_v23 = vadd.f32 %v1852_v10, %v1491_v27 }
 0x3be   :  { %v1059_v51 = vpop.f32.mrf.mxu1 }
 0x3bf   :  { %v1857_v8 = vpop.f32.mrf.mxu3  ;;  %v1060_v39 = vadd.f32 %v1059_v51, %v11677_v63 }
 0x3c0   :  { %v2993_v41 = vpop.f32.mrf.mxu2  ;;  %v2140_v58 = vpop.f32.mrf.mxu0 }
 0x3c1   :  { %v1492_v21 = vadd.f32 %v1425_v48, %v1060_v39  ;;  %9201 = vmatmul.msk.bf16.gmra.mxu1 %vm93_vm3, %v2425_v57  ;;  %v12234_v59 = vadd.f32 %v2140_v58, %v11747_v15  ;;  %v2370_v15 = vld [vmem:[#allocation2 + $0xda] sm:$0xff]  ;;  %v1947_v57 = vld [vmem:[#allocation2 + $0x129] sm:$0xff] }
 0x3c2   :  { %v2426_v1 = vpack.c.bf16 %v2371_v9, %v2370_v15 }
 0x3c3   :  { %v12236_v10 = vadd.f32 %v1855_v7, %v1492_v21  ;;  %9171 = vmatmul.msk.bf16.gmra.mxu0 %vm93_vm3, %v1998_v26 }
 0x3c4   :  { %9268 = vmatmul.msk.bf16.gmra.mxu3 %vm93_vm3, %v1997_v53  ;;  %v2805_v53 = vld [vmem:[#allocation2 + $0x120] sm:$0xff] }
 0x3c5   :  { %9236 = vmatmul.msk.bf16.gmra.mxu2 %vm93_vm3, %v2858_v18 }
 0x3c6   :  { %v1061_v29 = vpop.f32.mrf.mxu1 }
 0x3c7   :  { %v3421_v63 = vpop.f32.mrf.mxu3  ;;  %v1062_v54 = vadd.f32 %v1061_v29, %v11694_v6  ;;  %v1999_v6 = vpack.c.bf16 %v1947_v57, %v1946_v33  ;;  %v2373_v33 = vld [vmem:[#allocation2 + $0xfa] sm:$0xff] }
 0x3c8   :  { %v2996_v27 = vpop.f32.mrf.mxu2  ;;  %v2142_v24 = vpop.f32.mrf.mxu0  ;;  %v1948_v57 = vld [vmem:[#allocation2 + $0x139] sm:$0xff] }
 0x3c9   :  { %v1493_v48 = vadd.f32 %v1427_v30, %v1062_v54  ;;  %v12243_v52 = vadd.f32 %v2142_v24, %v11753_v20  ;;  %v2859_v30 = vpack.c.bf16 %v2806_v37, %v2805_v53  ;;  %v2808_v37 = vld [vmem:[#allocation2 + $0x140] sm:$0xff] }
 0x3cb   :  { %v12245_v7 = vadd.f32 %v1857_v8, %v1493_v48 }
 0x3ce   :  { %v2560_v51 = vpop.f32.mrf.mxu1 }
 0x3cf   :  { %v3423_v39 = vpop.f32.mrf.mxu3  ;;  %v2720_v58 = vadd.f32 %v2560_v51, %v12205_v50 }
 0x3d0   :  { %v2998_v18 = vpop.f32.mrf.mxu2  ;;  %v2145_v21 = vpop.f32.mrf.mxu0 }
 0x3d1   :  { %v3151_v29 = vadd.f32 %v2991_v13, %v2720_v58  ;;  %9202 = vmatmul.msk.bf16.gmra.mxu1 %vm93_vm3, %v2426_v1  ;;  %v12250_v20 = vadd.f32 %v2145_v21, %v11767_v42  ;;  %v2372_v42 = vld [vmem:[#allocation2 + $0xf2] sm:$0xff]  ;;  %v1949_v1 = vld [vmem:[#allocation2 + $0x141] sm:$0xff] }
 0x3d2   :  { %v2427_v53 = vpack.c.bf16 %v2373_v33, %v2372_v42 }
 0x3d3   :  { %v12252_v8 = vadd.f32 %v3421_v63, %v3151_v29  ;;  %9172 = vmatmul.msk.bf16.gmra.mxu0 %vm93_vm3, %v1999_v6 }
 0x3d4   :  { %9269 = vmatmul.msk.bf16.gmra.mxu3 %vm93_vm3, %v1998_v26  ;;  %v2807_v26 = vld [vmem:[#allocation2 + $0x138] sm:$0xff] }
 0x3d5   :  { %9237 = vmatmul.msk.bf16.gmra.mxu2 %vm93_vm3, %v2859_v30 }
 0x3d6   :  { %v2562_v54 = vpop.f32.mrf.mxu1 }
 0x3d7   :  { %v3426_v50 = vpop.f32.mrf.mxu3  ;;  %v2721_v24 = vadd.f32 %v2562_v54, %v12213_v47  ;;  %v2000_v47 = vpack.c.bf16 %v1949_v1, %v1948_v57  ;;  %v2375_v57 = vld [vmem:[#allocation2 + $0x112] sm:$0xff] }
 0x3d8   :  { %v3001_v48 = vpop.f32.mrf.mxu2  ;;  %v2147_v15 = vpop.f32.mrf.mxu0  ;;  %v1950_v1 = vld [vmem:[#allocation2 + $0x151] sm:$0xff] }
 0x3d9   :  { %v3152_v13 = vadd.f32 %v2993_v41, %v2721_v24  ;;  %v12259_v9 = vadd.f32 %v2147_v15, %v11773_v45  ;;  %v2860_v41 = vpack.c.bf16 %v2808_v37, %v2807_v26  ;;  %v2810_v37 = vld [vmem:[#allocation2 + $0x158] sm:$0xff] }
 0x3db   :  { %v12261_v63 = vadd.f32 %v3423_v39, %v3152_v13 }
 0x3de   :  { %v2565_v51 = vpop.f32.mrf.mxu1 }
 0x3df   :  { %v3428_v58 = vpop.f32.mrf.mxu3  ;;  %v2722_v21 = vadd.f32 %v2565_v51, %v12219_v34 }
 0x3e0   :  { %v3003_v30 = vpop.f32.mrf.mxu2  ;;  %v2150_v29 = vpop.f32.mrf.mxu0 }
 0x3e1   :  { %v3153_v54 = vadd.f32 %v2996_v27, %v2722_v21  ;;  %9203 = vmatmul.msk.bf16.gmra.mxu1 %vm93_vm3, %v2427_v53  ;;  %v12266_v45 = vadd.f32 %v2150_v29, %v11779_v4  ;;  %v2374_v4 = vld [vmem:[#allocation2 + $0x10a] sm:$0xff]  ;;  %v1951_v53 = vld [vmem:[#allocation2 + $0x159] sm:$0xff] }
 0x3e2   :  { %v2428_v26 = vpack.c.bf16 %v2375_v57, %v2374_v4 }
 0x3e3   :  { %v12268_v39 = vadd.f32 %v3426_v50, %v3153_v54  ;;  %9173 = vmatmul.msk.bf16.gmra.mxu0 %vm93_vm3, %v2000_v47 }
 0x3e4   :  { %9270 = vmatmul.msk.bf16.gmra.mxu3 %vm93_vm3, %v1999_v6  ;;  %v2809_v6 = vld [vmem:[#allocation2 + $0x150] sm:$0xff] }
 0x3e5   :  { %9238 = vmatmul.msk.bf16.gmra.mxu2 %vm93_vm3, %v2860_v41 }
 0x3e6   :  { %v2567_v24 = vpop.f32.mrf.mxu1 }
 0x3e7   :  { %v3431_v34 = vpop.f32.mrf.mxu3  ;;  %v2723_v15 = vadd.f32 %v2567_v24, %v12227_v55  ;;  %v2001_v55 = vpack.c.bf16 %v1951_v53, %v1950_v1  ;;  %v2377_v1 = vld [vmem:[#allocation2 + $0x12a] sm:$0xff] }
 0x3e8   :  { %v3006_v13 = vpop.f32.mrf.mxu2  ;;  %v2152_v42 = vpop.f32.mrf.mxu0  ;;  %v1952_v53 = vld [vmem:[#allocation2 + $0x169] sm:$0xff] }
 0x3e9   :  { %v3154_v27 = vadd.f32 %v2998_v18, %v2723_v15  ;;  %v12275_v33 = vadd.f32 %v2152_v42, %v11793_v14  ;;  %v2861_v18 = vpack.c.bf16 %v2810_v37, %v2809_v6  ;;  %v2812_v37 = vld [vmem:[#allocation2 + $0x170] sm:$0xff] }
 0x3eb   :  { %v12277_v50 = vadd.f32 %v3428_v58, %v3154_v27 }
 0x3ee   :  { %v2570_v51 = vpop.f32.mrf.mxu1 }
 0x3ef   :  { %v3433_v21 = vpop.f32.mrf.mxu3  ;;  %v2724_v29 = vadd.f32 %v2570_v51, %v12234_v59 }
 0x3f0   :  { %v3008_v41 = vpop.f32.mrf.mxu2  ;;  %v2155_v54 = vpop.f32.mrf.mxu0 }
 0x3f1   :  { %v3155_v24 = vadd.f32 %v3001_v48, %v2724_v29  ;;  %9204 = vmatmul.msk.bf16.gmra.mxu1 %vm93_vm3, %v2428_v26  ;;  %v12282_v14 = vadd.f32 %v2155_v54, %v11807_v38  ;;  %v2376_v38 = vld [vmem:[#allocation2 + $0x122] sm:$0xff]  ;;  %v1953_v26 = vld [vmem:[#allocation2 + $0x171] sm:$0xff] }
 0x3f2   :  { %v2429_v6 = vpack.c.bf16 %v2377_v1, %v2376_v38 }
 0x3f3   :  { %v12284_v58 = vadd.f32 %v3431_v34, %v3155_v24  ;;  %9174 = vmatmul.msk.bf16.gmra.mxu0 %vm93_vm3, %v2001_v55 }
 0x3f4   :  { %9271 = vmatmul.msk.bf16.gmra.mxu3 %vm93_vm3, %v2000_v47  ;;  %v2811_v47 = vld [vmem:[#allocation2 + $0x168] sm:$0xff] }
 0x3f5   :  { %9239 = vmatmul.msk.bf16.gmra.mxu2 %vm93_vm3, %v2861_v18 }
 0x3f6   :  { %v2572_v15 = vpop.f32.mrf.mxu1 }
 0x3f7   :  { %v3436_v59 = vpop.f32.mrf.mxu3  ;;  %v2725_v42 = vadd.f32 %v2572_v15, %v12243_v52  ;;  %v2002_v52 = vpack.c.bf16 %v1953_v26, %v1952_v53  ;;  %v2379_v53 = vld [vmem:[#allocation2 + $0x142] sm:$0xff] }
 0x3f8   :  { %v3011_v27 = vpop.f32.mrf.mxu2  ;;  %v2157_v4 = vpop.f32.mrf.mxu0  ;;  %v1954_v26 = vld [vmem:[#allocation2 + $0x181] sm:$0xff] }
 0x3f9   :  { %v3156_v48 = vadd.f32 %v3003_v30, %v2725_v42  ;;  %v12291_v57 = vadd.f32 %v2157_v4, %v11813_v36  ;;  %v2862_v30 = vpack.c.bf16 %v2812_v37, %v2811_v47  ;;  %v2814_v37 = vld [vmem:[#allocation2 + $0x188] sm:$0xff] }
 0x3fb   :  { %v12293_v34 = vadd.f32 %v3433_v21, %v3156_v48 }
 0x3fe   :  { %v2575_v51 = vpop.f32.mrf.mxu1 }
 0x3ff   :  { %v3438_v29 = vpop.f32.mrf.mxu3  ;;  %v2726_v54 = vadd.f32 %v2575_v51, %v12250_v20 }
 0x400   :  { %v3013_v18 = vpop.f32.mrf.mxu2  ;;  %v2160_v24 = vpop.f32.mrf.mxu0 }
 0x401   :  { %v3157_v15 = vadd.f32 %v3006_v13, %v2726_v54  ;;  %9205 = vmatmul.msk.bf16.gmra.mxu1 %vm93_vm3, %v2429_v6  ;;  %v12298_v36 = vadd.f32 %v2160_v24, %v11825_v2  ;;  %v2378_v2 = vld [vmem:[#allocation2 + $0x13a] sm:$0xff]  ;;  %v1955_v6 = vld [vmem:[#allocation2 + $0x189] sm:$0xff] }
 0x402   :  { %v2430_v47 = vpack.c.bf16 %v2379_v53, %v2378_v2 }
 0x403   :  { %v12300_v21 = vadd.f32 %v3436_v59, %v3157_v15  ;;  %9175 = vmatmul.msk.bf16.gmra.mxu0 %vm93_vm3, %v2002_v52 }
 0x404   :  { %9272 = vmatmul.msk.bf16.gmra.mxu3 %vm93_vm3, %v2001_v55  ;;  %v2813_v55 = vld [vmem:[#allocation2 + $0x180] sm:$0xff] }
 0x405   :  { %9240 = vmatmul.msk.bf16.gmra.mxu2 %vm93_vm3, %v2862_v30 }
 0x406   :  { %v2577_v42 = vpop.f32.mrf.mxu1 }
 0x407   :  { %v3441_v20 = vpop.f32.mrf.mxu3  ;;  %v2727_v4 = vadd.f32 %v2577_v42, %v12259_v9  ;;  %v2003_v9 = vpack.c.bf16 %v1955_v6, %v1954_v26  ;;  %v2381_v26 = vld [vmem:[#allocation2 + $0x15a] sm:$0xff]  ;;  %v1956_v6 = vld [vmem:[#allocation2 + $0x1c9] sm:$0xff] }
 0x408   :  { %v3016_v48 = vpop.f32.mrf.mxu2  ;;  %v2162_v38 = vpop.f32.mrf.mxu0 }
 0x409   :  { %v3158_v13 = vadd.f32 %v3008_v41, %v2727_v4  ;;  %v12307_v1 = vadd.f32 %v2162_v38, %v11832_v0  ;;  %v2863_v41 = vpack.c.bf16 %v2814_v37, %v2813_v55  ;;  %v2816_v37 = vld [vmem:[#allocation2 + $0x1a0] sm:$0xff] }
 0x40b   :  { %v12309_v59 = vadd.f32 %v3438_v29, %v3158_v13 }
 0x40e   :  { %v2580_v51 = vpop.f32.mrf.mxu1 }
 0x40f   :  { %v3443_v54 = vpop.f32.mrf.mxu3  ;;  %v2728_v24 = vadd.f32 %v2580_v51, %v12266_v45 }
 0x410   :  { %v3018_v30 = vpop.f32.mrf.mxu2  ;;  %v2165_v15 = vpop.f32.mrf.mxu0 }
 0x411   :  { %v3159_v42 = vadd.f32 %v3011_v27, %v2728_v24  ;;  %9206 = vmatmul.msk.bf16.gmra.mxu1 %vm93_vm3, %v2430_v47  ;;  %v12314_v0 = vadd.f32 %v2165_v15, %v11846_v31  ;;  %v2380_v31 = vld [vmem:[#allocation2 + $0x152] sm:$0xff] }
 0x412   :  { %v1957_v47 = vld [vmem:[#allocation2 + $0x1d1] sm:$0xff]  ;;  %v2431_v55 = vpack.c.bf16 %v2381_v26, %v2380_v31 }
 0x413   :  { %v12316_v29 = vadd.f32 %v3441_v20, %v3159_v42  ;;  %9176 = vmatmul.msk.bf16.gmra.mxu0 %vm93_vm3, %v2003_v9 }
 0x414   :  { %9273 = vmatmul.msk.bf16.gmra.mxu3 %vm93_vm3, %v2002_v52  ;;  %v2815_v52 = vld [vmem:[#allocation2 + $0x198] sm:$0xff] }
 0x415   :  { %9241 = vmatmul.msk.bf16.gmra.mxu2 %vm93_vm3, %v2863_v41 }
 0x416   :  { %v2582_v4 = vpop.f32.mrf.mxu1 }
 0x417   :  { %v3446_v45 = vpop.f32.mrf.mxu3  ;;  %v2729_v38 = vadd.f32 %v2582_v4, %v12275_v33  ;;  %v2004_v33 = vpack.c.bf16 %v1957_v47, %v1956_v6  ;;  %v2383_v6 = vld [vmem:[#allocation2 + $0x172] sm:$0xff]  ;;  %v1958_v47 = vld [vmem:[#allocation2 + $0x1e1] sm:$0xff] }
 0x418   :  { %v3021_v13 = vpop.f32.mrf.mxu2  ;;  %v2167_v2 = vpop.f32.mrf.mxu0 }
 0x419   :  { %v3160_v27 = vadd.f32 %v3013_v18, %v2729_v38  ;;  %v12323_v53 = vadd.f32 %v2167_v2, %v11854_v49  ;;  %v2864_v18 = vpack.c.bf16 %v2816_v37, %v2815_v52  ;;  %v3245_v52 = vld [vmem:[#allocation2 + $0x199] sm:$0xff] }
 0x41b   :  { %v12325_v20 = vadd.f32 %v3443_v54, %v3160_v27 }
 0x41e   :  { %v2585_v51 = vpop.f32.mrf.mxu1 }
 0x41f   :  { %v3448_v24 = vpop.f32.mrf.mxu3  ;;  %v2730_v15 = vadd.f32 %v2585_v51, %v12282_v14  ;;  %v2817_v51 = vld [vmem:[#allocation2 + $0x1e0] sm:$0xff] }
 0x420   :  { %v3023_v41 = vpop.f32.mrf.mxu2  ;;  %v2170_v42 = vpop.f32.mrf.mxu0 }
 0x421   :  { %v3161_v4 = vadd.f32 %v3016_v48, %v2730_v15  ;;  %9207 = vmatmul.msk.bf16.gmra.mxu1 %vm93_vm3, %v2431_v55  ;;  %v12330_v49 = vadd.f32 %v2170_v42, %v11867_v62  ;;  %v2382_v62 = vld [vmem:[#allocation2 + $0x16a] sm:$0xff] }
 0x422   :  { %v1959_v55 = vld [vmem:[#allocation2 + $0x1e9] sm:$0xff]  ;;  %v2432_v37 = vpack.c.bf16 %v2383_v6, %v2382_v62 }
 0x423   :  { %v12332_v54 = vadd.f32 %v3446_v45, %v3161_v4  ;;  %9177 = vmatmul.msk.bf16.gmra.mxu0 %vm93_vm3, %v2004_v33  ;;  %v2818_v15 = vld [vmem:[#allocation2 + $0x1e8] sm:$0xff] }
 0x424   :  { %9274 = vmatmul.msk.bf16.gmra.mxu3 %vm93_vm3, %v2003_v9  ;;  %v3246_v9 = vld [vmem:[#allocation2 + $0x1a1] sm:$0xff] }
 0x425   :  { %9242 = vmatmul.msk.bf16.gmra.mxu2 %vm93_vm3, %v2864_v18  ;;  %v2005_v18 = vpack.c.bf16 %v1959_v55, %v1958_v47 }
 0x426   :  { %v2587_v38 = vpop.f32.mrf.mxu1 }
 0x427   :  { %v3451_v14 = vpop.f32.mrf.mxu3  ;;  %v2731_v2 = vadd.f32 %v2587_v38, %v12291_v57  ;;  %v2865_v38 = vpack.c.bf16 %v2818_v15, %v2817_v51  ;;  %v2819_v15 = vld [vmem:[#allocation2 + $0x1f8] sm:$0xff] }
 0x428   :  { %v3026_v27 = vpop.f32.mrf.mxu2  ;;  %v2172_v31 = vpop.f32.mrf.mxu0 }
 0x429   :  { %v3162_v48 = vadd.f32 %v3018_v30, %v2731_v2  ;;  %v12339_v26 = vadd.f32 %v2172_v31, %v11874_v22  ;;  %v3294_v30 = vpack.c.bf16 %v3246_v9, %v3245_v52  ;;  %v2385_v52 = vld [vmem:[#allocation2 + $0x18a] sm:$0xff]  ;;  %v1960_v9 = vld [vmem:[#allocation2 + $0x1f9] sm:$0xff] }
 0x42b   :  { %v12341_v45 = vadd.f32 %v3448_v24, %v3162_v48 }
 0x42e   :  { %v2590_v33 = vpop.f32.mrf.mxu1 }
 0x42f   :  { %v3453_v42 = vpop.f32.mrf.mxu3  ;;  %v2732_v57 = vadd.f32 %v2590_v33, %v12298_v36  ;;  %v2820_v33 = vld [vmem:[#allocation2 + $0x200] sm:$0xff] }
 0x430   :  { %v3028_v4 = vpop.f32.mrf.mxu2  ;;  %v2175_v22 = vpop.f32.mrf.mxu0 }
 0x431   :  { %v3163_v2 = vadd.f32 %v3021_v13, %v2732_v57  ;;  %9208 = vmatmul.msk.bf16.gmra.mxu1 %vm93_vm3, %v2432_v37  ;;  %v12346_v24 = vadd.f32 %v2175_v22, %v11888_v12  ;;  %v2384_v12 = vld [vmem:[#allocation2 + $0x182] sm:$0xff] }
 0x432   :  { %v1961_v37 = vld [vmem:[#allocation2 + $0x201] sm:$0xff]  ;;  %v2433_v51 = vpack.c.bf16 %v2385_v52, %v2384_v12 }
 0x433   :  { %v12348_v31 = vadd.f32 %v3451_v14, %v3163_v2  ;;  %9178 = vmatmul.msk.bf16.gmra.mxu0 %vm93_vm3, %v2005_v18 }
 0x434   :  { %9275 = vmatmul.msk.bf16.gmra.mxu3 %vm93_vm3, %v3294_v30 }
 0x435   :  { %9243 = vmatmul.msk.bf16.gmra.mxu2 %vm93_vm3, %v2865_v38 }
 0x436   :  { %v2592_v36 = vpop.f32.mrf.mxu1 }
 0x437   :  { %v3456_v48 = vpop.f32.mrf.mxu3  ;;  %v2733_v62 = vadd.f32 %v2592_v36, %v12307_v1  ;;  %v2006_v1 = vpack.c.bf16 %v1961_v37, %v1960_v9  ;;  %v2387_v9 = vld [vmem:[#allocation2 + $0x1d2] sm:$0xff] }
 0x438   :  { %v3031_v6 = vpop.f32.mrf.mxu2  ;;  %v2177_v47 = vpop.f32.mrf.mxu0  ;;  %v1962_v37 = vld [vmem:[#allocation2 + $0x211] sm:$0xff] }
 0x439   :  { %v3164_v13 = vadd.f32 %v3023_v41, %v2733_v62  ;;  %v12355_v55 = vadd.f32 %v2177_v47, %v11895_v56  ;;  %v2866_v41 = vpack.c.bf16 %v2820_v33, %v2819_v15  ;;  %v2822_v33 = vld [vmem:[#allocation2 + $0x218] sm:$0xff] }
 0x43b   :  { %v12357_v14 = vadd.f32 %v3453_v42, %v3164_v13 }
 0x43e   :  { %v2595_v57 = vpop.f32.mrf.mxu1 }
 0x43f   :  { %v3458_v30 = vpop.f32.mrf.mxu3  ;;  %v2734_v22 = vadd.f32 %v2595_v57, %v12314_v0 }
 0x440   :  { %v3033_v38 = vpop.f32.mrf.mxu2  ;;  %v2180_v2 = vpop.f32.mrf.mxu0 }
 0x441   :  { %v3165_v36 = vadd.f32 %v3026_v27, %v2734_v22  ;;  %9209 = vmatmul.msk.bf16.gmra.mxu1 %vm93_vm3, %v2433_v51  ;;  %v12362_v56 = vadd.f32 %v2180_v2, %v11909_v5  ;;  %v2386_v5 = vld [vmem:[#allocation2 + $0x1ca] sm:$0xff]  ;;  %v1963_v51 = vld [vmem:[#allocation2 + $0x219] sm:$0xff] }
 0x442   :  { %v2434_v15 = vpack.c.bf16 %v2387_v9, %v2386_v5 }
 0x443   :  { %v12364_v42 = vadd.f32 %v3456_v48, %v3165_v36  ;;  %9179 = vmatmul.msk.bf16.gmra.mxu0 %vm93_vm3, %v2006_v1 }
 0x444   :  { %9276 = vmatmul.msk.bf16.gmra.mxu3 %vm93_vm3, %v2005_v18  ;;  %v2821_v18 = vld [vmem:[#allocation2 + $0x210] sm:$0xff] }
 0x445   :  { %9244 = vmatmul.msk.bf16.gmra.mxu2 %vm93_vm3, %v2866_v41 }
 0x446   :  { %v2597_v62 = vpop.f32.mrf.mxu1 }
 0x447   :  { %v3461_v0 = vpop.f32.mrf.mxu3  ;;  %v2735_v47 = vadd.f32 %v2597_v62, %v12323_v53  ;;  %v2007_v53 = vpack.c.bf16 %v1963_v51, %v1962_v37  ;;  %v2389_v37 = vld [vmem:[#allocation2 + $0x1ea] sm:$0xff] }
 0x448   :  { %v3036_v13 = vpop.f32.mrf.mxu2  ;;  %v2182_v12 = vpop.f32.mrf.mxu0  ;;  %v1964_v51 = vld [vmem:[#allocation2 + $0x229] sm:$0xff] }
 0x449   :  { %v3166_v27 = vadd.f32 %v3028_v4, %v2735_v47  ;;  %v12371_v52 = vadd.f32 %v2182_v12, %v11915_v43  ;;  %v2867_v4 = vpack.c.bf16 %v2822_v33, %v2821_v18  ;;  %v2824_v33 = vld [vmem:[#allocation2 + $0x230] sm:$0xff] }
 0x44b   :  { %v12373_v48 = vadd.f32 %v3458_v30, %v3166_v27 }
 0x44e   :  { %v2600_v57 = vpop.f32.mrf.mxu1 }
 0x44f   :  { %v3463_v22 = vpop.f32.mrf.mxu3  ;;  %v2736_v2 = vadd.f32 %v2600_v57, %v12330_v49 }
 0x450   :  { %v3038_v41 = vpop.f32.mrf.mxu2  ;;  %v2185_v36 = vpop.f32.mrf.mxu0 }
 0x451   :  { %v3167_v62 = vadd.f32 %v3031_v6, %v2736_v2  ;;  %9210 = vmatmul.msk.bf16.gmra.mxu1 %vm93_vm3, %v2434_v15  ;;  %v12378_v43 = vadd.f32 %v2185_v36, %v11929_v46  ;;  %v2388_v46 = vld [vmem:[#allocation2 + $0x1e2] sm:$0xff]  ;;  %v1965_v15 = vld [vmem:[#allocation2 + $0x231] sm:$0xff] }
 0x452   :  { %v2435_v18 = vpack.c.bf16 %v2389_v37, %v2388_v46 }
 0x453   :  { %v12380_v30 = vadd.f32 %v3461_v0, %v3167_v62  ;;  %9180 = vmatmul.msk.bf16.gmra.mxu0 %vm93_vm3, %v2007_v53 }
 0x454   :  { %9277 = vmatmul.msk.bf16.gmra.mxu3 %vm93_vm3, %v2006_v1  ;;  %v2823_v1 = vld [vmem:[#allocation2 + $0x228] sm:$0xff] }
 0x455   :  { %9245 = vmatmul.msk.bf16.gmra.mxu2 %vm93_vm3, %v2867_v4 }
 0x456   :  { %v2602_v47 = vpop.f32.mrf.mxu1 }
 0x457   :  { %v3466_v49 = vpop.f32.mrf.mxu3  ;;  %v2737_v12 = vadd.f32 %v2602_v47, %v12339_v26  ;;  %v2008_v26 = vpack.c.bf16 %v1965_v15, %v1964_v51  ;;  %v2391_v51 = vld [vmem:[#allocation2 + $0x202] sm:$0xff] }
 0x458   :  { %v3041_v27 = vpop.f32.mrf.mxu2  ;;  %v2187_v5 = vpop.f32.mrf.mxu0  ;;  %v1966_v15 = vld [vmem:[#allocation2 + $0x241] sm:$0xff] }
 0x459   :  { %v3168_v6 = vadd.f32 %v3033_v38, %v2737_v12  ;;  %v12387_v9 = vadd.f32 %v2187_v5, %v11935_v40  ;;  %v2868_v38 = vpack.c.bf16 %v2824_v33, %v2823_v1  ;;  %v2826_v33 = vld [vmem:[#allocation2 + $0x248] sm:$0xff] }
 0x45b   :  { %v12389_v0 = vadd.f32 %v3463_v22, %v3168_v6 }
 0x45e   :  { %v2605_v57 = vpop.f32.mrf.mxu1 }
 0x45f   :  { %v3468_v2 = vpop.f32.mrf.mxu3  ;;  %v2738_v36 = vadd.f32 %v2605_v57, %v12346_v24 }
 0x460   :  { %v3043_v4 = vpop.f32.mrf.mxu2  ;;  %v2190_v62 = vpop.f32.mrf.mxu0 }
 0x461   :  { %v3169_v47 = vadd.f32 %v3036_v13, %v2738_v36  ;;  %9211 = vmatmul.msk.bf16.gmra.mxu1 %vm93_vm3, %v2435_v18  ;;  %v12394_v40 = vadd.f32 %v2190_v62, %v11949_v19  ;;  %v2390_v19 = vld [vmem:[#allocation2 + $0x1fa] sm:$0xff]  ;;  %v1967_v18 = vld [vmem:[#allocation2 + $0x249] sm:$0xff] }
 0x462   :  { %v2436_v1 = vpack.c.bf16 %v2391_v51, %v2390_v19 }
 0x463   :  { %v12396_v22 = vadd.f32 %v3466_v49, %v3169_v47  ;;  %9181 = vmatmul.msk.bf16.gmra.mxu0 %vm93_vm3, %v2008_v26 }
 0x464   :  { %9278 = vmatmul.msk.bf16.gmra.mxu3 %vm93_vm3, %v2007_v53  ;;  %v2825_v53 = vld [vmem:[#allocation2 + $0x240] sm:$0xff] }
 0x465   :  { %9246 = vmatmul.msk.bf16.gmra.mxu2 %vm93_vm3, %v2868_v38 }
 0x466   :  { %v2607_v12 = vpop.f32.mrf.mxu1 }
 0x467   :  { %v3471_v24 = vpop.f32.mrf.mxu3  ;;  %v2739_v5 = vadd.f32 %v2607_v12, %v12355_v55  ;;  %v2009_v55 = vpack.c.bf16 %v1967_v18, %v1966_v15  ;;  %v2393_v15 = vld [vmem:[#allocation2 + $0x21a] sm:$0xff] }
 0x468   :  { %v3046_v6 = vpop.f32.mrf.mxu2  ;;  %v2192_v46 = vpop.f32.mrf.mxu0  ;;  %v1968_v18 = vld [vmem:[#allocation2 + $0x259] sm:$0xff] }
 0x469   :  { %v3170_v13 = vadd.f32 %v3038_v41, %v2739_v5  ;;  %v12403_v37 = vadd.f32 %v2192_v46, %v11955_v16  ;;  %v2869_v41 = vpack.c.bf16 %v2826_v33, %v2825_v53  ;;  %v2828_v33 = vld [vmem:[#allocation2 + $0x260] sm:$0xff] }
 0x46b   :  { %v12405_v49 = vadd.f32 %v3468_v2, %v3170_v13 }
 0x46e   :  { %v2610_v57 = vpop.f32.mrf.mxu1 }
 0x46f   :  { %v3473_v36 = vpop.f32.mrf.mxu3  ;;  %v2740_v62 = vadd.f32 %v2610_v57, %v12362_v56 }
 0x470   :  { %v3048_v38 = vpop.f32.mrf.mxu2  ;;  %v2195_v47 = vpop.f32.mrf.mxu0 }
 0x471   :  { %v3171_v12 = vadd.f32 %v3041_v27, %v2740_v62  ;;  %9212 = vmatmul.msk.bf16.gmra.mxu1 %vm93_vm3, %v2436_v1  ;;  %v12410_v16 = vadd.f32 %v2195_v47, %v11969_v60  ;;  %v2392_v60 = vld [vmem:[#allocation2 + $0x212] sm:$0xff]  ;;  %v1969_v1 = vld [vmem:[#allocation2 + $0x261] sm:$0xff] }
 0x472   :  { %v2437_v53 = vpack.c.bf16 %v2393_v15, %v2392_v60 }
 0x473   :  { %v12412_v2 = vadd.f32 %v3471_v24, %v3171_v12  ;;  %9182 = vmatmul.msk.bf16.gmra.mxu0 %vm93_vm3, %v2009_v55 }
 0x474   :  { %9279 = vmatmul.msk.bf16.gmra.mxu3 %vm93_vm3, %v2008_v26  ;;  %v2827_v26 = vld [vmem:[#allocation2 + $0x258] sm:$0xff] }
 0x475   :  { %9247 = vmatmul.msk.bf16.gmra.mxu2 %vm93_vm3, %v2869_v41 }
 0x476   :  { %v2612_v5 = vpop.f32.mrf.mxu1 }
 0x477   :  { %v3476_v56 = vpop.f32.mrf.mxu3  ;;  %v2741_v46 = vadd.f32 %v2612_v5, %v12371_v52  ;;  %v2010_v52 = vpack.c.bf16 %v1969_v1, %v1968_v18  ;;  %v2395_v18 = vld [vmem:[#allocation2 + $0x232] sm:$0xff] }
 0x478   :  { %v3051_v13 = vpop.f32.mrf.mxu2  ;;  %v2197_v19 = vpop.f32.mrf.mxu0  ;;  %v1970_v1 = vld [vmem:[#allocation2 + $0x271] sm:$0xff] }
 0x479   :  { %v3172_v27 = vadd.f32 %v3043_v4, %v2741_v46  ;;  %v12419_v51 = vadd.f32 %v2197_v19, %v11975_v28  ;;  %v2870_v4 = vpack.c.bf16 %v2828_v33, %v2827_v26  ;;  %v2830_v33 = vld [vmem:[#allocation2 + $0x278] sm:$0xff] }
 0x47b   :  { %v12421_v24 = vadd.f32 %v3473_v36, %v3172_v27 }
 0x47e   :  { %v2615_v57 = vpop.f32.mrf.mxu1 }
 0x47f   :  { %v3478_v62 = vpop.f32.mrf.mxu3  ;;  %v2742_v47 = vadd.f32 %v2615_v57, %v12378_v43 }
 0x480   :  { %v3053_v41 = vpop.f32.mrf.mxu2  ;;  %v2200_v12 = vpop.f32.mrf.mxu0 }
 0x481   :  { %v3173_v5 = vadd.f32 %v3046_v6, %v2742_v47  ;;  %9213 = vmatmul.msk.bf16.gmra.mxu1 %vm93_vm3, %v2437_v53  ;;  %v12426_v28 = vadd.f32 %v2200_v12, %v11989_v11  ;;  %v2394_v11 = vld [vmem:[#allocation2 + $0x22a] sm:$0xff]  ;;  %v1971_v53 = vld [vmem:[#allocation2 + $0x279] sm:$0xff] }
 0x482   :  { %v2438_v26 = vpack.c.bf16 %v2395_v18, %v2394_v11  ;;  %v13798_v18 = vld [vmem:[#allocation17_spill] sm:$0xff] }
 0x483   :  { %v12428_v36 = vadd.f32 %v3476_v56, %v3173_v5  ;;  %9183 = vmatmul.msk.bf16.gmra.mxu0 %vm93_vm3, %v2010_v52 }
 0x484   :  { %9280 = vmatmul.msk.bf16.gmra.mxu3 %vm93_vm3, %v2009_v55  ;;  %v2829_v55 = vld [vmem:[#allocation2 + $0x270] sm:$0xff] }
 0x485   :  { %9248 = vmatmul.msk.bf16.gmra.mxu2 %vm93_vm3, %v2870_v4 }
 0x486   :  { %v2617_v46 = vpop.f32.mrf.mxu1 }
 0x487   :  { %v3481_v43 = vpop.f32.mrf.mxu3  ;;  %v2743_v19 = vadd.f32 %v2617_v46, %v12387_v9  ;;  %v2011_v9 = vpack.c.bf16 %v1971_v53, %v1970_v1  ;;  %v2397_v53 = vld [vmem:[#allocation2 + $0x24a] sm:$0xff] }
 0x488   :  { %v3056_v27 = vpop.f32.mrf.mxu2  ;;  %v2202_v60 = vpop.f32.mrf.mxu0 }
 0x489   :  { %v3174_v6 = vadd.f32 %v3048_v38, %v2743_v19  ;;  %v12435_v15 = vadd.f32 %v2202_v60, %v11995_v32  ;;  %v2871_v38 = vpack.c.bf16 %v2830_v33, %v2829_v55  ;;  %v1973_v55 = vld [vmem:[#allocation2 + $0x291] sm:$0xff] }
 0x48b   :  { %v12437_v56 = vadd.f32 %v3478_v62, %v3174_v6 }
 0x48e   :  { %v2620_v57 = vpop.f32.mrf.mxu1 }
 0x48f   :  { %v3483_v47 = vpop.f32.mrf.mxu3  ;;  %v2744_v12 = vadd.f32 %v2620_v57, %v12394_v40  ;;  %v2832_v57 = vld [vmem:[#allocation2 + $0x290] sm:$0xff] }
 0x490   :  { %v3058_v4 = vpop.f32.mrf.mxu2  ;;  %v2205_v5 = vpop.f32.mrf.mxu0 }
 0x491   :  { %v3175_v46 = vadd.f32 %v3051_v13, %v2744_v12  ;;  %9214 = vmatmul.msk.bf16.gmra.mxu1 %vm93_vm3, %v2438_v26  ;;  %v12442_v32 = vadd.f32 %v2205_v5, %v12009_v25  ;;  %v2396_v25 = vld [vmem:[#allocation2 + $0x242] sm:$0xff] }
 0x492   :  { %v1972_v26 = vld [vmem:[#allocation2 + $0x289] sm:$0xff]  ;;  %v2439_v33 = vpack.c.bf16 %v2397_v53, %v2396_v25 }
 0x493   :  { %v12444_v62 = vadd.f32 %v3481_v43, %v3175_v46  ;;  %9184 = vmatmul.msk.bf16.gmra.mxu0 %vm93_vm3, %v2011_v9 }
 0x494   :  { %9281 = vmatmul.msk.bf16.gmra.mxu3 %vm93_vm3, %v2010_v52  ;;  %v2831_v52 = vld [vmem:[#allocation2 + $0x288] sm:$0xff] }
 0x495   :  { %9249 = vmatmul.msk.bf16.gmra.mxu2 %vm93_vm3, %v2871_v38 }
 0x496   :  { %v2622_v19 = vpop.f32.mrf.mxu1 }
 0x497   :  { %v3486_v40 = vpop.f32.mrf.mxu3  ;;  %v2745_v60 = vadd.f32 %v2622_v19, %v12403_v37  ;;  %v2012_v37 = vpack.c.bf16 %v1973_v55, %v1972_v26  ;;  %v13802_v55 = vld [vmem:[#allocation19_spill] sm:$0xff] }
 0x498   :  { %v3061_v6 = vpop.f32.mrf.mxu2  ;;  %v2207_v11 = vpop.f32.mrf.mxu0 }
 0x499   :  { %v3176_v13 = vadd.f32 %v3053_v41, %v2745_v60  ;;  %v12451_v1 = vadd.f32 %v2207_v11, %v13798_v18  ;;  %v2872_v41 = vpack.c.bf16 %v2832_v57, %v2831_v52  ;;  %v13800_v11 = vld [vmem:[#allocation18_spill] sm:$0xff]  ;;  %v2398_v52 = vld [vmem:[#allocation2 + $0x25a] sm:$0xff]  ;;  %v2399_v57 = vld [vmem:[#allocation2 + $0x262] sm:$0xff] }
 0x49b   :  { %v12453_v43 = vadd.f32 %v3483_v47, %v3176_v13 }
 0x49d   :  { %13799 = vst [vmem:[#allocation17_spill] sm:$0xff] %v12453_v43 }
 0x49e   :  { %v2625_v12 = vpop.f32.mrf.mxu1 }
 0x49f   :  { %v3488_v5 = vpop.f32.mrf.mxu3  ;;  %v2746_v38 = vadd.f32 %v2625_v12, %v12410_v16  ;;  %v1974_v12 = vld [vmem:[#allocation2 + $0x2a1] sm:$0xff] }
 0x4a0   :  { %v3063_v46 = vpop.f32.mrf.mxu2  ;;  %v2210_v19 = vpop.f32.mrf.mxu0 }
 0x4a1   :  { %v3177_v60 = vadd.f32 %v3056_v27, %v2746_v38  ;;  %9215 = vmatmul.msk.bf16.gmra.mxu1 %vm93_vm3, %v2439_v33  ;;  %v12458_v18 = vadd.f32 %v2210_v19, %v13800_v11  ;;  %v1975_v38 = vld [vmem:[#allocation2 + $0x2a9] sm:$0xff]  ;;  %v2440_v19 = vpack.c.bf16 %v2399_v57, %v2398_v52 }
 0x4a3   :  { %v12460_v47 = vadd.f32 %v3486_v40, %v3177_v60  ;;  %9185 = vmatmul.msk.bf16.gmra.mxu0 %vm93_vm3, %v2012_v37  ;;  %v2834_v60 = vld [vmem:[#allocation2 + $0x2a8] sm:$0xff] }
 0x4a4   :  { %9282 = vmatmul.msk.bf16.gmra.mxu3 %vm93_vm3, %v2011_v9  ;;  %v2833_v9 = vld [vmem:[#allocation2 + $0x2a0] sm:$0xff] }
 0x4a5   :  { %13801 = vst [vmem:[#allocation18_spill] sm:$0xff] %v12460_v47  ;;  %9250 = vmatmul.msk.bf16.gmra.mxu2 %vm93_vm3, %v2872_v41 }
 0x4a6   :  { %v2627_v13 = vpop.f32.mrf.mxu1 }
 0x4a7   :  { %v3491_v16 = vpop.f32.mrf.mxu3  ;;  %v2747_v25 = vadd.f32 %v2627_v13, %v12419_v51  ;;  %v2013_v51 = vpack.c.bf16 %v1975_v38, %v1974_v12 }
 0x4a8   :  { %v3066_v53 = vpop.f32.mrf.mxu2  ;;  %v2212_v26 = vpop.f32.mrf.mxu0 }
 0x4a9   :  { %v3178_v27 = vadd.f32 %v3058_v4, %v2747_v25  ;;  %v12467_v33 = vadd.f32 %v2212_v26, %v13802_v55  ;;  %v2873_v4 = vpack.c.bf16 %v2834_v60, %v2833_v9  ;;  %v13804_v26 = vld [vmem:[#allocation20_spill] sm:$0xff] }
 0x4aa   :  { %v1976_v9 = vld [vmem:[#allocation2 + $0x2b9] sm:$0xff]  ;;  %v1977_v60 = vld [vmem:[#allocation2 + $0x2c1] sm:$0xff] }
 0x4ab   :  { %v12469_v40 = vadd.f32 %v3488_v5, %v3178_v27 }
 0x4ad   :  { %13803 = vst [vmem:[#allocation19_spill] sm:$0xff] %v12469_v40 }
 0x4ae   :  { %v2630_v41 = vpop.f32.mrf.mxu1 }
 0x4af   :  { %v3493_v11 = vpop.f32.mrf.mxu3  ;;  %v2748_v47 = vadd.f32 %v2630_v41, %v12426_v28 }
 0x4b0   :  { %v3068_v13 = vpop.f32.mrf.mxu2  ;;  %v2215_v43 = vpop.f32.mrf.mxu0 }
 0x4b1   :  { %v3179_v25 = vadd.f32 %v3061_v6, %v2748_v47  ;;  %9216 = vmatmul.msk.bf16.gmra.mxu1 %vm93_vm3, %v2440_v19  ;;  %v12474_v55 = vadd.f32 %v2215_v43, %v13804_v26  ;;  %v13806_v47 = vld [vmem:[#allocation21_spill] sm:$0xff]  ;;  %v2400_v43 = vld [vmem:[#allocation2 + $0x272] sm:$0xff]  ;;  %v2401_v19 = vld [vmem:[#allocation2 + $0x27a] sm:$0xff] }
 0x4b2   :  { %v2441_v41 = vpack.c.bf16 %v2401_v19, %v2400_v43 }
 0x4b3   :  { %v12476_v5 = vadd.f32 %v3491_v16, %v3179_v25  ;;  %9186 = vmatmul.msk.bf16.gmra.mxu0 %vm93_vm3, %v2013_v51  ;;  %v2836_v25 = vld [vmem:[#allocation2 + $0x2c0] sm:$0xff] }
 0x4b4   :  { %9283 = vmatmul.msk.bf16.gmra.mxu3 %vm93_vm3, %v2012_v37  ;;  %v2835_v37 = vld [vmem:[#allocation2 + $0x2b8] sm:$0xff] }
 0x4b5   :  { %13805 = vst [vmem:[#allocation20_spill] sm:$0xff] %v12476_v5  ;;  %9251 = vmatmul.msk.bf16.gmra.mxu2 %vm93_vm3, %v2873_v4 }
 0x4b6   :  { %v2632_v27 = vpop.f32.mrf.mxu1 }
 0x4b7   :  { %v3496_v28 = vpop.f32.mrf.mxu3  ;;  %v2749_v52 = vadd.f32 %v2632_v27, %v12435_v15  ;;  %v2014_v15 = vpack.c.bf16 %v1977_v60, %v1976_v9 }
 0x4b8   :  { %v3071_v57 = vpop.f32.mrf.mxu2  ;;  %v2217_v12 = vpop.f32.mrf.mxu0 }
 0x4b9   :  { %v3180_v6 = vadd.f32 %v3063_v46, %v2749_v52  ;;  %v12483_v38 = vadd.f32 %v2217_v12, %v13806_v47  ;;  %v2874_v46 = vpack.c.bf16 %v2836_v25, %v2835_v37  ;;  %v13808_v12 = vld [vmem:[#allocation22_spill] sm:$0xff]  ;;  %v1979_v25 = vld [vmem:[#allocation2 + $0x2d9] sm:$0xff] }
 0x4ba   :  { %v1978_v37 = vld [vmem:[#allocation2 + $0x2d1] sm:$0xff] }
 0x4bb   :  { %v12485_v16 = vadd.f32 %v3493_v11, %v3180_v6 }
 0x4bd   :  { %13807 = vst [vmem:[#allocation21_spill] sm:$0xff] %v12485_v16 }
 0x4be   :  { %v2635_v4 = vpop.f32.mrf.mxu1 }
 0x4bf   :  { %v3498_v26 = vpop.f32.mrf.mxu3  ;;  %v2750_v5 = vadd.f32 %v2635_v4, %v12442_v32 }
 0x4c0   :  { %v3073_v27 = vpop.f32.mrf.mxu2  ;;  %v2220_v40 = vpop.f32.mrf.mxu0 }
 0x4c1   :  { %v3181_v52 = vadd.f32 %v3066_v53, %v2750_v5  ;;  %9217 = vmatmul.msk.bf16.gmra.mxu1 %vm93_vm3, %v2441_v41  ;;  %v12490_v47 = vadd.f32 %v2220_v40, %v13808_v12  ;;  %v13810_v5 = vld [vmem:[#allocation23_spill] sm:$0xff]  ;;  %v2402_v40 = vld [vmem:[#allocation2 + $0x28a] sm:$0xff] }
 0x4c2   :  { %v2403_v41 = vld [vmem:[#allocation2 + $0x292] sm:$0xff] }
 0x4c3   :  { %v12492_v11 = vadd.f32 %v3496_v28, %v3181_v52  ;;  %9187 = vmatmul.msk.bf16.gmra.mxu0 %vm93_vm3, %v2014_v15  ;;  %v2442_v4 = vpack.c.bf16 %v2403_v41, %v2402_v40  ;;  %v2838_v52 = vld [vmem:[#allocation2 + $0x2d8] sm:$0xff] }
 0x4c4   :  { %9284 = vmatmul.msk.bf16.gmra.mxu3 %vm93_vm3, %v2013_v51  ;;  %v2837_v51 = vld [vmem:[#allocation2 + $0x2d0] sm:$0xff] }
 0x4c5   :  { %13809 = vst [vmem:[#allocation22_spill] sm:$0xff] %v12492_v11  ;;  %9252 = vmatmul.msk.bf16.gmra.mxu2 %vm93_vm3, %v2874_v46 }
 0x4c6   :  { %v2637_v6 = vpop.f32.mrf.mxu1 }
 0x4c7   :  { %v3501_v32 = vpop.f32.mrf.mxu3  ;;  %v2751_v43 = vadd.f32 %v2637_v6, %v12451_v1  ;;  %v2015_v1 = vpack.c.bf16 %v1979_v25, %v1978_v37 }
 0x4c8   :  { %v3076_v19 = vpop.f32.mrf.mxu2  ;;  %v2222_v9 = vpop.f32.mrf.mxu0 }
 0x4c9   :  { %v3182_v53 = vadd.f32 %v3068_v13, %v2751_v43  ;;  %v12499_v60 = vadd.f32 %v2222_v9, %v13810_v5  ;;  %v2875_v13 = vpack.c.bf16 %v2838_v52, %v2837_v51  ;;  %v13812_v9 = vld [vmem:[#allocation24_spill] sm:$0xff]  ;;  %v1980_v51 = vld [vmem:[#allocation2 + $0x2e9] sm:$0xff]  ;;  %v1981_v52 = vld [vmem:[#allocation2 + $0x2f1] sm:$0xff] }
 0x4cb   :  { %v12501_v28 = vadd.f32 %v3498_v26, %v3182_v53 }
 0x4cd   :  { %13811 = vst [vmem:[#allocation23_spill] sm:$0xff] %v12501_v28 }
 0x4ce   :  { %v2640_v46 = vpop.f32.mrf.mxu1 }
 0x4cf   :  { %v3503_v12 = vpop.f32.mrf.mxu3  ;;  %v2752_v11 = vadd.f32 %v2640_v46, %v12458_v18 }
 0x4d0   :  { %v3078_v6 = vpop.f32.mrf.mxu2  ;;  %v2225_v16 = vpop.f32.mrf.mxu0 }
 0x4d1   :  { %v3183_v43 = vadd.f32 %v3071_v57, %v2752_v11  ;;  %9218 = vmatmul.msk.bf16.gmra.mxu1 %vm93_vm3, %v2442_v4  ;;  %v12506_v5 = vadd.f32 %v2225_v16, %v13812_v9  ;;  %v13814_v11 = vld [vmem:[#allocation25_spill] sm:$0xff]  ;;  %v2405_v4 = vld [vmem:[#allocation2 + $0x2aa] sm:$0xff] }
 0x4d2   :  { %v2404_v16 = vld [vmem:[#allocation2 + $0x2a2] sm:$0xff] }
 0x4d3   :  { %v12508_v26 = vadd.f32 %v3501_v32, %v3183_v43  ;;  %9188 = vmatmul.msk.bf16.gmra.mxu0 %vm93_vm3, %v2015_v1  ;;  %v2443_v46 = vpack.c.bf16 %v2405_v4, %v2404_v16  ;;  %v2840_v43 = vld [vmem:[#allocation2 + $0x2f0] sm:$0xff] }
 0x4d4   :  { %9285 = vmatmul.msk.bf16.gmra.mxu3 %vm93_vm3, %v2014_v15  ;;  %v2839_v15 = vld [vmem:[#allocation2 + $0x2e8] sm:$0xff] }
 0x4d5   :  { %13813 = vst [vmem:[#allocation24_spill] sm:$0xff] %v12508_v26  ;;  %9253 = vmatmul.msk.bf16.gmra.mxu2 %vm93_vm3, %v2875_v13 }
 0x4d6   :  { %v2642_v53 = vpop.f32.mrf.mxu1 }
 0x4d7   :  { %v3506_v18 = vpop.f32.mrf.mxu3  ;;  %v2753_v40 = vadd.f32 %v2642_v53, %v12467_v33  ;;  %v2016_v33 = vpack.c.bf16 %v1981_v52, %v1980_v51 }
 0x4d8   :  { %v3081_v41 = vpop.f32.mrf.mxu2  ;;  %v2227_v37 = vpop.f32.mrf.mxu0 }
 0x4d9   :  { %v3184_v57 = vadd.f32 %v3073_v27, %v2753_v40  ;;  %v12515_v25 = vadd.f32 %v2227_v37, %v13814_v11  ;;  %v2876_v27 = vpack.c.bf16 %v2840_v43, %v2839_v15  ;;  %v13815_v37 = vld [vmem:[#allocation26_spill] sm:$0xff]  ;;  %v1982_v15 = vld [vmem:[#allocation2 + $0x301] sm:$0xff] }
 0x4da   :  { %v1983_v43 = vld [vmem:[#allocation2 + $0x309] sm:$0xff] }
 0x4db   :  { %v12517_v32 = vadd.f32 %v3503_v12, %v3184_v57 }
 0x4de   :  { %v2645_v13 = vpop.f32.mrf.mxu1 }
 0x4df   :  { %v3508_v9 = vpop.f32.mrf.mxu3  ;;  %v2754_v26 = vadd.f32 %v2645_v13, %v12474_v55 }
 0x4e0   :  { %v3083_v53 = vpop.f32.mrf.mxu2  ;;  %v2230_v28 = vpop.f32.mrf.mxu0 }
 0x4e1   :  { %v3185_v40 = vadd.f32 %v3076_v19, %v2754_v26  ;;  %9219 = vmatmul.msk.bf16.gmra.mxu1 %vm93_vm3, %v2443_v46  ;;  %v12522_v11 = vadd.f32 %v2230_v28, %v13815_v37  ;;  %v13817_v19 = vld [vmem:[#allocation27_spill] sm:$0xff]  ;;  %v2406_v28 = vld [vmem:[#allocation2 + $0x2ba] sm:$0xff]  ;;  %v2407_v46 = vld [vmem:[#allocation2 + $0x2c2] sm:$0xff] }
 0x4e2   :  { %v2444_v13 = vpack.c.bf16 %v2407_v46, %v2406_v28 }
 0x4e3   :  { %v12524_v12 = vadd.f32 %v3506_v18, %v3185_v40  ;;  %9189 = vmatmul.msk.bf16.gmra.mxu0 %vm93_vm3, %v2016_v33  ;;  %v2842_v40 = vld [vmem:[#allocation2 + $0x308] sm:$0xff] }
 0x4e4   :  { %9286 = vmatmul.msk.bf16.gmra.mxu3 %vm93_vm3, %v2015_v1  ;;  %v2841_v1 = vld [vmem:[#allocation2 + $0x300] sm:$0xff] }
 0x4e5   :  { %13816 = vst [vmem:[#allocation25_spill] sm:$0xff] %v12524_v12  ;;  %9254 = vmatmul.msk.bf16.gmra.mxu2 %vm93_vm3, %v2876_v27 }
 0x4e6   :  { %v2647_v57 = vpop.f32.mrf.mxu1 }
 0x4e7   :  { %v3511_v55 = vpop.f32.mrf.mxu3  ;;  %v2755_v16 = vadd.f32 %v2647_v57, %v12483_v38  ;;  %v2017_v38 = vpack.c.bf16 %v1983_v43, %v1982_v15  ;;  %v2408_v43 = vld [vmem:[#allocation2 + $0x2d2] sm:$0xff] }
 0x4e8   :  { %v2232_v4 = vpop.f32.mrf.mxu0  ;;  %v3086_v52 = vpop.f32.mrf.mxu2 }
 0x4e9   :  { %v3186_v51 = vadd.f32 %v3078_v6, %v2755_v16  ;;  %v12531_v26 = vadd.f32 %v2232_v4, %v13817_v19  ;;  %v2877_v6 = vpack.c.bf16 %v2842_v40, %v2841_v1  ;;  %v13819_v4 = vld [vmem:[#allocation28_spill] sm:$0xff] }
 0x4ea   :  { %v1984_v1 = vld [vmem:[#allocation2 + $0x319] sm:$0xff]  ;;  %v1985_v40 = vld [vmem:[#allocation2 + $0x321] sm:$0xff] }
 0x4eb   :  { %13818 = vst [vmem:[#allocation26_spill] sm:$0xff] %v12531_v26  ;;  %v12533_v18 = vadd.f32 %v3508_v9, %v3186_v51 }
 0x4ee   :  { %v2650_v27 = vpop.f32.mrf.mxu1 }
 0x4ef   :  { %v3513_v37 = vpop.f32.mrf.mxu3  ;;  %v2756_v12 = vadd.f32 %v2650_v27, %v12490_v47 }
 0x4f0   :  { %v2235_v57 = vpop.f32.mrf.mxu0  ;;  %v3088_v51 = vpop.f32.mrf.mxu2 }
 0x4f1   :  { %v3187_v16 = vadd.f32 %v3081_v41, %v2756_v12  ;;  %9220 = vmatmul.msk.bf16.gmra.mxu1 %vm93_vm3, %v2444_v13  ;;  %v12538_v19 = vadd.f32 %v2235_v57, %v13819_v4  ;;  %v2409_v13 = vld [vmem:[#allocation2 + $0x2da] sm:$0xff] }
 0x4f2   :  { %v2445_v27 = vpack.c.bf16 %v2409_v13, %v2408_v43  ;;  %v2843_v57 = vld [vmem:[#allocation2 + $0x318] sm:$0xff] }
 0x4f3   :  { %v12540_v9 = vadd.f32 %v3511_v55, %v3187_v16  ;;  %9190 = vmatmul.msk.bf16.gmra.mxu0 %vm93_vm3, %v2017_v38  ;;  %v2844_v16 = vld [vmem:[#allocation2 + $0x320] sm:$0xff]  ;;  %v10576_v43 = vld [vmem:[#allocation7 + $0x58] sm:$0xff] }
 0x4f4   :  { %9287 = vmatmul.msk.bf16.gmra.mxu3 %vm93_vm3, %v2016_v33 }
 0x4f5   :  { %9255 = vmatmul.msk.bf16.gmra.mxu2 %vm93_vm3, %v2877_v6  ;;  %4901 = vmatpush.bf16.msra.mxu3 %v10576_v43 }
 0x4f6   :  { %v2652_v28 = vpop.f32.mrf.mxu1 }
 0x4f7   :  { %v3516_v47 = vpop.f32.mrf.mxu3  ;;  %v2757_v46 = vadd.f32 %v2652_v28, %v12499_v60  ;;  %v2018_v60 = vpack.c.bf16 %v1985_v40, %v1984_v1 }
 0x4f8   :  { %v2237_v15 = vpop.f32.mrf.mxu0  ;;  %v3091_v33 = vpop.f32.mrf.mxu2 }
 0x4f9   :  { %v3188_v41 = vadd.f32 %v3083_v53, %v2757_v46  ;;  %v12547_v12 = vadd.f32 %v2237_v15, %v12144_v44  ;;  %v2878_v53 = vpack.c.bf16 %v2844_v16, %v2843_v57  ;;  %v13821_v44 = vld [vmem:[#allocation29_spill] sm:$0xff]  ;;  %v2411_v16 = vld [vmem:[#allocation2 + $0x2f2] sm:$0xff] }
 0x4fb   :  { %13820 = vst [vmem:[#allocation27_spill] sm:$0xff] %v12547_v12  ;;  %v12549_v55 = vadd.f32 %v3513_v37, %v3188_v41  ;;  %v10568_v41 = vld [vmem:[#allocation7 + $0x18] sm:$0xff] }
 0x4fc   :  { %4755 = vmatpush.bf16.msra.mxu2 %v10568_v41  ;;  %v2846_v41 = vld [vmem:[#allocation2 + $0x338] sm:$0xff] }
 0x4fe   :  { %v2655_v6 = vpop.f32.mrf.mxu1 }
 0x4ff   :  { %v3518_v4 = vpop.f32.mrf.mxu3  ;;  %v2758_v26 = vadd.f32 %v2655_v6, %v12506_v5 }
 0x500   :  { %v2240_v28 = vpop.f32.mrf.mxu0  ;;  %v12562_v40 = vpop.f32.mrf.mxu2 }
 0x501   :  { %v3189_v46 = vadd.f32 %v3086_v52, %v2758_v26  ;;  %9221 = vmatmul.msk.bf16.gmra.mxu1 %vm93_vm3, %v2445_v27  ;;  %v12554_v15 = vadd.f32 %v2240_v28, %v13821_v44  ;;  %v10572_v52 = vld [vmem:[#allocation7 + $0x38] sm:$0xff]  ;;  %13822 = vst [vmem:[#allocation28_spill] sm:$0xff] %v12562_v40  ;;  %v13823_v27 = vld [vmem:[#allocation30_spill] sm:$0xff] }
 0x502   :  { %4658 = vmatpush.bf16.msrb.mxu1 %v10572_v52  ;;  %v1986_v28 = vld [vmem:[#allocation2 + $0x331] sm:$0xff] }
 0x503   :  { %v12556_v37 = vadd.f32 %v3516_v47, %v3189_v46  ;;  %9191 = vmatmul.msk.bf16.gmra.mxu0 %vm93_vm3, %v2018_v60  ;;  %v2845_v44 = vld [vmem:[#allocation2 + $0x330] sm:$0xff] }
 0x504   :  { %9288 = vmatmul.msk.bf16.gmra.mxu3 %vm93_vm3, %v2017_v38  ;;  %v2410_v38 = vld [vmem:[#allocation2 + $0x2ea] sm:$0xff]  ;;  %v13826_v52 = vld [vmem:[#allocation31_spill] sm:$0xff] }
 0x505   :  { %9256 = vmatmul.msk.bf16.gmra.mxu2 %vm93_vm3, %v2878_v53  ;;  %v1987_v53 = vld [vmem:[#allocation2 + $0x339] sm:$0xff]  ;;  %v2446_v46 = vpack.c.bf16 %v2411_v16, %v2410_v38 }
 0x506   :  { %v2657_v5 = vpop.f32.mrf.mxu1  ;;  %v2019_v12 = vpack.c.bf16 %v1987_v53, %v1986_v28  ;;  %v13827_v28 = vld [vmem:[#allocation32_spill] sm:$0xff]  ;;  %v2412_v53 = vld [vmem:[#allocation2 + $0x302] sm:$0xff] }
 0x507   :  { %v3521_v13 = vpop.f32.mrf.mxu3  ;;  %v2759_v26 = vadd.f32 %v2657_v5, %v12515_v25 }
 0x508   :  { %v2242_v1 = vpop.f32.mrf.mxu0 }
 0x509   :  { %v3190_v47 = vadd.f32 %v3088_v51, %v2759_v26  ;;  %v12565_v57 = vadd.f32 %v2242_v1, %v13823_v27  ;;  %v2879_v26 = vpack.c.bf16 %v2846_v41, %v2845_v44  ;;  %v3645_v41 = vld [vmem:[#allocation2 + $0x32] sm:$0xff] }
 0x50b   :  { %13824 = vst [vmem:[#allocation29_spill] sm:$0xff] %v12565_v57  ;;  %v12567_v6 = vadd.f32 %v3518_v4, %v3190_v47  ;;  %v3096_v4 = vpop.f32.mrf.mxu2 }
 0x50e   :  { %v2660_v43 = vpop.f32.mrf.mxu1 }
 0x50f   :  { %v12569_v25 = vpop.f32.mrf.mxu3  ;;  %v2760_v5 = vadd.f32 %v2660_v43, %v12522_v11 }
 0x510   :  { %13825 = vst [vmem:[#allocation30_spill] sm:$0xff] %v12569_v25  ;;  %v2245_v51 = vpop.f32.mrf.mxu0 }
 0x511   :  { %v3191_v1 = vadd.f32 %v3091_v33, %v2760_v5  ;;  %9222 = vmatmul.msk.bf16.gmra.mxu1 %vm93_vm3, %v2446_v46  ;;  %v12574_v27 = vadd.f32 %v2245_v51, %v13826_v52  ;;  %v2413_v46 = vld [vmem:[#allocation2 + $0x30a] sm:$0xff] }
 0x512   :  { %v2447_v43 = vpack.c.bf16 %v2413_v46, %v2412_v53  ;;  %v2847_v5 = vld [vmem:[#allocation2 + $0x348] sm:$0xff]  ;;  %v2848_v51 = vld [vmem:[#allocation2 + $0x350] sm:$0xff] }
 0x513   :  { %v12576_v47 = vadd.f32 %v3521_v13, %v3191_v1  ;;  %9192 = vmatmul.msk.bf16.gmra.mxu0 %vm93_vm3, %v2019_v12  ;;  %v12586_v44 = vpop.f32.mrf.mxu2  ;;  %v3646_v13 = vld [vmem:[#allocation2 + $0x3a] sm:$0xff]  ;;  %v2880_v25 = vpack.c.bf16 %v2848_v51, %v2847_v5  ;;  %v3647_v51 = vld [vmem:[#allocation2 + $0x4a] sm:$0xff] }
 0x514   :  { %9289 = vmatmul.msk.bf16.gmra.mxu3 %vm93_vm3, %v2018_v60  ;;  %13829 = vst [vmem:[#allocation32_spill] sm:$0xff] %v12586_v44  ;;  %v3709_v52 = vpack.c.bf16 %v3646_v13, %v3645_v41  ;;  %v13833_v13 = vld [vmem:[#allocation34_spill] sm:$0xff] }
 0x515   :  { %9257 = vmatmul.msk.bf16.gmra.mxu2 %vm93_vm3, %v2879_v26 }
 0x516   :  { %v12581_v38 = vpop.f32.mrf.mxu1 }
 0x517   :  { %v3526_v11 = vpop.f32.mrf.mxu3 }
 0x518   :  { %v2247_v16 = vpop.f32.mrf.mxu0 }
 0x519   :  { %v12584_v33 = vadd.f32 %v2247_v16, %v13827_v28  ;;  %v13831_v16 = vld [vmem:[#allocation33_spill] sm:$0xff] }
 0x51b   :  { %13828 = vst [vmem:[#allocation31_spill] sm:$0xff] %v12584_v33  ;;  %v3101_v46 = vpop.f32.mrf.mxu2 }
 0x51e   :  { %v2665_v1 = vpop.f32.mrf.mxu1 }
 0x51f   :  { %v12588_v60 = vpop.f32.mrf.mxu3  ;;  %v2762_v26 = vadd.f32 %v2665_v1, %v12538_v19 }
 0x520   :  { %13830 = vst [vmem:[#allocation42_spill] sm:$0xff] %v12588_v60  ;;  %v2250_v57 = vpop.f32.mrf.mxu0 }
 0x521   :  { %v3193_v40 = vadd.f32 %v3096_v4, %v2762_v26  ;;  %9223 = vmatmul.msk.bf16.gmra.mxu1 %vm93_vm3, %v2447_v43  ;;  %v2338_v28 = vadd.f32 %v2250_v57, %v13831_v16  ;;  %v2414_v4 = vld [vmem:[#allocation2 + $0x31a] sm:$0xff]  ;;  %v2415_v43 = vld [vmem:[#allocation2 + $0x322] sm:$0xff]  ;;  %v3648_v57 = vld [vmem:[#allocation2 + $0x52] sm:$0xff] }
 0x522   :  { %v2448_v1 = vpack.c.bf16 %v2415_v43, %v2414_v4  ;;  %v13838_v43 = vld [vmem:[#allocation36_spill] sm:$0xff] }
 0x523   :  { %v12593_v33 = vadd.f32 %v3526_v11, %v3193_v40  ;;  %9293 = vmatmul.msk.bf16.vlgmr.msra.gmra.mxu0 %vm93_vm3, %v3709_v52  ;;  %v3277_v40 = vld [vmem:[#allocation2 + $0x349] sm:$0xff]  ;;  %v3278_v11 = vld [vmem:[#allocation2 + $0x351] sm:$0xff]  ;;  %v3710_v52 = vpack.c.bf16 %v3648_v57, %v3647_v51  ;;  %v12604_v60 = vpop.f32.mrf.mxu2 }
 0x524   :  { %9290 = vmatmul.msk.bf16.gmra.mxu3 %vm93_vm3, %v2019_v12  ;;  %v2416_v57 = vld [vmem:[#allocation2 + $0x332] sm:$0xff] }
 0x525   :  { %13832 = vst [vmem:[#allocation33_spill] sm:$0xff] %v12593_v33  ;;  %9258 = vmatmul.msk.bf16.gmra.mxu2 %vm93_vm3, %v2880_v25  ;;  %v3310_v25 = vpack.c.bf16 %v3278_v11, %v3277_v40  ;;  %v2417_v40 = vld [vmem:[#allocation2 + $0x33a] sm:$0xff] }
 0x526   :  { %v12598_v53 = vpop.f32.mrf.mxu1 }
 0x527   :  { %v3531_v41 = vpop.f32.mrf.mxu3 }
 0x528   :  { %v2252_v19 = vpop.f32.mrf.mxu0 }
 0x529   :  { %v12601_v5 = vadd.f32 %v2252_v19, %v13833_v13  ;;  %v13835_v19 = vld [vmem:[#allocation35_spill] sm:$0xff] }
 0x52b   :  { %13834 = vst [vmem:[#allocation34_spill] sm:$0xff] %v12601_v5 }
 0x52e   :  { %v2670_v26 = vpop.f32.mrf.mxu1 }
 0x52f   :  { %v2764_v12 = vadd.f32 %v2670_v26, %v12554_v15  ;;  %v12610_v5 = vpop.f32.mrf.mxu3  ;;  %v3650_v26 = vld [vmem:[#allocation2 + $0x6a] sm:$0xff] }
 0x530   :  { %v2255_v16 = vpop.f32.mrf.mxu0  ;;  %13837 = vst [vmem:[#allocation43_spill] sm:$0xff] %v12610_v5 }
 0x531   :  { %v3195_v44 = vadd.f32 %v3101_v46, %v2764_v12  ;;  %9224 = vmatmul.msk.bf16.gmra.mxu1 %vm93_vm3, %v2448_v1  ;;  %v12608_v13 = vadd.f32 %v2255_v16, %v13835_v19  ;;  %v3106_v46 = vpop.f32.mrf.mxu2  ;;  %v3649_v1 = vld [vmem:[#allocation2 + $0x62] sm:$0xff]  ;;  %v2449_v12 = vpack.c.bf16 %v2417_v40, %v2416_v57 }
 0x533   :  { %13836 = vst [vmem:[#allocation35_spill] sm:$0xff] %v12608_v13  ;;  %v12612_v33 = vadd.f32 %v3531_v41, %v3195_v44  ;;  %9294 = vmatmul.msk.bf16.gmra.mxu0 %vm93_vm3, %v3710_v52  ;;  %v3711_v41 = vpack.c.bf16 %v3650_v26, %v3649_v1  ;;  %v3652_v26 = vld [vmem:[#allocation2 + $0x82] sm:$0xff] }
 0x534   :  { %9291 = vmatmul.msk.bf16.gmra.mxu3 %vm93_vm3, %v3310_v25  ;;  %v13840_v25 = vld [vmem:[#allocation37_spill] sm:$0xff] }
 0x536   :  { %v12616_v15 = vpop.f32.mrf.mxu1 }
 0x537   :  { %v3536_v11 = vpop.f32.mrf.mxu3 }
 0x538   :  { %v2257_v4 = vpop.f32.mrf.mxu0 }
 0x539   :  { %v12619_v51 = vadd.f32 %v2257_v4, %v13838_v43  ;;  %v12629_v43 = vpop.f32.mrf.mxu2 }
 0x53a   :  { %13843 = vst [vmem:[#allocation45_spill] sm:$0xff] %v12629_v43 }
 0x53b   :  { %13839 = vst [vmem:[#allocation36_spill] sm:$0xff] %v12619_v51 }
 0x53e   :  { %v2675_v16 = vpop.f32.mrf.mxu1 }
 0x53f   :  { %v2766_v44 = vadd.f32 %v2675_v16, %v12574_v27  ;;  %v12633_v57 = vpop.f32.mrf.mxu3  ;;  %v13846_v27 = vld [vmem:[#allocation38_spill] sm:$0xff] }
 0x540   :  { %v2260_v52 = vpop.f32.mrf.mxu0  ;;  %13845 = vst [vmem:[#allocation47_spill] sm:$0xff] %v12633_v57 }
 0x541   :  { %v3197_v19 = vadd.f32 %v3106_v46, %v2766_v44  ;;  %9225 = vmatmul.msk.bf16.gmra.mxu1 %vm93_vm3, %v2449_v12  ;;  %v12624_v13 = vadd.f32 %v2260_v52, %v13840_v25  ;;  %v3651_v46 = vld [vmem:[#allocation2 + $0x7a] sm:$0xff]  ;;  %v3111_v16 = vpop.f32.mrf.mxu2 }
 0x542   :  { %v3712_v52 = vpack.c.bf16 %v3652_v26, %v3651_v46 }
 0x543   :  { %13841 = vst [vmem:[#allocation37_spill] sm:$0xff] %v12624_v13  ;;  %v12626_v4 = vadd.f32 %v3536_v11, %v3197_v19  ;;  %9295 = vmatmul.msk.bf16.gmra.mxu0 %vm93_vm3, %v3711_v41  ;;  %v13848_v41 = vld [vmem:[#allocation39_spill] sm:$0xff] }
 0x545   :  { %13842 = vst [vmem:[#allocation44_spill] sm:$0xff] %v12626_v4  ;;  %v13849_v4 = vld [vmem:[#allocation40_spill] sm:$0xff] }
 0x546   :  { %v12631_v51 = vpop.f32.mrf.mxu1 }
 0x547   :  { %13844 = vst [vmem:[#allocation46_spill] sm:$0xff] %v12631_v51  ;;  %v3541_v11 = vpop.f32.mrf.mxu3 }
 0x548   :  { %v2262_v40 = vpop.f32.mrf.mxu0 }
 0x549   :  { %v12636_v1 = vadd.f32 %v2262_v40, %v13846_v27  ;;  %v3653_v27 = vld [vmem:[#allocation2 + $0x92] sm:$0xff] }
 0x54b   :  { %13847 = vst [vmem:[#allocation38_spill] sm:$0xff] %v12636_v1  ;;  %v3654_v1 = vld [vmem:[#allocation2 + $0x9a] sm:$0xff] }
 0x54c   :  { %v3713_v51 = vpack.c.bf16 %v3654_v1, %v3653_v27  ;;  %v10575_v27 = vld [vmem:[#allocation7 + $0x50] sm:$0xff] }
 0x54d   :  { %4902 = vmatpush.bf16.msra.mxu3 %v10575_v27 }
 0x54e   :  { %v2680_v12 = vpop.f32.mrf.mxu1 }
 0x54f   :  { %v2768_v44 = vadd.f32 %v2680_v12, %v2338_v28  ;;  %v13850_v28 = vld [vmem:[#allocation41_spill] sm:$0xff] }
 0x550   :  { %v2265_v19 = vpop.f32.mrf.mxu0 }
 0x551   :  { %v3199_v25 = vadd.f32 %v3111_v16, %v2768_v44  ;;  %v12639_v13 = vadd.f32 %v2265_v19, %v13848_v41  ;;  %v3655_v16 = vld [vmem:[#allocation2 + $0xaa] sm:$0xff]  ;;  %v3656_v44 = vld [vmem:[#allocation2 + $0xb2] sm:$0xff] }
 0x552   :  { %v3658_v19 = vld [vmem:[#allocation2 + $0xca] sm:$0xff] }
 0x553   :  { %v12641_v43 = vadd.f32 %v3541_v11, %v3199_v25  ;;  %9296 = vmatmul.msk.bf16.gmra.mxu0 %vm93_vm3, %v3712_v52  ;;  %v3714_v52 = vpack.c.bf16 %v3656_v44, %v3655_v16  ;;  %v10567_v41 = vld [vmem:[#allocation7 + $0x10] sm:$0xff]  ;;  %v3660_v16 = vld [vmem:[#allocation2 + $0xe2] sm:$0xff] }
 0x554   :  { %4756 = vmatpush.bf16.msra.mxu2 %v10567_v41 }
 0x558   :  { %v2267_v57 = vpop.f32.mrf.mxu0 }
 0x559   :  { %v12645_v40 = vadd.f32 %v2267_v57, %v13849_v4 }
 0x560   :  { %v2270_v5 = vpop.f32.mrf.mxu0 }
 0x561   :  { %v12648_v46 = vadd.f32 %v2270_v5, %v13850_v28  ;;  %v3657_v5 = vld [vmem:[#allocation2 + $0xc2] sm:$0xff] }
 0x563   :  { %13851 = vst [vmem:[#allocation39_spill] sm:$0xff] %v12648_v46  ;;  %9297 = vmatmul.msk.bf16.gmra.mxu0 %vm93_vm3, %v3713_v51  ;;  %v3715_v51 = vpack.c.bf16 %v3658_v19, %v3657_v5  ;;  %v3661_v5 = vld [vmem:[#allocation2 + $0xf2] sm:$0xff]  ;;  %v3662_v19 = vld [vmem:[#allocation2 + $0xfa] sm:$0xff] }
 0x568   :  { %v2272_v26 = vpop.f32.mrf.mxu0 }
 0x569   :  { %v12652_v12 = vadd.f32 %v2272_v26, %v12201_v3 }
 0x56b   :  { %13852 = vst [vmem:[#allocation40_spill] sm:$0xff] %v12652_v12 }
 0x570   :  { %v2275_v11 = vpop.f32.mrf.mxu0 }
 0x571   :  { %v12655_v4 = vadd.f32 %v2275_v11, %v12207_v17  ;;  %v10571_v17 = vld [vmem:[#allocation7 + $0x30] sm:$0xff] }
 0x572   :  { %4659 = vmatpush.bf16.msrb.mxu1 %v10571_v17 }
 0x573   :  { %13853 = vst [vmem:[#allocation41_spill] sm:$0xff] %v12655_v4  ;;  %9298 = vmatmul.msk.bf16.gmra.mxu0 %vm93_vm3, %v3714_v52 }
 0x578   :  { %v2277_v57 = vpop.f32.mrf.mxu0 }
 0x579   :  { %v12659_v1 = vadd.f32 %v2277_v57, %v12215_v35  ;;  %v3659_v35 = vld [vmem:[#allocation2 + $0xda] sm:$0xff] }
 0x57a   :  { %v3716_v44 = vpack.c.bf16 %v3660_v16, %v3659_v35  ;;  %v10570_v35 = vld [vmem:[#allocation7 + $0x28] sm:$0xff] }
 0x57b   :  { %13854 = vst [vmem:[#allocation48_spill] sm:$0xff] %v12659_v1  ;;  %v10566_v16 = vld [vmem:[#allocation7 + $0x8] sm:$0xff]  ;;  %4660 = vmatpush.bf16.msrb.mxu1 %v10570_v35 }
 0x57c   :  { %4757 = vmatpush.bf16.msra.mxu2 %v10566_v16  ;;  %v12691_v16 = vpop.f32.mrf.mxu1 }
 0x580   :  { %v2280_v25 = vpop.f32.mrf.mxu0 }
 0x581   :  { %v12662_v3 = vadd.f32 %v2280_v25, %v12221_v61 }
 0x583   :  { %13855 = vst [vmem:[#allocation49_spill] sm:$0xff] %v12662_v3  ;;  %9299 = vmatmul.msk.bf16.gmra.mxu0 %vm93_vm3, %v3715_v51  ;;  %v3717_v51 = vpack.c.bf16 %v3662_v19, %v3661_v5  ;;  %v3663_v5 = vld [vmem:[#allocation2 + $0x10a] sm:$0xff]  ;;  %v3664_v19 = vld [vmem:[#allocation2 + $0x112] sm:$0xff] }
 0x588   :  { %v2282_v28 = vpop.f32.mrf.mxu0 }
 0x589   :  { %v12666_v26 = vadd.f32 %v2282_v28, %v12229_v23  ;;  %v12678_v23 = vld [vmem:[%s13761_s2] ss:$0 sm:$0xff] }
 0x58b   :  { %13856 = vst [vmem:[#allocation50_spill] sm:$0xff] %v12666_v26 }
 0x590   :  { %v2285_v52 = vpop.f32.mrf.mxu0 }
 0x591   :  { %v12669_v11 = vadd.f32 %v2285_v52, %v12236_v10 }
 0x593   :  { %13857 = vst [vmem:[#allocation51_spill] sm:$0xff] %v12669_v11  ;;  %9300 = vmatmul.msk.bf16.gmra.mxu0 %vm93_vm3, %v3716_v44  ;;  %v10574_v44 = vld [vmem:[#allocation7 + $0x48] sm:$0xff] }
 0x594   :  { %4903 = vmatpush.bf16.msra.mxu3 %v10574_v44  ;;  %v12693_v44 = vpop.f32.mrf.mxu2 }
 0x598   :  { %v2287_v61 = vpop.f32.mrf.mxu0 }
 0x599   :  { %v12673_v57 = vadd.f32 %v2287_v61, %v12245_v7  ;;  %v10565_v61 = vld [vmem:[#allocation7] sm:$0xff] }
 0x59a   :  { %4758 = vmatpush.bf16.msra.mxu2 %v10565_v61  ;;  %v3665_v61 = vld [vmem:[#allocation2 + $0x122] sm:$0xff] }
 0x59b   :  { %13858 = vst [vmem:[#allocation52_spill] sm:$0xff] %v12673_v57 }
 0x5a0   :  { %v3851_v25 = vpop.f32.mrf.mxu0 }
 0x5a1   :  { %v4011_v41 = vadd.f32 %v3851_v25, %v12252_v8  ;;  %v10569_v8 = vld [vmem:[#allocation7 + $0x20] sm:$0xff] }
 0x5a2   :  { %4661 = vmatpush.bf16.msrb.mxu1 %v10569_v8  ;;  %v12696_v8 = vpop.f32.mrf.mxu3 }
 0x5a3   :  { %v4079_v10 = vadd.f32 %v12678_v23, %v4011_v41  ;;  %9301 = vmatmul.msk.bf16.gmra.mxu0 %vm93_vm3, %v3717_v51  ;;  %v10573_v51 = vld [vmem:[#allocation7 + $0x40] sm:$0xff] }
 0x5a4   :  { %4904 = vmatpush.bf16.msra.mxu3 %v10573_v51 }
 0x5a5   :  { %vm4143_vm5 = vcmp.ge.f32.partialorder %v4079_v10, 0.0  ;;  %v4207_v27 = vmul.f32 0.01, %v4079_v10 }
 0x5a7   :  { %v4271_v17 = vsel %vm4143_vm5, %v4079_v10, %v4207_v27  ;;  %v3718_v10 = vpack.c.bf16 %v3664_v19, %v3663_v5  ;;  %v3666_v5 = vld [vmem:[#allocation2 + $0x12a] sm:$0xff] }
 0x5a8   :  { %4446 = vst.msk [vmem:[#allocation3 + $0x19] sm:$0xff] %vm4335_vm0, %v4271_v17  ;;  %v3853_v7 = vpop.f32.mrf.mxu0 }
 0x5a9   :  { %v4012_v28 = vadd.f32 %v3853_v7, %v12261_v63 }
 0x5ab   :  { %v4080_v52 = vadd.f32 %v12678_v23, %v4012_v28 }
 0x5ad   :  { %vm4144_vm6 = vcmp.ge.f32.partialorder %v4080_v52, 0.0  ;;  %v4208_v25 = vmul.f32 0.01, %v4080_v52 }
 0x5af   :  { %v4272_v41 = vsel %vm4144_vm6, %v4080_v52, %v4208_v25  ;;  %v3719_v25 = vpack.c.bf16 %v3666_v5, %v3665_v61 }
 0x5b0   :  { %4447 = vst.msk [vmem:[#allocation3 + $0x21] sm:$0xff] %vm4335_vm0, %v4272_v41  ;;  %v3856_v63 = vpop.f32.mrf.mxu0 }
 0x5b1   :  { %v4013_v27 = vadd.f32 %v3856_v63, %v12268_v39  ;;  %v12701_v63 = vpop.f32.mrf.mxu1 }
 0x5b3   :  { %v4081_v17 = vadd.f32 %v12678_v23, %v4013_v27  ;;  %9302 = vmatmul.msk.bf16.gmra.mxu0 %vm93_vm3, %v3718_v10  ;;  %v12703_v27 = vpop.f32.mrf.mxu2 }
 0x5b5   :  { %vm4145_vm7 = vcmp.ge.f32.partialorder %v4081_v17, 0.0  ;;  %v4209_v7 = vmul.f32 0.01, %v4081_v17 }
 0x5b7   :  { %v4273_v28 = vsel %vm4145_vm7, %v4081_v17, %v4209_v7  ;;  %v4558_v17 = vld [vmem:[#allocation3 + $0x1] ss:$2 sm:$0xff]  ;;  %v4510_v7 = vld [vmem:[#allocation3] ss:$2 sm:$0xff] }
 0x5b8   :  { %4448 = vst.msk [vmem:[#allocation3 + $0x31] sm:$0xff] %vm4335_vm0, %v4273_v28  ;;  %v3858_v35 = vpop.f32.mrf.mxu0  ;;  %v12707_v28 = vpop.f32.mrf.mxu3 }
 0x5b9   :  { %v4014_v52 = vadd.f32 %v3858_v35, %v12277_v50  ;;  %v12715_v11 = vpop.f32.mrf.mxu1 }
 0x5bb   :  { %v4082_v39 = vadd.f32 %v12678_v23, %v4014_v52  ;;  %v4801_v52 = vld [vmem:[#allocation3 + $0x2] ss:$2 sm:$0xff]  ;;  %v12717_v26 = vpop.f32.mrf.mxu2 }
 0x5bd   :  { %vm4146_vm8 = vcmp.ge.f32.partialorder %v4082_v39, 0.0  ;;  %v4210_v19 = vmul.f32 0.01, %v4082_v39 }
 0x5bf   :  { %v4274_v51 = vsel %vm4146_vm8, %v4082_v39, %v4210_v19 }
 0x5c0   :  { %4449 = vst.msk [vmem:[#allocation3 + $0x39] sm:$0xff] %vm4335_vm0, %v4274_v51  ;;  %v3861_v41 = vpop.f32.mrf.mxu0 }
 0x5c1   :  { %v4015_v10 = vadd.f32 %v3861_v41, %v12284_v58 }
 0x5c3   :  { %v4083_v50 = vadd.f32 %v12678_v23, %v4015_v10  ;;  %9303 = vmatmul.msk.bf16.gmra.mxu0 %vm93_vm3, %v3719_v25 }
 0x5c5   :  { %vm4147_vm9 = vcmp.ge.f32.partialorder %v4083_v50, 0.0  ;;  %v4211_v35 = vmul.f32 0.01, %v4083_v50 }
 0x5c7   :  { %v4275_v39 = vsel %vm4147_vm9, %v4083_v50, %v4211_v35  ;;  %v4560_v61 = vld [vmem:[#allocation3 + $0x31] ss:$2 sm:$0xff]  ;;  %v4512_v5 = vld [vmem:[#allocation3 + $0x30] ss:$2 sm:$0xff]  ;;  %v3668_v35 = vld [vmem:[#allocation2 + $0x142] sm:$0xff] }
 0x5c8   :  { %v4803_v19 = vld [vmem:[#allocation3 + $0x32] ss:$2 sm:$0xff]  ;;  %4450 = vst.msk [vmem:[#allocation3 + $0x49] sm:$0xff] %vm4335_vm0, %v4275_v39  ;;  %v3863_v58 = vpop.f32.mrf.mxu0  ;;  %v4589_v51 = vpack.c.bf16 %v4560_v61, %v4558_v17  ;;  %v4541_v41 = vpack.c.bf16 %v4512_v5, %v4510_v7  ;;  %v12719_v7 = vpop.f32.mrf.mxu3 }
 0x5c9   :  { %v4832_v57 = vpack.c.bf16 %v4803_v19, %v4801_v52  ;;  %v4016_v10 = vadd.f32 %v3863_v58, %v12293_v34  ;;  %v3667_v50 = vld [vmem:[#allocation2 + $0x13a] sm:$0xff]  ;;  %v12725_v19 = vpop.f32.mrf.mxu1  ;;  %v12727_v58 = vpop.f32.mrf.mxu2 }
 0x5ca   :  { %9341 = vmatmul.msk.bf16.vlgmr.msrb.gmra.mxu1 %vm4335_vm0, %v4589_v51  ;;  %9365 = vmatmul.msk.bf16.vlgmr.msra.gmra.mxu2 %vm4335_vm0, %v4541_v41  ;;  %v3720_v34 = vpack.c.bf16 %v3668_v35, %v3667_v50  ;;  %v3669_v50 = vld [vmem:[#allocation2 + $0x152] sm:$0xff]  ;;  %v3670_v35 = vld [vmem:[#allocation2 + $0x15a] sm:$0xff] }
 0x5cb   :  { %v4084_v25 = vadd.f32 %v12678_v23, %v4016_v10  ;;  %9389 = vmatmul.msk.bf16.vlgmr.msra.gmra.mxu3 %vm4335_vm0, %v4832_v57 }
 0x5cd   :  { %vm4148_vm10 = vcmp.ge.f32.partialorder %v4084_v25, 0.0  ;;  %v4212_v17 = vmul.f32 0.01, %v4084_v25 }
 0x5cf   :  { %v4276_v52 = vsel %vm4148_vm10, %v4084_v25, %v4212_v17 }
 0x5d0   :  { %4451 = vst.msk [vmem:[#allocation3 + $0x51] sm:$0xff] %vm4335_vm0, %v4276_v52  ;;  %v3866_v39 = vpop.f32.mrf.mxu0  ;;  %v12730_v10 = vpop.f32.mrf.mxu3 }
 0x5d1   :  { %v4017_v61 = vadd.f32 %v3866_v39, %v12300_v21 }
 0x5d3   :  { %v4085_v5 = vadd.f32 %v12678_v23, %v4017_v61  ;;  %9304 = vmatmul.msk.bf16.gmra.mxu0 %vm93_vm3, %v3720_v34  ;;  %v3721_v34 = vpack.c.bf16 %v3670_v35, %v3669_v50  ;;  %v12735_v61 = vpop.f32.mrf.mxu1 }
 0x5d5   :  { %vm4149_vm11 = vcmp.ge.f32.partialorder %v4085_v5, 0.0  ;;  %v4213_v57 = vmul.f32 0.01, %v4085_v5 }
 0x5d7   :  { %v4277_v51 = vsel %vm4149_vm11, %v4085_v5, %v4213_v57  ;;  %v12737_v5 = vpop.f32.mrf.mxu2 }
 0x5d8   :  { %4452 = vst.msk [vmem:[#allocation3 + $0x61] sm:$0xff] %vm4335_vm0, %v4277_v51  ;;  %v3868_v41 = vpop.f32.mrf.mxu0  ;;  %v12740_v51 = vpop.f32.mrf.mxu3 }
 0x5d9   :  { %v4018_v25 = vadd.f32 %v3868_v41, %v12309_v59 }
 0x5db   :  { %v4086_v21 = vadd.f32 %v12678_v23, %v4018_v25  ;;  %v12746_v35 = vpop.f32.mrf.mxu1 }
 0x5dd   :  { %vm4150_vm12 = vcmp.ge.f32.partialorder %v4086_v21, 0.0  ;;  %v4214_v17 = vmul.f32 0.01, %v4086_v21 }
 0x5df   :  { %v4278_v52 = vsel %vm4150_vm12, %v4086_v21, %v4214_v17  ;;  %v12748_v17 = vpop.f32.mrf.mxu2 }
 0x5e0   :  { %4453 = vst.msk [vmem:[#allocation3 + $0x69] sm:$0xff] %vm4335_vm0, %v4278_v52  ;;  %v3871_v39 = vpop.f32.mrf.mxu0  ;;  %v3671_v52 = vld [vmem:[#allocation2 + $0x16a] sm:$0xff]  ;;  %v12751_v3 = vpop.f32.mrf.mxu3 }
 0x5e1   :  { %v4019_v57 = vadd.f32 %v3871_v39, %v12316_v29  ;;  %v3672_v39 = vld [vmem:[#allocation2 + $0x172] sm:$0xff] }
 0x5e2   :  { %v3722_v1 = vpack.c.bf16 %v3672_v39, %v3671_v52  ;;  %v3673_v39 = vld [vmem:[#allocation2 + $0x182] sm:$0xff] }
 0x5e3   :  { %v4087_v59 = vadd.f32 %v12678_v23, %v4019_v57  ;;  %9305 = vmatmul.msk.bf16.gmra.mxu0 %vm93_vm3, %v3721_v34 }
 0x5e5   :  { %vm4151_vm13 = vcmp.ge.f32.partialorder %v4087_v59, 0.0  ;;  %v4215_v41 = vmul.f32 0.01, %v4087_v59 }
 0x5e7   :  { %v4279_v25 = vsel %vm4151_vm13, %v4087_v59, %v4215_v41 }
 0x5e8   :  { %4454 = vst.msk [vmem:[#allocation3 + $0x79] sm:$0xff] %vm4335_vm0, %v4279_v25  ;;  %v3873_v21 = vpop.f32.mrf.mxu0  ;;  %v12757_v25 = vpop.f32.mrf.mxu1 }
 0x5e9   :  { %v4020_v50 = vadd.f32 %v3873_v21, %v12325_v20  ;;  %v12759_v21 = vpop.f32.mrf.mxu2  ;;  %v12761_v4 = vpop.f32.mrf.mxu3 }
 0x5ea   :  { %13859 = vst [vmem:[#allocation53_spill] sm:$0xff] %v12759_v21 }
 0x5eb   :  { %v4088_v29 = vadd.f32 %v12678_v23, %v4020_v50  ;;  %13860 = vst [vmem:[#allocation54_spill] sm:$0xff] %v12761_v4  ;;  %v4514_v4 = vld [vmem:[#allocation3 + $0x60] ss:$2 sm:$0xff] }
 0x5ed   :  { %vm4152_vm14 = vcmp.ge.f32.partialorder %v4088_v29, 0.0  ;;  %v4216_v34 = vmul.f32 0.01, %v4088_v29 }
 0x5ef   :  { %v4280_v57 = vsel %vm4152_vm14, %v4088_v29, %v4216_v34  ;;  %v3674_v34 = vld [vmem:[#allocation2 + $0x18a] sm:$0xff] }
 0x5f0   :  { %4455 = vst.msk [vmem:[#allocation3 + $0x81] sm:$0xff] %vm4335_vm0, %v4280_v57  ;;  %v3876_v59 = vpop.f32.mrf.mxu0  ;;  %v12766_v57 = vpop.f32.mrf.mxu1  ;;  %v3723_v46 = vpack.c.bf16 %v3674_v34, %v3673_v39 }
 0x5f1   :  { %v4021_v41 = vadd.f32 %v3876_v59, %v12332_v54  ;;  %13861 = vst [vmem:[#allocation55_spill] sm:$0xff] %v12766_v57  ;;  %v12768_v59 = vpop.f32.mrf.mxu2  ;;  %v4805_v57 = vld [vmem:[#allocation3 + $0x62] ss:$2 sm:$0xff] }
 0x5f2   :  { %13862 = vst [vmem:[#allocation56_spill] sm:$0xff] %v12768_v59 }
 0x5f3   :  { %v4089_v20 = vadd.f32 %v12678_v23, %v4021_v41  ;;  %9306 = vmatmul.msk.bf16.gmra.mxu0 %vm93_vm3, %v3722_v1 }
 0x5f5   :  { %vm4153_vm15 = vcmp.ge.f32.partialorder %v4089_v20, 0.0  ;;  %v4217_v50 = vmul.f32 0.01, %v4089_v20 }
 0x5f7   :  { %v4281_v12 = vsel %vm4153_vm15, %v4089_v20, %v4217_v50  ;;  %v12771_v50 = vpop.f32.mrf.mxu3 }
 0x5f8   :  { %4456 = vst.msk [vmem:[#allocation3 + $0x91] sm:$0xff] %vm4335_vm0, %v4281_v12  ;;  %v3878_v29 = vpop.f32.mrf.mxu0 }
 0x5f9   :  { %v4022_v52 = vadd.f32 %v3878_v29, %v12341_v45  ;;  %13863 = vst [vmem:[#allocation57_spill] sm:$0xff] %v12771_v50 }
 0x5fb   :  { %v4090_v54 = vadd.f32 %v12678_v23, %v4022_v52  ;;  %v4562_v52 = vld [vmem:[#allocation3 + $0x61] ss:$2 sm:$0xff] }
 0x5fd   :  { %vm4154_vm1 = vcmp.ge.f32.partialorder %v4090_v54, 0.0  ;;  %v4218_v1 = vmul.f32 0.01, %v4090_v54 }
 0x5ff   :  { %v4282_v41 = vsel %vm4154_vm1, %v4090_v54, %v4218_v1 }
 0x600   :  { %4457 = vst.msk [vmem:[#allocation3 + $0x99] sm:$0xff] %vm4335_vm0, %v4282_v41  ;;  %v3881_v20 = vpop.f32.mrf.mxu0 }
 0x601   :  { %v4023_v12 = vadd.f32 %v3881_v20, %v12348_v31  ;;  %v12777_v31 = vpop.f32.mrf.mxu1  ;;  %v12779_v20 = vpop.f32.mrf.mxu2 }
 0x603   :  { %v4091_v45 = vadd.f32 %v12678_v23, %v4023_v12  ;;  %9307 = vmatmul.msk.bf16.gmra.mxu0 %vm93_vm3, %v3723_v46  ;;  %v12784_v12 = vpop.f32.mrf.mxu3 }
 0x605   :  { %vm4155_vm2 = vcmp.ge.f32.partialorder %v4091_v45, 0.0  ;;  %v4219_v29 = vmul.f32 0.01, %v4091_v45 }
 0x607   :  { %v4283_v21 = vsel %vm4155_vm2, %v4091_v45, %v4219_v29  ;;  %v4564_v59 = vld [vmem:[#allocation3 + $0x91] ss:$2 sm:$0xff]  ;;  %v4516_v54 = vld [vmem:[#allocation3 + $0x90] ss:$2 sm:$0xff] }
 0x608   :  { %v4807_v39 = vld [vmem:[#allocation3 + $0x92] ss:$2 sm:$0xff]  ;;  %4458 = vst.msk [vmem:[#allocation3 + $0xa9] sm:$0xff] %vm4335_vm0, %v4283_v21  ;;  %v3883_v34 = vpop.f32.mrf.mxu0  ;;  %v4590_v1 = vpack.c.bf16 %v4564_v59, %v4562_v52  ;;  %v4542_v41 = vpack.c.bf16 %v4516_v54, %v4514_v4  ;;  %v3676_v59 = vld [vmem:[#allocation2 + $0x1a2] sm:$0xff] }
 0x609   :  { %v4833_v50 = vpack.c.bf16 %v4807_v39, %v4805_v57  ;;  %v4024_v46 = vadd.f32 %v3883_v34, %v12357_v14  ;;  %v3675_v21 = vld [vmem:[#allocation2 + $0x19a] sm:$0xff]  ;;  %v12790_v54 = vpop.f32.mrf.mxu1  ;;  %v12792_v39 = vpop.f32.mrf.mxu2 }
 0x60a   :  { %9342 = vmatmul.msk.bf16.gmra.mxu1 %vm4335_vm0, %v4590_v1  ;;  %9366 = vmatmul.msk.bf16.gmra.mxu2 %vm4335_vm0, %v4542_v41  ;;  %v3724_v29 = vpack.c.bf16 %v3676_v59, %v3675_v21  ;;  %v3677_v21 = vld [vmem:[#allocation2 + $0x1e2] sm:$0xff]  ;;  %v3678_v59 = vld [vmem:[#allocation2 + $0x1ea] sm:$0xff] }
 0x60b   :  { %v4092_v45 = vadd.f32 %v12678_v23, %v4024_v46  ;;  %9390 = vmatmul.msk.bf16.gmra.mxu3 %vm4335_vm0, %v4833_v50  ;;  %v12796_v50 = vpop.f32.mrf.mxu3 }
 0x60c   :  { %13864 = vst [vmem:[#allocation58_spill] sm:$0xff] %v12796_v50  ;;  %v3725_v50 = vpack.c.bf16 %v3678_v59, %v3677_v21 }
 0x60d   :  { %vm4156_vm5 = vcmp.ge.f32.partialorder %v4092_v45, 0.0  ;;  %v4220_v4 = vmul.f32 0.01, %v4092_v45 }
 0x60f   :  { %v4284_v57 = vsel %vm4156_vm5, %v4092_v45, %v4220_v4 }
 0x610   :  { %4459 = vst.msk [vmem:[#allocation3 + $0xb1] sm:$0xff] %vm4335_vm0, %v4284_v57  ;;  %v3886_v52 = vpop.f32.mrf.mxu0 }
 0x611   :  { %v4025_v14 = vadd.f32 %v3886_v52, %v12364_v42  ;;  %v12801_v4 = vpop.f32.mrf.mxu1  ;;  %v12803_v57 = vpop.f32.mrf.mxu2 }
 0x612   :  { %13865 = vst [vmem:[#allocation59_spill] sm:$0xff] %v12803_v57 }
 0x613   :  { %v4093_v34 = vadd.f32 %v12678_v23, %v4025_v14  ;;  %9308 = vmatmul.msk.bf16.gmra.mxu0 %vm93_vm3, %v3724_v29  ;;  %v12805_v52 = vpop.f32.mrf.mxu3 }
 0x615   :  { %vm4157_vm6 = vcmp.ge.f32.partialorder %v4093_v34, 0.0  ;;  %v4221_v1 = vmul.f32 0.01, %v4093_v34 }
 0x617   :  { %v4285_v41 = vsel %vm4157_vm6, %v4093_v34, %v4221_v1 }
 0x618   :  { %4460 = vst.msk [vmem:[#allocation3 + $0xc1] sm:$0xff] %vm4335_vm0, %v4285_v41  ;;  %v3888_v46 = vpop.f32.mrf.mxu0 }
 0x619   :  { %v4026_v45 = vadd.f32 %v3888_v46, %v12373_v48  ;;  %v12811_v46 = vpop.f32.mrf.mxu1 }
 0x61a   :  { %13866 = vst [vmem:[#allocation60_spill] sm:$0xff] %v12811_v46 }
 0x61b   :  { %v4094_v42 = vadd.f32 %v12678_v23, %v4026_v45  ;;  %v12813_v45 = vpop.f32.mrf.mxu2  ;;  %v12816_v21 = vpop.f32.mrf.mxu3 }
 0x61c   :  { %13867 = vst [vmem:[#allocation61_spill] sm:$0xff] %v12813_v45 }
 0x61d   :  { %vm4158_vm7 = vcmp.ge.f32.partialorder %v4094_v42, 0.0  ;;  %v4222_v29 = vmul.f32 0.01, %v4094_v42  ;;  %13868 = vst [vmem:[#allocation62_spill] sm:$0xff] %v12816_v21 }
 0x61f   :  { %v4286_v14 = vsel %vm4158_vm7, %v4094_v42, %v4222_v29  ;;  %v3679_v29 = vld [vmem:[#allocation2 + $0x1fa] sm:$0xff] }
 0x620   :  { %4461 = vst.msk [vmem:[#allocation3 + $0xc9] sm:$0xff] %vm4335_vm0, %v4286_v14  ;;  %v3891_v34 = vpop.f32.mrf.mxu0  ;;  %v3680_v14 = vld [vmem:[#allocation2 + $0x202] sm:$0xff] }
 0x621   :  { %v4027_v1 = vadd.f32 %v3891_v34, %v12380_v30  ;;  %v12821_v45 = vpop.f32.mrf.mxu1 }
 0x622   :  { %13869 = vst [vmem:[#allocation63_spill] sm:$0xff] %v12821_v45 }
 0x623   :  { %v4095_v48 = vadd.f32 %v12678_v23, %v4027_v1  ;;  %9309 = vmatmul.msk.bf16.gmra.mxu0 %vm93_vm3, %v3725_v50  ;;  %v3726_v1 = vpack.c.bf16 %v3680_v14, %v3679_v29 }
 0x625   :  { %vm4159_vm8 = vcmp.ge.f32.partialorder %v4095_v48, 0.0  ;;  %v4223_v41 = vmul.f32 0.01, %v4095_v48 }
 0x627   :  { %v4287_v57 = vsel %vm4159_vm8, %v4095_v48, %v4223_v41  ;;  %v12823_v48 = vpop.f32.mrf.mxu2  ;;  %v12826_v41 = vpop.f32.mrf.mxu3 }
 0x628   :  { %4462 = vst.msk [vmem:[#allocation3 + $0xd9] sm:$0xff] %vm4335_vm0, %v4287_v57  ;;  %v3893_v42 = vpop.f32.mrf.mxu0 }
 0x629   :  { %v4028_v59 = vadd.f32 %v3893_v42, %v12389_v0  ;;  %13870 = vst [vmem:[#allocation64_spill] sm:$0xff] %v12823_v48  ;;  %v12832_v14 = vpop.f32.mrf.mxu1 }
 0x62a   :  { %13871 = vst [vmem:[#allocation65_spill] sm:$0xff] %v12826_v41 }
 0x62b   :  { %v4096_v30 = vadd.f32 %v12678_v23, %v4028_v59  ;;  %13872 = vst [vmem:[#allocation66_spill] sm:$0xff] %v12832_v14  ;;  %v4809_v14 = vld [vmem:[#allocation3 + $0xc2] ss:$2 sm:$0xff] }
 0x62d   :  { %vm4160_vm9 = vcmp.ge.f32.partialorder %v4096_v30, 0.0  ;;  %v4224_v50 = vmul.f32 0.01, %v4096_v30 }
 0x62f   :  { %v4288_v34 = vsel %vm4160_vm9, %v4096_v30, %v4224_v50  ;;  %v12834_v50 = vpop.f32.mrf.mxu2  ;;  %v12837_v41 = vpop.f32.mrf.mxu3 }
 0x630   :  { %4463 = vst.msk [vmem:[#allocation3 + $0xe1] sm:$0xff] %vm4335_vm0, %v4288_v34  ;;  %v3896_v46 = vpop.f32.mrf.mxu0  ;;  %v3682_v34 = vld [vmem:[#allocation2 + $0x21a] sm:$0xff] }
 0x631   :  { %v4029_v57 = vadd.f32 %v3896_v46, %v12396_v22  ;;  %13873 = vst [vmem:[#allocation67_spill] sm:$0xff] %v12834_v50  ;;  %v3681_v46 = vld [vmem:[#allocation2 + $0x212] sm:$0xff]  ;;  %v4518_v50 = vld [vmem:[#allocation3 + $0xc0] ss:$2 sm:$0xff] }
 0x632   :  { %13874 = vst [vmem:[#allocation68_spill] sm:$0xff] %v12837_v41  ;;  %v3727_v48 = vpack.c.bf16 %v3682_v34, %v3681_v46  ;;  %v4566_v41 = vld [vmem:[#allocation3 + $0xc1] ss:$2 sm:$0xff] }
 0x633   :  { %v4097_v0 = vadd.f32 %v12678_v23, %v4029_v57  ;;  %9310 = vmatmul.msk.bf16.gmra.mxu0 %vm93_vm3, %v3726_v1 }
 0x635   :  { %vm4161_vm10 = vcmp.ge.f32.partialorder %v4097_v0, 0.0  ;;  %v4225_v42 = vmul.f32 0.01, %v4097_v0 }
 0x637   :  { %v4289_v59 = vsel %vm4161_vm10, %v4097_v0, %v4225_v42 }
 0x638   :  { %4464 = vst.msk [vmem:[#allocation3 + $0xf1] sm:$0xff] %vm4335_vm0, %v4289_v59  ;;  %v3898_v30 = vpop.f32.mrf.mxu0  ;;  %v12843_v59 = vpop.f32.mrf.mxu1 }
 0x639   :  { %v4030_v29 = vadd.f32 %v3898_v30, %v12405_v49  ;;  %13875 = vst [vmem:[#allocation69_spill] sm:$0xff] %v12843_v59  ;;  %v12845_v30 = vpop.f32.mrf.mxu2 }
 0x63a   :  { %13876 = vst [vmem:[#allocation70_spill] sm:$0xff] %v12845_v30 }
 0x63b   :  { %v4098_v22 = vadd.f32 %v12678_v23, %v4030_v29 }
 0x63d   :  { %vm4162_vm11 = vcmp.ge.f32.partialorder %v4098_v22, 0.0  ;;  %v4226_v1 = vmul.f32 0.01, %v4098_v22 }
 0x63f   :  { %v4290_v57 = vsel %vm4162_vm11, %v4098_v22, %v4226_v1  ;;  %v12847_v22 = vpop.f32.mrf.mxu3 }
 0x640   :  { %4465 = vst.msk [vmem:[#allocation3 + $0xf9] sm:$0xff] %vm4335_vm0, %v4290_v57  ;;  %v3901_v0 = vpop.f32.mrf.mxu0 }
 0x641   :  { %v4031_v42 = vadd.f32 %v3901_v0, %v12412_v2  ;;  %13877 = vst [vmem:[#allocation71_spill] sm:$0xff] %v12847_v22 }
 0x643   :  { %v4099_v49 = vadd.f32 %v12678_v23, %v4031_v42  ;;  %9311 = vmatmul.msk.bf16.gmra.mxu0 %vm93_vm3, %v3727_v48 }
 0x645   :  { %vm4163_vm12 = vcmp.ge.f32.partialorder %v4099_v49, 0.0  ;;  %v4227_v29 = vmul.f32 0.01, %v4099_v49 }
 0x647   :  { %v4291_v46 = vsel %vm4163_vm12, %v4099_v49, %v4227_v29  ;;  %v4568_v34 = vld [vmem:[#allocation3 + $0xf1] ss:$2 sm:$0xff]  ;;  %v4520_v1 = vld [vmem:[#allocation3 + $0xf0] ss:$2 sm:$0xff]  ;;  %v4663_v22 = vpop.f32.mrf.mxu1 }
 0x648   :  { %v4811_v57 = vld [vmem:[#allocation3 + $0xf2] ss:$2 sm:$0xff]  ;;  %4466 = vst.msk [vmem:[#allocation3 + $0x109] sm:$0xff] %vm4335_vm0, %v4291_v46  ;;  %v3903_v2 = vpop.f32.mrf.mxu0  ;;  %v4591_v0 = vpack.c.bf16 %v4568_v34, %v4566_v41  ;;  %v4543_v48 = vpack.c.bf16 %v4520_v1, %v4518_v50  ;;  %v3683_v49 = vld [vmem:[#allocation2 + $0x22a] sm:$0xff] }
 0x649   :  { %v4834_v42 = vpack.c.bf16 %v4811_v57, %v4809_v14  ;;  %v4032_v59 = vadd.f32 %v3903_v2, %v12421_v24  ;;  %v3684_v29 = vld [vmem:[#allocation2 + $0x232] sm:$0xff] }
 0x64a   :  { %9343 = vmatmul.msk.bf16.gmra.mxu1 %vm4335_vm0, %v4591_v0  ;;  %9367 = vmatmul.msk.bf16.gmra.mxu2 %vm4335_vm0, %v4543_v48  ;;  %v3728_v14 = vpack.c.bf16 %v3684_v29, %v3683_v49  ;;  %v3685_v0 = vld [vmem:[#allocation2 + $0x242] sm:$0xff] }
 0x64b   :  { %v4100_v30 = vadd.f32 %v12678_v23, %v4032_v59  ;;  %9391 = vmatmul.msk.bf16.gmra.mxu3 %vm4335_vm0, %v4834_v42 }
 0x64d   :  { %vm4164_vm13 = vcmp.ge.f32.partialorder %v4100_v30, 0.0  ;;  %v4228_v45 = vmul.f32 0.01, %v4100_v30  ;;  %v4760_v46 = vpop.f32.mrf.mxu2 }
 0x64e   :  { %v4761_v21 = vadd.f32 %v4760_v46, %v4663_v22  ;;  %v4906_v50 = vpop.f32.mrf.mxu3 }
 0x64f   :  { %v4292_v41 = vsel %vm4164_vm13, %v4100_v30, %v4228_v45 }
 0x650   :  { %4467 = vst.msk [vmem:[#allocation3 + $0x111] sm:$0xff] %vm4335_vm0, %v4292_v41  ;;  %v12856_v24 = vadd.f32 %v4906_v50, %v4761_v21  ;;  %v3906_v34 = vpop.f32.mrf.mxu0  ;;  %v3686_v21 = vld [vmem:[#allocation2 + $0x24a] sm:$0xff] }
 0x651   :  { %v4033_v1 = vadd.f32 %v3906_v34, %v12428_v36  ;;  %v3729_v36 = vpack.c.bf16 %v3686_v21, %v3685_v0 }
 0x653   :  { %v4101_v59 = vadd.f32 %v12678_v23, %v4033_v1  ;;  %9312 = vmatmul.msk.bf16.gmra.mxu0 %vm93_vm3, %v3728_v14  ;;  %v13878_v14 = vld [vmem:[#allocation17_spill] sm:$0xff] }
 0x655   :  { %vm4165_vm14 = vcmp.ge.f32.partialorder %v4101_v59, 0.0  ;;  %v4229_v57 = vmul.f32 0.01, %v4101_v59 }
 0x657   :  { %v4293_v2 = vsel %vm4165_vm14, %v4101_v59, %v4229_v57  ;;  %v3687_v59 = vld [vmem:[#allocation2 + $0x25a] sm:$0xff]  ;;  %v3688_v57 = vld [vmem:[#allocation2 + $0x262] sm:$0xff] }
 0x658   :  { %4468 = vst.msk [vmem:[#allocation3 + $0x121] sm:$0xff] %vm4335_vm0, %v4293_v2  ;;  %v3908_v22 = vpop.f32.mrf.mxu0 }
 0x659   :  { %v4034_v45 = vadd.f32 %v3908_v22, %v12437_v56 }
 0x65b   :  { %v4102_v30 = vadd.f32 %v12678_v23, %v4034_v45 }
 0x65d   :  { %vm4166_vm15 = vcmp.ge.f32.partialorder %v4102_v30, 0.0  ;;  %v4230_v48 = vmul.f32 0.01, %v4102_v30 }
 0x65f   :  { %v4294_v42 = vsel %vm4166_vm15, %v4102_v30, %v4230_v48  ;;  %v13879_v30 = vld [vmem:[#allocation18_spill] sm:$0xff] }
 0x660   :  { %4469 = vst.msk [vmem:[#allocation3 + $0x129] sm:$0xff] %vm4335_vm0, %v4294_v42  ;;  %v3911_v49 = vpop.f32.mrf.mxu0 }
 0x661   :  { %v4035_v29 = vadd.f32 %v3911_v49, %v12444_v62  ;;  %v3730_v62 = vpack.c.bf16 %v3688_v57, %v3687_v59  ;;  %v13880_v49 = vld [vmem:[#allocation19_spill] sm:$0xff]  ;;  %v13881_v59 = vld [vmem:[#allocation20_spill] sm:$0xff] }
 0x663   :  { %v4103_v46 = vadd.f32 %v12678_v23, %v4035_v29  ;;  %9313 = vmatmul.msk.bf16.gmra.mxu0 %vm93_vm3, %v3729_v36 }
 0x665   :  { %vm4167_vm1 = vcmp.ge.f32.partialorder %v4103_v46, 0.0  ;;  %v4231_v41 = vmul.f32 0.01, %v4103_v46 }
 0x667   :  { %v4295_v56 = vsel %vm4167_vm1, %v4103_v46, %v4231_v41  ;;  %v3689_v41 = vld [vmem:[#allocation2 + $0x272] sm:$0xff] }
 0x668   :  { %4470 = vst.msk [vmem:[#allocation3 + $0x139] sm:$0xff] %vm4335_vm0, %v4295_v56  ;;  %v3913_v50 = vpop.f32.mrf.mxu0  ;;  %v3690_v56 = vld [vmem:[#allocation2 + $0x27a] sm:$0xff] }
 0x669   :  { %v4036_v34 = vadd.f32 %v3913_v50, %v13878_v14 }
 0x66b   :  { %v4104_v1 = vadd.f32 %v12678_v23, %v4036_v34  ;;  %v3731_v34 = vpack.c.bf16 %v3690_v56, %v3689_v41 }
 0x66d   :  { %vm4168_vm2 = vcmp.ge.f32.partialorder %v4104_v1, 0.0  ;;  %v4232_v2 = vmul.f32 0.01, %v4104_v1 }
 0x66f   :  { %v4296_v22 = vsel %vm4168_vm2, %v4104_v1, %v4232_v2 }
 0x670   :  { %4471 = vst.msk [vmem:[#allocation3 + $0x141] sm:$0xff] %vm4335_vm0, %v4296_v22  ;;  %v3916_v45 = vpop.f32.mrf.mxu0  ;;  %v12882_v22 = vpop.f32.mrf.mxu1 }
 0x671   :  { %v4037_v0 = vadd.f32 %v3916_v45, %v13879_v30  ;;  %v4570_v30 = vld [vmem:[#allocation3 + $0x121] ss:$2 sm:$0xff] }
 0x673   :  { %v4105_v21 = vadd.f32 %v12678_v23, %v4037_v0  ;;  %9314 = vmatmul.msk.bf16.gmra.mxu0 %vm93_vm3, %v3730_v62  ;;  %v12884_v62 = vpop.f32.mrf.mxu2  ;;  %v4522_v0 = vld [vmem:[#allocation3 + $0x120] ss:$2 sm:$0xff] }
 0x675   :  { %vm4169_vm5 = vcmp.ge.f32.partialorder %v4105_v21, 0.0  ;;  %v4233_v48 = vmul.f32 0.01, %v4105_v21 }
 0x677   :  { %v4297_v42 = vsel %vm4169_vm5, %v4105_v21, %v4233_v48  ;;  %v4813_v21 = vld [vmem:[#allocation3 + $0x122] ss:$2 sm:$0xff]  ;;  %v12886_v48 = vpop.f32.mrf.mxu3 }
 0x678   :  { %4472 = vst.msk [vmem:[#allocation3 + $0x151] sm:$0xff] %vm4335_vm0, %v4297_v42  ;;  %v3918_v36 = vpop.f32.mrf.mxu0 }
 0x679   :  { %v4038_v29 = vadd.f32 %v3918_v36, %v13880_v49  ;;  %13882 = vst [vmem:[#allocation17_spill] sm:$0xff] %v12886_v48 }
 0x67b   :  { %v4106_v46 = vadd.f32 %v12678_v23, %v4038_v29 }
 0x67d   :  { %vm4170_vm6 = vcmp.ge.f32.partialorder %v4106_v46, 0.0  ;;  %v4234_v50 = vmul.f32 0.01, %v4106_v46 }
 0x67f   :  { %v4298_v14 = vsel %vm4170_vm6, %v4106_v46, %v4234_v50 }
 0x680   :  { %4473 = vst.msk [vmem:[#allocation3 + $0x159] sm:$0xff] %vm4335_vm0, %v4298_v14  ;;  %v3921_v1 = vpop.f32.mrf.mxu0  ;;  %v13883_v14 = vld [vmem:[#allocation21_spill] sm:$0xff] }
 0x681   :  { %v4039_v57 = vadd.f32 %v3921_v1, %v13881_v59  ;;  %v3691_v59 = vld [vmem:[#allocation2 + $0x28a] sm:$0xff] }
 0x683   :  { %v4107_v2 = vadd.f32 %v12678_v23, %v4039_v57  ;;  %9315 = vmatmul.msk.bf16.gmra.mxu0 %vm93_vm3, %v3731_v34  ;;  %v3692_v57 = vld [vmem:[#allocation2 + $0x292] sm:$0xff] }
 0x685   :  { %vm4171_vm7 = vcmp.ge.f32.partialorder %v4107_v2, 0.0  ;;  %v4235_v45 = vmul.f32 0.01, %v4107_v2 }
 0x687   :  { %v4299_v42 = vsel %vm4171_vm7, %v4107_v2, %v4235_v45  ;;  %v4572_v36 = vld [vmem:[#allocation3 + $0x151] ss:$2 sm:$0xff]  ;;  %v4524_v49 = vld [vmem:[#allocation3 + $0x150] ss:$2 sm:$0xff]  ;;  %v4668_v2 = vpop.f32.mrf.mxu1 }
 0x688   :  { %v4815_v29 = vld [vmem:[#allocation3 + $0x152] ss:$2 sm:$0xff]  ;;  %4474 = vst.msk [vmem:[#allocation3 + $0x169] sm:$0xff] %vm4335_vm0, %v4299_v42  ;;  %v3923_v46 = vpop.f32.mrf.mxu0  ;;  %v4592_v41 = vpack.c.bf16 %v4572_v36, %v4570_v30  ;;  %v4544_v56 = vpack.c.bf16 %v4524_v49, %v4522_v0 }
 0x689   :  { %v4835_v50 = vpack.c.bf16 %v4815_v29, %v4813_v21  ;;  %v4040_v34 = vadd.f32 %v3923_v46, %v13883_v14  ;;  %v3732_v21 = vpack.c.bf16 %v3692_v57, %v3691_v59  ;;  %v13884_v29 = vld [vmem:[#allocation22_spill] sm:$0xff]  ;;  %v3693_v57 = vld [vmem:[#allocation2 + $0x2a2] sm:$0xff] }
 0x68a   :  { %9344 = vmatmul.msk.bf16.gmra.mxu1 %vm4335_vm0, %v4592_v41  ;;  %9368 = vmatmul.msk.bf16.gmra.mxu2 %vm4335_vm0, %v4544_v56 }
 0x68b   :  { %v4108_v1 = vadd.f32 %v12678_v23, %v4040_v34  ;;  %9392 = vmatmul.msk.bf16.gmra.mxu3 %vm4335_vm0, %v4835_v50  ;;  %v13885_v34 = vld [vmem:[#allocation23_spill] sm:$0xff] }
 0x68d   :  { %vm4172_vm8 = vcmp.ge.f32.partialorder %v4108_v1, 0.0  ;;  %v4236_v45 = vmul.f32 0.01, %v4108_v1  ;;  %v4765_v42 = vpop.f32.mrf.mxu2 }
 0x68e   :  { %v4766_v48 = vadd.f32 %v4765_v42, %v4668_v2  ;;  %v4911_v0 = vpop.f32.mrf.mxu3 }
 0x68f   :  { %v4300_v30 = vsel %vm4172_vm8, %v4108_v1, %v4236_v45 }
 0x690   :  { %4475 = vst.msk [vmem:[#allocation3 + $0x171] sm:$0xff] %vm4335_vm0, %v4300_v30  ;;  %v12895_v36 = vadd.f32 %v4911_v0, %v4766_v48  ;;  %v3926_v49 = vpop.f32.mrf.mxu0  ;;  %v3694_v48 = vld [vmem:[#allocation2 + $0x2aa] sm:$0xff]  ;;  %v13886_v0 = vld [vmem:[#allocation24_spill] sm:$0xff] }
 0x691   :  { %v4041_v46 = vadd.f32 %v3926_v49, %v13884_v29  ;;  %v3733_v42 = vpack.c.bf16 %v3694_v48, %v3693_v57 }
 0x693   :  { %v4109_v41 = vadd.f32 %v12678_v23, %v4041_v46  ;;  %9316 = vmatmul.msk.bf16.gmra.mxu0 %vm93_vm3, %v3732_v21 }
 0x695   :  { %vm4173_vm9 = vcmp.ge.f32.partialorder %v4109_v41, 0.0  ;;  %v4237_v56 = vmul.f32 0.01, %v4109_v41 }
 0x697   :  { %v4301_v50 = vsel %vm4173_vm9, %v4109_v41, %v4237_v56 }
 0x698   :  { %4476 = vst.msk [vmem:[#allocation3 + $0x181] sm:$0xff] %vm4335_vm0, %v4301_v50  ;;  %v3928_v14 = vpop.f32.mrf.mxu0 }
 0x699   :  { %v4042_v1 = vadd.f32 %v3928_v14, %v13885_v34  ;;  %v3695_v14 = vld [vmem:[#allocation2 + $0x2ba] sm:$0xff]  ;;  %v3696_v34 = vld [vmem:[#allocation2 + $0x2c2] sm:$0xff] }
 0x69a   :  { %v3734_v57 = vpack.c.bf16 %v3696_v34, %v3695_v14 }
 0x69b   :  { %v4110_v59 = vadd.f32 %v12678_v23, %v4042_v1 }
 0x69d   :  { %vm4174_vm10 = vcmp.ge.f32.partialorder %v4110_v59, 0.0  ;;  %v4238_v2 = vmul.f32 0.01, %v4110_v59 }
 0x69f   :  { %v4302_v45 = vsel %vm4174_vm10, %v4110_v59, %v4238_v2  ;;  %v13887_v2 = vld [vmem:[#allocation25_spill] sm:$0xff] }
 0x6a0   :  { %4477 = vst.msk [vmem:[#allocation3 + $0x189] sm:$0xff] %vm4335_vm0, %v4302_v45  ;;  %v3931_v30 = vpop.f32.mrf.mxu0 }
 0x6a1   :  { %v4043_v21 = vadd.f32 %v3931_v30, %v13886_v0 }
 0x6a3   :  { %v4111_v49 = vadd.f32 %v12678_v23, %v4043_v21  ;;  %9317 = vmatmul.msk.bf16.gmra.mxu0 %vm93_vm3, %v3733_v42 }
 0x6a5   :  { %vm4175_vm11 = vcmp.ge.f32.partialorder %v4111_v49, 0.0  ;;  %v4239_v29 = vmul.f32 0.01, %v4111_v49 }
 0x6a7   :  { %v4303_v46 = vsel %vm4175_vm11, %v4111_v49, %v4239_v29  ;;  %v3697_v29 = vld [vmem:[#allocation2 + $0x2d2] sm:$0xff] }
 0x6a8   :  { %4478 = vst.msk [vmem:[#allocation3 + $0x1c9] sm:$0xff] %vm4335_vm0, %v4303_v46  ;;  %v3933_v41 = vpop.f32.mrf.mxu0  ;;  %v3698_v46 = vld [vmem:[#allocation2 + $0x2da] sm:$0xff] }
 0x6a9   :  { %v4044_v56 = vadd.f32 %v3933_v41, %v12517_v32 }
 0x6ab   :  { %v4112_v50 = vadd.f32 %v12678_v23, %v4044_v56 }
 0x6ad   :  { %vm4176_vm12 = vcmp.ge.f32.partialorder %v4112_v50, 0.0  ;;  %v4240_v1 = vmul.f32 0.01, %v4112_v50 }
 0x6af   :  { %v4304_v59 = vsel %vm4176_vm12, %v4112_v50, %v4240_v1  ;;  %v3735_v50 = vpack.c.bf16 %v3698_v46, %v3697_v29 }
 0x6b0   :  { %4479 = vst.msk [vmem:[#allocation3 + $0x1d1] sm:$0xff] %vm4335_vm0, %v4304_v59  ;;  %v3936_v48 = vpop.f32.mrf.mxu0  ;;  %v4574_v59 = vld [vmem:[#allocation3 + $0x1b1] ss:$2 sm:$0xff] }
 0x6b1   :  { %v4045_v45 = vadd.f32 %v3936_v48, %v13887_v2  ;;  %v12923_v48 = vpop.f32.mrf.mxu2 }
 0x6b3   :  { %v4113_v42 = vadd.f32 %v12678_v23, %v4045_v45  ;;  %9318 = vmatmul.msk.bf16.gmra.mxu0 %vm93_vm3, %v3734_v57  ;;  %v4526_v57 = vld [vmem:[#allocation3 + $0x1b0] ss:$2 sm:$0xff] }
 0x6b4   :  { %v4817_v45 = vld [vmem:[#allocation3 + $0x1b2] ss:$2 sm:$0xff] }
 0x6b5   :  { %vm4177_vm13 = vcmp.ge.f32.partialorder %v4113_v42, 0.0  ;;  %v4241_v30 = vmul.f32 0.01, %v4113_v42 }
 0x6b7   :  { %v4305_v32 = vsel %vm4177_vm13, %v4113_v42, %v4241_v30  ;;  %v12925_v42 = vpop.f32.mrf.mxu3 }
 0x6b8   :  { %4480 = vst.msk [vmem:[#allocation3 + $0x1e1] sm:$0xff] %vm4335_vm0, %v4305_v32  ;;  %v3938_v0 = vpop.f32.mrf.mxu0 }
 0x6b9   :  { %v4046_v21 = vadd.f32 %v3938_v0, %v12533_v18  ;;  %v12921_v18 = vpop.f32.mrf.mxu1 }
 0x6bb   :  { %v4114_v49 = vadd.f32 %v12678_v23, %v4046_v21 }
 0x6bd   :  { %vm4178_vm14 = vcmp.ge.f32.partialorder %v4114_v49, 0.0  ;;  %v4242_v41 = vmul.f32 0.01, %v4114_v49 }
 0x6bf   :  { %v4306_v56 = vsel %vm4178_vm14, %v4114_v49, %v4242_v41 }
 0x6c0   :  { %4481 = vst.msk [vmem:[#allocation3 + $0x1e9] sm:$0xff] %vm4335_vm0, %v4306_v56  ;;  %v3941_v14 = vpop.f32.mrf.mxu0 }
 0x6c1   :  { %v4047_v34 = vadd.f32 %v3941_v14, %v12540_v9  ;;  %v3700_v14 = vld [vmem:[#allocation2 + $0x2f2] sm:$0xff] }
 0x6c3   :  { %v4115_v1 = vadd.f32 %v12678_v23, %v4047_v34  ;;  %9319 = vmatmul.msk.bf16.gmra.mxu0 %vm93_vm3, %v3735_v50  ;;  %v3699_v50 = vld [vmem:[#allocation2 + $0x2ea] sm:$0xff] }
 0x6c5   :  { %vm4179_vm15 = vcmp.ge.f32.partialorder %v4115_v1, 0.0  ;;  %v4243_v2 = vmul.f32 0.01, %v4115_v1 }
 0x6c7   :  { %v4307_v30 = vsel %vm4179_vm15, %v4115_v1, %v4243_v2  ;;  %v4576_v32 = vld [vmem:[#allocation3 + $0x1e1] ss:$2 sm:$0xff]  ;;  %v4528_v0 = vld [vmem:[#allocation3 + $0x1e0] ss:$2 sm:$0xff]  ;;  %v4673_v34 = vpop.f32.mrf.mxu1 }
 0x6c8   :  { %v4819_v21 = vld [vmem:[#allocation3 + $0x1e2] ss:$2 sm:$0xff]  ;;  %4482 = vst.msk [vmem:[#allocation3 + $0x1f9] sm:$0xff] %vm4335_vm0, %v4307_v30  ;;  %v3943_v9 = vpop.f32.mrf.mxu0  ;;  %v4593_v49 = vpack.c.bf16 %v4576_v32, %v4574_v59  ;;  %v4545_v29 = vpack.c.bf16 %v4528_v0, %v4526_v57 }
 0x6c9   :  { %v4836_v46 = vpack.c.bf16 %v4819_v21, %v4817_v45  ;;  %v4048_v41 = vadd.f32 %v3943_v9, %v12549_v55  ;;  %v3736_v45 = vpack.c.bf16 %v3700_v14, %v3699_v50  ;;  %v3702_v50 = vld [vmem:[#allocation2 + $0x30a] sm:$0xff] }
 0x6ca   :  { %9345 = vmatmul.msk.bf16.gmra.mxu1 %vm4335_vm0, %v4593_v49  ;;  %9369 = vmatmul.msk.bf16.gmra.mxu2 %vm4335_vm0, %v4545_v29 }
 0x6cb   :  { %v4116_v56 = vadd.f32 %v12678_v23, %v4048_v41  ;;  %9393 = vmatmul.msk.bf16.gmra.mxu3 %vm4335_vm0, %v4836_v46 }
 0x6cd   :  { %vm4180_vm1 = vcmp.ge.f32.partialorder %v4116_v56, 0.0  ;;  %v4244_v1 = vmul.f32 0.01, %v4116_v56  ;;  %v4770_v2 = vpop.f32.mrf.mxu2 }
 0x6ce   :  { %v4771_v30 = vadd.f32 %v4770_v2, %v4673_v34  ;;  %v4916_v57 = vpop.f32.mrf.mxu3  ;;  %v13888_v34 = vld [vmem:[#allocation26_spill] sm:$0xff] }
 0x6cf   :  { %v4308_v59 = vsel %vm4180_vm1, %v4116_v56, %v4244_v1  ;;  %v3701_v56 = vld [vmem:[#allocation2 + $0x302] sm:$0xff] }
 0x6d0   :  { %4483 = vst.msk [vmem:[#allocation3 + $0x201] sm:$0xff] %vm4335_vm0, %v4308_v59  ;;  %v12934_v55 = vadd.f32 %v4916_v57, %v4771_v30  ;;  %v3946_v32 = vpop.f32.mrf.mxu0  ;;  %v3737_v2 = vpack.c.bf16 %v3702_v50, %v3701_v56  ;;  %v13889_v57 = vld [vmem:[#allocation28_spill] sm:$0xff]  ;;  %v13891_v56 = vld [vmem:[#allocation27_spill] sm:$0xff] }
 0x6d1   :  { %v4049_v0 = vadd.f32 %v3946_v32, %v12556_v37  ;;  %v2761_v37 = vadd.f32 %v12581_v38, %v13888_v34  ;;  %v2763_v50 = vadd.f32 %v12598_v53, %v13891_v56 }
 0x6d3   :  { %v4117_v21 = vadd.f32 %v12678_v23, %v4049_v0  ;;  %9320 = vmatmul.msk.bf16.gmra.mxu0 %vm93_vm3, %v3736_v45  ;;  %v3192_v45 = vadd.f32 %v13889_v57, %v2761_v37  ;;  %v13890_v0 = vld [vmem:[#allocation30_spill] sm:$0xff] }
 0x6d5   :  { %vm4181_vm2 = vcmp.ge.f32.partialorder %v4117_v21, 0.0  ;;  %v4245_v9 = vmul.f32 0.01, %v4117_v21 }
 0x6d7   :  { %v4309_v49 = vsel %vm4181_vm2, %v4117_v21, %v4245_v9  ;;  %v3622_v21 = vadd.f32 %v13890_v0, %v3192_v45 }
 0x6d8   :  { %4484 = vst.msk [vmem:[#allocation3 + $0x211] sm:$0xff] %vm4335_vm0, %v4309_v49  ;;  %v3948_v29 = vpop.f32.mrf.mxu0 }
 0x6d9   :  { %v4050_v46 = vadd.f32 %v3948_v29, %v12567_v6  ;;  %v12954_v29 = vld [vmem:[%s13761_s2] ss:$0 sm:$0xff] }
 0x6db   :  { %v4118_v41 = vadd.f32 %v12678_v23, %v4050_v46  ;;  %v3703_v46 = vld [vmem:[#allocation2 + $0x31a] sm:$0xff] }
 0x6dd   :  { %vm4182_vm5 = vcmp.ge.f32.partialorder %v4118_v41, 0.0  ;;  %v4246_v14 = vmul.f32 0.01, %v4118_v41 }
 0x6df   :  { %v4310_v1 = vsel %vm4182_vm5, %v4118_v41, %v4246_v14 }
 0x6e0   :  { %4485 = vst.msk [vmem:[#allocation3 + $0x219] sm:$0xff] %vm4335_vm0, %v4310_v1  ;;  %v3951_v30 = vpop.f32.mrf.mxu0  ;;  %v13892_v1 = vld [vmem:[#allocation33_spill] sm:$0xff] }
 0x6e1   :  { %v4051_v59 = vadd.f32 %v3951_v30, %v12576_v47  ;;  %v13893_v30 = vld [vmem:[#allocation32_spill] sm:$0xff] }
 0x6e3   :  { %v4119_v6 = vadd.f32 %v12678_v23, %v4051_v59  ;;  %9321 = vmatmul.msk.bf16.gmra.mxu0 %vm93_vm3, %v3737_v2  ;;  %v3704_v23 = vld [vmem:[#allocation2 + $0x322] sm:$0xff]  ;;  %v3194_v59 = vadd.f32 %v13893_v30, %v2763_v50 }
 0x6e4   :  { %v3738_v34 = vpack.c.bf16 %v3704_v23, %v3703_v46  ;;  %v13895_v46 = vld [vmem:[#allocation29_spill] sm:$0xff] }
 0x6e5   :  { %vm4183_vm6 = vcmp.ge.f32.partialorder %v4119_v6, 0.0  ;;  %v4247_v32 = vmul.f32 0.01, %v4119_v6  ;;  %v2765_v23 = vadd.f32 %v12616_v15, %v13895_v46  ;;  %v12974_v15 = vpop.f32.mrf.mxu1 }
 0x6e7   :  { %v4311_v9 = vsel %vm4183_vm6, %v4119_v6, %v4247_v32  ;;  %v13894_v6 = vld [vmem:[#allocation42_spill] sm:$0xff] }
 0x6e8   :  { %4486 = vst.msk [vmem:[#allocation3 + $0x229] sm:$0xff] %vm4335_vm0, %v4311_v9  ;;  %v3953_v38 = vpop.f32.mrf.mxu0  ;;  %v3624_v32 = vadd.f32 %v13894_v6, %v3194_v59  ;;  %v12976_v59 = vpop.f32.mrf.mxu2  ;;  %v4530_v6 = vld [vmem:[#allocation3 + $0x210] ss:$2 sm:$0xff] }
 0x6e9   :  { %v4052_v49 = vadd.f32 %v3953_v38, %v3622_v21  ;;  %v3705_v38 = vld [vmem:[#allocation2 + $0x332] sm:$0xff] }
 0x6eb   :  { %v4120_v47 = vadd.f32 %v12954_v29, %v4052_v49  ;;  %v3706_v49 = vld [vmem:[#allocation2 + $0x33a] sm:$0xff] }
 0x6ec   :  { %v3739_v56 = vpack.c.bf16 %v3706_v49, %v3705_v38 }
 0x6ed   :  { %vm4184_vm7 = vcmp.ge.f32.partialorder %v4120_v47, 0.0  ;;  %v4248_v41 = vmul.f32 0.01, %v4120_v47 }
 0x6ef   :  { %v4312_v14 = vsel %vm4184_vm7, %v4120_v47, %v4248_v41 }
 0x6f0   :  { %4487 = vst.msk [vmem:[#allocation3 + $0x231] sm:$0xff] %vm4335_vm0, %v4312_v14  ;;  %v3956_v37 = vpop.f32.mrf.mxu0  ;;  %v10584_v14 = vld [vmem:[#allocation7 + $0x98] sm:$0xff] }
 0x6f1   :  { %v4053_v2 = vadd.f32 %v3956_v37, %v13892_v1  ;;  %v10580_v37 = vld [vmem:[#allocation7 + $0x78] sm:$0xff]  ;;  %5224 = vmatpush.bf16.msrb.mxu2 %v10584_v14 }
 0x6f2   :  { %5062 = vmatpush.bf16.msra.mxu1 %v10580_v37  ;;  %v3708_v14 = vld [vmem:[#allocation2 + $0x352] sm:$0xff] }
 0x6f3   :  { %v4121_v57 = vadd.f32 %v12954_v29, %v4053_v2  ;;  %9322 = vmatmul.msk.bf16.gmra.mxu0 %vm93_vm3, %v3738_v34  ;;  %v10588_v34 = vld [vmem:[#allocation7 + $0xb8] sm:$0xff]  ;;  %v3196_v2 = vadd.f32 %v12604_v60, %v2765_v23 }
 0x6f4   :  { %5386 = vmatpush.bf16.msrb.mxu3 %v10588_v34 }
 0x6f5   :  { %vm4185_vm8 = vcmp.ge.f32.partialorder %v4121_v57, 0.0  ;;  %v4249_v45 = vmul.f32 0.01, %v4121_v57 }
 0x6f7   :  { %v4313_v0 = vsel %vm4185_vm8, %v4121_v57, %v4249_v45  ;;  %v4578_v45 = vld [vmem:[#allocation3 + $0x211] ss:$2 sm:$0xff] }
 0x6f8   :  { %4488 = vst.msk [vmem:[#allocation3 + $0x241] sm:$0xff] %vm4335_vm0, %v4313_v0  ;;  %v3958_v53 = vpop.f32.mrf.mxu0  ;;  %v13896_v0 = vld [vmem:[#allocation43_spill] sm:$0xff] }
 0x6f9   :  { %v4054_v21 = vadd.f32 %v3958_v53, %v3624_v32  ;;  %v4821_v32 = vld [vmem:[#allocation3 + $0x212] ss:$2 sm:$0xff]  ;;  %v12979_v53 = vpop.f32.mrf.mxu3 }
 0x6fb   :  { %v4122_v9 = vadd.f32 %v12954_v29, %v4054_v21 }
 0x6fd   :  { %vm4186_vm9 = vcmp.ge.f32.partialorder %v4122_v9, 0.0  ;;  %v4250_v47 = vmul.f32 0.01, %v4122_v9 }
 0x6ff   :  { %v4314_v41 = vsel %vm4186_vm9, %v4122_v9, %v4250_v47 }
 0x700   :  { %4489 = vst.msk [vmem:[#allocation3 + $0x249] sm:$0xff] %vm4335_vm0, %v4314_v41  ;;  %v3961_v50 = vpop.f32.mrf.mxu0 }
 0x701   :  { %v4055_v1 = vadd.f32 %v3961_v50, %v12612_v33  ;;  %v3626_v33 = vadd.f32 %v13896_v0, %v3196_v2  ;;  %v3707_v50 = vld [vmem:[#allocation2 + $0x34a] sm:$0xff] }
 0x702   :  { %v3740_v0 = vpack.c.bf16 %v3708_v14, %v3707_v50 }
 0x703   :  { %v4123_v30 = vadd.f32 %v12954_v29, %v4055_v1  ;;  %9323 = vmatmul.msk.bf16.gmra.mxu0 %vm93_vm3, %v3739_v56 }
 0x705   :  { %vm4187_vm10 = vcmp.ge.f32.partialorder %v4123_v30, 0.0  ;;  %v4251_v57 = vmul.f32 0.01, %v4123_v30 }
 0x707   :  { %v4315_v21 = vsel %vm4187_vm10, %v4123_v30, %v4251_v57  ;;  %v4580_v60 = vld [vmem:[#allocation3 + $0x241] ss:$2 sm:$0xff]  ;;  %v4532_v9 = vld [vmem:[#allocation3 + $0x240] ss:$2 sm:$0xff]  ;;  %v4678_v34 = vpop.f32.mrf.mxu1  ;;  %v13897_v30 = vld [vmem:[#allocation31_spill] sm:$0xff] }
 0x708   :  { %v4823_v38 = vld [vmem:[#allocation3 + $0x242] ss:$2 sm:$0xff]  ;;  %4490 = vst.msk [vmem:[#allocation3 + $0x259] sm:$0xff] %vm4335_vm0, %v4315_v21  ;;  %v3963_v49 = vpop.f32.mrf.mxu0  ;;  %v4594_v47 = vpack.c.bf16 %v4580_v60, %v4578_v45  ;;  %v4546_v46 = vpack.c.bf16 %v4532_v9, %v4530_v6  ;;  %v13899_v60 = vld [vmem:[#allocation44_spill] sm:$0xff] }
 0x709   :  { %v4837_v23 = vpack.c.bf16 %v4823_v38, %v4821_v32  ;;  %v4056_v41 = vadd.f32 %v3963_v49, %v3626_v33  ;;  %v13898_v57 = vld [vmem:[#allocation46_spill] sm:$0xff]  ;;  %v13900_v38 = vld [vmem:[#allocation45_spill] sm:$0xff] }
 0x70a   :  { %9346 = vmatmul.msk.bf16.gmra.mxu1 %vm4335_vm0, %v4594_v47  ;;  %9370 = vmatmul.msk.bf16.gmra.mxu2 %vm4335_vm0, %v4546_v46  ;;  %v2767_v45 = vadd.f32 %v13898_v57, %v13897_v30 }
 0x70b   :  { %v4124_v56 = vadd.f32 %v12954_v29, %v4056_v41  ;;  %9394 = vmatmul.msk.bf16.gmra.mxu3 %vm4335_vm0, %v4837_v23  ;;  %v13901_v23 = vld [vmem:[#allocation47_spill] sm:$0xff] }
 0x70c   :  { %v3198_v49 = vadd.f32 %v13900_v38, %v2767_v45  ;;  %v10583_v45 = vld [vmem:[#allocation7 + $0x90] sm:$0xff] }
 0x70d   :  { %vm4188_vm11 = vcmp.ge.f32.partialorder %v4124_v56, 0.0  ;;  %v4252_v37 = vmul.f32 0.01, %v4124_v56  ;;  %v4775_v1 = vpop.f32.mrf.mxu2  ;;  %5225 = vmatpush.bf16.msrb.mxu2 %v10583_v45  ;;  %v13903_v38 = vld [vmem:[#allocation35_spill] sm:$0xff] }
 0x70e   :  { %v4776_v2 = vadd.f32 %v4775_v1, %v4678_v34  ;;  %v4921_v32 = vpop.f32.mrf.mxu3  ;;  %v3628_v41 = vadd.f32 %v13901_v23, %v3198_v49  ;;  %v13902_v1 = vld [vmem:[#allocation34_spill] sm:$0xff]  ;;  %v2770_v49 = vadd.f32 %v12701_v63, %v13903_v38 }
 0x70f   :  { %v4316_v6 = vsel %vm4188_vm11, %v4124_v56, %v4252_v37  ;;  %v10578_v38 = vld [vmem:[#allocation7 + $0x68] sm:$0xff] }
 0x710   :  { %4491 = vst.msk [vmem:[#allocation3 + $0x261] sm:$0xff] %vm4335_vm0, %v4316_v6  ;;  %v12989_v33 = vadd.f32 %v4921_v32, %v4776_v2  ;;  %v3966_v21 = vpop.f32.mrf.mxu0  ;;  %v2769_v2 = vadd.f32 %v12691_v16, %v13902_v1  ;;  %v10587_v6 = vld [vmem:[#allocation7 + $0xb0] sm:$0xff] }
 0x711   :  { %v4057_v9 = vadd.f32 %v3966_v21, %v13899_v60  ;;  %v10579_v32 = vld [vmem:[#allocation7 + $0x70] sm:$0xff]  ;;  %5387 = vmatpush.bf16.msrb.mxu3 %v10587_v6 }
 0x712   :  { %v3200_v21 = vadd.f32 %v12693_v44, %v2769_v2  ;;  %5063 = vmatpush.bf16.msra.mxu1 %v10579_v32 }
 0x713   :  { %v4125_v47 = vadd.f32 %v12954_v29, %v4057_v9  ;;  %9324 = vmatmul.msk.bf16.gmra.mxu0 %vm93_vm3, %v3740_v0 }
 0x714   :  { %v3630_v16 = vadd.f32 %v12696_v8, %v3200_v21  ;;  %v13906_v21 = vld [vmem:[#allocation38_spill] sm:$0xff] }
 0x715   :  { %vm4189_vm12 = vcmp.ge.f32.partialorder %v4125_v47, 0.0  ;;  %v4253_v46 = vmul.f32 0.01, %v4125_v47 }
 0x716   :  { %5064 = vmatpush.bf16.msra.mxu1 %v10578_v38 }
 0x717   :  { %v4317_v56 = vsel %vm4189_vm12, %v4125_v47, %v4253_v46 }
 0x718   :  { %4492 = vst.msk [vmem:[#allocation3 + $0x271] sm:$0xff] %vm4335_vm0, %v4317_v56  ;;  %v3968_v50 = vpop.f32.mrf.mxu0 }
 0x719   :  { %v4058_v14 = vadd.f32 %v3968_v50, %v3628_v41  ;;  %v13904_v50 = vld [vmem:[#allocation36_spill] sm:$0xff] }
 0x71b   :  { %v4126_v34 = vadd.f32 %v12954_v29, %v4058_v14  ;;  %v2771_v14 = vadd.f32 %v12715_v11, %v13904_v50  ;;  %v13035_v50 = vpop.f32.mrf.mxu3 }
 0x71d   :  { %vm4190_vm13 = vcmp.ge.f32.partialorder %v4126_v34, 0.0  ;;  %v4254_v37 = vmul.f32 0.01, %v4126_v34 }
 0x71f   :  { %v4318_v30 = vsel %vm4190_vm13, %v4126_v34, %v4254_v37  ;;  %v3202_v37 = vadd.f32 %v12717_v26, %v2771_v14 }
 0x720   :  { %4493 = vst.msk [vmem:[#allocation3 + $0x279] sm:$0xff] %vm4335_vm0, %v4318_v30  ;;  %v3971_v57 = vpop.f32.mrf.mxu0  ;;  %v13905_v30 = vld [vmem:[#allocation37_spill] sm:$0xff] }
 0x721   :  { %v4059_v0 = vadd.f32 %v3971_v57, %v12641_v43  ;;  %v3201_v43 = vadd.f32 %v12703_v27, %v2770_v49  ;;  %v3632_v2 = vadd.f32 %v12719_v7, %v3202_v37  ;;  %v2772_v57 = vadd.f32 %v12725_v19, %v13905_v30 }
 0x723   :  { %v4127_v60 = vadd.f32 %v12954_v29, %v4059_v0  ;;  %v3631_v56 = vadd.f32 %v12707_v28, %v3201_v43  ;;  %v3203_v6 = vadd.f32 %v12727_v58, %v2772_v57 }
 0x725   :  { %vm4191_vm3 = vcmp.ge.f32.partialorder %v4127_v60, 0.0  ;;  %v4255_v9 = vmul.f32 0.01, %v4127_v60  ;;  %v3633_v0 = vadd.f32 %v12730_v10, %v3203_v6  ;;  %v13030_v10 = vpop.f32.mrf.mxu2 }
 0x727   :  { %v4319_v47 = vsel %vm4191_vm3, %v4127_v60, %v4255_v9  ;;  %v2773_v60 = vadd.f32 %v12735_v61, %v13906_v21  ;;  %v10582_v9 = vld [vmem:[#allocation7 + $0x88] sm:$0xff]  ;;  %v4534_v43 = vld [vmem:[#allocation3 + $0x270] ss:$2 sm:$0xff] }
 0x728   :  { %4494 = vst.msk [vmem:[#allocation3 + $0x289] sm:$0xff] %vm4335_vm0, %v4319_v47  ;;  %v3973_v46 = vpop.f32.mrf.mxu0  ;;  %5226 = vmatpush.bf16.msrb.mxu2 %v10582_v9  ;;  %v13909_v9 = vld [vmem:[#allocation39_spill] sm:$0xff] }
 0x729   :  { %v4060_v23 = vadd.f32 %v3973_v46, %v3630_v16  ;;  %v10586_v16 = vld [vmem:[#allocation7 + $0xa8] sm:$0xff]  ;;  %v3204_v58 = vadd.f32 %v12737_v5, %v2773_v60  ;;  %v13028_v46 = vpop.f32.mrf.mxu1 }
 0x72a   :  { %5388 = vmatpush.bf16.msrb.mxu3 %v10586_v16  ;;  %v13907_v60 = vld [vmem:[#allocation53_spill] sm:$0xff]  ;;  %v13910_v16 = vld [vmem:[#allocation55_spill] sm:$0xff] }
 0x72b   :  { %v4128_v41 = vadd.f32 %v12954_v29, %v4060_v23  ;;  %v4582_v23 = vld [vmem:[#allocation3 + $0x271] ss:$2 sm:$0xff]  ;;  %v2776_v38 = vadd.f32 %v13910_v16, %v13909_v9 }
 0x72c   :  { %v13919_v9 = vld [vmem:[#allocation60_spill] sm:$0xff] }
 0x72d   :  { %vm4192_vm14 = vcmp.ge.f32.partialorder %v4128_v41, 0.0  ;;  %v4256_v44 = vmul.f32 0.01, %v4128_v41 }
 0x72f   :  { %v4320_v8 = vsel %vm4192_vm14, %v4128_v41, %v4256_v44  ;;  %v4825_v41 = vld [vmem:[#allocation3 + $0x272] ss:$2 sm:$0xff]  ;;  %v3634_v44 = vadd.f32 %v12740_v51, %v3204_v58 }
 0x730   :  { %4495 = vst.msk [vmem:[#allocation3 + $0x291] sm:$0xff] %vm4335_vm0, %v4320_v8  ;;  %v3976_v63 = vpop.f32.mrf.mxu0 }
 0x731   :  { %v4061_v34 = vadd.f32 %v3976_v63, %v3631_v56  ;;  %v2774_v56 = vadd.f32 %v12746_v35, %v12639_v13 }
 0x733   :  { %v4129_v1 = vadd.f32 %v12954_v29, %v4061_v34  ;;  %v3205_v51 = vadd.f32 %v12748_v17, %v2774_v56 }
 0x735   :  { %vm4193_vm15 = vcmp.ge.f32.partialorder %v4129_v1, 0.0  ;;  %v4257_v27 = vmul.f32 0.01, %v4129_v1 }
 0x737   :  { %v4321_v28 = vsel %vm4193_vm15, %v4129_v1, %v4257_v27 }
 0x738   :  { %4496 = vst.msk [vmem:[#allocation3 + $0x2a1] sm:$0xff] %vm4335_vm0, %v4321_v28  ;;  %v3978_v11 = vpop.f32.mrf.mxu0 }
 0x739   :  { %v4062_v45 = vadd.f32 %v3978_v11, %v3632_v2  ;;  %v3635_v11 = vadd.f32 %v12751_v3, %v3205_v51 }
 0x73b   :  { %v4130_v32 = vadd.f32 %v12954_v29, %v4062_v45  ;;  %v2775_v45 = vadd.f32 %v12757_v25, %v12645_v40  ;;  %v13908_v40 = vld [vmem:[#allocation54_spill] sm:$0xff] }
 0x73d   :  { %vm4194_vm1 = vcmp.ge.f32.partialorder %v4130_v32, 0.0  ;;  %v4258_v26 = vmul.f32 0.01, %v4130_v32 }
 0x73f   :  { %v4322_v7 = vsel %vm4194_vm1, %v4130_v32, %v4258_v26 }
 0x740   :  { %4497 = vst.msk [vmem:[#allocation3 + $0x2a9] sm:$0xff] %vm4335_vm0, %v4322_v7  ;;  %v3981_v19 = vpop.f32.mrf.mxu0  ;;  %v3206_v7 = vadd.f32 %v13907_v60, %v2775_v45 }
 0x741   :  { %v4063_v49 = vadd.f32 %v3981_v19, %v3633_v0  ;;  %v10656_v0 = vld [vmem:[%s13764_s5 + $0x1b8] sm:$0xff] }
 0x742   :  { %6876 = vmatpush.bf16.msrb.mxu0 %v10656_v0  ;;  %v3636_v25 = vadd.f32 %v13908_v40, %v3206_v7  ;;  %v13916_v0 = vld [vmem:[#allocation48_spill] sm:$0xff]  ;;  %v13917_v7 = vld [vmem:[#allocation59_spill] sm:$0xff] }
 0x743   :  { %v4131_v47 = vadd.f32 %v12954_v29, %v4063_v49 }
 0x745   :  { %vm4195_vm2 = vcmp.ge.f32.partialorder %v4131_v47, 0.0  ;;  %v4259_v61 = vmul.f32 0.01, %v4131_v47 }
 0x747   :  { %v4323_v5 = vsel %vm4195_vm2, %v4131_v47, %v4259_v61  ;;  %v4584_v14 = vld [vmem:[#allocation3 + $0x2a1] ss:$2 sm:$0xff]  ;;  %v4536_v8 = vld [vmem:[#allocation3 + $0x2a0] ss:$2 sm:$0xff]  ;;  %v4683_v35 = vpop.f32.mrf.mxu1 }
 0x748   :  { %v4827_v63 = vld [vmem:[#allocation3 + $0x2a2] ss:$2 sm:$0xff]  ;;  %4498 = vst.msk [vmem:[#allocation3 + $0x2b9] sm:$0xff] %vm4335_vm0, %v4323_v5  ;;  %v3983_v34 = vpop.f32.mrf.mxu0  ;;  %v4595_v37 = vpack.c.bf16 %v4584_v14, %v4582_v23  ;;  %v4547_v1 = vpack.c.bf16 %v4536_v8, %v4534_v43  ;;  %v13911_v61 = vld [vmem:[#allocation56_spill] sm:$0xff] }
 0x749   :  { %v4838_v27 = vpack.c.bf16 %v4827_v63, %v4825_v41  ;;  %v4064_v2 = vadd.f32 %v3983_v34, %v3634_v44  ;;  %v3207_v23 = vadd.f32 %v13911_v61, %v2776_v38  ;;  %v13912_v44 = vld [vmem:[#allocation57_spill] sm:$0xff]  ;;  %v13913_v5 = vld [vmem:[#allocation40_spill] sm:$0xff] }
 0x74a   :  { %9347 = vmatmul.msk.bf16.gmra.mxu1 %vm4335_vm0, %v4595_v37  ;;  %9371 = vmatmul.msk.bf16.gmra.mxu2 %vm4335_vm0, %v4547_v1  ;;  %v2777_v14 = vadd.f32 %v12777_v31, %v13913_v5  ;;  %v10581_v34 = vld [vmem:[#allocation7 + $0x80] sm:$0xff] }
 0x74b   :  { %v4132_v13 = vadd.f32 %v12954_v29, %v4064_v2  ;;  %9395 = vmatmul.msk.bf16.gmra.mxu3 %vm4335_vm0, %v4838_v27  ;;  %v3637_v56 = vadd.f32 %v13912_v44, %v3207_v23  ;;  %v10585_v37 = vld [vmem:[#allocation7 + $0xa0] sm:$0xff]  ;;  %5227 = vmatpush.bf16.msrb.mxu2 %v10581_v34  ;;  %v13922_v44 = vld [vmem:[#allocation50_spill] sm:$0xff]  ;;  %v10592_v34 = vld [vmem:[#allocation7 + $0xd8] sm:$0xff] }
 0x74c   :  { %v10577_v1 = vld [vmem:[#allocation7 + $0x60] sm:$0xff]  ;;  %5389 = vmatpush.bf16.msrb.mxu3 %v10585_v37  ;;  %v3208_v2 = vadd.f32 %v12779_v20, %v2777_v14 }
 0x74d   :  { %vm4196_vm5 = vcmp.ge.f32.partialorder %v4132_v13, 0.0  ;;  %v4260_v30 = vmul.f32 0.01, %v4132_v13  ;;  %v4780_v57 = vpop.f32.mrf.mxu2  ;;  %5065 = vmatpush.bf16.msra.mxu1 %v10577_v1  ;;  %v13914_v31 = vld [vmem:[#allocation41_spill] sm:$0xff]  ;;  %v13924_v1 = vld [vmem:[#allocation64_spill] sm:$0xff] }
 0x74e   :  { %v4781_v28 = vadd.f32 %v4780_v57, %v4683_v35  ;;  %v4926_v32 = vpop.f32.mrf.mxu3  ;;  %v3638_v35 = vadd.f32 %v12784_v12, %v3208_v2 }
 0x74f   :  { %v4324_v6 = vsel %vm4196_vm5, %v4132_v13, %v4260_v30  ;;  %v2778_v30 = vadd.f32 %v12790_v54, %v13914_v31 }
 0x750   :  { %4499 = vst.msk [vmem:[#allocation3 + $0x2c1] sm:$0xff] %vm4335_vm0, %v4324_v6  ;;  %v13047_v26 = vadd.f32 %v4926_v32, %v4781_v28  ;;  %v3986_v17 = vpop.f32.mrf.mxu0  ;;  %v13915_v32 = vld [vmem:[#allocation58_spill] sm:$0xff] }
 0x751   :  { %v4065_v21 = vadd.f32 %v3986_v17, %v3635_v11  ;;  %v3209_v45 = vadd.f32 %v12792_v39, %v2778_v30  ;;  %5548 = vmatpush.bf16.msrb.mxu1 %v10592_v34  ;;  %v4964_v34 = vld [vmem:[#allocation3 + $0x48] ss:$2 sm:$0xff] }
 0x753   :  { %v4133_v3 = vadd.f32 %v12954_v29, %v4065_v21  ;;  %v3639_v17 = vadd.f32 %v13915_v32, %v3209_v45  ;;  %v2779_v21 = vadd.f32 %v12801_v4, %v13916_v0  ;;  %v13926_v45 = vld [vmem:[#allocation51_spill] sm:$0xff] }
 0x755   :  { %vm4197_vm6 = vcmp.ge.f32.partialorder %v4133_v3, 0.0  ;;  %v4261_v19 = vmul.f32 0.01, %v4133_v3 }
 0x756   :  { %v13097_v32 = vpop.f32.mrf.mxu3 }
 0x757   :  { %v4325_v49 = vsel %vm4197_vm6, %v4133_v3, %v4261_v19  ;;  %v3210_v3 = vadd.f32 %v13917_v7, %v2779_v21 }
 0x758   :  { %4500 = vst.msk [vmem:[#allocation3 + $0x2d1] sm:$0xff] %vm4335_vm0, %v4325_v49  ;;  %v3988_v58 = vpop.f32.mrf.mxu0 }
 0x759   :  { %v4066_v47 = vadd.f32 %v3988_v58, %v3636_v25  ;;  %v3640_v40 = vadd.f32 %v12805_v52, %v3210_v3  ;;  %v13918_v25 = vld [vmem:[#allocation49_spill] sm:$0xff] }
 0x75a   :  { %v2780_v16 = vadd.f32 %v13919_v9, %v13918_v25  ;;  %v13920_v58 = vld [vmem:[#allocation61_spill] sm:$0xff]  ;;  %v10655_v9 = vld [vmem:[%s13764_s5 + $0x1b0] sm:$0xff] }
 0x75b   :  { %v4134_v43 = vadd.f32 %v12954_v29, %v4066_v47  ;;  %6877 = vmatpush.bf16.msrb.mxu0 %v10655_v9 }
 0x75c   :  { %v3211_v47 = vadd.f32 %v13920_v58, %v2780_v16  ;;  %v13929_v58 = vld [vmem:[#allocation68_spill] sm:$0xff] }
 0x75d   :  { %vm4198_vm7 = vcmp.ge.f32.partialorder %v4134_v43, 0.0  ;;  %v4262_v41 = vmul.f32 0.01, %v4134_v43 }
 0x75f   :  { %v4326_v8 = vsel %vm4198_vm7, %v4134_v43, %v4262_v41  ;;  %v13921_v43 = vld [vmem:[#allocation62_spill] sm:$0xff] }
 0x760   :  { %4501 = vst.msk [vmem:[#allocation3 + $0x2d9] sm:$0xff] %vm4335_vm0, %v4326_v8  ;;  %v3991_v63 = vpop.f32.mrf.mxu0  ;;  %v3641_v41 = vadd.f32 %v13921_v43, %v3211_v47  ;;  %v10596_v8 = vld [vmem:[#allocation7 + $0xf8] sm:$0xff] }
 0x761   :  { %v4067_v27 = vadd.f32 %v3991_v63, %v3637_v56  ;;  %v13923_v56 = vld [vmem:[#allocation63_spill] sm:$0xff]  ;;  %5710 = vmatpush.bf16.msra.mxu2 %v10596_v8 }
 0x762   :  { %v2781_v5 = vadd.f32 %v13923_v56, %v13922_v44  ;;  %v10600_v63 = vld [vmem:[#allocation7 + $0x118] sm:$0xff] }
 0x763   :  { %v4135_v51 = vadd.f32 %v12954_v29, %v4067_v27  ;;  %5872 = vmatpush.bf16.msra.mxu3 %v10600_v63 }
 0x764   :  { %v3212_v27 = vadd.f32 %v13924_v1, %v2781_v5  ;;  %v5126_v1 = vld [vmem:[#allocation3 + $0x49] ss:$2 sm:$0xff] }
 0x765   :  { %vm4199_vm8 = vcmp.ge.f32.partialorder %v4135_v51, 0.0  ;;  %v4263_v13 = vmul.f32 0.01, %v4135_v51 }
 0x767   :  { %v4327_v57 = vsel %vm4199_vm8, %v4135_v51, %v4263_v13  ;;  %v13090_v51 = vpop.f32.mrf.mxu1  ;;  %v13092_v13 = vpop.f32.mrf.mxu2  ;;  %v4586_v31 = vld [vmem:[#allocation3 + $0x2d1] ss:$2 sm:$0xff]  ;;  %v4538_v30 = vld [vmem:[#allocation3 + $0x2d0] ss:$2 sm:$0xff] }
 0x768   :  { %4502 = vst.msk [vmem:[#allocation3 + $0x2e9] sm:$0xff] %vm4335_vm0, %v4327_v57  ;;  %v3993_v28 = vpop.f32.mrf.mxu0  ;;  %v4829_v57 = vld [vmem:[#allocation3 + $0x2d2] ss:$2 sm:$0xff] }
 0x769   :  { %v4068_v11 = vadd.f32 %v3993_v28, %v3638_v35  ;;  %v13925_v28 = vld [vmem:[#allocation65_spill] sm:$0xff] }
 0x76b   :  { %v4136_v6 = vadd.f32 %v12954_v29, %v4068_v11  ;;  %v3642_v11 = vadd.f32 %v13925_v28, %v3212_v27  ;;  %v5288_v27 = vld [vmem:[#allocation3 + $0x4a] ss:$2 sm:$0xff] }
 0x76d   :  { %vm4200_vm9 = vcmp.ge.f32.partialorder %v4136_v6, 0.0  ;;  %v4264_v20 = vmul.f32 0.01, %v4136_v6 }
 0x76f   :  { %v4328_v12 = vsel %vm4200_vm9, %v4136_v6, %v4264_v20  ;;  %v13927_v6 = vld [vmem:[#allocation66_spill] sm:$0xff] }
 0x770   :  { %4503 = vst.msk [vmem:[#allocation3 + $0x2f1] sm:$0xff] %vm4335_vm0, %v4328_v12  ;;  %v3996_v54 = vpop.f32.mrf.mxu0  ;;  %v2782_v20 = vadd.f32 %v13927_v6, %v13926_v45  ;;  %v5286_v6 = vld [vmem:[#allocation3 + $0x1a] ss:$2 sm:$0xff] }
 0x771   :  { %v4069_v60 = vadd.f32 %v3996_v54, %v3639_v17 }
 0x773   :  { %v4137_v19 = vadd.f32 %v12954_v29, %v4069_v60 }
 0x775   :  { %vm4201_vm10 = vcmp.ge.f32.partialorder %v4137_v19, 0.0  ;;  %v4265_v39 = vmul.f32 0.01, %v4137_v19 }
 0x777   :  { %v4329_v38 = vsel %vm4201_vm10, %v4137_v19, %v4265_v39  ;;  %v13928_v39 = vld [vmem:[#allocation67_spill] sm:$0xff] }
 0x778   :  { %4504 = vst.msk [vmem:[#allocation3 + $0x301] sm:$0xff] %vm4335_vm0, %v4329_v38  ;;  %v3998_v4 = vpop.f32.mrf.mxu0 }
 0x779   :  { %v4070_v49 = vadd.f32 %v3998_v4, %v3640_v40  ;;  %v3213_v40 = vadd.f32 %v13928_v39, %v2782_v20  ;;  %v5292_v39 = vld [vmem:[#allocation3 + $0xaa] ss:$2 sm:$0xff] }
 0x77b   :  { %v4138_v61 = vadd.f32 %v12954_v29, %v4070_v49  ;;  %v3643_v47 = vadd.f32 %v13929_v58, %v3213_v40  ;;  %v4966_v40 = vld [vmem:[#allocation3 + $0x78] ss:$2 sm:$0xff] }
 0x77c   :  { %v5296_v58 = vld [vmem:[#allocation3 + $0x10a] ss:$2 sm:$0xff] }
 0x77d   :  { %vm4202_vm11 = vcmp.ge.f32.partialorder %v4138_v61, 0.0  ;;  %v4266_v23 = vmul.f32 0.01, %v4138_v61 }
 0x77f   :  { %v4330_v52 = vsel %vm4202_vm11, %v4138_v61, %v4266_v23  ;;  %v13930_v61 = vld [vmem:[#allocation52_spill] sm:$0xff]  ;;  %v13931_v23 = vld [vmem:[#allocation69_spill] sm:$0xff] }
 0x780   :  { %4505 = vst.msk [vmem:[#allocation3 + $0x309] sm:$0xff] %vm4335_vm0, %v4330_v52  ;;  %v4001_v14 = vpop.f32.mrf.mxu0  ;;  %v2783_v43 = vadd.f32 %v13931_v23, %v13930_v61  ;;  %v5132_v61 = vld [vmem:[#allocation3 + $0xd9] ss:$2 sm:$0xff] }
 0x781   :  { %v4071_v37 = vadd.f32 %v4001_v14, %v3641_v41  ;;  %v13932_v14 = vld [vmem:[#allocation70_spill] sm:$0xff] }
 0x782   :  { %v3214_v8 = vadd.f32 %v13932_v14, %v2783_v43  ;;  %v10590_v14 = vld [vmem:[#allocation7 + $0xc8] sm:$0xff] }
 0x783   :  { %v4139_v2 = vadd.f32 %v12954_v29, %v4071_v37 }
 0x785   :  { %vm4203_vm12 = vcmp.ge.f32.partialorder %v4139_v2, 0.0  ;;  %v4267_v35 = vmul.f32 0.01, %v4139_v2 }
 0x787   :  { %v4331_v17 = vsel %vm4203_vm12, %v4139_v2, %v4267_v35  ;;  %v4588_v0 = vld [vmem:[#allocation3 + $0x301] ss:$2 sm:$0xff]  ;;  %v4540_v21 = vld [vmem:[#allocation3 + $0x300] ss:$2 sm:$0xff]  ;;  %v4688_v16 = vpop.f32.mrf.mxu1  ;;  %v13933_v2 = vld [vmem:[#allocation71_spill] sm:$0xff] }
 0x788   :  { %v4831_v12 = vld [vmem:[#allocation3 + $0x302] ss:$2 sm:$0xff]  ;;  %4506 = vst.msk [vmem:[#allocation3 + $0x319] sm:$0xff] %vm4335_vm0, %v4331_v17  ;;  %v4003_v54 = vpop.f32.mrf.mxu0  ;;  %v4596_v60 = vpack.c.bf16 %v4588_v0, %v4586_v31  ;;  %v4548_v7 = vpack.c.bf16 %v4540_v21, %v4538_v30  ;;  %v3644_v35 = vadd.f32 %v13933_v2, %v3214_v8  ;;  %v5317_v17 = vpack.c.bf16 %v5288_v27, %v5286_v6 }
 0x789   :  { %v4839_v3 = vpack.c.bf16 %v4831_v12, %v4829_v57  ;;  %v4072_v19 = vadd.f32 %v4003_v54, %v3642_v11  ;;  %v4962_v30 = vld [vmem:[#allocation3 + $0x18] ss:$2 sm:$0xff]  ;;  %v5124_v57 = vld [vmem:[#allocation3 + $0x19] ss:$2 sm:$0xff]  ;;  %v10595_v21 = vld [vmem:[#allocation7 + $0xf0] sm:$0xff] }
 0x78a   :  { %9348 = vmatmul.msk.bf16.gmra.mxu1 %vm4335_vm0, %v4596_v60  ;;  %9372 = vmatmul.msk.bf16.gmra.mxu2 %vm4335_vm0, %v4548_v7  ;;  %v4993_v11 = vpack.c.bf16 %v4964_v34, %v4962_v30  ;;  %v5155_v45 = vpack.c.bf16 %v5126_v1, %v5124_v57  ;;  %v10599_v12 = vld [vmem:[#allocation7 + $0x110] sm:$0xff]  ;;  %v4974_v2 = vld [vmem:[#allocation3 + $0x138] ss:$2 sm:$0xff] }
 0x78b   :  { %v4140_v25 = vadd.f32 %v12954_v29, %v4072_v19  ;;  %9396 = vmatmul.msk.bf16.gmra.mxu3 %vm4335_vm0, %v4839_v3  ;;  %v10591_v54 = vld [vmem:[#allocation7 + $0xd0] sm:$0xff]  ;;  %5711 = vmatpush.bf16.msra.mxu2 %v10595_v21  ;;  %v5298_v57 = vld [vmem:[#allocation3 + $0x13a] ss:$2 sm:$0xff] }
 0x78c   :  { %5873 = vmatpush.bf16.msra.mxu3 %v10599_v12  ;;  %5549 = vmatpush.bf16.msrb.mxu1 %v10591_v54  ;;  %v4968_v3 = vld [vmem:[#allocation3 + $0xa8] ss:$2 sm:$0xff]  ;;  %v5130_v19 = vld [vmem:[#allocation3 + $0xa9] ss:$2 sm:$0xff]  ;;  %v4980_v21 = vld [vmem:[#allocation3 + $0x1f8] ss:$2 sm:$0xff] }
 0x78d   :  { %vm4204_vm13 = vcmp.ge.f32.partialorder %v4140_v25, 0.0  ;;  %v4268_v38 = vmul.f32 0.01, %v4140_v25  ;;  %v4785_v4 = vpop.f32.mrf.mxu2  ;;  %v4994_v9 = vpack.c.bf16 %v4968_v3, %v4966_v40  ;;  %v4976_v34 = vld [vmem:[#allocation3 + $0x168] ss:$2 sm:$0xff] }
 0x78e   :  { %v4786_v49 = vadd.f32 %v4785_v4, %v4688_v16  ;;  %v4931_v44 = vpop.f32.mrf.mxu3  ;;  %v5290_v16 = vld [vmem:[#allocation3 + $0x7a] ss:$2 sm:$0xff]  ;;  %v5300_v1 = vld [vmem:[#allocation3 + $0x16a] ss:$2 sm:$0xff]  ;;  %v5142_v12 = vld [vmem:[#allocation3 + $0x1f9] ss:$2 sm:$0xff] }
 0x78f   :  { %v4332_v41 = vsel %vm4204_vm13, %v4140_v25, %v4268_v38  ;;  %v5128_v25 = vld [vmem:[#allocation3 + $0x79] ss:$2 sm:$0xff]  ;;  %v5318_v38 = vpack.c.bf16 %v5292_v39, %v5290_v16  ;;  %v4972_v4 = vld [vmem:[#allocation3 + $0x108] ss:$2 sm:$0xff]  ;;  %v13129_v8 = vpop.f32.mrf.mxu1  ;;  %v4984_v16 = vld [vmem:[#allocation3 + $0x258] ss:$2 sm:$0xff] }
 0x790   :  { %4507 = vst.msk [vmem:[#allocation3 + $0x321] sm:$0xff] %vm4335_vm0, %v4332_v41  ;;  %v13112_v56 = vadd.f32 %v4931_v44, %v4786_v49  ;;  %v4006_v5 = vpop.f32.mrf.mxu0  ;;  %v5134_v49 = vld [vmem:[#allocation3 + $0x109] ss:$2 sm:$0xff]  ;;  %v5294_v41 = vld [vmem:[#allocation3 + $0xda] ss:$2 sm:$0xff]  ;;  %5550 = vmatpush.bf16.msrb.mxu1 %v10590_v14 }
 0x791   :  { %v4073_v52 = vadd.f32 %v4006_v5, %v3643_v47  ;;  %v4970_v47 = vld [vmem:[#allocation3 + $0xd8] ss:$2 sm:$0xff]  ;;  %v5157_v43 = vpack.c.bf16 %v5134_v49, %v5132_v61  ;;  %v5319_v44 = vpack.c.bf16 %v5296_v58, %v5294_v41  ;;  %v10594_v5 = vld [vmem:[#allocation7 + $0xe8] sm:$0xff] }
 0x792   :  { %v4995_v23 = vpack.c.bf16 %v4972_v4, %v4970_v47  ;;  %5712 = vmatpush.bf16.msra.mxu2 %v10594_v5  ;;  %v5304_v54 = vld [vmem:[#allocation3 + $0x1fa] ss:$2 sm:$0xff]  ;;  %v5302_v39 = vld [vmem:[#allocation3 + $0x1ca] ss:$2 sm:$0xff]  ;;  %v5144_v58 = vld [vmem:[#allocation3 + $0x229] ss:$2 sm:$0xff] }
 0x793   :  { %v4141_v63 = vadd.f32 %v12954_v29, %v4073_v52  ;;  %v10598_v52 = vld [vmem:[#allocation7 + $0x108] sm:$0xff]  ;;  %v5321_v40 = vpack.c.bf16 %v5304_v54, %v5302_v39  ;;  %v4988_v41 = vld [vmem:[#allocation3 + $0x2b8] ss:$2 sm:$0xff] }
 0x794   :  { %5874 = vmatpush.bf16.msra.mxu3 %v10598_v52  ;;  %v5308_v4 = vld [vmem:[#allocation3 + $0x25a] ss:$2 sm:$0xff]  ;;  %v5148_v14 = vld [vmem:[#allocation3 + $0x289] ss:$2 sm:$0xff] }
 0x795   :  { %vm4205_vm3 = vcmp.ge.f32.partialorder %v4141_v63, 0.0  ;;  %v4269_v37 = vmul.f32 0.01, %v4141_v63  ;;  %v4982_v49 = vld [vmem:[#allocation3 + $0x228] ss:$2 sm:$0xff] }
 0x796   :  { %v13133_v27 = vpop.f32.mrf.mxu3  ;;  %v4998_v47 = vpack.c.bf16 %v4984_v16, %v4982_v49  ;;  %v5312_v5 = vld [vmem:[#allocation3 + $0x2ba] ss:$2 sm:$0xff] }
 0x797   :  { %v4333_v31 = vsel %vm4205_vm3, %v4141_v63, %v4269_v37  ;;  %v13131_v63 = vpop.f32.mrf.mxu2  ;;  %v5138_v37 = vld [vmem:[#allocation3 + $0x169] ss:$2 sm:$0xff]  ;;  %v4986_v52 = vld [vmem:[#allocation3 + $0x288] ss:$2 sm:$0xff] }
 0x798   :  { %4508 = vst.msk [vmem:[#allocation3 + $0x331] sm:$0xff] %vm4335_vm0, %v4333_v31  ;;  %v4008_v28 = vpop.f32.mrf.mxu0  ;;  %v4996_v31 = vpack.c.bf16 %v4976_v34, %v4974_v2  ;;  %v4999_v34 = vpack.c.bf16 %v4988_v41, %v4986_v52 }
 0x799   :  { %v4074_v20 = vadd.f32 %v4008_v28, %v3644_v35  ;;  %v5136_v35 = vld [vmem:[#allocation3 + $0x139] ss:$2 sm:$0xff]  ;;  %v5320_v28 = vpack.c.bf16 %v5300_v1, %v5298_v57  ;;  %v5310_v1 = vld [vmem:[#allocation3 + $0x28a] ss:$2 sm:$0xff] }
 0x79a   :  { %9413 = vmatmul.msk.bf16.vlgmr.msra.gmra.mxu1 %vm4335_vm0, %v4993_v11  ;;  %9437 = vmatmul.msk.bf16.vlgmr.msrb.gmra.mxu2 %vm4335_vm0, %v5155_v45  ;;  %v5158_v30 = vpack.c.bf16 %v5138_v37, %v5136_v35  ;;  %v10654_v11 = vld [vmem:[%s13764_s5 + $0x1a8] sm:$0xff]  ;;  %v5323_v2 = vpack.c.bf16 %v5312_v5, %v5310_v1  ;;  %v5154_v57 = vld [vmem:[#allocation3 + $0x319] ss:$2 sm:$0xff] }
 0x79b   :  { %v4142_v0 = vadd.f32 %v12954_v29, %v4074_v20  ;;  %9461 = vmatmul.msk.bf16.vlgmr.msrb.gmra.mxu3 %vm4335_vm0, %v5317_v17  ;;  %v5156_v29 = vpack.c.bf16 %v5130_v19, %v5128_v25  ;;  %6878 = vmatpush.bf16.msrb.mxu0 %v10654_v11  ;;  %v10593_v25 = vld [vmem:[#allocation7 + $0xe0] sm:$0xff] }
 0x79c   :  { %5713 = vmatpush.bf16.msra.mxu2 %v10593_v25  ;;  %v5316_v11 = vld [vmem:[#allocation3 + $0x31a] ss:$2 sm:$0xff] }
 0x79d   :  { %vm4206_vm14 = vcmp.ge.f32.partialorder %v4142_v0, 0.0  ;;  %v4270_v60 = vmul.f32 0.01, %v4142_v0 }
 0x79f   :  { %v4334_v7 = vsel %vm4206_vm14, %v4142_v0, %v4270_v60  ;;  %v4978_v60 = vld [vmem:[#allocation3 + $0x1c8] ss:$2 sm:$0xff] }
 0x7a0   :  { %4509 = vst.msk [vmem:[#allocation3 + $0x339] sm:$0xff] %vm4335_vm0, %v4334_v7  ;;  %v5140_v7 = vld [vmem:[#allocation3 + $0x1c9] ss:$2 sm:$0xff]  ;;  %v4997_v3 = vpack.c.bf16 %v4980_v21, %v4978_v60  ;;  %v10653_v60 = vld [vmem:[%s13764_s5 + $0x1a0] sm:$0xff] }
 0x7a1   :  { %v5159_v19 = vpack.c.bf16 %v5142_v12, %v5140_v7  ;;  %v5314_v12 = vld [vmem:[#allocation3 + $0x2ea] ss:$2 sm:$0xff]  ;;  %6879 = vmatpush.bf16.msrb.mxu0 %v10653_v60  ;;  %v5614_v60 = vld [vmem:[#allocation3 + $0x91] ss:$2 sm:$0xff] }
 0x7a2   :  { %v5324_v54 = vpack.c.bf16 %v5316_v11, %v5314_v12 }
 0x7aa   :  { %9414 = vmatmul.msk.bf16.gmra.mxu1 %vm4335_vm0, %v4994_v9  ;;  %9438 = vmatmul.msk.bf16.gmra.mxu2 %vm4335_vm0, %v5156_v29  ;;  %v10597_v9 = vld [vmem:[#allocation7 + $0x100] sm:$0xff] }
 0x7ab   :  { %9462 = vmatmul.msk.bf16.gmra.mxu3 %vm4335_vm0, %v5318_v38  ;;  %v10589_v29 = vld [vmem:[#allocation7 + $0xc0] sm:$0xff] }
 0x7ac   :  { %5875 = vmatpush.bf16.msra.mxu3 %v10597_v9  ;;  %5551 = vmatpush.bf16.msrb.mxu1 %v10589_v29  ;;  %v5146_v38 = vld [vmem:[#allocation3 + $0x259] ss:$2 sm:$0xff]  ;;  %v5450_v9 = vld [vmem:[#allocation3 + $0x60] ss:$2 sm:$0xff] }
 0x7ad   :  { %v5160_v61 = vpack.c.bf16 %v5146_v38, %v5144_v58  ;;  %v5612_v29 = vld [vmem:[#allocation3 + $0x61] ss:$2 sm:$0xff]  ;;  %v5448_v58 = vld [vmem:[#allocation3 + $0x30] ss:$2 sm:$0xff] }
 0x7ba   :  { %9415 = vmatmul.msk.bf16.gmra.mxu1 %vm4335_vm0, %v4995_v23  ;;  %9439 = vmatmul.msk.bf16.gmra.mxu2 %vm4335_vm0, %v5157_v43  ;;  %v5306_v23 = vld [vmem:[#allocation3 + $0x22a] ss:$2 sm:$0xff] }
 0x7bb   :  { %9463 = vmatmul.msk.bf16.gmra.mxu3 %vm4335_vm0, %v5319_v44  ;;  %v5322_v43 = vpack.c.bf16 %v5308_v4, %v5306_v23  ;;  %v5150_v44 = vld [vmem:[#allocation3 + $0x2b9] ss:$2 sm:$0xff]  ;;  %v5774_v4 = vld [vmem:[#allocation3 + $0x62] ss:$2 sm:$0xff] }
 0x7bc   :  { %v5161_v37 = vpack.c.bf16 %v5150_v44, %v5148_v14  ;;  %v5772_v44 = vld [vmem:[#allocation3 + $0x32] ss:$2 sm:$0xff]  ;;  %v4763_v14 = vadd.f32 %v12884_v62, %v12882_v22 }
 0x7bd   :  { %v5803_v5 = vpack.c.bf16 %v5774_v4, %v5772_v44  ;;  %v5782_v44 = vld [vmem:[#allocation3 + $0x122] ss:$2 sm:$0xff] }
 0x7c7   :  { %v4693_v45 = vpop.f32.mrf.mxu1 }
 0x7ca   :  { %9416 = vmatmul.msk.bf16.gmra.mxu1 %vm4335_vm0, %v4996_v31  ;;  %9440 = vmatmul.msk.bf16.gmra.mxu2 %vm4335_vm0, %v5158_v30  ;;  %v4992_v30 = vld [vmem:[#allocation3 + $0x318] ss:$2 sm:$0xff] }
 0x7cb   :  { %9464 = vmatmul.msk.bf16.gmra.mxu3 %vm4335_vm0, %v5320_v28 }
 0x7cd   :  { %v4790_v6 = vpop.f32.mrf.mxu2 }
 0x7ce   :  { %v4791_v20 = vadd.f32 %v4790_v6, %v4693_v45  ;;  %v4936_v17 = vpop.f32.mrf.mxu3  ;;  %v4990_v6 = vld [vmem:[#allocation3 + $0x2e8] ss:$2 sm:$0xff] }
 0x7cf   :  { %v13152_v35 = vpop.f32.mrf.mxu1 }
 0x7d0   :  { %v13141_v0 = vadd.f32 %v4936_v17, %v4791_v20  ;;  %v5152_v20 = vld [vmem:[#allocation3 + $0x2e9] ss:$2 sm:$0xff]  ;;  %v5000_v17 = vpack.c.bf16 %v4992_v30, %v4990_v6 }
 0x7d1   :  { %v5162_v21 = vpack.c.bf16 %v5154_v57, %v5152_v20  ;;  %v5616_v6 = vld [vmem:[#allocation3 + $0xc1] ss:$2 sm:$0xff] }
 0x7d5   :  { %v13154_v31 = vpop.f32.mrf.mxu2 }
 0x7d6   :  { %v13156_v28 = vpop.f32.mrf.mxu3 }
 0x7da   :  { %9417 = vmatmul.msk.bf16.gmra.mxu1 %vm4335_vm0, %v4997_v3  ;;  %9441 = vmatmul.msk.bf16.gmra.mxu2 %vm4335_vm0, %v5159_v19 }
 0x7db   :  { %9465 = vmatmul.msk.bf16.gmra.mxu3 %vm4335_vm0, %v5321_v40 }
 0x7ea   :  { %9418 = vmatmul.msk.bf16.gmra.mxu1 %vm4335_vm0, %v4998_v47  ;;  %9442 = vmatmul.msk.bf16.gmra.mxu2 %vm4335_vm0, %v5160_v61  ;;  %v5610_v47 = vld [vmem:[#allocation3 + $0x31] ss:$2 sm:$0xff] }
 0x7eb   :  { %9466 = vmatmul.msk.bf16.gmra.mxu3 %vm4335_vm0, %v5322_v43  ;;  %v5479_v43 = vpack.c.bf16 %v5450_v9, %v5448_v58  ;;  %v5641_v41 = vpack.c.bf16 %v5612_v29, %v5610_v47  ;;  %v4768_v9 = vadd.f32 %v12923_v48, %v12921_v18  ;;  %v5458_v47 = vld [vmem:[#allocation3 + $0x120] ss:$2 sm:$0xff] }
 0x7fa   :  { %9419 = vmatmul.msk.bf16.gmra.mxu1 %vm4335_vm0, %v4999_v34  ;;  %9443 = vmatmul.msk.bf16.gmra.mxu2 %vm4335_vm0, %v5161_v37 }
 0x7fb   :  { %9467 = vmatmul.msk.bf16.gmra.mxu3 %vm4335_vm0, %v5323_v2 }
 0x807   :  { %v4698_v45 = vpop.f32.mrf.mxu1 }
 0x80a   :  { %9420 = vmatmul.msk.bf16.gmra.mxu1 %vm4335_vm0, %v5000_v17  ;;  %9444 = vmatmul.msk.bf16.gmra.mxu2 %vm4335_vm0, %v5162_v21  ;;  %v5778_v21 = vld [vmem:[#allocation3 + $0xc2] ss:$2 sm:$0xff] }
 0x80b   :  { %9468 = vmatmul.msk.bf16.gmra.mxu3 %vm4335_vm0, %v5324_v54  ;;  %v5452_v54 = vld [vmem:[#allocation3 + $0x90] ss:$2 sm:$0xff] }
 0x80d   :  { %v4795_v7 = vpop.f32.mrf.mxu2 }
 0x80e   :  { %v4796_v3 = vadd.f32 %v4795_v7, %v4698_v45  ;;  %v4941_v19 = vpop.f32.mrf.mxu3  ;;  %v5454_v45 = vld [vmem:[#allocation3 + $0xc0] ss:$2 sm:$0xff] }
 0x80f   :  { %v4700_v39 = vpop.f32.mrf.mxu1  ;;  %v5480_v62 = vpack.c.bf16 %v5454_v45, %v5452_v54 }
 0x810   :  { %v13164_v40 = vadd.f32 %v4941_v19, %v4796_v3  ;;  %v5642_v3 = vpack.c.bf16 %v5616_v6, %v5614_v60  ;;  %v5776_v19 = vld [vmem:[#allocation3 + $0x92] ss:$2 sm:$0xff] }
 0x815   :  { %v4797_v25 = vpop.f32.mrf.mxu2 }
 0x816   :  { %v4798_v16 = vadd.f32 %v4797_v25, %v4700_v39  ;;  %v4943_v38 = vpop.f32.mrf.mxu3  ;;  %v5804_v39 = vpack.c.bf16 %v5778_v21, %v5776_v19  ;;  %v5462_v21 = vld [vmem:[#allocation3 + $0x180] ss:$2 sm:$0xff]  ;;  %v5622_v19 = vld [vmem:[#allocation3 + $0x151] ss:$2 sm:$0xff] }
 0x817   :  { %v5067_v49 = vpop.f32.mrf.mxu1 }
 0x818   :  { %v13166_v61 = vadd.f32 %v4943_v38, %v4798_v16  ;;  %v5107_v23 = vadd.f32 %v5067_v49, %v12856_v24  ;;  %v13934_v24 = vld [vmem:[#allocation17_spill] sm:$0xff] }
 0x819   :  { %v4947_v30 = vadd.f32 %v13934_v24, %v4763_v14  ;;  %v5618_v14 = vld [vmem:[#allocation3 + $0xf1] ss:$2 sm:$0xff] }
 0x81a   :  { %9485 = vmatmul.msk.bf16.vlgmr.msrb.gmra.mxu1 %vm4335_vm0, %v5479_v43  ;;  %9509 = vmatmul.msk.bf16.vlgmr.msra.gmra.mxu2 %vm4335_vm0, %v5641_v41 }
 0x81b   :  { %9533 = vmatmul.msk.bf16.vlgmr.msra.gmra.mxu3 %vm4335_vm0, %v5803_v5 }
 0x81d   :  { %v5229_v52 = vpop.f32.mrf.mxu2 }
 0x81e   :  { %v5269_v34 = vadd.f32 %v5229_v52, %v5107_v23  ;;  %v5391_v37 = vpop.f32.mrf.mxu3  ;;  %v5620_v23 = vld [vmem:[#allocation3 + $0x121] ss:$2 sm:$0xff]  ;;  %v5456_v52 = vld [vmem:[#allocation3 + $0xf0] ss:$2 sm:$0xff] }
 0x81f   :  { %v5069_v1 = vpop.f32.mrf.mxu1  ;;  %v5481_v48 = vpack.c.bf16 %v5458_v47, %v5456_v52  ;;  %v5628_v52 = vld [vmem:[#allocation3 + $0x211] ss:$2 sm:$0xff] }
 0x820   :  { %v13174_v2 = vadd.f32 %v5391_v37, %v5269_v34  ;;  %v5108_v57 = vadd.f32 %v5069_v1, %v4947_v30  ;;  %v5643_v37 = vpack.c.bf16 %v5620_v23, %v5618_v14  ;;  %v5780_v1 = vld [vmem:[#allocation3 + $0xf2] ss:$2 sm:$0xff]  ;;  %v4773_v30 = vadd.f32 %v12976_v59, %v12974_v15 }
 0x821   :  { %v5805_v24 = vpack.c.bf16 %v5782_v44, %v5780_v1  ;;  %v10616_v23 = vld [vmem:[%s13764_s5 + $0x78] sm:$0xff] }
 0x822   :  { %6198 = vmatpush.bf16.msra.mxu1 %v10616_v23 }
 0x825   :  { %v5231_v11 = vpop.f32.mrf.mxu2 }
 0x826   :  { %v5270_v20 = vadd.f32 %v5231_v11, %v5108_v57  ;;  %v5393_v17 = vpop.f32.mrf.mxu3 }
 0x827   :  { %v5072_v12 = vpop.f32.mrf.mxu1 }
 0x828   :  { %v13177_v7 = vadd.f32 %v5393_v17, %v5270_v20  ;;  %v5109_v22 = vadd.f32 %v5072_v12, %v12895_v36  ;;  %v4949_v36 = vadd.f32 %v12925_v42, %v4768_v9  ;;  %v5624_v12 = vld [vmem:[#allocation3 + $0x181] ss:$2 sm:$0xff]  ;;  %v5784_v9 = vld [vmem:[#allocation3 + $0x152] ss:$2 sm:$0xff] }
 0x82a   :  { %9486 = vmatmul.msk.bf16.gmra.mxu1 %vm4335_vm0, %v5480_v62  ;;  %9510 = vmatmul.msk.bf16.gmra.mxu2 %vm4335_vm0, %v5642_v3  ;;  %v5460_v3 = vld [vmem:[#allocation3 + $0x150] ss:$2 sm:$0xff] }
 0x82b   :  { %9534 = vmatmul.msk.bf16.gmra.mxu3 %vm4335_vm0, %v5804_v39  ;;  %v5482_v59 = vpack.c.bf16 %v5462_v21, %v5460_v3  ;;  %v10615_v21 = vld [vmem:[%s13764_s5 + $0x70] sm:$0xff] }
 0x82c   :  { %6199 = vmatpush.bf16.msra.mxu1 %v10615_v21  ;;  %v5478_v21 = vld [vmem:[#allocation3 + $0x330] ss:$2 sm:$0xff] }
 0x82d   :  { %v5234_v25 = vpop.f32.mrf.mxu2 }
 0x82e   :  { %v5271_v29 = vadd.f32 %v5234_v25, %v5109_v22  ;;  %v5396_v16 = vpop.f32.mrf.mxu3  ;;  %v5786_v22 = vld [vmem:[#allocation3 + $0x182] ss:$2 sm:$0xff]  ;;  %v5644_v25 = vpack.c.bf16 %v5624_v12, %v5622_v19 }
 0x82f   :  { %v5074_v38 = vpop.f32.mrf.mxu1  ;;  %v5468_v19 = vld [vmem:[#allocation3 + $0x240] ss:$2 sm:$0xff] }
 0x830   :  { %v13185_v4 = vadd.f32 %v5396_v16, %v5271_v29  ;;  %v5110_v49 = vadd.f32 %v5074_v38, %v4949_v36  ;;  %v5806_v29 = vpack.c.bf16 %v5786_v22, %v5784_v9  ;;  %v10652_v16 = vld [vmem:[%s13764_s5 + $0x198] sm:$0xff]  ;;  %v4778_v38 = vadd.f32 %v13030_v10, %v13028_v46  ;;  %v5464_v10 = vld [vmem:[#allocation3 + $0x1e0] ss:$2 sm:$0xff] }
 0x831   :  { %6880 = vmatpush.bf16.msrb.mxu0 %v10652_v16 }
 0x835   :  { %v5236_v58 = vpop.f32.mrf.mxu2 }
 0x836   :  { %v5272_v43 = vadd.f32 %v5236_v58, %v5110_v49  ;;  %v5398_v41 = vpop.f32.mrf.mxu3 }
 0x837   :  { %v5077_v5 = vpop.f32.mrf.mxu1 }
 0x838   :  { %v13188_v34 = vadd.f32 %v5398_v41, %v5272_v43  ;;  %v5111_v18 = vadd.f32 %v5077_v5, %v12934_v55  ;;  %v4951_v55 = vadd.f32 %v12979_v53, %v4773_v30  ;;  %v10608_v53 = vld [vmem:[%s13764_s5 + $0x38] sm:$0xff]  ;;  %v4953_v43 = vadd.f32 %v13035_v50, %v4778_v38  ;;  %v10607_v50 = vld [vmem:[%s13764_s5 + $0x30] sm:$0xff] }
 0x839   :  { %6275 = vmatpush.bf16.msrb.mxu2 %v10608_v53  ;;  %v5466_v5 = vld [vmem:[#allocation3 + $0x210] ss:$2 sm:$0xff] }
 0x83a   :  { %9487 = vmatmul.msk.bf16.gmra.mxu1 %vm4335_vm0, %v5481_v48  ;;  %9511 = vmatmul.msk.bf16.gmra.mxu2 %vm4335_vm0, %v5643_v37  ;;  %v5790_v48 = vld [vmem:[#allocation3 + $0x212] ss:$2 sm:$0xff]  ;;  %v5626_v37 = vld [vmem:[#allocation3 + $0x1e1] ss:$2 sm:$0xff]  ;;  %v5792_v53 = vld [vmem:[#allocation3 + $0x242] ss:$2 sm:$0xff] }
 0x83b   :  { %9535 = vmatmul.msk.bf16.gmra.mxu3 %vm4335_vm0, %v5805_v24  ;;  %v5645_v30 = vpack.c.bf16 %v5628_v52, %v5626_v37  ;;  %v5796_v37 = vld [vmem:[#allocation3 + $0x2a2] ss:$2 sm:$0xff] }
 0x83d   :  { %v5239_v42 = vpop.f32.mrf.mxu2  ;;  %6276 = vmatpush.bf16.msrb.mxu2 %v10607_v50 }
 0x83e   :  { %v5273_v57 = vadd.f32 %v5239_v42, %v5111_v18  ;;  %v5401_v11 = vpop.f32.mrf.mxu3  ;;  %v5483_v42 = vpack.c.bf16 %v5466_v5, %v5464_v10  ;;  %v5798_v5 = vld [vmem:[#allocation3 + $0x2d2] ss:$2 sm:$0xff] }
 0x83f   :  { %v5079_v45 = vpop.f32.mrf.mxu1 }
 0x840   :  { %v13196_v6 = vadd.f32 %v5401_v11, %v5273_v57  ;;  %v5112_v20 = vadd.f32 %v5079_v45, %v4951_v55  ;;  %v5788_v57 = vld [vmem:[#allocation3 + $0x1e2] ss:$2 sm:$0xff] }
 0x841   :  { %v5807_v11 = vpack.c.bf16 %v5790_v48, %v5788_v57 }
 0x845   :  { %v5241_v17 = vpop.f32.mrf.mxu2 }
 0x846   :  { %v5274_v54 = vadd.f32 %v5241_v17, %v5112_v20  ;;  %v5403_v60 = vpop.f32.mrf.mxu3 }
 0x847   :  { %v5082_v62 = vpop.f32.mrf.mxu1 }
 0x848   :  { %v13199_v39 = vadd.f32 %v5403_v60, %v5274_v54  ;;  %v5113_v15 = vadd.f32 %v5082_v62, %v12989_v33  ;;  %v5470_v54 = vld [vmem:[#allocation3 + $0x270] ss:$2 sm:$0xff]  ;;  %v5632_v60 = vld [vmem:[#allocation3 + $0x271] ss:$2 sm:$0xff] }
 0x849   :  { %v5794_v62 = vld [vmem:[#allocation3 + $0x272] ss:$2 sm:$0xff] }
 0x84a   :  { %9488 = vmatmul.msk.bf16.gmra.mxu1 %vm4335_vm0, %v5482_v59  ;;  %9512 = vmatmul.msk.bf16.gmra.mxu2 %vm4335_vm0, %v5644_v25  ;;  %v5484_v25 = vpack.c.bf16 %v5470_v54, %v5468_v19  ;;  %v5808_v16 = vpack.c.bf16 %v5794_v62, %v5792_v53  ;;  %v5640_v54 = vld [vmem:[#allocation3 + $0x331] ss:$2 sm:$0xff]  ;;  %v5802_v62 = vld [vmem:[#allocation3 + $0x332] ss:$2 sm:$0xff] }
 0x84b   :  { %9536 = vmatmul.msk.bf16.gmra.mxu3 %vm4335_vm0, %v5806_v29  ;;  %v10606_v29 = vld [vmem:[%s13764_s5 + $0x28] sm:$0xff] }
 0x84c   :  { %6277 = vmatpush.bf16.msrb.mxu2 %v10606_v29  ;;  %v5476_v19 = vld [vmem:[#allocation3 + $0x300] ss:$2 sm:$0xff] }
 0x84d   :  { %v5244_v33 = vpop.f32.mrf.mxu2  ;;  %v5800_v29 = vld [vmem:[#allocation3 + $0x302] ss:$2 sm:$0xff] }
 0x84e   :  { %v5275_v36 = vadd.f32 %v5244_v33, %v5113_v15  ;;  %v5406_v49 = vpop.f32.mrf.mxu3  ;;  %v5630_v15 = vld [vmem:[#allocation3 + $0x241] ss:$2 sm:$0xff] }
 0x84f   :  { %v5084_v58 = vpop.f32.mrf.mxu1  ;;  %v5646_v9 = vpack.c.bf16 %v5632_v60, %v5630_v15  ;;  %v5638_v15 = vld [vmem:[#allocation3 + $0x301] ss:$2 sm:$0xff] }
 0x850   :  { %v13213_v47 = vadd.f32 %v5406_v49, %v5275_v36  ;;  %v5114_v41 = vadd.f32 %v5084_v58, %v4953_v43  ;;  %v10614_v58 = vld [vmem:[%s13764_s5 + $0x68] sm:$0xff]  ;;  %v5474_v43 = vld [vmem:[#allocation3 + $0x2d0] ss:$2 sm:$0xff]  ;;  %v5648_v53 = vpack.c.bf16 %v5640_v54, %v5638_v15  ;;  %v10617_v54 = vld [vmem:[%s13764_s5 + $0x80] sm:$0xff] }
 0x851   :  { %6200 = vmatpush.bf16.msra.mxu1 %v10614_v58 }
 0x855   :  { %v5246_v44 = vpop.f32.mrf.mxu2 }
 0x856   :  { %v5276_v14 = vadd.f32 %v5246_v44, %v5114_v41  ;;  %v5408_v18 = vpop.f32.mrf.mxu3  ;;  %v5636_v41 = vld [vmem:[#allocation3 + $0x2d1] ss:$2 sm:$0xff] }
 0x857   :  { %v5087_v46 = vpop.f32.mrf.mxu1 }
 0x858   :  { %v13219_v1 = vadd.f32 %v5408_v18, %v5276_v14  ;;  %v5115_v24 = vadd.f32 %v5087_v46, %v13047_v26  ;;  %v5472_v14 = vld [vmem:[#allocation3 + $0x2a0] ss:$2 sm:$0xff]  ;;  %v5634_v18 = vld [vmem:[#allocation3 + $0x2a1] ss:$2 sm:$0xff] }
 0x859   :  { %v5485_v46 = vpack.c.bf16 %v5474_v43, %v5472_v14  ;;  %v5647_v10 = vpack.c.bf16 %v5636_v41, %v5634_v18  ;;  %v10604_v41 = vld [vmem:[%s13764_s5 + $0x18] sm:$0xff]  ;;  %v10651_v18 = vld [vmem:[%s13764_s5 + $0x190] sm:$0xff] }
 0x85a   :  { %9489 = vmatmul.msk.bf16.gmra.mxu1 %vm4335_vm0, %v5483_v42  ;;  %9513 = vmatmul.msk.bf16.gmra.mxu2 %vm4335_vm0, %v5645_v30  ;;  %v10624_v42 = vld [vmem:[%s13764_s5 + $0xb8] sm:$0xff]  ;;  %v5809_v30 = vpack.c.bf16 %v5798_v5, %v5796_v37 }
 0x85b   :  { %9537 = vmatmul.msk.bf16.gmra.mxu3 %vm4335_vm0, %v5807_v11  ;;  %v10612_v5 = vld [vmem:[%s13764_s5 + $0x58] sm:$0xff]  ;;  %6881 = vmatpush.bf16.msrb.mxu0 %v10651_v18 }
 0x85c   :  { %6389 = vmatpush.bf16.msrb.mxu3 %v10624_v42  ;;  %v10620_v14 = vld [vmem:[%s13764_s5 + $0x98] sm:$0xff] }
 0x85d   :  { %v5249_v45 = vpop.f32.mrf.mxu2 }
 0x85e   :  { %v5277_v55 = vadd.f32 %v5249_v45, %v5115_v24  ;;  %v5411_v20 = vpop.f32.mrf.mxu3  ;;  %v10605_v24 = vld [vmem:[%s13764_s5 + $0x20] sm:$0xff] }
 0x85f   :  { %v13228_v17 = vpop.f32.mrf.mxu1  ;;  %6278 = vmatpush.bf16.msrb.mxu2 %v10605_v24 }
 0x860   :  { %v13230_v26 = vadd.f32 %v5411_v20, %v5277_v55  ;;  %v10623_v55 = vld [vmem:[%s13764_s5 + $0xb0] sm:$0xff] }
 0x861   :  { %6390 = vmatpush.bf16.msrb.mxu3 %v10623_v55  ;;  %v10609_v55 = vld [vmem:[%s13764_s5 + $0x40] sm:$0xff] }
 0x863   :  { %6279 = vmatpush.bf16.msrb.mxu2 %v10604_v41 }
 0x865   :  { %v13235_v12 = vpop.f32.mrf.mxu2 }
 0x866   :  { %v13237_v22 = vpop.f32.mrf.mxu3 }
 0x867   :  { %v5092_v3 = vpop.f32.mrf.mxu1 }
 0x868   :  { %v5117_v59 = vadd.f32 %v5092_v3, %v13112_v56 }
 0x86a   :  { %9490 = vmatmul.msk.bf16.gmra.mxu1 %vm4335_vm0, %v5484_v25  ;;  %9514 = vmatmul.msk.bf16.gmra.mxu2 %vm4335_vm0, %v5646_v9  ;;  %v5486_v9 = vpack.c.bf16 %v5478_v21, %v5476_v19  ;;  %v10601_v21 = vld [vmem:[%s13764_s5] sm:$0xff] }
 0x86b   :  { %9538 = vmatmul.msk.bf16.gmra.mxu3 %vm4335_vm0, %v5808_v16  ;;  %v10622_v16 = vld [vmem:[%s13764_s5 + $0xa8] sm:$0xff] }
 0x86c   :  { %6391 = vmatpush.bf16.msrb.mxu3 %v10622_v16 }
 0x86d   :  { %v5254_v33 = vpop.f32.mrf.mxu2 }
 0x86e   :  { %v5279_v38 = vadd.f32 %v5254_v33, %v5117_v59  ;;  %v5416_v36 = vpop.f32.mrf.mxu3  ;;  %v10613_v59 = vld [vmem:[%s13764_s5 + $0x60] sm:$0xff]  ;;  %v5810_v33 = vpack.c.bf16 %v5802_v62, %v5800_v29 }
 0x86f   :  { %v13246_v49 = vpop.f32.mrf.mxu1  ;;  %6201 = vmatpush.bf16.msra.mxu1 %v10613_v59 }
 0x870   :  { %v13248_v56 = vadd.f32 %v5416_v36, %v5279_v38 }
 0x873   :  { %6202 = vmatpush.bf16.msra.mxu1 %v10612_v5 }
 0x875   :  { %v13253_v23 = vpop.f32.mrf.mxu2 }
 0x876   :  { %v13255_v44 = vpop.f32.mrf.mxu3 }
 0x877   :  { %v5097_v52 = vpop.f32.mrf.mxu1 }
 0x878   :  { %v5119_v48 = vadd.f32 %v5097_v52, %v13141_v0 }
 0x87a   :  { %9491 = vmatmul.msk.bf16.gmra.mxu1 %vm4335_vm0, %v5485_v46  ;;  %9515 = vmatmul.msk.bf16.gmra.mxu2 %vm4335_vm0, %v5647_v10  ;;  %v10603_v46 = vld [vmem:[%s13764_s5 + $0x10] sm:$0xff] }
 0x87b   :  { %9539 = vmatmul.msk.bf16.gmra.mxu3 %vm4335_vm0, %v5809_v30  ;;  %v10619_v10 = vld [vmem:[%s13764_s5 + $0x90] sm:$0xff]  ;;  %6280 = vmatpush.bf16.msrb.mxu2 %v10603_v46  ;;  %v10610_v30 = vld [vmem:[%s13764_s5 + $0x48] sm:$0xff] }
 0x87d   :  { %v5259_v0 = vpop.f32.mrf.mxu2 }
 0x87e   :  { %v5281_v57 = vadd.f32 %v5259_v0, %v5119_v48  ;;  %v5421_v50 = vpop.f32.mrf.mxu3  ;;  %v10611_v48 = vld [vmem:[%s13764_s5 + $0x50] sm:$0xff]  ;;  %v10602_v0 = vld [vmem:[%s13764_s5 + $0x8] sm:$0xff] }
 0x87f   :  { %v13267_v11 = vpop.f32.mrf.mxu1  ;;  %6203 = vmatpush.bf16.msra.mxu1 %v10611_v48  ;;  %6281 = vmatpush.bf16.msrb.mxu2 %v10602_v0 }
 0x880   :  { %v13269_v45 = vadd.f32 %v5421_v50, %v5281_v57  ;;  %v10618_v57 = vld [vmem:[%s13764_s5 + $0x88] sm:$0xff] }
 0x883   :  { %6204 = vmatpush.bf16.msra.mxu1 %v10610_v30  ;;  %6282 = vmatpush.bf16.msrb.mxu2 %v10601_v21  ;;  %v6305_v21 = vld [vmem:[#allocation4 + $0x2] ss:$2 sm:$0xff] }
 0x885   :  { %v13274_v20 = vpop.f32.mrf.mxu2 }
 0x886   :  { %v13276_v60 = vpop.f32.mrf.mxu3 }
 0x887   :  { %v5102_v3 = vpop.f32.mrf.mxu1  ;;  %6205 = vmatpush.bf16.msra.mxu1 %v10609_v55 }
 0x888   :  { %v5121_v25 = vadd.f32 %v5102_v3, %v13164_v40  ;;  %v10621_v40 = vld [vmem:[%s13764_s5 + $0xa0] sm:$0xff] }
 0x889   :  { %6392 = vmatpush.bf16.msrb.mxu3 %v10621_v40 }
 0x88a   :  { %9492 = vmatmul.msk.bf16.gmra.mxu1 %vm4335_vm0, %v5486_v9  ;;  %9516 = vmatmul.msk.bf16.gmra.mxu2 %vm4335_vm0, %v5648_v53 }
 0x88b   :  { %9540 = vmatmul.msk.bf16.gmra.mxu3 %vm4335_vm0, %v5810_v33 }
 0x88d   :  { %v5264_v38 = vpop.f32.mrf.mxu2  ;;  %6393 = vmatpush.bf16.msrb.mxu3 %v10620_v14 }
 0x88e   :  { %v5283_v36 = vadd.f32 %v5264_v38, %v5121_v25  ;;  %v5426_v58 = vpop.f32.mrf.mxu3 }
 0x88f   :  { %v13291_v43 = vpop.f32.mrf.mxu1 }
 0x890   :  { %v13299_v52 = vadd.f32 %v5426_v58, %v5283_v36  ;;  %v10650_v36 = vld [vmem:[%s13764_s5 + $0x188] sm:$0xff] }
 0x891   :  { %6394 = vmatpush.bf16.msrb.mxu3 %v10619_v10  ;;  %6882 = vmatpush.bf16.msrb.mxu0 %v10650_v36 }
 0x895   :  { %v13316_v37 = vpop.f32.mrf.mxu2  ;;  %6395 = vmatpush.bf16.msrb.mxu3 %v10618_v57  ;;  %v6114_v57 = vld [vmem:[#allocation4 + $0x1] ss:$2 sm:$0xff] }
 0x896   :  { %v13318_v24 = vpop.f32.mrf.mxu3 }
 0x897   :  { %v5553_v42 = vpop.f32.mrf.mxu1 }
 0x898   :  { %v5593_v50 = vadd.f32 %v5553_v42, %v13174_v2  ;;  %v13342_v2 = vld [vmem:[%s13763_s4] ss:$0 sm:$0xff] }
 0x899   :  { %6396 = vmatpush.bf16.msrb.mxu3 %v10617_v54 }
 0x89d   :  { %v5715_v62 = vpop.f32.mrf.mxu2 }
 0x89e   :  { %v5755_v3 = vadd.f32 %v5715_v62, %v5593_v50  ;;  %v5877_v19 = vpop.f32.mrf.mxu3  ;;  %v6078_v50 = vld [vmem:[#allocation4] ss:$2 sm:$0xff] }
 0x89f   :  { %v5555_v15 = vpop.f32.mrf.mxu1 }
 0x8a0   :  { %v5917_v59 = vadd.f32 %v5877_v19, %v5755_v3  ;;  %v5594_v53 = vadd.f32 %v5555_v15, %v13177_v7  ;;  %v10649_v7 = vld [vmem:[%s13764_s5 + $0x180] sm:$0xff] }
 0x8a1   :  { %6883 = vmatpush.bf16.msrb.mxu0 %v10649_v7 }
 0x8a2   :  { %v5937_v25 = vadd.f32 %v13342_v2, %v5917_v59 }
 0x8a4   :  { %vm5953_vm0 = vcmp.ge.f32.partialorder %v5937_v25, 0.0  ;;  %v5969_v9 = vmul.f32 0.01, %v5937_v25 }
 0x8a5   :  { %v5717_v29 = vpop.f32.mrf.mxu2 }
 0x8a6   :  { %v5985_v16 = vsel %vm5953_vm0, %v5937_v25, %v5969_v9  ;;  %v5756_v33 = vadd.f32 %v5717_v29, %v5594_v53  ;;  %v5879_v40 = vpop.f32.mrf.mxu3 }
 0x8a7   :  { %6062 = vst [vmem:[#allocation4 + $0x19] sm:$0xff] %v5985_v16  ;;  %v5558_v38 = vpop.f32.mrf.mxu1 }
 0x8a8   :  { %v5918_v58 = vadd.f32 %v5879_v40, %v5756_v33  ;;  %v5595_v14 = vadd.f32 %v5558_v38, %v13185_v4 }
 0x8aa   :  { %v5938_v41 = vadd.f32 %v13342_v2, %v5918_v58 }
 0x8ac   :  { %vm5954_vm15 = vcmp.ge.f32.partialorder %v5938_v41, 0.0  ;;  %v5970_v5 = vmul.f32 0.01, %v5938_v41 }
 0x8ad   :  { %v5720_v18 = vpop.f32.mrf.mxu2 }
 0x8ae   :  { %v5986_v48 = vsel %vm5954_vm15, %v5938_v41, %v5970_v5  ;;  %v5757_v46 = vadd.f32 %v5720_v18, %v5595_v14  ;;  %v5882_v10 = vpop.f32.mrf.mxu3 }
 0x8af   :  { %6063 = vst [vmem:[#allocation4 + $0x31] sm:$0xff] %v5986_v48  ;;  %v5560_v42 = vpop.f32.mrf.mxu1 }
 0x8b0   :  { %v5919_v30 = vadd.f32 %v5882_v10, %v5757_v46  ;;  %v5596_v4 = vadd.f32 %v5560_v42, %v13188_v34 }
 0x8b2   :  { %v5939_v0 = vadd.f32 %v13342_v2, %v5919_v30 }
 0x8b4   :  { %vm5955_vm1 = vcmp.ge.f32.partialorder %v5939_v0, 0.0  ;;  %v5971_v55 = vmul.f32 0.01, %v5939_v0 }
 0x8b5   :  { %v5722_v54 = vpop.f32.mrf.mxu2 }
 0x8b6   :  { %v5987_v62 = vsel %vm5955_vm1, %v5939_v0, %v5971_v55  ;;  %v5758_v3 = vadd.f32 %v5722_v54, %v5596_v4  ;;  %v5884_v19 = vpop.f32.mrf.mxu3  ;;  %v6116_v15 = vld [vmem:[#allocation4 + $0x31] ss:$2 sm:$0xff]  ;;  %v6080_v59 = vld [vmem:[#allocation4 + $0x30] ss:$2 sm:$0xff] }
 0x8b7   :  { %v6307_v25 = vld [vmem:[#allocation4 + $0x32] ss:$2 sm:$0xff]  ;;  %6064 = vst [vmem:[#allocation4 + $0x49] sm:$0xff] %v5987_v62  ;;  %v5563_v9 = vpop.f32.mrf.mxu1  ;;  %v6129_v53 = vpack.c.bf16 %v6116_v15, %v6114_v57  ;;  %v6093_v29 = vpack.c.bf16 %v6080_v59, %v6078_v50 }
 0x8b8   :  { %v6320_v16 = vpack.c.bf16 %v6307_v25, %v6305_v21  ;;  %v5920_v33 = vadd.f32 %v5884_v19, %v5758_v3  ;;  %v5597_v38 = vadd.f32 %v5563_v9, %v13196_v6  ;;  %v6792_v57 = vld [vmem:[#allocation4 + $0x30] ss:$2 sm:$0xff] }
 0x8b9   :  { %6206 = vmatmul.bf16.vlgmr.msra.gmra.mxu1 %v6129_v53  ;;  %6283 = vmatmul.bf16.vlgmr.msrb.gmra.mxu2 %v6093_v29  ;;  %v10640_v25 = vld [vmem:[%s13764_s5 + $0x138] sm:$0xff] }
 0x8ba   :  { %v5940_v40 = vadd.f32 %v13342_v2, %v5920_v33  ;;  %6397 = vmatmul.bf16.vlgmr.msrb.gmra.mxu3 %v6320_v16  ;;  %6632 = vmatpush.bf16.msra.mxu2 %v10640_v25 }
 0x8bc   :  { %vm5956_vm2 = vcmp.ge.f32.partialorder %v5940_v40, 0.0  ;;  %v5972_v34 = vmul.f32 0.01, %v5940_v40 }
 0x8bd   :  { %v5725_v36 = vpop.f32.mrf.mxu2 }
 0x8be   :  { %v5988_v58 = vsel %vm5956_vm2, %v5940_v40, %v5972_v34  ;;  %v5759_v41 = vadd.f32 %v5725_v36, %v5597_v38  ;;  %v5887_v5 = vpop.f32.mrf.mxu3  ;;  %v4783_v38 = vadd.f32 %v13092_v13, %v13090_v51 }
 0x8bf   :  { %6065 = vst [vmem:[#allocation4 + $0x61] sm:$0xff] %v5988_v58  ;;  %v5565_v14 = vpop.f32.mrf.mxu1 }
 0x8c0   :  { %v5921_v7 = vadd.f32 %v5887_v5, %v5759_v41  ;;  %v5598_v46 = vadd.f32 %v5565_v14, %v13199_v39  ;;  %v4955_v13 = vadd.f32 %v13097_v32, %v4783_v38  ;;  %v10631_v32 = vld [vmem:[%s13764_s5 + $0xf0] sm:$0xff] }
 0x8c2   :  { %v5941_v18 = vadd.f32 %v13342_v2, %v5921_v7 }
 0x8c4   :  { %vm5957_vm5 = vcmp.ge.f32.partialorder %v5941_v18, 0.0  ;;  %v5973_v48 = vmul.f32 0.01, %v5941_v18 }
 0x8c5   :  { %v5727_v10 = vpop.f32.mrf.mxu2 }
 0x8c6   :  { %v5989_v42 = vsel %vm5957_vm5, %v5941_v18, %v5973_v48  ;;  %v5760_v30 = vadd.f32 %v5727_v10, %v5598_v46  ;;  %v5889_v0 = vpop.f32.mrf.mxu3  ;;  %v6794_v50 = vld [vmem:[#allocation4 + $0x60] ss:$2 sm:$0xff] }
 0x8c7   :  { %6066 = vst [vmem:[#allocation4 + $0x79] sm:$0xff] %v5989_v42  ;;  %v5568_v6 = vpop.f32.mrf.mxu1  ;;  %v6807_v55 = vpack.c.bf16 %v6794_v50, %v6792_v57  ;;  %v6082_v40 = vld [vmem:[#allocation4 + $0x60] ss:$2 sm:$0xff]  ;;  %v10639_v42 = vld [vmem:[%s13764_s5 + $0x130] sm:$0xff] }
 0x8c8   :  { %v5922_v4 = vadd.f32 %v5889_v0, %v5760_v30  ;;  %v5599_v62 = vadd.f32 %v5568_v6, %v13213_v47  ;;  %v6118_v47 = vld [vmem:[#allocation4 + $0x61] ss:$2 sm:$0xff]  ;;  %v6309_v34 = vld [vmem:[#allocation4 + $0x62] ss:$2 sm:$0xff]  ;;  %6633 = vmatpush.bf16.msra.mxu2 %v10639_v42  ;;  %v5116_v0 = vadd.f32 %v13228_v17, %v4955_v13 }
 0x8c9   :  { %6884 = vmatmul.bf16.vlgmr.msrb.gmra.mxu0 %v6807_v55  ;;  %v10638_v17 = vld [vmem:[%s13764_s5 + $0x128] sm:$0xff]  ;;  %v6086_v42 = vld [vmem:[#allocation4 + $0xf0] ss:$2 sm:$0xff] }
 0x8ca   :  { %v5942_v21 = vadd.f32 %v13342_v2, %v5922_v4  ;;  %v5278_v55 = vadd.f32 %v13235_v12, %v5116_v0  ;;  %v10647_v0 = vld [vmem:[%s13764_s5 + $0x170] sm:$0xff] }
 0x8cc   :  { %vm5958_vm6 = vcmp.ge.f32.partialorder %v5942_v21, 0.0  ;;  %v5974_v54 = vmul.f32 0.01, %v5942_v21  ;;  %6634 = vmatpush.bf16.msra.mxu2 %v10638_v17 }
 0x8cd   :  { %v5730_v3 = vpop.f32.mrf.mxu2 }
 0x8ce   :  { %v5990_v19 = vsel %vm5958_vm6, %v5942_v21, %v5974_v54  ;;  %v5761_v39 = vadd.f32 %v5730_v3, %v5599_v62  ;;  %v5892_v15 = vpop.f32.mrf.mxu3 }
 0x8cf   :  { %6067 = vst [vmem:[#allocation4 + $0x91] sm:$0xff] %v5990_v19  ;;  %v5570_v59 = vpop.f32.mrf.mxu1 }
 0x8d0   :  { %v5923_v9 = vadd.f32 %v5892_v15, %v5761_v39  ;;  %v5600_v16 = vadd.f32 %v5570_v59, %v13219_v1  ;;  %v10632_v1 = vld [vmem:[%s13764_s5 + $0xf8] sm:$0xff]  ;;  %v4788_v59 = vadd.f32 %v13131_v63, %v13129_v8 }
 0x8d1   :  { %6510 = vmatpush.bf16.msrb.mxu1 %v10632_v1  ;;  %v6122_v1 = vld [vmem:[#allocation4 + $0xf1] ss:$2 sm:$0xff] }
 0x8d2   :  { %v5943_v53 = vadd.f32 %v13342_v2, %v5923_v9  ;;  %v4957_v8 = vadd.f32 %v13133_v27, %v4788_v59  ;;  %v10629_v27 = vld [vmem:[%s13764_s5 + $0xe0] sm:$0xff] }
 0x8d4   :  { %vm5959_vm7 = vcmp.ge.f32.partialorder %v5943_v53, 0.0  ;;  %v5975_v29 = vmul.f32 0.01, %v5943_v53  ;;  %v5118_v38 = vadd.f32 %v13246_v49, %v4957_v8  ;;  %v10636_v49 = vld [vmem:[%s13764_s5 + $0x118] sm:$0xff] }
 0x8d5   :  { %v5732_v33 = vpop.f32.mrf.mxu2  ;;  %6511 = vmatpush.bf16.msrb.mxu1 %v10631_v32 }
 0x8d6   :  { %v5991_v36 = vsel %vm5959_vm7, %v5943_v53, %v5975_v29  ;;  %v5762_v58 = vadd.f32 %v5732_v33, %v5600_v16  ;;  %v5894_v41 = vpop.f32.mrf.mxu3  ;;  %v6120_v5 = vld [vmem:[#allocation4 + $0x91] ss:$2 sm:$0xff]  ;;  %v6084_v14 = vld [vmem:[#allocation4 + $0x90] ss:$2 sm:$0xff] }
 0x8d7   :  { %v6311_v7 = vld [vmem:[#allocation4 + $0x92] ss:$2 sm:$0xff]  ;;  %6068 = vst [vmem:[#allocation4 + $0xa9] sm:$0xff] %v5991_v36  ;;  %v5573_v18 = vpop.f32.mrf.mxu1  ;;  %v6130_v48 = vpack.c.bf16 %v6120_v5, %v6118_v47  ;;  %v6094_v46 = vpack.c.bf16 %v6084_v14, %v6082_v40  ;;  %v5280_v5 = vadd.f32 %v13253_v23, %v5118_v38 }
 0x8d8   :  { %v6321_v10 = vpack.c.bf16 %v6311_v7, %v6309_v34  ;;  %v5924_v51 = vadd.f32 %v5894_v41, %v5762_v58  ;;  %v5601_v50 = vadd.f32 %v5573_v18, %v13230_v26  ;;  %v5440_v26 = vadd.f32 %v13237_v22, %v5278_v55  ;;  %v6796_v29 = vld [vmem:[#allocation4 + $0x90] ss:$2 sm:$0xff]  ;;  %v10630_v22 = vld [vmem:[%s13764_s5 + $0xe8] sm:$0xff]  ;;  %v10637_v40 = vld [vmem:[%s13764_s5 + $0x120] sm:$0xff] }
 0x8d9   :  { %6211 = vmatmul.bf16.gmra.mxu1 %v6130_v48  ;;  %6288 = vmatmul.bf16.gmra.mxu2 %v6094_v46  ;;  %v5442_v23 = vadd.f32 %v13255_v44, %v5280_v5  ;;  %v10643_v38 = vld [vmem:[%s13764_s5 + $0x150] sm:$0xff]  ;;  %v10625_v5 = vld [vmem:[%s13764_s5 + $0xc0] sm:$0xff] }
 0x8da   :  { %v5944_v30 = vadd.f32 %v13342_v2, %v5924_v51  ;;  %6402 = vmatmul.bf16.gmra.mxu3 %v6321_v10  ;;  %6512 = vmatpush.bf16.msrb.mxu1 %v10630_v22  ;;  %v10644_v22 = vld [vmem:[%s13764_s5 + $0x158] sm:$0xff] }
 0x8db   :  { %6635 = vmatpush.bf16.msra.mxu2 %v10637_v40 }
 0x8dc   :  { %vm5960_vm8 = vcmp.ge.f32.partialorder %v5944_v30, 0.0  ;;  %v5976_v57 = vmul.f32 0.01, %v5944_v30 }
 0x8dd   :  { %v5735_v6 = vpop.f32.mrf.mxu2 }
 0x8de   :  { %v5992_v4 = vsel %vm5960_vm8, %v5944_v30, %v5976_v57  ;;  %v5763_v21 = vadd.f32 %v5735_v6, %v5601_v50  ;;  %v5897_v54 = vpop.f32.mrf.mxu3  ;;  %6513 = vmatpush.bf16.msrb.mxu1 %v10629_v27  ;;  %v6313_v30 = vld [vmem:[#allocation4 + $0xf2] ss:$2 sm:$0xff]  ;;  %v4793_v50 = vadd.f32 %v13154_v31, %v13152_v35 }
 0x8df   :  { %6069 = vst [vmem:[#allocation4 + $0xc1] sm:$0xff] %v5992_v4  ;;  %v5575_v62 = vpop.f32.mrf.mxu1  ;;  %6636 = vmatpush.bf16.msra.mxu2 %v10636_v49  ;;  %v10635_v35 = vld [vmem:[%s13764_s5 + $0x110] sm:$0xff] }
 0x8e0   :  { %v5925_v3 = vadd.f32 %v5897_v54, %v5763_v21  ;;  %v5602_v39 = vadd.f32 %v5575_v62, %v5440_v26  ;;  %v10628_v26 = vld [vmem:[%s13764_s5 + $0xd8] sm:$0xff] }
 0x8e2   :  { %v5945_v12 = vadd.f32 %v13342_v2, %v5925_v3  ;;  %6514 = vmatpush.bf16.msrb.mxu1 %v10628_v26 }
 0x8e3   :  { %6637 = vmatpush.bf16.msra.mxu2 %v10635_v35 }
 0x8e4   :  { %vm5961_vm9 = vcmp.ge.f32.partialorder %v5945_v12, 0.0  ;;  %v5977_v19 = vmul.f32 0.01, %v5945_v12 }
 0x8e5   :  { %v5737_v15 = vpop.f32.mrf.mxu2 }
 0x8e6   :  { %v5993_v25 = vsel %vm5961_vm9, %v5945_v12, %v5977_v19  ;;  %v5764_v9 = vadd.f32 %v5737_v15, %v5602_v39  ;;  %v5899_v53 = vpop.f32.mrf.mxu3  ;;  %v6798_v16 = vld [vmem:[#allocation4 + $0xc0] ss:$2 sm:$0xff]  ;;  %v4959_v19 = vadd.f32 %v13156_v28, %v4793_v50 }
 0x8e7   :  { %6070 = vst [vmem:[#allocation4 + $0x109] sm:$0xff] %v5993_v25  ;;  %v5578_v33 = vpop.f32.mrf.mxu1  ;;  %v6808_v47 = vpack.c.bf16 %v6798_v16, %v6796_v29  ;;  %v10646_v12 = vld [vmem:[%s13764_s5 + $0x168] sm:$0xff] }
 0x8e8   :  { %v5926_v34 = vadd.f32 %v5899_v53, %v5764_v9  ;;  %v5603_v58 = vadd.f32 %v5578_v33, %v13248_v56  ;;  %v10648_v56 = vld [vmem:[%s13764_s5 + $0x178] sm:$0xff]  ;;  %v5120_v15 = vadd.f32 %v13267_v11, %v4959_v19  ;;  %v10645_v9 = vld [vmem:[%s13764_s5 + $0x160] sm:$0xff]  ;;  %v10627_v11 = vld [vmem:[%s13764_s5 + $0xd0] sm:$0xff] }
 0x8e9   :  { %6889 = vmatmul.bf16.gmra.mxu0 %v6808_v47  ;;  %6754 = vmatpush.bf16.msra.mxu3 %v10648_v56  ;;  %v10642_v56 = vld [vmem:[%s13764_s5 + $0x148] sm:$0xff] }
 0x8ea   :  { %v5946_v63 = vadd.f32 %v13342_v2, %v5926_v34  ;;  %v5282_v29 = vadd.f32 %v13274_v20, %v5120_v15  ;;  %6515 = vmatpush.bf16.msrb.mxu1 %v10627_v11  ;;  %v10626_v20 = vld [vmem:[%s13764_s5 + $0xc8] sm:$0xff]  ;;  %v10633_v34 = vld [vmem:[%s13764_s5 + $0x100] sm:$0xff] }
 0x8eb   :  { %v6426_v11 = vld [vmem:[#allocation4 + $0x18] ss:$2 sm:$0xff] }
 0x8ec   :  { %vm5962_vm10 = vcmp.ge.f32.partialorder %v5946_v63, 0.0  ;;  %v5978_v36 = vmul.f32 0.01, %v5946_v63  ;;  %v5444_v8 = vadd.f32 %v13276_v60, %v5282_v29 }
 0x8ed   :  { %v5740_v41 = vpop.f32.mrf.mxu2  ;;  %6755 = vmatpush.bf16.msra.mxu3 %v10647_v0  ;;  %v10671_v0 = vld [vmem:[%s13764_s5 + $0x230] sm:$0xff] }
 0x8ee   :  { %v5994_v14 = vsel %vm5962_vm10, %v5946_v63, %v5978_v36  ;;  %v5765_v7 = vadd.f32 %v5740_v41, %v5603_v58  ;;  %v5902_v18 = vpop.f32.mrf.mxu3  ;;  %6516 = vmatpush.bf16.msrb.mxu1 %v10626_v20 }
 0x8ef   :  { %6071 = vst [vmem:[#allocation4 + $0x121] sm:$0xff] %v5994_v14  ;;  %v5580_v48 = vpop.f32.mrf.mxu1 }
 0x8f0   :  { %v5927_v46 = vadd.f32 %v5902_v18, %v5765_v7  ;;  %v5604_v13 = vadd.f32 %v5580_v48, %v5442_v23 }
 0x8f1   :  { %6756 = vmatpush.bf16.msra.mxu3 %v10646_v12 }
 0x8f2   :  { %v5947_v10 = vadd.f32 %v13342_v2, %v5927_v46  ;;  %6517 = vmatpush.bf16.msrb.mxu1 %v10625_v5  ;;  %v10660_v5 = vld [vmem:[%s13764_s5 + $0x1d8] sm:$0xff] }
 0x8f4   :  { %vm5963_vm11 = vcmp.ge.f32.partialorder %v5947_v10, 0.0  ;;  %v5979_v51 = vmul.f32 0.01, %v5947_v10 }
 0x8f5   :  { %v5742_v57 = vpop.f32.mrf.mxu2  ;;  %6757 = vmatpush.bf16.msra.mxu3 %v10645_v9 }
 0x8f6   :  { %v5995_v6 = vsel %vm5963_vm11, %v5947_v10, %v5979_v51  ;;  %v5766_v55 = vadd.f32 %v5742_v57, %v5604_v13  ;;  %v5904_v44 = vpop.f32.mrf.mxu3  ;;  %v6124_v4 = vld [vmem:[#allocation4 + $0x121] ss:$2 sm:$0xff]  ;;  %v6088_v21 = vld [vmem:[#allocation4 + $0x120] ss:$2 sm:$0xff]  ;;  %v10672_v10 = vld [vmem:[%s13764_s5 + $0x238] sm:$0xff]  ;;  %v5122_v51 = vadd.f32 %v13291_v43, %v13166_v61 }
 0x8f7   :  { %v6315_v54 = vld [vmem:[#allocation4 + $0x122] ss:$2 sm:$0xff]  ;;  %6072 = vst [vmem:[#allocation4 + $0x139] sm:$0xff] %v5995_v6  ;;  %v5583_v62 = vpop.f32.mrf.mxu1  ;;  %v6131_v32 = vpack.c.bf16 %v6124_v4, %v6122_v1  ;;  %v6095_v17 = vpack.c.bf16 %v6088_v21, %v6086_v42  ;;  %v10664_v1 = vld [vmem:[%s13764_s5 + $0x1f8] sm:$0xff] }
 0x8f8   :  { %v6322_v3 = vpack.c.bf16 %v6315_v54, %v6313_v30  ;;  %v5928_v31 = vadd.f32 %v5904_v44, %v5766_v55  ;;  %v5605_v25 = vadd.f32 %v5583_v62, %v13269_v45  ;;  %v10634_v45 = vld [vmem:[%s13764_s5 + $0x108] sm:$0xff]  ;;  %v10641_v42 = vld [vmem:[%s13764_s5 + $0x140] sm:$0xff]  ;;  %6998 = vmatpush.bf16.msra.mxu1 %v10664_v1  ;;  %v10663_v57 = vld [vmem:[%s13764_s5 + $0x1f0] sm:$0xff]  ;;  %v5284_v6 = vadd.f32 %v13316_v37, %v5122_v51 }
 0x8f9   :  { %6216 = vmatmul.bf16.gmra.mxu1 %v6131_v32  ;;  %6293 = vmatmul.bf16.gmra.mxu2 %v6095_v17  ;;  %v6800_v18 = vld [vmem:[#allocation4 + $0x120] ss:$2 sm:$0xff] }
 0x8fa   :  { %v5948_v39 = vadd.f32 %v13342_v2, %v5928_v31  ;;  %6407 = vmatmul.bf16.gmra.mxu3 %v6322_v3  ;;  %6638 = vmatpush.bf16.msra.mxu2 %v10634_v45  ;;  %v5446_v4 = vadd.f32 %v13318_v24, %v5284_v6  ;;  %v6672_v45 = vld [vmem:[#allocation4 + $0x4a] ss:$2 sm:$0xff] }
 0x8fb   :  { %6758 = vmatpush.bf16.msra.mxu3 %v10644_v22  ;;  %v6548_v22 = vld [vmem:[#allocation4 + $0x19] ss:$2 sm:$0xff]  ;;  %v10666_v1 = vld [vmem:[%s13764_s5 + $0x208] sm:$0xff] }
 0x8fc   :  { %vm5964_vm12 = vcmp.ge.f32.partialorder %v5948_v39, 0.0  ;;  %v5980_v59 = vmul.f32 0.01, %v5948_v39  ;;  %6999 = vmatpush.bf16.msra.mxu1 %v10663_v57 }
 0x8fd   :  { %v5745_v53 = vpop.f32.mrf.mxu2 }
 0x8fe   :  { %v5996_v28 = vsel %vm5964_vm12, %v5948_v39, %v5980_v59  ;;  %v5767_v16 = vadd.f32 %v5745_v53, %v5605_v25  ;;  %v5907_v33 = vpop.f32.mrf.mxu3  ;;  %6639 = vmatpush.bf16.msra.mxu2 %v10633_v34  ;;  %v10670_v53 = vld [vmem:[%s13764_s5 + $0x228] sm:$0xff]  ;;  %v6436_v57 = vld [vmem:[#allocation4 + $0x138] ss:$2 sm:$0xff] }
 0x8ff   :  { %6073 = vst [vmem:[#allocation4 + $0x151] sm:$0xff] %v5996_v28  ;;  %v5585_v47 = vpop.f32.mrf.mxu1  ;;  %6759 = vmatpush.bf16.msra.mxu3 %v10643_v38  ;;  %v6680_v6 = vld [vmem:[#allocation4 + $0x13a] ss:$2 sm:$0xff] }
 0x900   :  { %v5929_v40 = vadd.f32 %v5907_v33, %v5767_v16  ;;  %v5606_v58 = vadd.f32 %v5585_v47, %v5444_v8  ;;  %v10662_v16 = vld [vmem:[%s13764_s5 + $0x1e8] sm:$0xff]  ;;  %v10669_v33 = vld [vmem:[%s13764_s5 + $0x220] sm:$0xff] }
 0x901   :  { %7000 = vmatpush.bf16.msra.mxu1 %v10662_v16  ;;  %v6550_v47 = vld [vmem:[#allocation4 + $0x49] ss:$2 sm:$0xff] }
 0x902   :  { %v5949_v63 = vadd.f32 %v13342_v2, %v5929_v40  ;;  %7120 = vmatpush.bf16.msrb.mxu2 %v10672_v10  ;;  %v6563_v8 = vpack.c.bf16 %v6550_v47, %v6548_v22  ;;  %v7042_v47 = vld [vmem:[#allocation4 + $0xc2] ss:$2 sm:$0xff] }
 0x903   :  { %6760 = vmatpush.bf16.msra.mxu3 %v10642_v56 }
 0x904   :  { %vm5965_vm13 = vcmp.ge.f32.partialorder %v5949_v63, 0.0  ;;  %v5981_v36 = vmul.f32 0.01, %v5949_v63 }
 0x905   :  { %v5747_v41 = vpop.f32.mrf.mxu2 }
 0x906   :  { %v5997_v14 = vsel %vm5965_vm13, %v5949_v63, %v5981_v36  ;;  %v5768_v7 = vadd.f32 %v5747_v41, %v5606_v58  ;;  %v5909_v60 = vpop.f32.mrf.mxu3  ;;  %v6802_v48 = vld [vmem:[#allocation4 + $0x150] ss:$2 sm:$0xff]  ;;  %7121 = vmatpush.bf16.msrb.mxu2 %v10671_v0  ;;  %v6126_v17 = vld [vmem:[#allocation4 + $0x151] ss:$2 sm:$0xff]  ;;  %v10661_v36 = vld [vmem:[%s13764_s5 + $0x1e0] sm:$0xff] }
 0x907   :  { %6074 = vst [vmem:[#allocation4 + $0x169] sm:$0xff] %v5997_v14  ;;  %v5588_v27 = vpop.f32.mrf.mxu1  ;;  %v6809_v49 = vpack.c.bf16 %v6802_v48, %v6800_v18  ;;  %6761 = vmatpush.bf16.msra.mxu3 %v10641_v42  ;;  %v6090_v3 = vld [vmem:[#allocation4 + $0x150] ss:$2 sm:$0xff]  ;;  %7001 = vmatpush.bf16.msra.mxu1 %v10661_v36  ;;  %v6554_v18 = vld [vmem:[#allocation4 + $0xa9] ss:$2 sm:$0xff]  ;;  %v10665_v0 = vld [vmem:[%s13764_s5 + $0x200] sm:$0xff] }
 0x908   :  { %v5930_v46 = vadd.f32 %v5909_v60, %v5768_v7  ;;  %v5607_v30 = vadd.f32 %v5588_v27, %v13299_v52  ;;  %v6317_v37 = vld [vmem:[#allocation4 + $0x152] ss:$2 sm:$0xff]  ;;  %v6922_v36 = vld [vmem:[#allocation4 + $0x121] ss:$2 sm:$0xff] }
 0x909   :  { %6894 = vmatmul.bf16.gmra.mxu0 %v6809_v49  ;;  %v6670_v63 = vld [vmem:[#allocation4 + $0x1a] ss:$2 sm:$0xff]  ;;  %v10667_v14 = vld [vmem:[%s13764_s5 + $0x210] sm:$0xff]  ;;  %v6552_v49 = vld [vmem:[#allocation4 + $0x79] ss:$2 sm:$0xff] }
 0x90a   :  { %v5950_v23 = vadd.f32 %v13342_v2, %v5930_v46  ;;  %7122 = vmatpush.bf16.msrb.mxu2 %v10670_v53  ;;  %v6685_v58 = vpack.c.bf16 %v6672_v45, %v6670_v63  ;;  %v10668_v41 = vld [vmem:[%s13764_s5 + $0x218] sm:$0xff]  ;;  %v10659_v7 = vld [vmem:[%s13764_s5 + $0x1d0] sm:$0xff]  ;;  %v6564_v46 = vpack.c.bf16 %v6554_v18, %v6552_v49 }
 0x90b   :  { %7002 = vmatpush.bf16.msra.mxu1 %v10660_v5  ;;  %v6432_v60 = vld [vmem:[#allocation4 + $0xa8] ss:$2 sm:$0xff]  ;;  %v6430_v27 = vld [vmem:[#allocation4 + $0x78] ss:$2 sm:$0xff]  ;;  %v6924_v63 = vld [vmem:[#allocation4 + $0x151] ss:$2 sm:$0xff] }
 0x90c   :  { %vm5966_vm3 = vcmp.ge.f32.partialorder %v5950_v23, 0.0  ;;  %v5982_v13 = vmul.f32 0.01, %v5950_v23  ;;  %v6676_v48 = vld [vmem:[#allocation4 + $0xaa] ss:$2 sm:$0xff]  ;;  %v6442_v56 = vpack.c.bf16 %v6432_v60, %v6430_v27 }
 0x90d   :  { %v5750_v50 = vpop.f32.mrf.mxu2  ;;  %v7036_v53 = vld [vmem:[#allocation4 + $0x32] ss:$2 sm:$0xff] }
 0x90e   :  { %v5998_v55 = vsel %vm5966_vm3, %v5950_v23, %v5982_v13  ;;  %v5769_v44 = vadd.f32 %v5750_v50, %v5607_v30  ;;  %v5912_v61 = vpop.f32.mrf.mxu3  ;;  %7123 = vmatpush.bf16.msrb.mxu2 %v10669_v33  ;;  %v6674_v23 = vld [vmem:[#allocation4 + $0x7a] ss:$2 sm:$0xff]  ;;  %v6558_v50 = vld [vmem:[#allocation4 + $0x139] ss:$2 sm:$0xff]  ;;  %vm8179_vm3 = vcmask 1041409  }
 0x90f   :  { %6075 = vst [vmem:[#allocation4 + $0x181] sm:$0xff] %v5998_v55  ;;  %v5590_v52 = vpop.f32.mrf.mxu1  ;;  %7003 = vmatpush.bf16.msra.mxu1 %v10659_v7  ;;  %v6686_v10 = vpack.c.bf16 %v6676_v48, %v6674_v23  ;;  %v10658_v30 = vld [vmem:[%s13764_s5 + $0x1c8] sm:$0xff]  ;;  %v7040_v45 = vld [vmem:[#allocation4 + $0x92] ss:$2 sm:$0xff] }
 0x910   :  { %v5931_v43 = vadd.f32 %v5912_v61, %v5769_v44  ;;  %v5608_v62 = vadd.f32 %v5590_v52, %v5446_v4  ;;  %v6434_v55 = vld [vmem:[#allocation4 + $0x108] ss:$2 sm:$0xff]  ;;  %v6556_v44 = vld [vmem:[#allocation4 + $0x109] ss:$2 sm:$0xff]  ;;  %v10657_v4 = vld [vmem:[%s13764_s5 + $0x1c0] sm:$0xff] }
 0x911   :  { %v6443_v61 = vpack.c.bf16 %v6436_v57, %v6434_v55  ;;  %v6678_v52 = vld [vmem:[#allocation4 + $0x10a] ss:$2 sm:$0xff] }
 0x912   :  { %v5951_v21 = vadd.f32 %v13342_v2, %v5931_v43  ;;  %7124 = vmatpush.bf16.msrb.mxu2 %v10668_v41  ;;  %v6565_v43 = vpack.c.bf16 %v6558_v50, %v6556_v44  ;;  %v6931_v41 = vpack.c.bf16 %v6924_v63, %v6922_v36 }
 0x913   :  { %7004 = vmatpush.bf16.msra.mxu1 %v10658_v30 }
 0x914   :  { %vm5967_vm14 = vcmp.ge.f32.partialorder %v5951_v21, 0.0  ;;  %v5983_v54 = vmul.f32 0.01, %v5951_v21 }
 0x915   :  { %v5752_v32 = vpop.f32.mrf.mxu2 }
 0x916   :  { %v5999_v26 = vsel %vm5967_vm14, %v5951_v21, %v5983_v54  ;;  %v5770_v35 = vadd.f32 %v5752_v32, %v5608_v62  ;;  %v6128_v31 = vld [vmem:[#allocation4 + $0x181] ss:$2 sm:$0xff]  ;;  %v6092_v12 = vld [vmem:[#allocation4 + $0x180] ss:$2 sm:$0xff]  ;;  %v5914_v39 = vpop.f32.mrf.mxu3  ;;  %7125 = vmatpush.bf16.msrb.mxu2 %v10667_v14  ;;  %v6687_v21 = vpack.c.bf16 %v6680_v6, %v6678_v52  ;;  %v10688_v52 = vld [vmem:[#allocation10 + $0x78] sm:$0xff] }
 0x917   :  { %v6319_v19 = vld [vmem:[#allocation4 + $0x182] ss:$2 sm:$0xff]  ;;  %6076 = vst [vmem:[#allocation4 + $0x199] sm:$0xff] %v5999_v26  ;;  %v6132_v15 = vpack.c.bf16 %v6128_v31, %v6126_v17  ;;  %v6096_v59 = vpack.c.bf16 %v6092_v12, %v6090_v3  ;;  %7005 = vmatpush.bf16.msra.mxu1 %v10657_v4  ;;  %v6560_v26 = vld [vmem:[#allocation4 + $0x169] ss:$2 sm:$0xff]  ;;  %7338 = vmatpush.bf16.msrb.mxu3 %v10688_v52 }
 0x918   :  { %v6323_v25 = vpack.c.bf16 %v6319_v19, %v6317_v37  ;;  %v5932_v24 = vadd.f32 %v5914_v39, %v5770_v35  ;;  %v6804_v40 = vld [vmem:[#allocation4 + $0x180] ss:$2 sm:$0xff] }
 0x919   :  { %6221 = vmatmul.bf16.gmra.mxu1 %v6132_v15  ;;  %6298 = vmatmul.bf16.gmra.mxu2 %v6096_v59  ;;  %v6438_v37 = vld [vmem:[#allocation4 + $0x168] ss:$2 sm:$0xff] }
 0x91a   :  { %v5952_v9 = vadd.f32 %v13342_v2, %v5932_v24  ;;  %6412 = vmatmul.bf16.gmra.mxu3 %v6323_v25  ;;  %v6428_v2 = vld [vmem:[#allocation4 + $0x48] ss:$2 sm:$0xff]  ;;  %7126 = vmatpush.bf16.msrb.mxu2 %v10666_v1  ;;  %v6916_v25 = vld [vmem:[#allocation4 + $0x61] ss:$2 sm:$0xff] }
 0x91b   :  { %v6441_v34 = vpack.c.bf16 %v6428_v2, %v6426_v11  ;;  %v6682_v12 = vld [vmem:[#allocation4 + $0x16a] ss:$2 sm:$0xff]  ;;  %v6920_v2 = vld [vmem:[#allocation4 + $0xc1] ss:$2 sm:$0xff]  ;;  %v6918_v11 = vld [vmem:[#allocation4 + $0x91] ss:$2 sm:$0xff] }
 0x91c   :  { %vm5968_vm0 = vcmp.ge.f32.partialorder %v5952_v9, 0.0  ;;  %v5984_v29 = vmul.f32 0.01, %v5952_v9  ;;  %v7038_v24 = vld [vmem:[#allocation4 + $0x62] ss:$2 sm:$0xff]  ;;  %v6930_v22 = vpack.c.bf16 %v6920_v2, %v6918_v11 }
 0x91d   :  { %v10703_v11 = vld [vmem:[#allocation10 + $0xf0] sm:$0xff] }
 0x91e   :  { %v6000_v28 = vsel %vm5968_vm0, %v5952_v9, %v5984_v29  ;;  %7127 = vmatpush.bf16.msrb.mxu2 %v10665_v0  ;;  %v6440_v32 = vld [vmem:[#allocation4 + $0x198] ss:$2 sm:$0xff]  ;;  %v6562_v17 = vld [vmem:[#allocation4 + $0x199] ss:$2 sm:$0xff] }
 0x91f   :  { %6077 = vst [vmem:[#allocation4 + $0x1b1] sm:$0xff] %v6000_v28  ;;  %v6684_v3 = vld [vmem:[#allocation4 + $0x19a] ss:$2 sm:$0xff]  ;;  %v6444_v35 = vpack.c.bf16 %v6440_v32, %v6438_v37  ;;  %v6566_v31 = vpack.c.bf16 %v6562_v17, %v6560_v26  ;;  %v6914_v9 = vld [vmem:[#allocation4 + $0x31] ss:$2 sm:$0xff]  ;;  %v7051_v28 = vpack.c.bf16 %v7038_v24, %v7036_v53 }
 0x920   :  { %v6688_v19 = vpack.c.bf16 %v6684_v3, %v6682_v12  ;;  %v6929_v29 = vpack.c.bf16 %v6916_v25, %v6914_v9  ;;  %v10687_v17 = vld [vmem:[#allocation10 + $0x70] sm:$0xff]  ;;  %v10685_v24 = vld [vmem:[#allocation10 + $0x60] sm:$0xff]  ;;  %v10694_v9 = vld [vmem:[#allocation10 + $0xa8] sm:$0xff] }
 0x921   :  { %7339 = vmatpush.bf16.msrb.mxu3 %v10687_v17  ;;  %v10695_v12 = vld [vmem:[#allocation10 + $0xb0] sm:$0xff]  ;;  %v10704_v53 = vld [vmem:[#allocation10 + $0xf8] sm:$0xff] }
 0x922   :  { %v10708_v17 = vld [vmem:[#allocation10 + $0x118] sm:$0xff] }
 0x926   :  { %v6806_v20 = vld [vmem:[#allocation4 + $0x1b0] ss:$2 sm:$0xff]  ;;  %v6928_v18 = vld [vmem:[#allocation4 + $0x1b1] ss:$2 sm:$0xff] }
 0x927   :  { %v6810_v38 = vpack.c.bf16 %v6806_v20, %v6804_v40  ;;  %v7052_v40 = vpack.c.bf16 %v7042_v47, %v7040_v45  ;;  %v7050_v48 = vld [vmem:[#allocation4 + $0x1b2] ss:$2 sm:$0xff] }
 0x928   :  { %v10693_v47 = vld [vmem:[#allocation10 + $0xa0] sm:$0xff]  ;;  %v10711_v45 = vld [vmem:[#allocation10 + $0x130] sm:$0xff] }
 0x929   :  { %6518 = vmatmul.bf16.vlgmr.msrb.gmra.mxu1 %v6441_v34  ;;  %6640 = vmatmul.bf16.vlgmr.msra.gmra.mxu2 %v6563_v8 }
 0x92a   :  { %6762 = vmatmul.bf16.vlgmr.msra.gmra.mxu3 %v6685_v58  ;;  %6899 = vmatmul.bf16.gmra.mxu0 %v6810_v38  ;;  %v7046_v38 = vld [vmem:[#allocation4 + $0x152] ss:$2 sm:$0xff]  ;;  %v7044_v58 = vld [vmem:[#allocation4 + $0x122] ss:$2 sm:$0xff] }
 0x92b   :  { %v7053_v5 = vpack.c.bf16 %v7046_v38, %v7044_v58  ;;  %7596 = vmatpush.bf16.msrb.mxu1 %v10704_v53  ;;  %v10710_v38 = vld [vmem:[#allocation10 + $0x128] sm:$0xff]  ;;  %v10683_v58 = vld [vmem:[#allocation10 + $0x50] sm:$0xff] }
 0x92f   :  { %7597 = vmatpush.bf16.msrb.mxu1 %v10703_v11  ;;  %v10706_v11 = vld [vmem:[#allocation10 + $0x108] sm:$0xff] }
 0x936   :  { %v6207_v42 = vpop.f32.mrf.mxu1 }
 0x939   :  { %6523 = vmatmul.bf16.gmra.mxu1 %v6442_v56  ;;  %6645 = vmatmul.bf16.gmra.mxu2 %v6564_v46  ;;  %v6926_v56 = vld [vmem:[#allocation4 + $0x181] ss:$2 sm:$0xff]  ;;  %v7048_v46 = vld [vmem:[#allocation4 + $0x182] ss:$2 sm:$0xff] }
 0x93a   :  { %6767 = vmatmul.bf16.gmra.mxu3 %v6686_v10  ;;  %v6932_v23 = vpack.c.bf16 %v6928_v18, %v6926_v56  ;;  %v7054_v10 = vpack.c.bf16 %v7050_v48, %v7048_v46  ;;  %v10701_v18 = vld [vmem:[#allocation10 + $0xe0] sm:$0xff] }
 0x93b   :  { %v10709_v48 = vld [vmem:[#allocation10 + $0x120] sm:$0xff] }
 0x93c   :  { %v6284_v51 = vpop.f32.mrf.mxu2 }
 0x93d   :  { %v13510_v13 = vadd.f32 %v6284_v51, %v6207_v42  ;;  %v13533_v14 = vpop.f32.mrf.mxu3 }
 0x93e   :  { %v13521_v54 = vpop.f32.mrf.mxu1 }
 0x93f   :  { %v6418_v63 = vadd.f32 %v13533_v14, %v13510_v13  ;;  %v10682_v14 = vld [vmem:[#allocation10 + $0x48] sm:$0xff] }
 0x944   :  { %v13523_v62 = vpop.f32.mrf.mxu2 }
 0x945   :  { %v13539_v27 = vpop.f32.mrf.mxu3  ;;  %v6287_v46 = vadd.f32 %v13523_v62, %v13521_v54  ;;  %v10699_v62 = vld [vmem:[#allocation10 + $0xd0] sm:$0xff] }
 0x949   :  { %6528 = vmatmul.bf16.gmra.mxu1 %v6443_v61  ;;  %6650 = vmatmul.bf16.gmra.mxu2 %v6565_v43 }
 0x94a   :  { %6772 = vmatmul.bf16.gmra.mxu3 %v6687_v21 }
 0x956   :  { %v6212_v39 = vpop.f32.mrf.mxu1 }
 0x959   :  { %6533 = vmatmul.bf16.gmra.mxu1 %v6444_v35  ;;  %6655 = vmatmul.bf16.gmra.mxu2 %v6566_v31  ;;  %v10686_v35 = vld [vmem:[#allocation10 + $0x68] sm:$0xff]  ;;  %v10696_v31 = vld [vmem:[#allocation10 + $0xb8] sm:$0xff] }
 0x95a   :  { %6777 = vmatmul.bf16.gmra.mxu3 %v6688_v19  ;;  %7499 = vmatpush.bf16.msra.mxu0 %v10696_v31  ;;  %v10681_v31 = vld [vmem:[#allocation10 + $0x40] sm:$0xff] }
 0x95b   :  { %7340 = vmatpush.bf16.msrb.mxu3 %v10686_v35 }
 0x95c   :  { %v6289_v15 = vpop.f32.mrf.mxu2 }
 0x95d   :  { %v13525_v59 = vadd.f32 %v6289_v15, %v6212_v39  ;;  %v13543_v51 = vpop.f32.mrf.mxu3 }
 0x95e   :  { %v13527_v16 = vpop.f32.mrf.mxu1  ;;  %7500 = vmatpush.bf16.msra.mxu0 %v10695_v12  ;;  %v10689_v12 = vld [vmem:[#allocation10 + $0x80] sm:$0xff] }
 0x95f   :  { %7341 = vmatpush.bf16.msrb.mxu3 %v10685_v24 }
 0x962   :  { %7501 = vmatpush.bf16.msra.mxu0 %v10694_v9 }
 0x964   :  { %v13529_v33 = vpop.f32.mrf.mxu2 }
 0x965   :  { %v13549_v50 = vpop.f32.mrf.mxu3 }
 0x966   :  { %7502 = vmatpush.bf16.msra.mxu0 %v10693_v47  ;;  %v10698_v47 = vld [vmem:[#allocation10 + $0xc8] sm:$0xff] }
 0x969   :  { %7006 = vmatmul.bf16.vlgmr.msra.gmra.mxu1 %v6929_v29  ;;  %7128 = vmatmul.bf16.vlgmr.msrb.gmra.mxu2 %v7051_v28  ;;  %v10712_v29 = vld [vmem:[#allocation10 + $0x138] sm:$0xff] }
 0x96a   :  { %7694 = vmatpush.bf16.msra.mxu2 %v10712_v29 }
 0x96e   :  { %7695 = vmatpush.bf16.msra.mxu2 %v10711_v45  ;;  %v6420_v45 = vadd.f32 %v13543_v51, %v13525_v59 }
 0x972   :  { %7696 = vmatpush.bf16.msra.mxu2 %v10710_v38  ;;  %v10697_v38 = vld [vmem:[#allocation10 + $0xc0] sm:$0xff] }
 0x976   :  { %v6217_v20 = vpop.f32.mrf.mxu1  ;;  %7697 = vmatpush.bf16.msra.mxu2 %v10709_v48 }
 0x979   :  { %7011 = vmatmul.bf16.gmra.mxu1 %v6930_v22  ;;  %7133 = vmatmul.bf16.gmra.mxu2 %v7052_v40  ;;  %v10684_v40 = vld [vmem:[#allocation10 + $0x58] sm:$0xff] }
 0x97a   :  { %7342 = vmatpush.bf16.msrb.mxu3 %v10684_v40  ;;  %7698 = vmatpush.bf16.msra.mxu2 %v10708_v17 }
 0x97c   :  { %v6294_v34 = vpop.f32.mrf.mxu2 }
 0x97d   :  { %v13531_v8 = vadd.f32 %v6294_v34, %v6217_v20  ;;  %v13553_v44 = vpop.f32.mrf.mxu3  ;;  %v10692_v20 = vld [vmem:[#allocation10 + $0x98] sm:$0xff]  ;;  %v10702_v34 = vld [vmem:[#allocation10 + $0xe8] sm:$0xff] }
 0x97e   :  { %v13535_v7 = vpop.f32.mrf.mxu1  ;;  %7503 = vmatpush.bf16.msra.mxu0 %v10692_v20  ;;  %7598 = vmatpush.bf16.msrb.mxu1 %v10702_v34 }
 0x97f   :  { %7343 = vmatpush.bf16.msrb.mxu3 %v10683_v58  ;;  %v10705_v58 = vld [vmem:[#allocation10 + $0x100] sm:$0xff] }
 0x982   :  { %7599 = vmatpush.bf16.msrb.mxu1 %v10701_v18 }
 0x983   :  { %7344 = vmatpush.bf16.msrb.mxu3 %v10682_v14 }
 0x984   :  { %v13537_v60 = vpop.f32.mrf.mxu2 }
 0x985   :  { %v13559_v4 = vpop.f32.mrf.mxu3 }
 0x987   :  { %7345 = vmatpush.bf16.msrb.mxu3 %v10681_v31 }
 0x989   :  { %7016 = vmatmul.bf16.gmra.mxu1 %v6931_v41  ;;  %7138 = vmatmul.bf16.gmra.mxu2 %v7053_v5  ;;  %v10691_v41 = vld [vmem:[#allocation10 + $0x90] sm:$0xff] }
 0x98a   :  { %7504 = vmatpush.bf16.msra.mxu0 %v10691_v41  ;;  %v6292_v41 = vadd.f32 %v13529_v33, %v13527_v16 }
 0x996   :  { %v6222_v49 = vpop.f32.mrf.mxu1 }
 0x999   :  { %7021 = vmatmul.bf16.gmra.mxu1 %v6932_v23  ;;  %7143 = vmatmul.bf16.gmra.mxu2 %v7054_v10  ;;  %v10690_v10 = vld [vmem:[#allocation10 + $0x88] sm:$0xff] }
 0x99a   :  { %7505 = vmatpush.bf16.msra.mxu0 %v10690_v10 }
 0x99c   :  { %v6299_v1 = vpop.f32.mrf.mxu2 }
 0x99d   :  { %v13541_v42 = vadd.f32 %v6299_v1, %v6222_v49  ;;  %v13565_v3 = vpop.f32.mrf.mxu3  ;;  %v6885_v49 = vpop.f32.mrf.mxu0  ;;  %v10700_v1 = vld [vmem:[#allocation10 + $0xd8] sm:$0xff] }
 0x99e   :  { %v13545_v30 = vpop.f32.mrf.mxu1  ;;  %7600 = vmatpush.bf16.msrb.mxu1 %v10700_v1  ;;  %7506 = vmatpush.bf16.msra.mxu0 %v10689_v12  ;;  %v10680_v12 = vld [vmem:[#allocation10 + $0x38] sm:$0xff] }
 0x99f   :  { %7405 = vmatpush.bf16.msra.mxu3 %v10680_v12  ;;  %v10724_v12 = vld [vmem:[#allocation10 + $0x198] sm:$0xff] }
 0x9a2   :  { %7601 = vmatpush.bf16.msrb.mxu1 %v10699_v62 }
 0x9a4   :  { %v13547_v0 = vpop.f32.mrf.mxu2 }
 0x9a5   :  { %v13571_v19 = vpop.f32.mrf.mxu3  ;;  %v6887_v53 = vpop.f32.mrf.mxu0 }
 0x9a6   :  { %v6519_v57 = vpop.f32.mrf.mxu1  ;;  %7602 = vmatpush.bf16.msrb.mxu1 %v10698_v47 }
 0x9a7   :  { %v6539_v5 = vadd.f32 %v6519_v57, %v6418_v63  ;;  %v6419_v57 = vadd.f32 %v13539_v27, %v6287_v46  ;;  %v6421_v46 = vadd.f32 %v13549_v50, %v6292_v41  ;;  %v6422_v50 = vadd.f32 %v13553_v44, %v13531_v8 }
 0x9aa   :  { %7603 = vmatpush.bf16.msrb.mxu1 %v10697_v38 }
 0x9ac   :  { %v6641_v6 = vpop.f32.mrf.mxu2 }
 0x9ad   :  { %v6763_v28 = vpop.f32.mrf.mxu3  ;;  %v6661_v23 = vadd.f32 %v6641_v6, %v6539_v5  ;;  %v10707_v6 = vld [vmem:[#allocation10 + $0x110] sm:$0xff]  ;;  %v6890_v59 = vpop.f32.mrf.mxu0 }
 0x9ae   :  { %v13551_v55 = vpop.f32.mrf.mxu1  ;;  %7699 = vmatpush.bf16.msra.mxu2 %v10707_v6 }
 0x9af   :  { %v6783_v52 = vadd.f32 %v6763_v28, %v6661_v23  ;;  %v6540_v54 = vadd.f32 %v13551_v55, %v6419_v57  ;;  %v13597_v28 = vld [vmem:[%s13765_s6] ss:$0 sm:$0xff] }
 0x9b1   :  { %v6905_v9 = vadd.f32 %v6885_v49, %v6783_v52 }
 0x9b2   :  { %7700 = vmatpush.bf16.msra.mxu2 %v10706_v11  ;;  %v7425_v11 = vld [vmem:[#allocation5 + $0x2] ss:$2 sm:$0xff] }
 0x9b4   :  { %v13555_v61 = vpop.f32.mrf.mxu2 }
 0x9b5   :  { %v6765_v56 = vpop.f32.mrf.mxu3  ;;  %v6662_v24 = vadd.f32 %v13555_v61, %v6540_v54  ;;  %v10728_v54 = vld [vmem:[#allocation10 + $0x1b8] sm:$0xff] }
 0x9b6   :  { %v13557_v43 = vpop.f32.mrf.mxu1  ;;  %7701 = vmatpush.bf16.msra.mxu2 %v10705_v58  ;;  %7890 = vmatpush.bf16.msrb.mxu0 %v10728_v54  ;;  %v10678_v58 = vld [vmem:[#allocation10 + $0x28] sm:$0xff] }
 0x9b7   :  { %v6784_v61 = vadd.f32 %v6765_v56, %v6662_v24  ;;  %v6541_v34 = vadd.f32 %v13557_v43, %v6420_v45 }
 0x9b9   :  { %v6906_v48 = vadd.f32 %v6887_v53, %v6784_v61 }
 0x9bc   :  { %v13561_v21 = vpop.f32.mrf.mxu2 }
 0x9bd   :  { %v6768_v29 = vpop.f32.mrf.mxu3  ;;  %v6663_v5 = vadd.f32 %v13561_v21, %v6541_v34 }
 0x9be   :  { %v13563_v32 = vpop.f32.mrf.mxu1 }
 0x9bf   :  { %v6785_v23 = vadd.f32 %v6768_v29, %v6663_v5  ;;  %v6542_v16 = vadd.f32 %v13563_v32, %v6421_v46  ;;  %v10735_v46 = vld [vmem:[#allocation10 + $0x1f0] sm:$0xff] }
 0x9c1   :  { %v6907_v57 = vadd.f32 %v6890_v59, %v6785_v23  ;;  %v10743_v23 = vld [vmem:[#allocation10 + $0x230] sm:$0xff] }
 0x9c4   :  { %v13567_v37 = vpop.f32.mrf.mxu2 }
 0x9c5   :  { %v6770_v43 = vpop.f32.mrf.mxu3  ;;  %v6664_v21 = vadd.f32 %v13567_v37, %v6542_v16  ;;  %v10679_v37 = vld [vmem:[#allocation10 + $0x30] sm:$0xff] }
 0x9c6   :  { %v13569_v26 = vpop.f32.mrf.mxu1  ;;  %7406 = vmatpush.bf16.msra.mxu3 %v10679_v37 }
 0x9c7   :  { %v6786_v62 = vadd.f32 %v6770_v43, %v6664_v21  ;;  %v6543_v53 = vadd.f32 %v13569_v26, %v6422_v50  ;;  %v10725_v43 = vld [vmem:[#allocation10 + $0x1a0] sm:$0xff] }
 0x9ca   :  { %7407 = vmatpush.bf16.msra.mxu3 %v10678_v58 }
 0x9cc   :  { %v13573_v39 = vpop.f32.mrf.mxu2 }
 0x9cd   :  { %v6773_v32 = vpop.f32.mrf.mxu3  ;;  %v6665_v47 = vadd.f32 %v13573_v39, %v6543_v53  ;;  %v10675_v53 = vld [vmem:[#allocation10 + $0x10] sm:$0xff] }
 0x9ce   :  { %v13575_v15 = vpop.f32.mrf.mxu1 }
 0x9cf   :  { %v6787_v41 = vadd.f32 %v6773_v32, %v6665_v47 }
 0x9d4   :  { %v13577_v25 = vpop.f32.mrf.mxu2 }
 0x9d6   :  { %v13579_v2 = vpop.f32.mrf.mxu1 }
 0x9dc   :  { %v13581_v22 = vpop.f32.mrf.mxu2 }
 0x9de   :  { %v13585_v36 = vpop.f32.mrf.mxu1 }
 0x9e4   :  { %v13589_v13 = vpop.f32.mrf.mxu2 }
 0x9e6   :  { %v7007_v35 = vpop.f32.mrf.mxu1 }
 0x9e7   :  { %v7027_v27 = vadd.f32 %v7007_v35, %v6905_v9  ;;  %v6892_v35 = vpop.f32.mrf.mxu0  ;;  %v10727_v9 = vld [vmem:[#allocation10 + $0x1b0] sm:$0xff] }
 0x9e8   :  { %v6908_v44 = vadd.f32 %v6892_v35, %v6786_v62  ;;  %7891 = vmatpush.bf16.msrb.mxu0 %v10727_v9  ;;  %v10734_v62 = vld [vmem:[#allocation10 + $0x1e8] sm:$0xff] }
 0x9ec   :  { %v7129_v55 = vpop.f32.mrf.mxu2 }
 0x9ed   :  { %v7149_v40 = vadd.f32 %v7129_v55, %v7027_v27  ;;  %v6297_v27 = vadd.f32 %v13537_v60, %v13535_v7  ;;  %v7264_v55 = vld [vmem:[#allocation5 + $0x1] ss:$2 sm:$0xff]  ;;  %v10736_v60 = vld [vmem:[#allocation10 + $0x1f8] sm:$0xff] }
 0x9ee   :  { %v7009_v20 = vpop.f32.mrf.mxu1  ;;  %v10726_v7 = vld [vmem:[#allocation10 + $0x1a8] sm:$0xff]  ;;  %7988 = vmatpush.bf16.msra.mxu1 %v10736_v60  ;;  %v10721_v60 = vld [vmem:[#allocation10 + $0x180] sm:$0xff] }
 0x9ef   :  { %v7161_v63 = vadd.f32 %v13597_v28, %v7149_v40  ;;  %v7028_v49 = vadd.f32 %v7009_v20, %v6906_v48  ;;  %v6895_v34 = vpop.f32.mrf.mxu0  ;;  %v6423_v39 = vadd.f32 %v13559_v4, %v6297_v27  ;;  %7892 = vmatpush.bf16.msrb.mxu0 %v10726_v7  ;;  %v6302_v27 = vadd.f32 %v13547_v0, %v13545_v30  ;;  %v10732_v30 = vld [vmem:[#allocation10 + $0x1d8] sm:$0xff]  ;;  %v10673_v7 = vld [vmem:[#allocation10] sm:$0xff] }
 0x9f0   :  { %v10740_v0 = vld [vmem:[#allocation10 + $0x218] sm:$0xff] }
 0x9f1   :  { %vm7169_vm15 = vcmp.ge.f32.partialorder %v7161_v63, 0.0  ;;  %v7177_v18 = vmul.f32 0.01, %v7161_v63  ;;  %v6544_v59 = vadd.f32 %v13575_v15, %v6423_v39  ;;  %v10731_v39 = vld [vmem:[#allocation10 + $0x1d0] sm:$0xff] }
 0x9f2   :  { %7989 = vmatpush.bf16.msra.mxu1 %v10735_v46 }
 0x9f3   :  { %v7185_v51 = vsel %vm7169_vm15, %v7161_v63, %v7177_v18  ;;  %v10744_v18 = vld [vmem:[#allocation10 + $0x238] sm:$0xff]  ;;  %v6666_v4 = vadd.f32 %v13577_v25, %v6544_v59  ;;  %7893 = vmatpush.bf16.msrb.mxu0 %v10725_v43  ;;  %v6424_v25 = vadd.f32 %v13565_v3, %v13541_v42  ;;  %v10733_v42 = vld [vmem:[#allocation10 + $0x1e0] sm:$0xff]  ;;  %v10730_v43 = vld [vmem:[#allocation10 + $0x1c8] sm:$0xff] }
 0x9f4   :  { %7230 = vst [vmem:[#allocation5 + $0x19] sm:$0xf] %v7185_v51  ;;  %v7131_v56 = vpop.f32.mrf.mxu2  ;;  %8086 = vmatpush.bf16.msrb.mxu2 %v10744_v18  ;;  %v10741_v3 = vld [vmem:[#allocation10 + $0x220] sm:$0xff] }
 0x9f5   :  { %v7150_v14 = vadd.f32 %v7131_v56, %v7028_v49  ;;  %v10677_v49 = vld [vmem:[#allocation10 + $0x20] sm:$0xff]  ;;  %v6775_v56 = vpop.f32.mrf.mxu3  ;;  %v6545_v37 = vadd.f32 %v13579_v2, %v6424_v25 }
 0x9f6   :  { %v7012_v10 = vpop.f32.mrf.mxu1  ;;  %7408 = vmatpush.bf16.msra.mxu3 %v10677_v49  ;;  %v6788_v54 = vadd.f32 %v6775_v56, %v6666_v4  ;;  %7990 = vmatpush.bf16.msra.mxu1 %v10734_v62  ;;  %v10738_v56 = vld [vmem:[#allocation10 + $0x208] sm:$0xff]  ;;  %v10719_v4 = vld [vmem:[#allocation10 + $0x170] sm:$0xff] }
 0x9f7   :  { %v7162_v33 = vadd.f32 %v13597_v28, %v7150_v14  ;;  %v7029_v17 = vadd.f32 %v7012_v10, %v6907_v57  ;;  %v6909_v10 = vadd.f32 %v6895_v34, %v6787_v41  ;;  %v6897_v32 = vpop.f32.mrf.mxu0  ;;  %7894 = vmatpush.bf16.msrb.mxu0 %v10724_v12  ;;  %v10739_v41 = vld [vmem:[#allocation10 + $0x210] sm:$0xff] }
 0x9f8   :  { %8087 = vmatpush.bf16.msrb.mxu2 %v10743_v23 }
 0x9f9   :  { %vm7170_vm1 = vcmp.ge.f32.partialorder %v7162_v33, 0.0  ;;  %v7178_v1 = vmul.f32 0.01, %v7162_v33 }
 0x9fa   :  { %7991 = vmatpush.bf16.msra.mxu1 %v10733_v42 }
 0x9fb   :  { %v7186_v52 = vsel %vm7170_vm1, %v7162_v33, %v7178_v1  ;;  %v7522_v16 = vld [vmem:[#allocation5 + $0x18] ss:$2 sm:$0xff]  ;;  %v7620_v1 = vld [vmem:[#allocation5 + $0x19] ss:$2 sm:$0xff] }
 0x9fc   :  { %7231 = vst [vmem:[#allocation5 + $0x31] sm:$0xf] %v7186_v52  ;;  %v7134_v31 = vpop.f32.mrf.mxu2 }
 0x9fd   :  { %v7151_v6 = vadd.f32 %v7134_v31, %v7029_v17  ;;  %v10676_v31 = vld [vmem:[#allocation10 + $0x18] sm:$0xff] }
 0x9fe   :  { %v7014_v24 = vpop.f32.mrf.mxu1  ;;  %7409 = vmatpush.bf16.msra.mxu3 %v10676_v31  ;;  %7992 = vmatpush.bf16.msra.mxu1 %v10732_v30 }
 0x9ff   :  { %v7163_v29 = vadd.f32 %v13597_v28, %v7151_v6  ;;  %v7030_v61 = vadd.f32 %v7014_v24, %v6908_v44  ;;  %v10742_v6 = vld [vmem:[#allocation10 + $0x228] sm:$0xff]  ;;  %v6778_v44 = vpop.f32.mrf.mxu3 }
 0xa00   :  { %8088 = vmatpush.bf16.msrb.mxu2 %v10742_v6  ;;  %v10717_v6 = vld [vmem:[#allocation10 + $0x160] sm:$0xff] }
 0xa01   :  { %vm7171_vm2 = vcmp.ge.f32.partialorder %v7163_v29, 0.0  ;;  %v7179_v8 = vmul.f32 0.01, %v7163_v29 }
 0xa02   :  { %7410 = vmatpush.bf16.msra.mxu3 %v10675_v53  ;;  %7993 = vmatpush.bf16.msra.mxu1 %v10731_v39 }
 0xa03   :  { %v7187_v45 = vsel %vm7171_vm2, %v7163_v29, %v7179_v8  ;;  %v7266_v40 = vld [vmem:[#allocation5 + $0x31] ss:$2 sm:$0xff]  ;;  %v7427_v20 = vld [vmem:[#allocation5 + $0x32] ss:$2 sm:$0xff]  ;;  %v6910_v8 = vadd.f32 %v6897_v32, %v6788_v54 }
 0xa04   :  { %7232 = vst [vmem:[#allocation5 + $0x49] sm:$0xf] %v7187_v45  ;;  %v7136_v26 = vpop.f32.mrf.mxu2  ;;  %v7271_v63 = vpack.c.bf16 %v7266_v40, %v7264_v55  ;;  %v7432_v38 = vpack.c.bf16 %v7427_v20, %v7425_v11  ;;  %v10723_v29 = vld [vmem:[#allocation10 + $0x190] sm:$0xff]  ;;  %v6667_v55 = vadd.f32 %v13581_v22, %v6545_v37  ;;  %v10674_v45 = vld [vmem:[#allocation10 + $0x8] sm:$0xff]  ;;  %8089 = vmatpush.bf16.msrb.mxu2 %v10741_v3  ;;  %v10716_v37 = vld [vmem:[#allocation10 + $0x158] sm:$0xff] }
 0xa05   :  { %v7152_v5 = vadd.f32 %v7136_v26, %v7030_v61  ;;  %7895 = vmatpush.bf16.msrb.mxu0 %v10723_v29  ;;  %v10722_v61 = vld [vmem:[#allocation10 + $0x188] sm:$0xff]  ;;  %v6425_v20 = vadd.f32 %v13571_v19, %v6302_v27  ;;  %v6900_v26 = vpop.f32.mrf.mxu0 }
 0xa06   :  { %v7017_v48 = vpop.f32.mrf.mxu1  ;;  %7346 = vmatmul.bf16.vlgmr.msrb.gmra.mxu3 %v7271_v63  ;;  %7507 = vmatmul.bf16.vlgmr.msra.gmra.mxu0 %v7432_v38  ;;  %v6789_v34 = vadd.f32 %v6778_v44, %v6667_v55  ;;  %v7240_v44 = vld [vmem:[#allocation5 + $0x30] ss:$2 sm:$0xff] }
 0xa07   :  { %v7164_v51 = vadd.f32 %v13597_v28, %v7152_v5  ;;  %v7031_v21 = vadd.f32 %v7017_v48, %v6909_v10  ;;  %v6546_v38 = vadd.f32 %v13585_v36, %v6425_v20  ;;  %7411 = vmatpush.bf16.msra.mxu3 %v10674_v45  ;;  %v10720_v48 = vld [vmem:[#allocation10 + $0x178] sm:$0xff]  ;;  %v6780_v36 = vpop.f32.mrf.mxu3  ;;  %7994 = vmatpush.bf16.msra.mxu1 %v10730_v43 }
 0xa08   :  { %8090 = vmatpush.bf16.msrb.mxu2 %v10740_v0  ;;  %v6911_v18 = vadd.f32 %v6900_v26, %v6789_v34  ;;  %v7914_v20 = vld [vmem:[#allocation5 + $0x31] ss:$2 sm:$0xff]  ;;  %v8012_v34 = vld [vmem:[#allocation5 + $0x32] ss:$2 sm:$0xff] }
 0xa09   :  { %vm7172_vm5 = vcmp.ge.f32.partialorder %v7164_v51, 0.0  ;;  %v7180_v14 = vmul.f32 0.01, %v7164_v51  ;;  %7896 = vmatpush.bf16.msrb.mxu0 %v10722_v61  ;;  %v6668_v5 = vadd.f32 %v13589_v13, %v6546_v38 }
 0xa0b   :  { %v7188_v33 = vsel %vm7172_vm5, %v7164_v51, %v7180_v14  ;;  %v7524_v15 = vld [vmem:[#allocation5 + $0x48] ss:$2 sm:$0xff]  ;;  %v7622_v57 = vld [vmem:[#allocation5 + $0x49] ss:$2 sm:$0xff]  ;;  %7412 = vmatpush.bf16.msra.mxu3 %v10673_v7  ;;  %v6790_v46 = vadd.f32 %v6780_v36, %v6668_v5 }
 0xa0c   :  { %7233 = vst [vmem:[#allocation5 + $0x61] sm:$0xf] %v7188_v33  ;;  %v7139_v52 = vpop.f32.mrf.mxu2  ;;  %v7529_v17 = vpack.c.bf16 %v7524_v15, %v7522_v16  ;;  %v7627_v35 = vpack.c.bf16 %v7622_v57, %v7620_v1  ;;  %8091 = vmatpush.bf16.msrb.mxu2 %v10739_v41  ;;  %v7268_v16 = vld [vmem:[#allocation5 + $0x91] ss:$2 sm:$0xff]  ;;  %v10729_v33 = vld [vmem:[#allocation10 + $0x1c0] sm:$0xff] }
 0xa0d   :  { %v7153_v50 = vadd.f32 %v7139_v52, %v7031_v21  ;;  %7897 = vmatpush.bf16.msrb.mxu0 %v10721_v60  ;;  %v6902_v14 = vpop.f32.mrf.mxu0  ;;  %v10737_v21 = vld [vmem:[#allocation10 + $0x200] sm:$0xff]  ;;  %v10718_v52 = vld [vmem:[#allocation10 + $0x168] sm:$0xff]  ;;  %7995 = vmatpush.bf16.msra.mxu1 %v10729_v33 }
 0xa0e   :  { %v7019_v24 = vpop.f32.mrf.mxu1  ;;  %7604 = vmatmul.bf16.vlgmr.msrb.gmra.mxu1 %v7529_v17  ;;  %7702 = vmatmul.bf16.vlgmr.msra.gmra.mxu2 %v7627_v35  ;;  %v6912_v1 = vadd.f32 %v6902_v14, %v6790_v46  ;;  %v7429_v57 = vld [vmem:[#allocation5 + $0x92] ss:$2 sm:$0xff] }
 0xa0f   :  { %v7165_v9 = vadd.f32 %v13597_v28, %v7153_v50  ;;  %v7032_v11 = vadd.f32 %v7019_v24, %v6910_v8  ;;  %7792 = vmatpush.bf16.msrb.mxu3 %v10720_v48  ;;  %v7238_v8 = vld [vmem:[#allocation5] ss:$2 sm:$0xff] }
 0xa10   :  { %8092 = vmatpush.bf16.msrb.mxu2 %v10738_v56  ;;  %v7245_v45 = vpack.c.bf16 %v7240_v44, %v7238_v8  ;;  %v7718_v36 = vld [vmem:[#allocation5 + $0x1a] ss:$2 sm:$0xff] }
 0xa11   :  { %vm7173_vm6 = vcmp.ge.f32.partialorder %v7165_v9, 0.0  ;;  %v7181_v47 = vmul.f32 0.01, %v7165_v9  ;;  %v10359_v8 = vld [vmem:[#allocation12 + $0x60] sm:$0xf] }
 0xa12   :  { %v10758_v44 = vld [vmem:[#allocation12 + $0x64] sm:$0xf0] }
 0xa13   :  { %v7189_v2 = vsel %vm7173_vm6, %v7165_v9, %v7181_v47  ;;  %7793 = vmatpush.bf16.msrb.mxu3 %v10719_v4  ;;  %v10715_v47 = vld [vmem:[#allocation10 + $0x150] sm:$0xff]  ;;  %v7916_v30 = vld [vmem:[#allocation5 + $0x61] ss:$2 sm:$0xff] }
 0xa14   :  { %7234 = vst [vmem:[#allocation5 + $0xa9] sm:$0xf] %v7189_v2  ;;  %v7141_v40 = vpop.f32.mrf.mxu2  ;;  %8093 = vmatpush.bf16.msrb.mxu2 %v10737_v21  ;;  %v7818_v2 = vld [vmem:[#allocation5 + $0x60] ss:$2 sm:$0xff] }
 0xa15   :  { %v7154_v22 = vadd.f32 %v7141_v40, %v7032_v11  ;;  %v7816_v11 = vld [vmem:[#allocation5 + $0x30] ss:$2 sm:$0xff]  ;;  %v10713_v40 = vld [vmem:[#allocation10 + $0x140] sm:$0xff] }
 0xa16   :  { %v7022_v63 = vpop.f32.mrf.mxu1  ;;  %v7823_v61 = vpack.c.bf16 %v7818_v2, %v7816_v11  ;;  %v8014_v0 = vld [vmem:[#allocation5 + $0x62] ss:$2 sm:$0xff] }
 0xa17   :  { %v7166_v58 = vadd.f32 %v13597_v28, %v7154_v22  ;;  %v7033_v51 = vadd.f32 %v7022_v63, %v6911_v18  ;;  %7794 = vmatpush.bf16.msrb.mxu3 %v10718_v52  ;;  %v7921_v22 = vpack.c.bf16 %v7916_v30, %v7914_v20  ;;  %v8019_v26 = vpack.c.bf16 %v8014_v0, %v8012_v34  ;;  %v7242_v63 = vld [vmem:[#allocation5 + $0x90] ss:$2 sm:$0xff]  ;;  %v10757_v11 = vld [vmem:[#allocation12 + $0x64] sm:$0xf] }
 0xa18   :  { %v10287_v30 = vld [vmem:[#allocation12 + $0xd0] sm:$0xf]  ;;  %v10772_v0 = vld [vmem:[#allocation12 + $0xd4] sm:$0xf0]  ;;  %v10771_v20 = vld [vmem:[#allocation12 + $0xd4] sm:$0xf] }
 0xa19   :  { %vm7174_vm7 = vcmp.ge.f32.partialorder %v7166_v58, 0.0  ;;  %v7182_v19 = vmul.f32 0.01, %v7166_v58  ;;  %v10288_v34 = vor.u32 %v10772_v0, %v10287_v30  ;;  %v10750_v30 = vld [vmem:[#allocation12 + $0x24] sm:$0xf0] }
 0xa1b   :  { %v7190_v59 = vsel %vm7174_vm7, %v7166_v58, %v7182_v19  ;;  %7795 = vmatpush.bf16.msrb.mxu3 %v10717_v6  ;;  %v7526_v9 = vld [vmem:[#allocation5 + $0xa8] ss:$2 sm:$0xff]  ;;  %v7624_v27 = vld [vmem:[#allocation5 + $0xa9] ss:$2 sm:$0xff] }
 0xa1c   :  { %7235 = vst [vmem:[#allocation5 + $0xc1] sm:$0xf] %v7190_v59  ;;  %v7144_v49 = vpop.f32.mrf.mxu2  ;;  %v7722_v56 = vld [vmem:[#allocation5 + $0xaa] ss:$2 sm:$0xff] }
 0xa1d   :  { %v7155_v23 = vadd.f32 %v7144_v49, %v7033_v51  ;;  %v7720_v51 = vld [vmem:[#allocation5 + $0x4a] ss:$2 sm:$0xff] }
 0xa1e   :  { %v7024_v10 = vpop.f32.mrf.mxu1  ;;  %v7725_v49 = vpack.c.bf16 %v7720_v51, %v7718_v36  ;;  %v10281_v36 = vld [vmem:[#allocation12 + $0xc8] sm:$0xf0] }
 0xa1f   :  { %v7167_v13 = vadd.f32 %v13597_v28, %v7155_v23  ;;  %v7034_v35 = vadd.f32 %v7024_v10, %v6912_v1  ;;  %7796 = vmatpush.bf16.msrb.mxu3 %v10716_v37  ;;  %v10759_v37 = vld [vmem:[#allocation12 + $0x74] sm:$0xf] }
 0xa21   :  { %vm7175_vm8 = vcmp.ge.f32.partialorder %v7167_v13, 0.0  ;;  %v7183_v15 = vmul.f32 0.01, %v7167_v13 }
 0xa23   :  { %v7191_v17 = vsel %vm7175_vm8, %v7167_v13, %v7183_v15  ;;  %v7270_v31 = vld [vmem:[#allocation5 + $0xc1] ss:$2 sm:$0xff]  ;;  %v7431_v12 = vld [vmem:[#allocation5 + $0xc2] ss:$2 sm:$0xff]  ;;  %7797 = vmatpush.bf16.msrb.mxu3 %v10715_v47 }
 0xa24   :  { %7236 = vst [vmem:[#allocation5 + $0xd9] sm:$0xf] %v7191_v17  ;;  %v7146_v25 = vpop.f32.mrf.mxu2  ;;  %v7272_v54 = vpack.c.bf16 %v7270_v31, %v7268_v16  ;;  %v7433_v50 = vpack.c.bf16 %v7431_v12, %v7429_v57  ;;  %v7244_v38 = vld [vmem:[#allocation5 + $0xc0] ss:$2 sm:$0xff]  ;;  %v7918_v19 = vld [vmem:[#allocation5 + $0xc1] ss:$2 sm:$0xff] }
 0xa25   :  { %v7156_v62 = vadd.f32 %v7146_v25, %v7034_v35  ;;  %v7820_v7 = vld [vmem:[#allocation5 + $0xc0] ss:$2 sm:$0xff]  ;;  %v7246_v60 = vpack.c.bf16 %v7244_v38, %v7242_v63  ;;  %v10303_v35 = vld [vmem:[#allocation12 + $0xf0] sm:$0xf]  ;;  %v10776_v31 = vld [vmem:[#allocation12 + $0xf4] sm:$0xf0] }
 0xa26   :  { %7351 = vmatmul.bf16.gmra.mxu3 %v7272_v54  ;;  %7512 = vmatmul.bf16.gmra.mxu0 %v7433_v50  ;;  %v8016_v18 = vld [vmem:[#allocation5 + $0xc2] ss:$2 sm:$0xff]  ;;  %v10775_v12 = vld [vmem:[#allocation12 + $0xf4] sm:$0xf]  ;;  %v10304_v25 = vor.u32 %v10776_v31, %v10303_v35  ;;  %v10305_v54 = vld [vmem:[#allocation12 + $0xf8] sm:$0xf0] }
 0xa27   :  { %v7168_v32 = vadd.f32 %v13597_v28, %v7156_v62  ;;  %v10714_v28 = vld [vmem:[#allocation10 + $0x148] sm:$0xff]  ;;  %v10367_v50 = vld [vmem:[#allocation12 + $0x70] sm:$0xf]  ;;  %v10760_v62 = vld [vmem:[#allocation12 + $0x74] sm:$0xf0] }
 0xa28   :  { %7798 = vmatpush.bf16.msrb.mxu3 %v10714_v28  ;;  %v10297_v47 = vld [vmem:[#allocation12 + $0xe8] sm:$0xf0]  ;;  %v10360_v28 = vor.u32 %v10758_v44, %v10359_v8  ;;  %v10756_v63 = vld [vmem:[#allocation12 + $0x54] sm:$0xf0]  ;;  %v10753_v31 = vld [vmem:[#allocation12 + $0x44] sm:$0xf] }
 0xa29   :  { %vm7176_vm9 = vcmp.ge.f32.partialorder %v7168_v32, 0.0  ;;  %v7184_v24 = vmul.f32 0.01, %v7168_v32  ;;  %v10263_v44 = vld [vmem:[#allocation12 + $0xa0] sm:$0xf] }
 0xa2b   :  { %v7192_v53 = vsel %vm7176_vm9, %v7168_v32, %v7184_v24  ;;  %v7528_v29 = vld [vmem:[#allocation5 + $0xd8] ss:$2 sm:$0xff]  ;;  %v7626_v42 = vld [vmem:[#allocation5 + $0xd9] ss:$2 sm:$0xff]  ;;  %v10308_v32 = vor.u32 %v10775_v12, %v10305_v54  ;;  %v10368_v24 = vor.u32 %v10760_v62, %v10367_v50  ;;  %v10271_v54 = vld [vmem:[#allocation12 + $0xb0] sm:$0xf] }
 0xa2c   :  { %7237 = vst [vmem:[#allocation5 + $0xf1] sm:$0xf] %v7192_v53  ;;  %v7530_v3 = vpack.c.bf16 %v7528_v29, %v7526_v9  ;;  %v7628_v55 = vpack.c.bf16 %v7626_v42, %v7624_v27  ;;  %7799 = vmatpush.bf16.msrb.mxu3 %v10713_v40  ;;  %v7724_v43 = vld [vmem:[#allocation5 + $0xda] ss:$2 sm:$0xff]  ;;  %v10767_v62 = vld [vmem:[#allocation12 + $0xb4] sm:$0xf] }
 0xa2d   :  { %v7726_v46 = vpack.c.bf16 %v7724_v43, %v7722_v56  ;;  %v10369_v9 = vld [vmem:[#allocation12 + $0x78] sm:$0xf0]  ;;  %8276 = vmatpush.bf16.msra.mxu0 %v10308_v32  ;;  %8377 = vmatpush.bf16.msrb.mxu1 %v10368_v24  ;;  %v10295_v27 = vld [vmem:[#allocation12 + $0xe0] sm:$0xf]  ;;  %v10774_v42 = vld [vmem:[#allocation12 + $0xe4] sm:$0xf0] }
 0xa2e   :  { %7609 = vmatmul.bf16.gmra.mxu1 %v7530_v3  ;;  %7707 = vmatmul.bf16.gmra.mxu2 %v7628_v55  ;;  %v10372_v53 = vor.u32 %v10759_v37, %v10369_v9  ;;  %v10773_v3 = vld [vmem:[#allocation12 + $0xe4] sm:$0xf]  ;;  %v10296_v55 = vor.u32 %v10774_v42, %v10295_v27  ;;  %v10754_v43 = vld [vmem:[#allocation12 + $0x44] sm:$0xf0]  ;;  %v10768_v50 = vld [vmem:[#allocation12 + $0xb4] sm:$0xf0] }
 0xa2f   :  { %v10300_v2 = vor.u32 %v10773_v3, %v10297_v47  ;;  %v10272_v32 = vor.u32 %v10768_v50, %v10271_v54  ;;  %v10273_v24 = vld [vmem:[#allocation12 + $0xb8] sm:$0xf0]  ;;  %v10335_v37 = vld [vmem:[#allocation12 + $0x30] sm:$0xf]  ;;  %v10752_v9 = vld [vmem:[#allocation12 + $0x34] sm:$0xf0] }
 0xa30   :  { %8390 = vmatpush.bf16.msra.mxu2 %v10372_v53  ;;  %v10276_v53 = vor.u32 %v10767_v62, %v10273_v24  ;;  %v10336_v27 = vor.u32 %v10752_v9, %v10335_v37  ;;  %v10751_v42 = vld [vmem:[#allocation12 + $0x34] sm:$0xf]  ;;  %v10337_v3 = vld [vmem:[#allocation12 + $0x38] sm:$0xf0]  ;;  %v10249_v50 = vld [vmem:[#allocation12 + $0x88] sm:$0xf0] }
 0xa31   :  { %8277 = vmatpush.bf16.msra.mxu0 %v10300_v2  ;;  %8378 = vmatpush.bf16.msrb.mxu1 %v10360_v28  ;;  %v10340_v47 = vor.u32 %v10751_v42, %v10337_v3  ;;  %v10766_v2 = vld [vmem:[#allocation12 + $0xa4] sm:$0xf0]  ;;  %v10765_v28 = vld [vmem:[#allocation12 + $0xa4] sm:$0xf]  ;;  %v10311_v62 = vld [vmem:[#allocation12] sm:$0xf] }
 0xa33   :  { %v7822_v58 = vld [vmem:[#allocation5 + $0xf0] ss:$2 sm:$0xff]  ;;  %v7920_v41 = vld [vmem:[#allocation5 + $0xf1] ss:$2 sm:$0xff] }
 0xa34   :  { %v7824_v39 = vpack.c.bf16 %v7822_v58, %v7820_v7  ;;  %v8018_v5 = vld [vmem:[#allocation5 + $0xf2] ss:$2 sm:$0xff]  ;;  %v7922_v48 = vpack.c.bf16 %v7920_v41, %v7918_v19 }
 0xa35   :  { %v8020_v59 = vpack.c.bf16 %v8018_v5, %v8016_v18  ;;  %v10279_v18 = vld [vmem:[#allocation12 + $0xc0] sm:$0xf] }
 0xa36   :  { %7413 = vmatmul.bf16.vlgmr.msra.gmra.mxu3 %v7245_v45  ;;  %7898 = vmatmul.bf16.vlgmr.msrb.gmra.mxu0 %v7823_v61  ;;  %v10361_v45 = vld [vmem:[#allocation12 + $0x68] sm:$0xf0] }
 0xa37   :  { %8263 = vmatpush.bf16.msra.mxu3 %v10304_v25  ;;  %v10364_v61 = vor.u32 %v10757_v11, %v10361_v45  ;;  %v10264_v11 = vor.u32 %v10766_v2, %v10263_v44  ;;  %v10265_v45 = vld [vmem:[#allocation12 + $0xa8] sm:$0xf0] }
 0xa39   :  { %8391 = vmatpush.bf16.msra.mxu2 %v10364_v61  ;;  %v10327_v61 = vld [vmem:[#allocation12 + $0x20] sm:$0xf] }
 0xa3b   :  { %8264 = vmatpush.bf16.msra.mxu3 %v10296_v55 }
 0xa3e   :  { %7996 = vmatmul.bf16.vlgmr.msra.gmra.mxu1 %v7921_v22  ;;  %8094 = vmatmul.bf16.vlgmr.msrb.gmra.mxu2 %v8019_v26  ;;  %v10289_v22 = vld [vmem:[#allocation12 + $0xd8] sm:$0xf0]  ;;  %v10351_v26 = vld [vmem:[#allocation12 + $0x50] sm:$0xf] }
 0xa3f   :  { %v10292_v58 = vor.u32 %v10771_v20, %v10289_v22  ;;  %v10352_v7 = vor.u32 %v10756_v63, %v10351_v26  ;;  %8265 = vmatpush.bf16.msra.mxu3 %v10288_v34  ;;  %v10268_v20 = vor.u32 %v10765_v28, %v10265_v45  ;;  %v10328_v34 = vor.u32 %v10750_v30, %v10327_v61  ;;  %v10749_v22 = vld [vmem:[#allocation12 + $0x24] sm:$0xf]  ;;  %v10808_v45 = vld [vmem:[#allocation12 + $0x1f4] sm:$0xf0]  ;;  %v10807_v61 = vld [vmem:[#allocation12 + $0x1f4] sm:$0xf] }
 0xa41   :  { %8278 = vmatpush.bf16.msra.mxu0 %v10292_v58  ;;  %8379 = vmatpush.bf16.msrb.mxu1 %v10352_v7  ;;  %v10255_v7 = vld [vmem:[#allocation12 + $0x90] sm:$0xf] }
 0xa46   :  { %7418 = vmatmul.bf16.gmra.mxu3 %v7246_v60  ;;  %7903 = vmatmul.bf16.gmra.mxu0 %v7824_v39  ;;  %v10755_v60 = vld [vmem:[#allocation12 + $0x54] sm:$0xf]  ;;  %v10353_v39 = vld [vmem:[#allocation12 + $0x58] sm:$0xf0] }
 0xa47   :  { %v10356_v5 = vor.u32 %v10755_v60, %v10353_v39  ;;  %v10764_v60 = vld [vmem:[#allocation12 + $0x94] sm:$0xf0]  ;;  %v10763_v39 = vld [vmem:[#allocation12 + $0x94] sm:$0xf] }
 0xa49   :  { %8392 = vmatpush.bf16.msra.mxu2 %v10356_v5 }
 0xa4e   :  { %8001 = vmatmul.bf16.gmra.mxu1 %v7922_v48  ;;  %8099 = vmatmul.bf16.gmra.mxu2 %v8020_v59  ;;  %v10770_v48 = vld [vmem:[#allocation12 + $0xc4] sm:$0xf0]  ;;  %v10769_v59 = vld [vmem:[#allocation12 + $0xc4] sm:$0xf] }
 0xa4f   :  { %v10280_v51 = vor.u32 %v10770_v48, %v10279_v18  ;;  %v10256_v18 = vor.u32 %v10764_v60, %v10255_v7  ;;  %v10257_v48 = vld [vmem:[#allocation12 + $0x98] sm:$0xf0]  ;;  %v10425_v7 = vld [vmem:[#allocation12 + $0x168] sm:$0xf0]  ;;  %v10487_v60 = vld [vmem:[#allocation12 + $0x1e0] sm:$0xf] }
 0xa51   :  { %8266 = vmatpush.bf16.msra.mxu3 %v10280_v51  ;;  %v10260_v51 = vor.u32 %v10763_v39, %v10257_v48  ;;  %v10805_v48 = vld [vmem:[#allocation12 + $0x1e4] sm:$0xf] }
 0xa55   :  { %8267 = vmatpush.bf16.msra.mxu3 %v10272_v32  ;;  %v10746_v32 = vld [vmem:[#allocation12 + $0x4] sm:$0xf0] }
 0xa56   :  { %7800 = vmatmul.bf16.vlgmr.msrb.gmra.mxu3 %v7725_v49  ;;  %v10343_v49 = vld [vmem:[#allocation12 + $0x40] sm:$0xf]  ;;  %v10312_v9 = vor.u32 %v10746_v32, %v10311_v62 }
 0xa57   :  { %v10344_v35 = vor.u32 %v10754_v43, %v10343_v49  ;;  %v10321_v49 = vld [vmem:[#allocation12 + $0x18] sm:$0xf0]  ;;  %v10407_v62 = vld [vmem:[#allocation12 + $0x140] sm:$0xf] }
 0xa59   :  { %8380 = vmatpush.bf16.msrb.mxu1 %v10344_v35  ;;  %8268 = vmatpush.bf16.msra.mxu3 %v10264_v11  ;;  %v10495_v11 = vld [vmem:[#allocation12 + $0x1f0] sm:$0xf] }
 0xa5d   :  { %8381 = vmatpush.bf16.msrb.mxu1 %v10336_v27  ;;  %8269 = vmatpush.bf16.msra.mxu3 %v10256_v18  ;;  %v10431_v27 = vld [vmem:[#allocation12 + $0x170] sm:$0xf] }
 0xa61   :  { %8382 = vmatpush.bf16.msrb.mxu1 %v10328_v34  ;;  %v10497_v34 = vld [vmem:[#allocation12 + $0x1f8] sm:$0xf0] }
 0xa66   :  { %7805 = vmatmul.bf16.gmra.mxu3 %v7726_v46  ;;  %v10284_v46 = vor.u32 %v10769_v59, %v10281_v36  ;;  %v10319_v59 = vld [vmem:[#allocation12 + $0x10] sm:$0xf]  ;;  %v10747_v36 = vld [vmem:[#allocation12 + $0x14] sm:$0xf] }
 0xa68   :  { %8279 = vmatpush.bf16.msra.mxu0 %v10284_v46  ;;  %v13681_v46 = vld [vmem:[%s13767_s8] ss:$0 sm:$0xff] }
 0xa6c   :  { %8280 = vmatpush.bf16.msra.mxu0 %v10276_v53  ;;  %v10745_v53 = vld [vmem:[#allocation12 + $0x4] sm:$0xf] }
 0xa70   :  { %8281 = vmatpush.bf16.msra.mxu0 %v10268_v20 }
 0xa74   :  { %8282 = vmatpush.bf16.msra.mxu0 %v10260_v51 }
 0xa83   :  { %v13638_v14 = vpop.f32.mrf.mxu0 }
 0xa89   :  { %v7347_v23 = vpop.f32.mrf.mxu3 }
 0xa8b   :  { %v13640_v10 = vpop.f32.mrf.mxu1  ;;  %v13646_v21 = vpop.f32.mrf.mxu0 }
 0xa91   :  { %v13634_v4 = vpop.f32.mrf.mxu3  ;;  %v13644_v33 = vpop.f32.mrf.mxu2 }
 0xa93   :  { %v13648_v1 = vpop.f32.mrf.mxu1 }
 0xa99   :  { %v13650_v57 = vpop.f32.mrf.mxu2 }
 0xaa3   :  { %v13652_v52 = vpop.f32.mrf.mxu0 }
 0xaa9   :  { %v13636_v13 = vpop.f32.mrf.mxu3 }
 0xaab   :  { %v13656_v6 = vpop.f32.mrf.mxu1  ;;  %v13662_v38 = vpop.f32.mrf.mxu0 }
 0xab1   :  { %v13642_v16 = vpop.f32.mrf.mxu3  ;;  %v13658_v29 = vpop.f32.mrf.mxu2 }
 0xab3   :  { %v13664_v19 = vpop.f32.mrf.mxu1  ;;  %v7899_v8 = vpop.f32.mrf.mxu0 }
 0xab9   :  { %v7414_v15 = vpop.f32.mrf.mxu3  ;;  %v13666_v56 = vpop.f32.mrf.mxu2 }
 0xaba   :  { %v7415_v41 = vadd.f32 %v7414_v15, %v7347_v23  ;;  %v10345_v23 = vld [vmem:[#allocation12 + $0x48] sm:$0xf0] }
 0xabb   :  { %v10348_v12 = vor.u32 %v10753_v31, %v10345_v23  ;;  %v7997_v0 = vpop.f32.mrf.mxu1  ;;  %v10762_v31 = vld [vmem:[#allocation12 + $0x84] sm:$0xf0]  ;;  %v10761_v23 = vld [vmem:[#allocation12 + $0x84] sm:$0xf]  ;;  %v7901_v24 = vpop.f32.mrf.mxu0 }
 0xabc   :  { %v7518_v15 = vadd.f32 %v13638_v14, %v7415_v41  ;;  %v10252_v37 = vor.u32 %v10761_v23, %v10249_v50  ;;  %v10481_v50 = vld [vmem:[#allocation12 + $0x1d8] sm:$0xf0] }
 0xabd   :  { %8393 = vmatpush.bf16.msra.mxu2 %v10348_v12 }
 0xabe   :  { %v7615_v55 = vadd.f32 %v13640_v10, %v7518_v15  ;;  %8283 = vmatpush.bf16.msra.mxu0 %v10252_v37 }
 0xac1   :  { %v13654_v17 = vpop.f32.mrf.mxu3  ;;  %8394 = vmatpush.bf16.msra.mxu2 %v10340_v47  ;;  %v8095_v63 = vpop.f32.mrf.mxu2  ;;  %v10791_v47 = vld [vmem:[#allocation12 + $0x174] sm:$0xf] }
 0xac2   :  { %v7417_v14 = vadd.f32 %v13654_v17, %v13634_v4  ;;  %v10329_v4 = vld [vmem:[#allocation12 + $0x28] sm:$0xf0]  ;;  %v7713_v17 = vadd.f32 %v13644_v33, %v7615_v55  ;;  %v10792_v55 = vld [vmem:[#allocation12 + $0x174] sm:$0xf0] }
 0xac3   :  { %v10332_v26 = vor.u32 %v10749_v22, %v10329_v4  ;;  %v10432_v2 = vor.u32 %v10792_v55, %v10431_v27  ;;  %v10423_v22 = vld [vmem:[#allocation12 + $0x160] sm:$0xf]  ;;  %v10790_v4 = vld [vmem:[#allocation12 + $0x164] sm:$0xf0]  ;;  %v7904_v32 = vpop.f32.mrf.mxu0 }
 0xac4   :  { %v7519_v10 = vadd.f32 %v13646_v21, %v7417_v14  ;;  %v10748_v21 = vld [vmem:[#allocation12 + $0x14] sm:$0xf0] }
 0xac5   :  { %8395 = vmatpush.bf16.msra.mxu2 %v10332_v26  ;;  %v10320_v33 = vor.u32 %v10748_v21, %v10319_v59  ;;  %v10500_v26 = vor.u32 %v10807_v61, %v10497_v34  ;;  %v10489_v59 = vld [vmem:[#allocation12 + $0x1e8] sm:$0xf0]  ;;  %v10415_v21 = vld [vmem:[#allocation12 + $0x150] sm:$0xf]  ;;  %v10783_v61 = vld [vmem:[#allocation12 + $0x134] sm:$0xf] }
 0xac6   :  { %v7616_v35 = vadd.f32 %v13648_v1, %v7519_v10  ;;  %v10313_v1 = vld [vmem:[#allocation12 + $0x8] sm:$0xf0]  ;;  %v10800_v34 = vld [vmem:[#allocation12 + $0x1b4] sm:$0xf0] }
 0xac7   :  { %8383 = vmatpush.bf16.msrb.mxu1 %v10320_v33  ;;  %v10316_v14 = vor.u32 %v10745_v53, %v10313_v1  ;;  %v10788_v33 = vld [vmem:[#allocation12 + $0x154] sm:$0xf0]  ;;  %v10409_v53 = vld [vmem:[#allocation12 + $0x148] sm:$0xf0] }
 0xac8   :  { %v7714_v3 = vadd.f32 %v13650_v57, %v7616_v35  ;;  %v10496_v57 = vor.u32 %v10808_v45, %v10495_v11  ;;  %v10416_v35 = vor.u32 %v10788_v33, %v10415_v21 }
 0xac9   :  { %v13660_v40 = vpop.f32.mrf.mxu3  ;;  %v8097_v10 = vpop.f32.mrf.mxu2 }
 0xaca   :  { %v7420_v41 = vadd.f32 %v13660_v40, %v13636_v13  ;;  %v10324_v13 = vor.u32 %v10747_v36, %v10321_v49  ;;  %v10247_v40 = vld [vmem:[#allocation12 + $0x80] sm:$0xf]  ;;  %v10787_v36 = vld [vmem:[#allocation12 + $0x154] sm:$0xf]  ;;  %v10417_v49 = vld [vmem:[#allocation12 + $0x158] sm:$0xf0] }
 0xacb   :  { %v10248_v54 = vor.u32 %v10762_v31, %v10247_v40  ;;  %8384 = vmatpush.bf16.msrb.mxu1 %v10312_v9  ;;  %v10479_v40 = vld [vmem:[#allocation12 + $0x1d0] sm:$0xf]  ;;  %v10804_v31 = vld [vmem:[#allocation12 + $0x1d4] sm:$0xf0]  ;;  %v10785_v9 = vld [vmem:[#allocation12 + $0x144] sm:$0xf]  ;;  %v7906_v33 = vpop.f32.mrf.mxu0 }
 0xacc   :  { %v7520_v15 = vadd.f32 %v13652_v52, %v7420_v41  ;;  %8396 = vmatpush.bf16.msra.mxu2 %v10324_v13  ;;  %v10433_v52 = vld [vmem:[#allocation12 + $0x178] sm:$0xf0]  ;;  %v10420_v13 = vor.u32 %v10787_v36, %v10417_v49  ;;  %v10383_v49 = vld [vmem:[#allocation12 + $0x110] sm:$0xf] }
 0xacd   :  { %8270 = vmatpush.bf16.msra.mxu3 %v10248_v54  ;;  %v10436_v28 = vor.u32 %v10791_v47, %v10433_v52  ;;  %v10803_v54 = vld [vmem:[#allocation12 + $0x1d4] sm:$0xf]  ;;  %v10412_v52 = vor.u32 %v10785_v9, %v10409_v53 }
 0xace   :  { %v7617_v20 = vadd.f32 %v13656_v6, %v7520_v15  ;;  %v10484_v37 = vor.u32 %v10803_v54, %v10481_v50  ;;  %v10447_v54 = vld [vmem:[#allocation12 + $0x190] sm:$0xf]  ;;  %v10796_v50 = vld [vmem:[#allocation12 + $0x194] sm:$0xf0] }
 0xacf   :  { %8526 = vmatpush.bf16.msrb.mxu0 %v10436_v28  ;;  %8650 = vmatpush.bf16.msra.mxu1 %v10496_v57  ;;  %v10463_v57 = vld [vmem:[#allocation12 + $0x1b0] sm:$0xf] }
 0xad0   :  { %8397 = vmatpush.bf16.msra.mxu2 %v10316_v14  ;;  %v7715_v15 = vadd.f32 %v13658_v29, %v7617_v20  ;;  %v10801_v14 = vld [vmem:[#allocation12 + $0x1c4] sm:$0xf]  ;;  %v10401_v20 = vld [vmem:[#allocation12 + $0x138] sm:$0xf0] }
 0xad1   :  { %v13669_v25 = vpop.f32.mrf.mxu3  ;;  %8513 = vmatpush.bf16.msrb.mxu3 %v10432_v2  ;;  %v10784_v2 = vld [vmem:[#allocation12 + $0x134] sm:$0xf0] }
 0xad4   :  { %8663 = vmatpush.bf16.msrb.mxu2 %v10500_v26  ;;  %v10465_v26 = vld [vmem:[#allocation12 + $0x1b8] sm:$0xf0] }
 0xad9   :  { %v7801_v58 = vpop.f32.mrf.mxu3 }
 0xada   :  { %v7811_v5 = vadd.f32 %v7801_v58, %v7713_v17  ;;  %v7422_v17 = vadd.f32 %v13669_v25, %v13642_v16  ;;  %v10789_v58 = vld [vmem:[#allocation12 + $0x164] sm:$0xf]  ;;  %v10492_v25 = vor.u32 %v10805_v48, %v10489_v59  ;;  %v10455_v48 = vld [vmem:[#allocation12 + $0x1a0] sm:$0xf]  ;;  %v10798_v59 = vld [vmem:[#allocation12 + $0x1a4] sm:$0xf0] }
 0xadb   :  { %v10428_v6 = vor.u32 %v10789_v58, %v10425_v7 }
 0xadc   :  { %v7909_v43 = vadd.f32 %v7899_v8, %v7811_v5  ;;  %v7999_v8 = vpop.f32.mrf.mxu1  ;;  %v10806_v5 = vld [vmem:[#allocation12 + $0x1e4] sm:$0xf0]  ;;  %8664 = vmatpush.bf16.msrb.mxu2 %v10492_v25  ;;  %v10457_v25 = vld [vmem:[#allocation12 + $0x1a8] sm:$0xf0] }
 0xadd   :  { %v10488_v18 = vor.u32 %v10806_v5, %v10487_v60  ;;  %8527 = vmatpush.bf16.msrb.mxu0 %v10428_v6  ;;  %v10464_v60 = vor.u32 %v10800_v34, %v10463_v57  ;;  %v10393_v6 = vld [vmem:[#allocation12 + $0x128] sm:$0xf0] }
 0xade   :  { %v8007_v12 = vadd.f32 %v7997_v0, %v7909_v43  ;;  %v7521_v43 = vadd.f32 %v13662_v38, %v7422_v17  ;;  %v10786_v38 = vld [vmem:[#allocation12 + $0x144] sm:$0xf0]  ;;  %v10404_v17 = vor.u32 %v10783_v61, %v10401_v20 }
 0xadf   :  { %8651 = vmatpush.bf16.msra.mxu1 %v10488_v18  ;;  %v10408_v47 = vor.u32 %v10786_v38, %v10407_v62 }
 0xae0   :  { %v8105_v42 = vadd.f32 %v8095_v63, %v8007_v12  ;;  %v10424_v63 = vor.u32 %v10790_v4, %v10423_v22  ;;  %v10480_v12 = vor.u32 %v10804_v31, %v10479_v40  ;;  %v7618_v29 = vadd.f32 %v13664_v19, %v7521_v43  ;;  %8665 = vmatpush.bf16.msrb.mxu2 %v10484_v37  ;;  %v10799_v4 = vld [vmem:[#allocation12 + $0x1b4] sm:$0xf]  ;;  %v10780_v43 = vld [vmem:[#allocation12 + $0x114] sm:$0xf0]  ;;  %v10449_v37 = vld [vmem:[#allocation12 + $0x198] sm:$0xf0] }
 0xae1   :  { %v7803_v44 = vpop.f32.mrf.mxu3  ;;  %8528 = vmatpush.bf16.msrb.mxu0 %v10420_v13  ;;  %v10468_v18 = vor.u32 %v10799_v4, %v10465_v26  ;;  %v10456_v31 = vor.u32 %v10798_v59, %v10455_v48  ;;  %v10384_v9 = vor.u32 %v10780_v43, %v10383_v49 }
 0xae2   :  { %v8113_v30 = vadd.f32 %v13681_v46, %v8105_v42  ;;  %v7812_v0 = vadd.f32 %v7803_v44, %v7714_v3  ;;  %8514 = vmatpush.bf16.msrb.mxu3 %v10424_v63  ;;  %v10471_v42 = vld [vmem:[#allocation12 + $0x1c0] sm:$0xf]  ;;  %v10802_v3 = vld [vmem:[#allocation12 + $0x1c4] sm:$0xf0]  ;;  %v10399_v44 = vld [vmem:[#allocation12 + $0x130] sm:$0xf]  ;;  %v7716_v7 = vadd.f32 %v13666_v56, %v7618_v29 }
 0xae3   :  { %8652 = vmatpush.bf16.msra.mxu1 %v10480_v12  ;;  %v10472_v45 = vor.u32 %v10802_v3, %v10471_v42  ;;  %v10391_v63 = vld [vmem:[#allocation12 + $0x120] sm:$0xf]  ;;  %v10448_v42 = vor.u32 %v10796_v50, %v10447_v54  ;;  %v10778_v3 = vld [vmem:[#allocation12 + $0x104] sm:$0xf0]  ;;  %v10816_v54 = vld [vmem:[%s13770_s11 + $0x38] sm:$0xff] }
 0xae4   :  { %vm8117_vm10 = vcmp.ge.f32.partialorder %v8113_v30, 0.0  ;;  %v8121_v39 = vmul.f32 0.01, %v8113_v30  ;;  %v7910_v41 = vadd.f32 %v7901_v24, %v7812_v0  ;;  %v8002_v55 = vpop.f32.mrf.mxu1  ;;  %v10823_v50 = vld [vmem:[%s13770_s11 + $0x70] sm:$0xff] }
 0xae5   :  { %8529 = vmatpush.bf16.msrb.mxu0 %v10412_v52  ;;  %v10794_v52 = vld [vmem:[#allocation12 + $0x184] sm:$0xf0] }
 0xae6   :  { %v8125_v51 = vsel %vm8117_vm10, %v8113_v30, %v8121_v39  ;;  %v8008_v16 = vadd.f32 %v7999_v8, %v7910_v41  ;;  %8515 = vmatpush.bf16.msrb.mxu3 %v10416_v35  ;;  %v10473_v8 = vld [vmem:[#allocation12 + $0x1c8] sm:$0xf0]  ;;  %v8100_v30 = vpop.f32.mrf.mxu2  ;;  %v10782_v39 = vld [vmem:[#allocation12 + $0x124] sm:$0xf0]  ;;  %v10781_v41 = vld [vmem:[#allocation12 + $0x124] sm:$0xf] }
 0xae7   :  { %8129 = vst [vmem:[#allocation6] sm:$0xff] %v8125_v51  ;;  %v10476_v0 = vor.u32 %v10801_v14, %v10473_v8  ;;  %8653 = vmatpush.bf16.msra.mxu1 %v10472_v45  ;;  %v10392_v36 = vor.u32 %v10782_v39, %v10391_v63  ;;  %v10396_v56 = vor.u32 %v10781_v41, %v10393_v6  ;;  %v10779_v35 = vld [vmem:[#allocation12 + $0x114] sm:$0xf]  ;;  %v10777_v14 = vld [vmem:[#allocation12 + $0x104] sm:$0xf] }
 0xae8   :  { %v8106_v23 = vadd.f32 %v8097_v10, %v8008_v16  ;;  %v10400_v10 = vor.u32 %v10784_v2, %v10399_v44  ;;  %v10797_v16 = vld [vmem:[#allocation12 + $0x1a4] sm:$0xf]  ;;  %v10441_v2 = vld [vmem:[#allocation12 + $0x188] sm:$0xf0] }
 0xae9   :  { %v7806_v24 = vpop.f32.mrf.mxu3  ;;  %8666 = vmatpush.bf16.msrb.mxu2 %v10476_v0  ;;  %8530 = vmatpush.bf16.msrb.mxu0 %v10404_v17  ;;  %v10460_v12 = vor.u32 %v10797_v16, %v10457_v25  ;;  %v10793_v44 = vld [vmem:[#allocation12 + $0x184] sm:$0xf] }
 0xaea   :  { %v8114_v1 = vadd.f32 %v13681_v46, %v8106_v23  ;;  %v7813_v27 = vadd.f32 %v7806_v24, %v7715_v15  ;;  %8516 = vmatpush.bf16.msrb.mxu3 %v10408_v47  ;;  %v10385_v23 = vld [vmem:[#allocation12 + $0x118] sm:$0xf0]  ;;  %v10795_v24 = vld [vmem:[#allocation12 + $0x194] sm:$0xf]  ;;  %v10439_v47 = vld [vmem:[#allocation12 + $0x180] sm:$0xf]  ;;  %v10444_v20 = vor.u32 %v10793_v44, %v10441_v2 }
 0xaeb   :  { %8654 = vmatpush.bf16.msra.mxu1 %v10464_v60  ;;  %v10388_v53 = vor.u32 %v10779_v35, %v10385_v23  ;;  %v10452_v29 = vor.u32 %v10795_v24, %v10449_v37  ;;  %v10440_v0 = vor.u32 %v10794_v52, %v10439_v47  ;;  %v10814_v24 = vld [vmem:[%s13770_s11 + $0x28] sm:$0xff]  ;;  %v10821_v37 = vld [vmem:[%s13770_s11 + $0x60] sm:$0xff] }
 0xaec   :  { %vm8118_vm11 = vcmp.ge.f32.partialorder %v8114_v1, 0.0  ;;  %v8122_v28 = vmul.f32 0.01, %v8114_v1  ;;  %v7911_v11 = vadd.f32 %v7904_v32, %v7813_v27  ;;  %v8004_v15 = vpop.f32.mrf.mxu1  ;;  %v10809_v47 = vld [vmem:[%s13770_s11] sm:$0xff] }
 0xaed   :  { %8667 = vmatpush.bf16.msrb.mxu2 %v10468_v18  ;;  %8531 = vmatpush.bf16.msrb.mxu0 %v10396_v56 }
 0xaee   :  { %v8126_v19 = vsel %vm8118_vm11, %v8114_v1, %v8122_v28  ;;  %v8009_v22 = vadd.f32 %v8002_v55, %v7911_v11  ;;  %8517 = vmatpush.bf16.msrb.mxu3 %v10400_v10  ;;  %v8102_v38 = vpop.f32.mrf.mxu2  ;;  %v10375_v1 = vld [vmem:[#allocation12 + $0x100] sm:$0xf]  ;;  %v10377_v55 = vld [vmem:[#allocation12 + $0x108] sm:$0xf0] }
 0xaef   :  { %8130 = vst [vmem:[#allocation6 + $0x8] sm:$0xff] %v8126_v19  ;;  %8655 = vmatpush.bf16.msra.mxu1 %v10456_v31  ;;  %v8153_v28 = vld [vmem:[#allocation6 + $0x1] sm:$0x1]  ;;  %v10376_v11 = vor.u32 %v10778_v3, %v10375_v1  ;;  %v10380_v45 = vor.u32 %v10777_v14, %v10377_v55  ;;  %v10819_v1 = vld [vmem:[%s13770_s11 + $0x50] sm:$0xff]  ;;  %v10810_v3 = vld [vmem:[%s13770_s11 + $0x8] sm:$0xff] }
 0xaf0   :  { %v8107_v58 = vadd.f32 %v8100_v30, %v8009_v22  ;;  %v8133_v30 = vld [vmem:[#allocation6] sm:$0x1]  ;;  %v8155_v19 = vpack.c.bf16 %v8153_v28, %v8153_v28 }
 0xaf1   :  { %v7808_v5 = vpop.f32.mrf.mxu3  ;;  %8668 = vmatpush.bf16.msrb.mxu2 %v10460_v12  ;;  %8532 = vmatpush.bf16.msrb.mxu0 %v10388_v53  ;;  %v8135_v4 = vpack.c.bf16 %v8133_v30, %v8133_v30  ;;  %v10824_v12 = vld [vmem:[%s13770_s11 + $0x78] sm:$0xff]  ;;  %v10817_v55 = vld [vmem:[%s13770_s11 + $0x40] sm:$0xff] }
 0xaf2   :  { %v8115_v21 = vadd.f32 %v13681_v46, %v8107_v58  ;;  %v7814_v51 = vadd.f32 %v7808_v5, %v7716_v7  ;;  %8518 = vmatpush.bf16.msrb.mxu3 %v10392_v36  ;;  %v8176_v63 = vunpack.c.l.b16 %v8155_v19  ;;  %v10812_v53 = vld [vmem:[%s13770_s11 + $0x18] sm:$0xff]  ;;  %v8678_v30 = vld [vmem:[%s13769_s10] sm:$0x3] }
 0xaf3   :  { %8656 = vmatpush.bf16.msra.mxu1 %v10448_v42  ;;  %v8291_v7 = vunpack.c.l.b16 %v8135_v4  ;;  %v10818_v42 = vld [vmem:[%s13770_s11 + $0x48] sm:$0xff]  ;;  %v8681_v19 = vperm.slane %v8678_v30, 1 }
 0xaf4   :  { %vm8119_vm12 = vcmp.ge.f32.partialorder %v8115_v21, 0.0  ;;  %v8123_v13 = vmul.f32 0.01, %v8115_v21  ;;  %v7912_v40 = vadd.f32 %v7906_v33, %v7814_v51 }
 0xaf5   :  { %8669 = vmatpush.bf16.msrb.mxu2 %v10452_v29  ;;  %8533 = vmatpush.bf16.msrb.mxu0 %v10380_v45 }
 0xaf6   :  { %v8127_v62 = vsel %vm8119_vm12, %v8115_v21, %v8123_v13  ;;  %v8010_v32 = vadd.f32 %v8004_v15, %v7912_v40  ;;  %8519 = vmatpush.bf16.msrb.mxu3 %v10384_v9  ;;  %v8404_v51 = vld [vmem:[#allocation6 + $0x8] sm:$0x1]  ;;  %v8541_v25 = vld [vmem:[#allocation6 + $0x9] sm:$0x1]  ;;  %v10820_v9 = vld [vmem:[%s13770_s11 + $0x58] sm:$0xff] }
 0xaf7   :  { %8131 = vst [vmem:[#allocation6 + $0x10] sm:$0xff] %v8127_v62  ;;  %8657 = vmatpush.bf16.msra.mxu1 %v10440_v0  ;;  %v8406_v36 = vpack.c.bf16 %v8404_v51, %v8404_v51  ;;  %v8543_v56 = vpack.c.bf16 %v8541_v25, %v8541_v25  ;;  %v10815_v62 = vld [vmem:[%s13770_s11 + $0x30] sm:$0xff] }
 0xaf8   :  { %v8108_v27 = vadd.f32 %v8102_v38, %v8010_v32  ;;  %v10822_v32 = vld [vmem:[%s13770_s11 + $0x68] sm:$0xff]  ;;  %v10813_v38 = vld [vmem:[%s13770_s11 + $0x20] sm:$0xff] }
 0xaf9   :  { %8670 = vmatpush.bf16.msrb.mxu2 %v10444_v20  ;;  %v8427_v35 = vunpack.c.l.b16 %v8406_v36  ;;  %v8564_v13 = vunpack.c.l.b16 %v8543_v56 }
 0xafa   :  { %v8116_v8 = vadd.f32 %v13681_v46, %v8108_v27  ;;  %8520 = vmatpush.bf16.msrb.mxu3 %v10376_v11  ;;  %v10811_v27 = vld [vmem:[%s13770_s11 + $0x10] sm:$0xff] }
 0xafc   :  { %vm8120_vm13 = vcmp.ge.f32.partialorder %v8116_v8, 0.0  ;;  %v8124_v61 = vmul.f32 0.01, %v8116_v8 }
 0xafe   :  { %v8128_v57 = vsel %vm8120_vm13, %v8116_v8, %v8124_v61  ;;  %v8154_v34 = vld [vmem:[#allocation6 + $0x11] sm:$0x1]  ;;  %v8134_v22 = vld [vmem:[#allocation6 + $0x10] sm:$0x1] }
 0xaff   :  { %8132 = vst [vmem:[#allocation6 + $0x18] sm:$0xff] %v8128_v57  ;;  %v8156_v46 = vpack.c.bf16 %v8154_v34, %v8154_v34  ;;  %v8136_v10 = vpack.c.bf16 %v8134_v22, %v8134_v22 }
 0xb01   :  { %v8177_v17 = vunpack.c.l.b16 %v8156_v46  ;;  %v8292_v26 = vunpack.c.l.b16 %v8136_v10  ;;  %v8680_v46 = vperm.slane %v8678_v30, 0 }
 0xb03   :  { %v8178_v58 = vrot.slane %v8177_v17, 7  ;;  %v8293_v60 = vrot.slane %v8292_v26, 7 }
 0xb05   :  { %v8180_v39 = vsel %vm8179_vm3, %v8178_v58, %v8176_v63  ;;  %v8294_v41 = vsel %vm8179_vm3, %v8293_v60, %v8291_v7 }
 0xb06   :  { %v8181_v6 = vpack.c.b16 %v8180_v39, %v8180_v39  ;;  %v8295_v5 = vpack.c.b16 %v8294_v41, %v8294_v41  ;;  %v8405_v18 = vld [vmem:[#allocation6 + $0x18] sm:$0x1]  ;;  %v8542_v48 = vld [vmem:[#allocation6 + $0x19] sm:$0x1] }
 0xb07   :  { %v8407_v59 = vpack.c.bf16 %v8405_v18, %v8405_v18  ;;  %v8544_v21 = vpack.c.bf16 %v8542_v48, %v8542_v48 }
 0xb08   :  { %8271 = vmatmul.bf16.vlgmr.msra.gmra.mxu3 %v8181_v6  ;;  %8284 = vmatmul.bf16.vlgmr.msra.gmra.mxu0 %v8181_v6 }
 0xb09   :  { %8385 = vmatmul.bf16.vlgmr.msrb.gmra.mxu1 %v8295_v5  ;;  %8398 = vmatmul.bf16.vlgmr.msra.gmra.mxu2 %v8295_v5  ;;  %v8428_v16 = vunpack.c.l.b16 %v8407_v59  ;;  %v8565_v33 = vunpack.c.l.b16 %v8544_v21  ;;  %v10839_v59 = vld [vmem:[%s13771_s12] ss:$0 sm:$0xff] }
 0xb0a   :  { %8835 = vmatpush.bf16.msra.mxu0 %v10824_v12  ;;  %8822 = vmatpush.bf16.msra.mxu3 %v10816_v54 }
 0xb0b   :  { %v8429_v49 = vrot.slane %v8428_v16, 7  ;;  %v8566_v43 = vrot.slane %v8565_v33, 7 }
 0xb0d   :  { %v8430_v40 = vsel %vm8179_vm3, %v8429_v49, %v8427_v35  ;;  %v8567_v31 = vsel %vm8179_vm3, %v8566_v43, %v8564_v13 }
 0xb0e   :  { %v8431_v23 = vpack.c.b16 %v8430_v40, %v8430_v40  ;;  %v8568_v15 = vpack.c.b16 %v8567_v31, %v8567_v31  ;;  %8836 = vmatpush.bf16.msra.mxu0 %v10823_v50  ;;  %8823 = vmatpush.bf16.msra.mxu3 %v10815_v62 }
 0xb12   :  { %8837 = vmatpush.bf16.msra.mxu0 %v10822_v32  ;;  %8824 = vmatpush.bf16.msra.mxu3 %v10814_v24 }
 0xb16   :  { %8838 = vmatpush.bf16.msra.mxu0 %v10821_v37  ;;  %8825 = vmatpush.bf16.msra.mxu3 %v10813_v38 }
 0xb18   :  { %8521 = vmatmul.bf16.vlgmr.msrb.gmra.mxu3 %v8431_v23  ;;  %8534 = vmatmul.bf16.vlgmr.msrb.gmra.mxu0 %v8431_v23 }
 0xb19   :  { %8658 = vmatmul.bf16.vlgmr.msra.gmra.mxu1 %v8568_v15  ;;  %8671 = vmatmul.bf16.vlgmr.msrb.gmra.mxu2 %v8568_v15 }
 0xb1a   :  { %8839 = vmatpush.bf16.msra.mxu0 %v10820_v9  ;;  %8826 = vmatpush.bf16.msra.mxu3 %v10812_v53 }
 0xb1e   :  { %8840 = vmatpush.bf16.msra.mxu0 %v10819_v1  ;;  %8827 = vmatpush.bf16.msra.mxu3 %v10811_v27 }
 0xb22   :  { %8841 = vmatpush.bf16.msra.mxu0 %v10818_v42  ;;  %8828 = vmatpush.bf16.msra.mxu3 %v10810_v3 }
 0xb26   :  { %8842 = vmatpush.bf16.msra.mxu0 %v10817_v55  ;;  %8829 = vmatpush.bf16.msra.mxu3 %v10809_v47 }
 0xb85   :  { %v8285_v14 = vpop.f32.mrf.mxu0 }
 0xb86   :  { %v8386_v29 = vpop.f32.mrf.mxu1 }
 0xb8b   :  { %v8272_v52 = vpop.f32.mrf.mxu3 }
 0xb8c   :  { %v8399_v8 = vpop.f32.mrf.mxu2  ;;  %v8387_v20 = vadd.f32 %v8386_v29, %v8272_v52 }
 0xb8d   :  { %v8287_v44 = vpop.f32.mrf.mxu0  ;;  %v8400_v0 = vadd.f32 %v8399_v8, %v8285_v14 }
 0xb8e   :  { %v8388_v2 = vpop.f32.mrf.mxu1 }
 0xb93   :  { %v8274_v28 = vpop.f32.mrf.mxu3 }
 0xb94   :  { %v8401_v11 = vpop.f32.mrf.mxu2 }
 0xb95   :  { %v8535_v45 = vpop.f32.mrf.mxu0 }
 0xb96   :  { %v8659_v61 = vpop.f32.mrf.mxu1  ;;  %v8540_v57 = vadd.f32 %v8535_v45, %v8400_v0 }
 0xb9b   :  { %v8522_v34 = vpop.f32.mrf.mxu3 }
 0xb9c   :  { %v8539_v22 = vadd.f32 %v8522_v34, %v8387_v20  ;;  %v8672_v4 = vpop.f32.mrf.mxu2 }
 0xb9d   :  { %v8677_v10 = vadd.f32 %v8672_v4, %v8540_v57  ;;  %v8537_v17 = vpop.f32.mrf.mxu0 }
 0xb9e   :  { %v8676_v26 = vadd.f32 %v8659_v61, %v8539_v22  ;;  %v8661_v63 = vpop.f32.mrf.mxu1 }
 0xb9f   :  { %v8685_v58 = vadd.f32 %v8681_v19, %v8677_v10 }
 0xba0   :  { %v8684_v7 = vadd.f32 %v8680_v46, %v8676_v26 }
 0xba1   :  { %v8687_v60 = vmax.f32 %v8685_v58, 0.0 }
 0xba2   :  { %v8686_v39 = vmax.f32 %v8684_v7, 0.0 }
 0xba3   :  { %v8689_v41 = vpack.c.bf16 %v8687_v60, %v8687_v60  ;;  %v8524_v6 = vpop.f32.mrf.mxu3 }
 0xba4   :  { %v8688_v5 = vpack.c.bf16 %v8686_v39, %v8686_v39  ;;  %v8674_v18 = vpop.f32.mrf.mxu2 }
 0xba5   :  { %8843 = vmatmul.bf16.vlgmr.msra.gmra.mxu0 %v8689_v41 }
 0xba6   :  { %8830 = vmatmul.bf16.vlgmr.msra.gmra.mxu3 %v8688_v5 }
 0xc22   :  { %v8844_v48 = vpop.f32.mrf.mxu0 }
 0xc29   :  { %v8831_v21 = vpop.f32.mrf.mxu3 }
 0xc2a   :  { %v8832_v51 = vadd.f32 %v10839_v59, %v8831_v21  ;;  %v8846_v16 = vpop.f32.mrf.mxu0 }
 0xc2c   :  { %v8845_v25 = vadd.f32 %v8844_v48, %v8832_v51 }
 0xc2e   :  { %8848 = vst.msk [vmem:[#allocation13] sm:$0x3] %vm96_vm4, %v8845_v25 }
 0xc2f   :  { %8859 = dma.vmem_to_hbm [thread:$0]  %s8855_s3, 32, %s8857_s9, [#allocation9]  }
 0xc31   :  { %v8833_v33 = vpop.f32.mrf.mxu3 }
 0xc32   :  { %10941 = dma.done.wait [#allocation9], 32  }
 0xc33   :  { %10942 = vsyncadd [#allocation9], 4294967264 }
 0xc34   :  { %8864 = vsyncpa [#allocation8], 1 }
 0xc35   :  { %8865 = vsyncpa [#allocation11], 1 }
 0xc36   :  { %8866 = vsyncpa [#allocation9], 1 }

</bundles_post_ra>
